<compile_context>
chip_gen: v6e
topology: v6e:2x2x1
jax: 0.10.0
libtpu: 0.0.40
codegen_flags: <defaults>
</compile_context>

<pallas_src>
import jax
import jax.numpy as jnp
from jax import lax
from jax.experimental import pallas as pl
from jax.experimental.pallas import tpu as pltpu

LANE = 128


def _round_up(x, m):
    return ((x + m - 1) // m) * m


def maddpg_rnn_rollout_kernel(x_ref, h0_ref,
                              w1t_ref, b1_ref,
                              wiht_ref, whht_ref,
                              b_rzn_ref, b_hn_ref,
                              w2t_ref, b2_ref,
                              q_ref, hout_ref,
                              gx_scr, hist_scr):
    """One batch tile of the fused T-step rollout (whole rollout per call)."""
    T, tb, IN = x_ref.shape
    H = h0_ref.shape[-1]
    R = T * tb

    # ---- x-dependent projections, batched over the whole rollout -----------
    # (off the serial chain; M = T*tb rows fills the MXU on v6e/v7x)
    x2d = x_ref[...].reshape(R, IN).astype(jnp.bfloat16)
    a1 = jnp.dot(x2d, w1t_ref[...], preferred_element_type=jnp.float32)
    a1 = jnp.maximum(a1 + b1_ref[...], 0.0)                        # (R, H) f32
    gx = jnp.dot(a1.astype(jnp.bfloat16), wiht_ref[...],
                 preferred_element_type=jnp.float32) + b_rzn_ref[...]
    gx_scr[...] = gx.reshape(T, tb, 3 * H)                         # r|z|n, biases folded

    # ---- serial GRU recurrence: only the h-dependent matmul + gates --------
    bhn = jnp.broadcast_to(b_hn_ref[...], (tb, H))                 # hoisted broadcast

    def step(t, h):
        gx_t = gx_scr[t]                                           # (tb, 3H)
        gh = jnp.dot(h.astype(jnp.bfloat16), whht_ref[...],
                     preferred_element_type=jnp.float32)           # (tb, 3H)
        rz = jax.nn.sigmoid(gx_t[:, :2 * H] + gh[:, :2 * H])
        r = rz[:, :H]
        z = rz[:, H:]
        n = jnp.tanh(gx_t[:, 2 * H:] + r * (gh[:, 2 * H:] + bhn))
        h_new = n + z * (h - n)                                    # == (1-z)*n + z*h
        hist_scr[t] = h_new
        return h_new

    h_final = lax.fori_loop(0, T, step, h0_ref[...], unroll=True)
    hout_ref[...] = h_final

    # ---- fc2 + tanh head, batched over the whole rollout --------------------
    h_all = hist_scr[...].reshape(R, H).astype(jnp.bfloat16)
    q = jnp.dot(h_all, w2t_ref[...],
                preferred_element_type=jnp.float32) + b2_ref[...]
    q_ref[...] = jnp.tanh(q).reshape(T, tb, -1).astype(q_ref.dtype)


def maddpg_rnn_forward_seq(x_seq, hidden_state, kp, action_dim, *, batch_tile=128):
    """Fused T-step rollout.  T=1 reproduces the original per-step forward().

    x_seq:        (T, B, IN)  float32
    hidden_state: (B, H)      float32  (init_hidden() -> zeros)
    returns       q_seq (T, B, action_dim) f32,  h_final (B, H) f32
    """
    T, B, IN = x_seq.shape
    H = hidden_state.shape[-1]
    AP = kp["w2t"].shape[-1]

    tb = min(batch_tile, B)
    assert B % tb == 0, "batch must be divisible by the batch tile"
    assert tb % 8 == 0, "batch tile must be sublane-aligned"

    x_seq = x_seq.astype(jnp.float32)          # no wrapper pad / cast: done in-kernel
    h0 = hidden_state.reshape(-1, H).astype(jnp.float32)

    const = lambda b: (0, 0)

    q_pad, h_final = pl.pallas_call(
        maddpg_rnn_rollout_kernel,
        out_shape=(jax.ShapeDtypeStruct((T, B, AP), jnp.bfloat16),
                   jax.ShapeDtypeStruct((B, H), jnp.float32)),
        grid_spec=pltpu.PrefetchScalarGridSpec(
            num_scalar_prefetch=0,
            grid=(B // tb,),
            in_specs=[
                pl.BlockSpec((T, tb, IN), lambda b: (0, b, 0)),     # x (full T, full IN)
                pl.BlockSpec((tb, H), lambda b: (b, 0)),            # h0
                pl.BlockSpec((IN, H), const),                       # w1t
                pl.BlockSpec((1, H), const),                        # b1
                pl.BlockSpec((H, 3 * H), const),                    # wiht
                pl.BlockSpec((H, 3 * H), const),                    # whht
                pl.BlockSpec((1, 3 * H), const),                    # b_rzn
                pl.BlockSpec((1, H), const),                        # b_hn
                pl.BlockSpec((H, AP), const),                       # w2t
                pl.BlockSpec((1, AP), const),                       # b2
            ],
            out_specs=(
                pl.BlockSpec((T, tb, AP), lambda b: (0, b, 0)),     # q (bf16, lane-dense)
                pl.BlockSpec((tb, H), lambda b: (b, 0)),            # h_out
            ),
            scratch_shapes=[
                pltpu.VMEM((T, tb, 3 * H), jnp.float32),            # gx for all T
                pltpu.VMEM((T, tb, H), jnp.float32),                # h history
            ],
        ),
        compiler_params=pltpu.CompilerParams(
            dimension_semantics=("parallel",)),
    )(x_seq, h0,
      kp["w1t"], kp["b1"],
      kp["wiht"], kp["whht"],
      kp["b_rzn"], kp["b_hn"],
      kp["w2t"], kp["b2"])

    return q_pad[:, :, :action_dim].astype(jnp.float32), h_final


def init_params(key, input_shape, hidden_dim, action_dim):
    """Raw f32 params matching the PyTorch module's inits (weights transposed)."""
    ks = jax.random.split(key, 8)

    def uni(k, shape, bound):
        return jax.random.uniform(k, shape, jnp.float32, -bound, bound)

    b_fc1 = 1.0 / float(input_shape) ** 0.5
    b_gru = 1.0 / float(hidden_dim) ** 0.5
    return {
        # fc1: nn.Linear(input_shape, hidden_dim)
        "w1t": uni(ks[0], (input_shape, hidden_dim), b_fc1),
        "b1": uni(ks[1], (1, hidden_dim), b_fc1),
        # GRUCell(hidden_dim, hidden_dim)
        "wiht": uni(ks[2], (hidden_dim, 3 * hidden_dim), b_gru),
        "bih": uni(ks[3], (1, 3 * hidden_dim), b_gru),
        "whht": uni(ks[4], (hidden_dim, 3 * hidden_dim), b_gru),
        "bhh": uni(ks[5], (1, 3 * hidden_dim), b_gru),
        # fc2: weight re-init U(-0.003, 0.003), bias keeps default U(+-1/sqrt(H))
        "w2t": uni(ks[6], (hidden_dim, action_dim), 0.003),
        "b2": uni(ks[7], (1, action_dim), b_gru),
    }


def prepare_kernel_params(params, input_shape, hidden_dim, action_dim):
    """Pack raw params into the kernel layout: bf16 weights, f32 biases,
    fc2 cols zero-padded to 128 lanes, GRU r/z biases pre-summed."""
    H = hidden_dim
    AP = _round_up(action_dim, LANE)

    w2t = jnp.pad(params["w2t"], ((0, 0), (0, AP - action_dim)))
    b2 = jnp.pad(params["b2"], ((0, 0), (0, AP - action_dim)))
    b_rzn = jnp.concatenate(
        [params["bih"][:, :2 * H] + params["bhh"][:, :2 * H],
         params["bih"][:, 2 * H:]], axis=-1)
    b_hn = params["bhh"][:, 2 * H:]

    return {
        "w1t": params["w1t"].astype(jnp.bfloat16),
        "b1": params["b1"].astype(jnp.float32),
        "wiht": params["wiht"].astype(jnp.bfloat16),
        "whht": params["whht"].astype(jnp.bfloat16),
        "b_rzn": b_rzn.astype(jnp.float32),
        "b_hn": b_hn.astype(jnp.float32),
        "w2t": w2t.astype(jnp.bfloat16),
        "b2": b2.astype(jnp.float32),
    }


def reference_forward_seq(x_seq, hidden_state, kp, action_dim):
    """Pure-JAX reference with the same bf16-matmul / f32-gate numerics."""
    H = hidden_state.shape[-1]
    xb = x_seq.astype(jnp.bfloat16)

    def step(h, x_t):
        a1 = jnp.dot(x_t, kp["w1t"], preferred_element_type=jnp.float32)
        a1 = jnp.maximum(a1 + kp["b1"], 0.0)
        gx = jnp.dot(a1.astype(jnp.bfloat16), kp["wiht"],
                     preferred_element_type=jnp.float32) + kp["b_rzn"]
        gh = jnp.dot(h.astype(jnp.bfloat16), kp["whht"],
                     preferred_element_type=jnp.float32)
        rz = jax.nn.sigmoid(gx[:, :2 * H] + gh[:, :2 * H])
        r, z = rz[:, :H], rz[:, H:]
        n = jnp.tanh(gx[:, 2 * H:] + r * (gh[:, 2 * H:] + kp["b_hn"]))
        h_new = n + z * (h - n)
        q = jnp.tanh(jnp.dot(h_new.astype(jnp.bfloat16), kp["w2t"],
                             preferred_element_type=jnp.float32) + kp["b2"])
        return h_new, q.astype(jnp.bfloat16)

    h_final, q_seq = jax.lax.scan(step, hidden_state.astype(jnp.float32), xb)
    return q_seq[:, :, :action_dim].astype(jnp.float32), h_final


if __name__ == "__main__":
    T = 8            # fused rollout length
    B = 256          # agents * envs flattened (2 parallel batch tiles -> both v7x TCs)
    INPUT_SHAPE = 64 # obs/input dim
    HIDDEN = 128     # args.hidden_dim (lane-aligned)
    ACTION = 4       # args.action_shape (continuous -> tanh head)

    key = jax.random.PRNGKey(0)
    k_x, k_p = jax.random.split(key)
    x_seq = jax.random.normal(k_x, (T, B, INPUT_SHAPE), jnp.float32)
    hidden = jnp.zeros((B, HIDDEN), jnp.float32)   # init_hidden() zeros

    raw = init_params(k_p, INPUT_SHAPE, HIDDEN, ACTION)
    kp = prepare_kernel_params(raw, INPUT_SHAPE, HIDDEN, ACTION)

    q, h = maddpg_rnn_forward_seq(x_seq, hidden, kp, ACTION, batch_tile=128)
    jax.block_until_ready((q, h))

    q_ref, h_ref = reference_forward_seq(x_seq, hidden, kp, ACTION)
    assert q.shape == (T, B, ACTION) and h.shape == (B, HIDDEN)
    assert jnp.allclose(q, q_ref, rtol=2e-2, atol=2e-2), \
        float(jnp.max(jnp.abs(q - q_ref)))
    assert jnp.allclose(h, h_ref, rtol=2e-2, atol=2e-2), \
        float(jnp.max(jnp.abs(h - h_ref)))

    # TODO(synk): use_rnn=False (Linear+ReLU recurrent stub) and is_discrete=True
    # (identity out_fn) branches are not exercised; this kernel implements the
    # GRUCell + tanh configuration of the module.
    print("KERNEL_OK")
</pallas_src>

<mosaic_0001>
module attributes {stable_mosaic.version = 11 : i64} {
  func.func @maddpg_rnn_rollout_kernel(%arg0: i32, %arg1: memref<8x128x64xf32, #tpu.memory_space<vmem>>, %arg2: memref<128x128xf32, #tpu.memory_space<vmem>>, %arg3: memref<64x128xbf16, #tpu.memory_space<vmem>>, %arg4: memref<1x128xf32, #tpu.memory_space<vmem>>, %arg5: memref<128x384xbf16, #tpu.memory_space<vmem>>, %arg6: memref<128x384xbf16, #tpu.memory_space<vmem>>, %arg7: memref<1x384xf32, #tpu.memory_space<vmem>>, %arg8: memref<1x128xf32, #tpu.memory_space<vmem>>, %arg9: memref<128x128xbf16, #tpu.memory_space<vmem>>, %arg10: memref<1x128xf32, #tpu.memory_space<vmem>>, %arg11: memref<8x128x128xbf16, #tpu.memory_space<vmem>>, %arg12: memref<128x128xf32, #tpu.memory_space<vmem>>, %arg13: memref<8x128x384xf32, #tpu.memory_space<vmem>>, %arg14: memref<8x128x128xf32, #tpu.memory_space<vmem>>) attributes {dimension_semantics = [#tpu.dimension_semantics<parallel>], iteration_bounds = array<i64: 2>, scalar_prefetch = 0 : i64, scratch_operands = 2 : i64, tpu.core_type = #tpu.core_type<tc>, window_params = [{transform_indices = @transform_0, window_bounds = array<i64: 8, 128, 64>}, {transform_indices = @transform_1, window_bounds = array<i64: 128, 128>}, {pipeline_mode = #tpu.pipeline_mode<synchronous>, transform_indices = @transform_2, window_bounds = array<i64: 64, 128>}, {pipeline_mode = #tpu.pipeline_mode<synchronous>, transform_indices = @transform_3, window_bounds = array<i64: 1, 128>}, {pipeline_mode = #tpu.pipeline_mode<synchronous>, transform_indices = @transform_4, window_bounds = array<i64: 128, 384>}, {pipeline_mode = #tpu.pipeline_mode<synchronous>, transform_indices = @transform_5, window_bounds = array<i64: 128, 384>}, {pipeline_mode = #tpu.pipeline_mode<synchronous>, transform_indices = @transform_6, window_bounds = array<i64: 1, 384>}, {pipeline_mode = #tpu.pipeline_mode<synchronous>, transform_indices = @transform_7, window_bounds = array<i64: 1, 128>}, {pipeline_mode = #tpu.pipeline_mode<synchronous>, transform_indices = @transform_8, window_bounds = array<i64: 128, 128>}, {pipeline_mode = #tpu.pipeline_mode<synchronous>, transform_indices = @transform_9, window_bounds = array<i64: 1, 128>}, {transform_indices = @transform_10, window_bounds = array<i64: 8, 128, 128>}, {transform_indices = @transform_11, window_bounds = array<i64: 128, 128>}]} {
    %c0 = arith.constant 0 : index
    %c0_0 = arith.constant 0 : index
    %c0_1 = arith.constant 0 : index
    %0 = vector.load %arg1[%c0, %c0_0, %c0_1] : memref<8x128x64xf32, #tpu.memory_space<vmem>>, vector<8x128x64xf32>
    %1 = vector.shape_cast %0 : vector<8x128x64xf32> to vector<1024x64xf32>
    %2 = arith.truncf %1 : vector<1024x64xf32> to vector<1024x64xbf16>
    %c0_2 = arith.constant 0 : index
    %c0_3 = arith.constant 0 : index
    %3 = vector.load %arg3[%c0_2, %c0_3] : memref<64x128xbf16, #tpu.memory_space<vmem>>, vector<64x128xbf16>
    %cst = arith.constant dense<0.000000e+00> : vector<1024x128xf32>
    %4 = tpu.matmul %2, %3, %cst {dimension_numbers = #tpu.dot_dimension_numbers<[1], [0], [0], [1], [0, 0, 1, 1], [], []>} : vector<1024x64xbf16>, vector<64x128xbf16>, vector<1024x128xf32> -> vector<1024x128xf32>
    %c0_4 = arith.constant 0 : index
    %c0_5 = arith.constant 0 : index
    %5 = vector.load %arg4[%c0_4, %c0_5] : memref<1x128xf32, #tpu.memory_space<vmem>>, vector<1x128xf32>
    %6 = vector.broadcast %5 : vector<1x128xf32> to vector<1024x128xf32>
    %7 = arith.addf %4, %6 : vector<1024x128xf32>
    %cst_6 = arith.constant 0.000000e+00 : f32
    %8 = vector.broadcast %cst_6 : f32 to vector<1024x128xf32>
    %9 = arith.maximumf %7, %8 : vector<1024x128xf32>
    %10 = arith.truncf %9 : vector<1024x128xf32> to vector<1024x128xbf16>
    %c0_7 = arith.constant 0 : index
    %c0_8 = arith.constant 0 : index
    %11 = vector.load %arg5[%c0_7, %c0_8] : memref<128x384xbf16, #tpu.memory_space<vmem>>, vector<128x384xbf16>
    %cst_9 = arith.constant dense<0.000000e+00> : vector<1024x384xf32>
    %12 = tpu.matmul %10, %11, %cst_9 {dimension_numbers = #tpu.dot_dimension_numbers<[1], [0], [0], [1], [0, 0, 1, 1], [], []>} : vector<1024x128xbf16>, vector<128x384xbf16>, vector<1024x384xf32> -> vector<1024x384xf32>
    %c0_10 = arith.constant 0 : index
    %c0_11 = arith.constant 0 : index
    %13 = vector.load %arg7[%c0_10, %c0_11] : memref<1x384xf32, #tpu.memory_space<vmem>>, vector<1x384xf32>
    %14 = vector.broadcast %13 : vector<1x384xf32> to vector<1024x384xf32>
    %15 = arith.addf %12, %14 : vector<1024x384xf32>
    %16 = vector.shape_cast %15 : vector<1024x384xf32> to vector<8x128x384xf32>
    %c0_12 = arith.constant 0 : index
    %c0_13 = arith.constant 0 : index
    %c0_14 = arith.constant 0 : index
    %17 = vector.load %arg13[%c0_12, %c0_13, %c0_14] : memref<8x128x384xf32, #tpu.memory_space<vmem>>, vector<8x128x384xf32>
    tpu.vector_store %arg13[%c0_12, %c0_13, %c0_14], %16 {strides = array<i32>} : memref<8x128x384xf32, #tpu.memory_space<vmem>>, vector<8x128x384xf32>,
    %c0_15 = arith.constant 0 : index
    %c0_16 = arith.constant 0 : index
    %18 = vector.load %arg8[%c0_15, %c0_16] : memref<1x128xf32, #tpu.memory_space<vmem>>, vector<1x128xf32>
    %19 = vector.shape_cast %18 : vector<1x128xf32> to vector<1x128xf32>
    %20 = vector.broadcast %19 : vector<1x128xf32> to vector<128x128xf32>
    %c0_17 = arith.constant 0 : index
    %c0_18 = arith.constant 0 : index
    %21 = vector.load %arg2[%c0_17, %c0_18] : memref<128x128xf32, #tpu.memory_space<vmem>>, vector<128x128xf32>
    %c0_i32 = arith.constant 0 : i32
    %22 = arith.index_cast %c0_i32 : i32 to index
    %c0_19 = arith.constant 0 : index
    %c0_20 = arith.constant 0 : index
    %23 = vector.load %arg13[%22, %c0_19, %c0_20] : memref<8x128x384xf32, #tpu.memory_space<vmem>>, vector<1x128x384xf32>
    %24 = vector.shape_cast %23 : vector<1x128x384xf32> to vector<128x384xf32>
    %25 = arith.truncf %21 : vector<128x128xf32> to vector<128x128xbf16>
    %c0_21 = arith.constant 0 : index
    %c0_22 = arith.constant 0 : index
    %26 = vector.load %arg6[%c0_21, %c0_22] : memref<128x384xbf16, #tpu.memory_space<vmem>>, vector<128x384xbf16>
    %cst_23 = arith.constant dense<0.000000e+00> : vector<128x384xf32>
    %27 = tpu.matmul %25, %26, %cst_23 {dimension_numbers = #tpu.dot_dimension_numbers<[1], [0], [0], [1], [0, 0, 1, 1], [], []>} : vector<128x128xbf16>, vector<128x384xbf16>, vector<128x384xf32> -> vector<128x384xf32>
    %28 = vector.extract_strided_slice %24 {offsets = [0, 0], sizes = [128, 256], strides = [1, 1]} : vector<128x384xf32> to vector<128x256xf32>
    %29 = vector.extract_strided_slice %27 {offsets = [0, 0], sizes = [128, 256], strides = [1, 1]} : vector<128x384xf32> to vector<128x256xf32>
    %30 = arith.addf %28, %29 : vector<128x256xf32>
    %31 = arith.negf %30 : vector<128x256xf32>
    %32 = math.exp %31 : vector<128x256xf32>
    %cst_24 = arith.constant 1.000000e+00 : f32
    %33 = vector.broadcast %cst_24 : f32 to vector<128x256xf32>
    %34 = arith.addf %33, %32 : vector<128x256xf32>
    %35 = arith.divf %33, %34 : vector<128x256xf32>
    %36 = vector.extract_strided_slice %35 {offsets = [0, 0], sizes = [128, 128], strides = [1, 1]} : vector<128x256xf32> to vector<128x128xf32>
    %37 = vector.extract_strided_slice %35 {offsets = [0, 128], sizes = [128, 128], strides = [1, 1]} : vector<128x256xf32> to vector<128x128xf32>
    %38 = vector.extract_strided_slice %24 {offsets = [0, 256], sizes = [128, 128], strides = [1, 1]} : vector<128x384xf32> to vector<128x128xf32>
    %39 = vector.extract_strided_slice %27 {offsets = [0, 256], sizes = [128, 128], strides = [1, 1]} : vector<128x384xf32> to vector<128x128xf32>
    %40 = arith.addf %39, %20 : vector<128x128xf32>
    %41 = arith.mulf %36, %40 : vector<128x128xf32>
    %42 = arith.addf %38, %41 : vector<128x128xf32>
    %43 = math.tanh %42 : vector<128x128xf32>
    %44 = arith.subf %21, %43 : vector<128x128xf32>
    %45 = arith.mulf %37, %44 : vector<128x128xf32>
    %46 = arith.addf %43, %45 : vector<128x128xf32>
    %47 = arith.index_cast %c0_i32 : i32 to index
    %c0_25 = arith.constant 0 : index
    %c0_26 = arith.constant 0 : index
    %48 = vector.load %arg14[%47, %c0_25, %c0_26] : memref<8x128x128xf32, #tpu.memory_space<vmem>>, vector<1x128x128xf32>
    %49 = vector.shape_cast %48 : vector<1x128x128xf32> to vector<128x128xf32>
    %50 = vector.shape_cast %46 : vector<128x128xf32> to vector<1x128x128xf32>
    tpu.vector_store %arg14[%47, %c0_25, %c0_26], %50 {strides = array<i32>} : memref<8x128x128xf32, #tpu.memory_space<vmem>>, vector<1x128x128xf32>,
    %c1_i32 = arith.constant 1 : i32
    %51 = arith.index_cast %c1_i32 : i32 to index
    %c0_27 = arith.constant 0 : index
    %c0_28 = arith.constant 0 : index
    %52 = vector.load %arg13[%51, %c0_27, %c0_28] : memref<8x128x384xf32, #tpu.memory_space<vmem>>, vector<1x128x384xf32>
    %53 = vector.shape_cast %52 : vector<1x128x384xf32> to vector<128x384xf32>
    %54 = arith.truncf %46 : vector<128x128xf32> to vector<128x128xbf16>
    %c0_29 = arith.constant 0 : index
    %c0_30 = arith.constant 0 : index
    %55 = vector.load %arg6[%c0_29, %c0_30] : memref<128x384xbf16, #tpu.memory_space<vmem>>, vector<128x384xbf16>
    %cst_31 = arith.constant dense<0.000000e+00> : vector<128x384xf32>
    %56 = tpu.matmul %54, %55, %cst_31 {dimension_numbers = #tpu.dot_dimension_numbers<[1], [0], [0], [1], [0, 0, 1, 1], [], []>} : vector<128x128xbf16>, vector<128x384xbf16>, vector<128x384xf32> -> vector<128x384xf32>
    %57 = vector.extract_strided_slice %53 {offsets = [0, 0], sizes = [128, 256], strides = [1, 1]} : vector<128x384xf32> to vector<128x256xf32>
    %58 = vector.extract_strided_slice %56 {offsets = [0, 0], sizes = [128, 256], strides = [1, 1]} : vector<128x384xf32> to vector<128x256xf32>
    %59 = arith.addf %57, %58 : vector<128x256xf32>
    %60 = arith.negf %59 : vector<128x256xf32>
    %61 = math.exp %60 : vector<128x256xf32>
    %cst_32 = arith.constant 1.000000e+00 : f32
    %62 = vector.broadcast %cst_32 : f32 to vector<128x256xf32>
    %63 = arith.addf %62, %61 : vector<128x256xf32>
    %64 = arith.divf %62, %63 : vector<128x256xf32>
    %65 = vector.extract_strided_slice %64 {offsets = [0, 0], sizes = [128, 128], strides = [1, 1]} : vector<128x256xf32> to vector<128x128xf32>
    %66 = vector.extract_strided_slice %64 {offsets = [0, 128], sizes = [128, 128], strides = [1, 1]} : vector<128x256xf32> to vector<128x128xf32>
    %67 = vector.extract_strided_slice %53 {offsets = [0, 256], sizes = [128, 128], strides = [1, 1]} : vector<128x384xf32> to vector<128x128xf32>
    %68 = vector.extract_strided_slice %56 {offsets = [0, 256], sizes = [128, 128], strides = [1, 1]} : vector<128x384xf32> to vector<128x128xf32>
    %69 = arith.addf %68, %20 : vector<128x128xf32>
    %70 = arith.mulf %65, %69 : vector<128x128xf32>
    %71 = arith.addf %67, %70 : vector<128x128xf32>
    %72 = math.tanh %71 : vector<128x128xf32>
    %73 = arith.subf %46, %72 : vector<128x128xf32>
    %74 = arith.mulf %66, %73 : vector<128x128xf32>
    %75 = arith.addf %72, %74 : vector<128x128xf32>
    %76 = arith.index_cast %c1_i32 : i32 to index
    %c0_33 = arith.constant 0 : index
    %c0_34 = arith.constant 0 : index
    %77 = vector.load %arg14[%76, %c0_33, %c0_34] : memref<8x128x128xf32, #tpu.memory_space<vmem>>, vector<1x128x128xf32>
    %78 = vector.shape_cast %77 : vector<1x128x128xf32> to vector<128x128xf32>
    %79 = vector.shape_cast %75 : vector<128x128xf32> to vector<1x128x128xf32>
    tpu.vector_store %arg14[%76, %c0_33, %c0_34], %79 {strides = array<i32>} : memref<8x128x128xf32, #tpu.memory_space<vmem>>, vector<1x128x128xf32>,
    %c2_i32 = arith.constant 2 : i32
    %80 = arith.index_cast %c2_i32 : i32 to index
    %c0_35 = arith.constant 0 : index
    %c0_36 = arith.constant 0 : index
    %81 = vector.load %arg13[%80, %c0_35, %c0_36] : memref<8x128x384xf32, #tpu.memory_space<vmem>>, vector<1x128x384xf32>
    %82 = vector.shape_cast %81 : vector<1x128x384xf32> to vector<128x384xf32>
    %83 = arith.truncf %75 : vector<128x128xf32> to vector<128x128xbf16>
    %c0_37 = arith.constant 0 : index
    %c0_38 = arith.constant 0 : index
    %84 = vector.load %arg6[%c0_37, %c0_38] : memref<128x384xbf16, #tpu.memory_space<vmem>>, vector<128x384xbf16>
    %cst_39 = arith.constant dense<0.000000e+00> : vector<128x384xf32>
    %85 = tpu.matmul %83, %84, %cst_39 {dimension_numbers = #tpu.dot_dimension_numbers<[1], [0], [0], [1], [0, 0, 1, 1], [], []>} : vector<128x128xbf16>, vector<128x384xbf16>, vector<128x384xf32> -> vector<128x384xf32>
    %86 = vector.extract_strided_slice %82 {offsets = [0, 0], sizes = [128, 256], strides = [1, 1]} : vector<128x384xf32> to vector<128x256xf32>
    %87 = vector.extract_strided_slice %85 {offsets = [0, 0], sizes = [128, 256], strides = [1, 1]} : vector<128x384xf32> to vector<128x256xf32>
    %88 = arith.addf %86, %87 : vector<128x256xf32>
    %89 = arith.negf %88 : vector<128x256xf32>
    %90 = math.exp %89 : vector<128x256xf32>
    %cst_40 = arith.constant 1.000000e+00 : f32
    %91 = vector.broadcast %cst_40 : f32 to vector<128x256xf32>
    %92 = arith.addf %91, %90 : vector<128x256xf32>
    %93 = arith.divf %91, %92 : vector<128x256xf32>
    %94 = vector.extract_strided_slice %93 {offsets = [0, 0], sizes = [128, 128], strides = [1, 1]} : vector<128x256xf32> to vector<128x128xf32>
    %95 = vector.extract_strided_slice %93 {offsets = [0, 128], sizes = [128, 128], strides = [1, 1]} : vector<128x256xf32> to vector<128x128xf32>
    %96 = vector.extract_strided_slice %82 {offsets = [0, 256], sizes = [128, 128], strides = [1, 1]} : vector<128x384xf32> to vector<128x128xf32>
    %97 = vector.extract_strided_slice %85 {offsets = [0, 256], sizes = [128, 128], strides = [1, 1]} : vector<128x384xf32> to vector<128x128xf32>
    %98 = arith.addf %97, %20 : vector<128x128xf32>
    %99 = arith.mulf %94, %98 : vector<128x128xf32>
    %100 = arith.addf %96, %99 : vector<128x128xf32>
    %101 = math.tanh %100 : vector<128x128xf32>
    %102 = arith.subf %75, %101 : vector<128x128xf32>
    %103 = arith.mulf %95, %102 : vector<128x128xf32>
    %104 = arith.addf %101, %103 : vector<128x128xf32>
    %105 = arith.index_cast %c2_i32 : i32 to index
    %c0_41 = arith.constant 0 : index
    %c0_42 = arith.constant 0 : index
    %106 = vector.load %arg14[%105, %c0_41, %c0_42] : memref<8x128x128xf32, #tpu.memory_space<vmem>>, vector<1x128x128xf32>
    %107 = vector.shape_cast %106 : vector<1x128x128xf32> to vector<128x128xf32>
    %108 = vector.shape_cast %104 : vector<128x128xf32> to vector<1x128x128xf32>
    tpu.vector_store %arg14[%105, %c0_41, %c0_42], %108 {strides = array<i32>} : memref<8x128x128xf32, #tpu.memory_space<vmem>>, vector<1x128x128xf32>,
    %c3_i32 = arith.constant 3 : i32
    %109 = arith.index_cast %c3_i32 : i32 to index
    %c0_43 = arith.constant 0 : index
    %c0_44 = arith.constant 0 : index
    %110 = vector.load %arg13[%109, %c0_43, %c0_44] : memref<8x128x384xf32, #tpu.memory_space<vmem>>, vector<1x128x384xf32>
    %111 = vector.shape_cast %110 : vector<1x128x384xf32> to vector<128x384xf32>
    %112 = arith.truncf %104 : vector<128x128xf32> to vector<128x128xbf16>
    %c0_45 = arith.constant 0 : index
    %c0_46 = arith.constant 0 : index
    %113 = vector.load %arg6[%c0_45, %c0_46] : memref<128x384xbf16, #tpu.memory_space<vmem>>, vector<128x384xbf16>
    %cst_47 = arith.constant dense<0.000000e+00> : vector<128x384xf32>
    %114 = tpu.matmul %112, %113, %cst_47 {dimension_numbers = #tpu.dot_dimension_numbers<[1], [0], [0], [1], [0, 0, 1, 1], [], []>} : vector<128x128xbf16>, vector<128x384xbf16>, vector<128x384xf32> -> vector<128x384xf32>
    %115 = vector.extract_strided_slice %111 {offsets = [0, 0], sizes = [128, 256], strides = [1, 1]} : vector<128x384xf32> to vector<128x256xf32>
    %116 = vector.extract_strided_slice %114 {offsets = [0, 0], sizes = [128, 256], strides = [1, 1]} : vector<128x384xf32> to vector<128x256xf32>
    %117 = arith.addf %115, %116 : vector<128x256xf32>
    %118 = arith.negf %117 : vector<128x256xf32>
    %119 = math.exp %118 : vector<128x256xf32>
    %cst_48 = arith.constant 1.000000e+00 : f32
    %120 = vector.broadcast %cst_48 : f32 to vector<128x256xf32>
    %121 = arith.addf %120, %119 : vector<128x256xf32>
    %122 = arith.divf %120, %121 : vector<128x256xf32>
    %123 = vector.extract_strided_slice %122 {offsets = [0, 0], sizes = [128, 128], strides = [1, 1]} : vector<128x256xf32> to vector<128x128xf32>
    %124 = vector.extract_strided_slice %122 {offsets = [0, 128], sizes = [128, 128], strides = [1, 1]} : vector<128x256xf32> to vector<128x128xf32>
    %125 = vector.extract_strided_slice %111 {offsets = [0, 256], sizes = [128, 128], strides = [1, 1]} : vector<128x384xf32> to vector<128x128xf32>
    %126 = vector.extract_strided_slice %114 {offsets = [0, 256], sizes = [128, 128], strides = [1, 1]} : vector<128x384xf32> to vector<128x128xf32>
    %127 = arith.addf %126, %20 : vector<128x128xf32>
    %128 = arith.mulf %123, %127 : vector<128x128xf32>
    %129 = arith.addf %125, %128 : vector<128x128xf32>
    %130 = math.tanh %129 : vector<128x128xf32>
    %131 = arith.subf %104, %130 : vector<128x128xf32>
    %132 = arith.mulf %124, %131 : vector<128x128xf32>
    %133 = arith.addf %130, %132 : vector<128x128xf32>
    %134 = arith.index_cast %c3_i32 : i32 to index
    %c0_49 = arith.constant 0 : index
    %c0_50 = arith.constant 0 : index
    %135 = vector.load %arg14[%134, %c0_49, %c0_50] : memref<8x128x128xf32, #tpu.memory_space<vmem>>, vector<1x128x128xf32>
    %136 = vector.shape_cast %135 : vector<1x128x128xf32> to vector<128x128xf32>
    %137 = vector.shape_cast %133 : vector<128x128xf32> to vector<1x128x128xf32>
    tpu.vector_store %arg14[%134, %c0_49, %c0_50], %137 {strides = array<i32>} : memref<8x128x128xf32, #tpu.memory_space<vmem>>, vector<1x128x128xf32>,
    %c4_i32 = arith.constant 4 : i32
    %138 = arith.index_cast %c4_i32 : i32 to index
    %c0_51 = arith.constant 0 : index
    %c0_52 = arith.constant 0 : index
    %139 = vector.load %arg13[%138, %c0_51, %c0_52] : memref<8x128x384xf32, #tpu.memory_space<vmem>>, vector<1x128x384xf32>
    %140 = vector.shape_cast %139 : vector<1x128x384xf32> to vector<128x384xf32>
    %141 = arith.truncf %133 : vector<128x128xf32> to vector<128x128xbf16>
    %c0_53 = arith.constant 0 : index
    %c0_54 = arith.constant 0 : index
    %142 = vector.load %arg6[%c0_53, %c0_54] : memref<128x384xbf16, #tpu.memory_space<vmem>>, vector<128x384xbf16>
    %cst_55 = arith.constant dense<0.000000e+00> : vector<128x384xf32>
    %143 = tpu.matmul %141, %142, %cst_55 {dimension_numbers = #tpu.dot_dimension_numbers<[1], [0], [0], [1], [0, 0, 1, 1], [], []>} : vector<128x128xbf16>, vector<128x384xbf16>, vector<128x384xf32> -> vector<128x384xf32>
    %144 = vector.extract_strided_slice %140 {offsets = [0, 0], sizes = [128, 256], strides = [1, 1]} : vector<128x384xf32> to vector<128x256xf32>
    %145 = vector.extract_strided_slice %143 {offsets = [0, 0], sizes = [128, 256], strides = [1, 1]} : vector<128x384xf32> to vector<128x256xf32>
    %146 = arith.addf %144, %145 : vector<128x256xf32>
    %147 = arith.negf %146 : vector<128x256xf32>
    %148 = math.exp %147 : vector<128x256xf32>
    %cst_56 = arith.constant 1.000000e+00 : f32
    %149 = vector.broadcast %cst_56 : f32 to vector<128x256xf32>
    %150 = arith.addf %149, %148 : vector<128x256xf32>
    %151 = arith.divf %149, %150 : vector<128x256xf32>
    %152 = vector.extract_strided_slice %151 {offsets = [0, 0], sizes = [128, 128], strides = [1, 1]} : vector<128x256xf32> to vector<128x128xf32>
    %153 = vector.extract_strided_slice %151 {offsets = [0, 128], sizes = [128, 128], strides = [1, 1]} : vector<128x256xf32> to vector<128x128xf32>
    %154 = vector.extract_strided_slice %140 {offsets = [0, 256], sizes = [128, 128], strides = [1, 1]} : vector<128x384xf32> to vector<128x128xf32>
    %155 = vector.extract_strided_slice %143 {offsets = [0, 256], sizes = [128, 128], strides = [1, 1]} : vector<128x384xf32> to vector<128x128xf32>
    %156 = arith.addf %155, %20 : vector<128x128xf32>
    %157 = arith.mulf %152, %156 : vector<128x128xf32>
    %158 = arith.addf %154, %157 : vector<128x128xf32>
    %159 = math.tanh %158 : vector<128x128xf32>
    %160 = arith.subf %133, %159 : vector<128x128xf32>
    %161 = arith.mulf %153, %160 : vector<128x128xf32>
    %162 = arith.addf %159, %161 : vector<128x128xf32>
    %163 = arith.index_cast %c4_i32 : i32 to index
    %c0_57 = arith.constant 0 : index
    %c0_58 = arith.constant 0 : index
    %164 = vector.load %arg14[%163, %c0_57, %c0_58] : memref<8x128x128xf32, #tpu.memory_space<vmem>>, vector<1x128x128xf32>
    %165 = vector.shape_cast %164 : vector<1x128x128xf32> to vector<128x128xf32>
    %166 = vector.shape_cast %162 : vector<128x128xf32> to vector<1x128x128xf32>
    tpu.vector_store %arg14[%163, %c0_57, %c0_58], %166 {strides = array<i32>} : memref<8x128x128xf32, #tpu.memory_space<vmem>>, vector<1x128x128xf32>,
    %c5_i32 = arith.constant 5 : i32
    %167 = arith.index_cast %c5_i32 : i32 to index
    %c0_59 = arith.constant 0 : index
    %c0_60 = arith.constant 0 : index
    %168 = vector.load %arg13[%167, %c0_59, %c0_60] : memref<8x128x384xf32, #tpu.memory_space<vmem>>, vector<1x128x384xf32>
    %169 = vector.shape_cast %168 : vector<1x128x384xf32> to vector<128x384xf32>
    %170 = arith.truncf %162 : vector<128x128xf32> to vector<128x128xbf16>
    %c0_61 = arith.constant 0 : index
    %c0_62 = arith.constant 0 : index
    %171 = vector.load %arg6[%c0_61, %c0_62] : memref<128x384xbf16, #tpu.memory_space<vmem>>, vector<128x384xbf16>
    %cst_63 = arith.constant dense<0.000000e+00> : vector<128x384xf32>
    %172 = tpu.matmul %170, %171, %cst_63 {dimension_numbers = #tpu.dot_dimension_numbers<[1], [0], [0], [1], [0, 0, 1, 1], [], []>} : vector<128x128xbf16>, vector<128x384xbf16>, vector<128x384xf32> -> vector<128x384xf32>
    %173 = vector.extract_strided_slice %169 {offsets = [0, 0], sizes = [128, 256], strides = [1, 1]} : vector<128x384xf32> to vector<128x256xf32>
    %174 = vector.extract_strided_slice %172 {offsets = [0, 0], sizes = [128, 256], strides = [1, 1]} : vector<128x384xf32> to vector<128x256xf32>
    %175 = arith.addf %173, %174 : vector<128x256xf32>
    %176 = arith.negf %175 : vector<128x256xf32>
    %177 = math.exp %176 : vector<128x256xf32>
    %cst_64 = arith.constant 1.000000e+00 : f32
    %178 = vector.broadcast %cst_64 : f32 to vector<128x256xf32>
    %179 = arith.addf %178, %177 : vector<128x256xf32>
    %180 = arith.divf %178, %179 : vector<128x256xf32>
    %181 = vector.extract_strided_slice %180 {offsets = [0, 0], sizes = [128, 128], strides = [1, 1]} : vector<128x256xf32> to vector<128x128xf32>
    %182 = vector.extract_strided_slice %180 {offsets = [0, 128], sizes = [128, 128], strides = [1, 1]} : vector<128x256xf32> to vector<128x128xf32>
    %183 = vector.extract_strided_slice %169 {offsets = [0, 256], sizes = [128, 128], strides = [1, 1]} : vector<128x384xf32> to vector<128x128xf32>
    %184 = vector.extract_strided_slice %172 {offsets = [0, 256], sizes = [128, 128], strides = [1, 1]} : vector<128x384xf32> to vector<128x128xf32>
    %185 = arith.addf %184, %20 : vector<128x128xf32>
    %186 = arith.mulf %181, %185 : vector<128x128xf32>
    %187 = arith.addf %183, %186 : vector<128x128xf32>
    %188 = math.tanh %187 : vector<128x128xf32>
    %189 = arith.subf %162, %188 : vector<128x128xf32>
    %190 = arith.mulf %182, %189 : vector<128x128xf32>
    %191 = arith.addf %188, %190 : vector<128x128xf32>
    %192 = arith.index_cast %c5_i32 : i32 to index
    %c0_65 = arith.constant 0 : index
    %c0_66 = arith.constant 0 : index
    %193 = vector.load %arg14[%192, %c0_65, %c0_66] : memref<8x128x128xf32, #tpu.memory_space<vmem>>, vector<1x128x128xf32>
    %194 = vector.shape_cast %193 : vector<1x128x128xf32> to vector<128x128xf32>
    %195 = vector.shape_cast %191 : vector<128x128xf32> to vector<1x128x128xf32>
    tpu.vector_store %arg14[%192, %c0_65, %c0_66], %195 {strides = array<i32>} : memref<8x128x128xf32, #tpu.memory_space<vmem>>, vector<1x128x128xf32>,
    %c6_i32 = arith.constant 6 : i32
    %196 = arith.index_cast %c6_i32 : i32 to index
    %c0_67 = arith.constant 0 : index
    %c0_68 = arith.constant 0 : index
    %197 = vector.load %arg13[%196, %c0_67, %c0_68] : memref<8x128x384xf32, #tpu.memory_space<vmem>>, vector<1x128x384xf32>
    %198 = vector.shape_cast %197 : vector<1x128x384xf32> to vector<128x384xf32>
    %199 = arith.truncf %191 : vector<128x128xf32> to vector<128x128xbf16>
    %c0_69 = arith.constant 0 : index
    %c0_70 = arith.constant 0 : index
    %200 = vector.load %arg6[%c0_69, %c0_70] : memref<128x384xbf16, #tpu.memory_space<vmem>>, vector<128x384xbf16>
    %cst_71 = arith.constant dense<0.000000e+00> : vector<128x384xf32>
    %201 = tpu.matmul %199, %200, %cst_71 {dimension_numbers = #tpu.dot_dimension_numbers<[1], [0], [0], [1], [0, 0, 1, 1], [], []>} : vector<128x128xbf16>, vector<128x384xbf16>, vector<128x384xf32> -> vector<128x384xf32>
    %202 = vector.extract_strided_slice %198 {offsets = [0, 0], sizes = [128, 256], strides = [1, 1]} : vector<128x384xf32> to vector<128x256xf32>
    %203 = vector.extract_strided_slice %201 {offsets = [0, 0], sizes = [128, 256], strides = [1, 1]} : vector<128x384xf32> to vector<128x256xf32>
    %204 = arith.addf %202, %203 : vector<128x256xf32>
    %205 = arith.negf %204 : vector<128x256xf32>
    %206 = math.exp %205 : vector<128x256xf32>
    %cst_72 = arith.constant 1.000000e+00 : f32
    %207 = vector.broadcast %cst_72 : f32 to vector<128x256xf32>
    %208 = arith.addf %207, %206 : vector<128x256xf32>
    %209 = arith.divf %207, %208 : vector<128x256xf32>
    %210 = vector.extract_strided_slice %209 {offsets = [0, 0], sizes = [128, 128], strides = [1, 1]} : vector<128x256xf32> to vector<128x128xf32>
    %211 = vector.extract_strided_slice %209 {offsets = [0, 128], sizes = [128, 128], strides = [1, 1]} : vector<128x256xf32> to vector<128x128xf32>
    %212 = vector.extract_strided_slice %198 {offsets = [0, 256], sizes = [128, 128], strides = [1, 1]} : vector<128x384xf32> to vector<128x128xf32>
    %213 = vector.extract_strided_slice %201 {offsets = [0, 256], sizes = [128, 128], strides = [1, 1]} : vector<128x384xf32> to vector<128x128xf32>
    %214 = arith.addf %213, %20 : vector<128x128xf32>
    %215 = arith.mulf %210, %214 : vector<128x128xf32>
    %216 = arith.addf %212, %215 : vector<128x128xf32>
    %217 = math.tanh %216 : vector<128x128xf32>
    %218 = arith.subf %191, %217 : vector<128x128xf32>
    %219 = arith.mulf %211, %218 : vector<128x128xf32>
    %220 = arith.addf %217, %219 : vector<128x128xf32>
    %221 = arith.index_cast %c6_i32 : i32 to index
    %c0_73 = arith.constant 0 : index
    %c0_74 = arith.constant 0 : index
    %222 = vector.load %arg14[%221, %c0_73, %c0_74] : memref<8x128x128xf32, #tpu.memory_space<vmem>>, vector<1x128x128xf32>
    %223 = vector.shape_cast %222 : vector<1x128x128xf32> to vector<128x128xf32>
    %224 = vector.shape_cast %220 : vector<128x128xf32> to vector<1x128x128xf32>
    tpu.vector_store %arg14[%221, %c0_73, %c0_74], %224 {strides = array<i32>} : memref<8x128x128xf32, #tpu.memory_space<vmem>>, vector<1x128x128xf32>,
    %c7_i32 = arith.constant 7 : i32
    %225 = arith.index_cast %c7_i32 : i32 to index
    %c0_75 = arith.constant 0 : index
    %c0_76 = arith.constant 0 : index
    %226 = vector.load %arg13[%225, %c0_75, %c0_76] : memref<8x128x384xf32, #tpu.memory_space<vmem>>, vector<1x128x384xf32>
    %227 = vector.shape_cast %226 : vector<1x128x384xf32> to vector<128x384xf32>
    %228 = arith.truncf %220 : vector<128x128xf32> to vector<128x128xbf16>
    %c0_77 = arith.constant 0 : index
    %c0_78 = arith.constant 0 : index
    %229 = vector.load %arg6[%c0_77, %c0_78] : memref<128x384xbf16, #tpu.memory_space<vmem>>, vector<128x384xbf16>
    %cst_79 = arith.constant dense<0.000000e+00> : vector<128x384xf32>
    %230 = tpu.matmul %228, %229, %cst_79 {dimension_numbers = #tpu.dot_dimension_numbers<[1], [0], [0], [1], [0, 0, 1, 1], [], []>} : vector<128x128xbf16>, vector<128x384xbf16>, vector<128x384xf32> -> vector<128x384xf32>
    %231 = vector.extract_strided_slice %227 {offsets = [0, 0], sizes = [128, 256], strides = [1, 1]} : vector<128x384xf32> to vector<128x256xf32>
    %232 = vector.extract_strided_slice %230 {offsets = [0, 0], sizes = [128, 256], strides = [1, 1]} : vector<128x384xf32> to vector<128x256xf32>
    %233 = arith.addf %231, %232 : vector<128x256xf32>
    %234 = arith.negf %233 : vector<128x256xf32>
    %235 = math.exp %234 : vector<128x256xf32>
    %cst_80 = arith.constant 1.000000e+00 : f32
    %236 = vector.broadcast %cst_80 : f32 to vector<128x256xf32>
    %237 = arith.addf %236, %235 : vector<128x256xf32>
    %238 = arith.divf %236, %237 : vector<128x256xf32>
    %239 = vector.extract_strided_slice %238 {offsets = [0, 0], sizes = [128, 128], strides = [1, 1]} : vector<128x256xf32> to vector<128x128xf32>
    %240 = vector.extract_strided_slice %238 {offsets = [0, 128], sizes = [128, 128], strides = [1, 1]} : vector<128x256xf32> to vector<128x128xf32>
    %241 = vector.extract_strided_slice %227 {offsets = [0, 256], sizes = [128, 128], strides = [1, 1]} : vector<128x384xf32> to vector<128x128xf32>
    %242 = vector.extract_strided_slice %230 {offsets = [0, 256], sizes = [128, 128], strides = [1, 1]} : vector<128x384xf32> to vector<128x128xf32>
    %243 = arith.addf %242, %20 : vector<128x128xf32>
    %244 = arith.mulf %239, %243 : vector<128x128xf32>
    %245 = arith.addf %241, %244 : vector<128x128xf32>
    %246 = math.tanh %245 : vector<128x128xf32>
    %247 = arith.subf %220, %246 : vector<128x128xf32>
    %248 = arith.mulf %240, %247 : vector<128x128xf32>
    %249 = arith.addf %246, %248 : vector<128x128xf32>
    %250 = arith.index_cast %c7_i32 : i32 to index
    %c0_81 = arith.constant 0 : index
    %c0_82 = arith.constant 0 : index
    %251 = vector.load %arg14[%250, %c0_81, %c0_82] : memref<8x128x128xf32, #tpu.memory_space<vmem>>, vector<1x128x128xf32>
    %252 = vector.shape_cast %251 : vector<1x128x128xf32> to vector<128x128xf32>
    %253 = vector.shape_cast %249 : vector<128x128xf32> to vector<1x128x128xf32>
    tpu.vector_store %arg14[%250, %c0_81, %c0_82], %253 {strides = array<i32>} : memref<8x128x128xf32, #tpu.memory_space<vmem>>, vector<1x128x128xf32>,
    %c8_i32 = arith.constant 8 : i32
    %c0_83 = arith.constant 0 : index
    %c0_84 = arith.constant 0 : index
    %254 = vector.load %arg12[%c0_83, %c0_84] : memref<128x128xf32, #tpu.memory_space<vmem>>, vector<128x128xf32>
    tpu.vector_store %arg12[%c0_83, %c0_84], %249 {strides = array<i32>} : memref<128x128xf32, #tpu.memory_space<vmem>>, vector<128x128xf32>,
    %c0_85 = arith.constant 0 : index
    %c0_86 = arith.constant 0 : index
    %c0_87 = arith.constant 0 : index
    %255 = vector.load %arg14[%c0_85, %c0_86, %c0_87] : memref<8x128x128xf32, #tpu.memory_space<vmem>>, vector<8x128x128xf32>
    %256 = vector.shape_cast %255 : vector<8x128x128xf32> to vector<1024x128xf32>
    %257 = arith.truncf %256 : vector<1024x128xf32> to vector<1024x128xbf16>
    %c0_88 = arith.constant 0 : index
    %c0_89 = arith.constant 0 : index
    %258 = vector.load %arg9[%c0_88, %c0_89] : memref<128x128xbf16, #tpu.memory_space<vmem>>, vector<128x128xbf16>
    %cst_90 = arith.constant dense<0.000000e+00> : vector<1024x128xf32>
    %259 = tpu.matmul %257, %258, %cst_90 {dimension_numbers = #tpu.dot_dimension_numbers<[1], [0], [0], [1], [0, 0, 1, 1], [], []>} : vector<1024x128xbf16>, vector<128x128xbf16>, vector<1024x128xf32> -> vector<1024x128xf32>
    %c0_91 = arith.constant 0 : index
    %c0_92 = arith.constant 0 : index
    %260 = vector.load %arg10[%c0_91, %c0_92] : memref<1x128xf32, #tpu.memory_space<vmem>>, vector<1x128xf32>
    %261 = vector.broadcast %260 : vector<1x128xf32> to vector<1024x128xf32>
    %262 = arith.addf %259, %261 : vector<1024x128xf32>
    %263 = math.tanh %262 : vector<1024x128xf32>
    %264 = vector.shape_cast %263 : vector<1024x128xf32> to vector<8x128x128xf32>
    %265 = arith.truncf %264 : vector<8x128x128xf32> to vector<8x128x128xbf16>
    %c0_93 = arith.constant 0 : index
    %c0_94 = arith.constant 0 : index
    %c0_95 = arith.constant 0 : index
    %266 = vector.load %arg11[%c0_93, %c0_94, %c0_95] : memref<8x128x128xbf16, #tpu.memory_space<vmem>>, vector<8x128x128xbf16>
    tpu.vector_store %arg11[%c0_93, %c0_94, %c0_95], %265 {strides = array<i32>} : memref<8x128x128xbf16, #tpu.memory_space<vmem>>, vector<8x128x128xbf16>,
    return
  }
  func.func @transform_0(%arg0: i32) -> (i32, i32, i32) {
    %c0_i32 = arith.constant 0 : i32
    %c0_i32_0 = arith.constant 0 : i32
    %c0_i32_1 = arith.constant 0 : i32
    return %c0_i32, %arg0, %c0_i32_0 : i32, i32, i32
  }
  func.func @transform_1(%arg0: i32) -> (i32, i32) {
    %c0_i32 = arith.constant 0 : i32
    %c0_i32_0 = arith.constant 0 : i32
    return %arg0, %c0_i32 : i32, i32
  }
  func.func @transform_2(%arg0: i32) -> (i32, i32) {
    %c0_i32 = arith.constant 0 : i32
    %c0_i32_0 = arith.constant 0 : i32
    %c0_i32_1 = arith.constant 0 : i32
    return %c0_i32, %c0_i32_0 : i32, i32
  }
  func.func @transform_3(%arg0: i32) -> (i32, i32) {
    %c0_i32 = arith.constant 0 : i32
    %c0_i32_0 = arith.constant 0 : i32
    %c0_i32_1 = arith.constant 0 : i32
    return %c0_i32, %c0_i32_0 : i32, i32
  }
  func.func @transform_4(%arg0: i32) -> (i32, i32) {
    %c0_i32 = arith.constant 0 : i32
    %c0_i32_0 = arith.constant 0 : i32
    %c0_i32_1 = arith.constant 0 : i32
    return %c0_i32, %c0_i32_0 : i32, i32
  }
  func.func @transform_5(%arg0: i32) -> (i32, i32) {
    %c0_i32 = arith.constant 0 : i32
    %c0_i32_0 = arith.constant 0 : i32
    %c0_i32_1 = arith.constant 0 : i32
    return %c0_i32, %c0_i32_0 : i32, i32
  }
  func.func @transform_6(%arg0: i32) -> (i32, i32) {
    %c0_i32 = arith.constant 0 : i32
    %c0_i32_0 = arith.constant 0 : i32
    %c0_i32_1 = arith.constant 0 : i32
    return %c0_i32, %c0_i32_0 : i32, i32
  }
  func.func @transform_7(%arg0: i32) -> (i32, i32) {
    %c0_i32 = arith.constant 0 : i32
    %c0_i32_0 = arith.constant 0 : i32
    %c0_i32_1 = arith.constant 0 : i32
    return %c0_i32, %c0_i32_0 : i32, i32
  }
  func.func @transform_8(%arg0: i32) -> (i32, i32) {
    %c0_i32 = arith.constant 0 : i32
    %c0_i32_0 = arith.constant 0 : i32
    %c0_i32_1 = arith.constant 0 : i32
    return %c0_i32, %c0_i32_0 : i32, i32
  }
  func.func @transform_9(%arg0: i32) -> (i32, i32) {
    %c0_i32 = arith.constant 0 : i32
    %c0_i32_0 = arith.constant 0 : i32
    %c0_i32_1 = arith.constant 0 : i32
    return %c0_i32, %c0_i32_0 : i32, i32
  }
  func.func @transform_10(%arg0: i32) -> (i32, i32, i32) {
    %c0_i32 = arith.constant 0 : i32
    %c0_i32_0 = arith.constant 0 : i32
    %c0_i32_1 = arith.constant 0 : i32
    return %c0_i32, %arg0, %c0_i32_0 : i32, i32, i32
  }
  func.func @transform_11(%arg0: i32) -> (i32, i32) {
    %c0_i32 = arith.constant 0 : i32
    %c0_i32_0 = arith.constant 0 : i32
    return %arg0, %c0_i32 : i32, i32
  }
}

</mosaic_0001>

<bundles_post_ra>
// kernel: tpu_custom_call.1
= control target key start
LH: loop header
LB: loop body
LE: loop exit
PB: predicated region body
PF: predicated region fallthrough
CT: control target
= control target key end

     0   :  { %s21366_s0 = inlined_call_operand.vmem [shape: f32[8,256,64], index: 0, kind: input, shape index: {}]   ;;  %s21367_s1 = inlined_call_operand.vmem [shape: f32[256,128], index: 1, kind: input, shape index: {}]   ;;  %s21368_s2 = inlined_call_operand.vmem [shape: bf16[64,128], index: 2, kind: input, shape index: {}]   ;;  %s21369_s3 = inlined_call_operand.vmem [shape: f32[1,128], index: 3, kind: input, shape index: {}]   ;;  %s21370_s4 = inlined_call_operand.vmem [shape: bf16[128,384], index: 4, kind: input, shape index: {}]   ;;  %s21371_s5 = inlined_call_operand.vmem [shape: bf16[128,384], index: 5, kind: input, shape index: {}]   ;;  %s21372_s6 = inlined_call_operand.vmem [shape: f32[1,384], index: 6, kind: input, shape index: {}]   ;;  %s21373_s7 = inlined_call_operand.vmem [shape: f32[1,128], index: 7, kind: input, shape index: {}]   ;;  %s21374_s8 = inlined_call_operand.vmem [shape: bf16[128,128], index: 8, kind: input, shape index: {}]   ;;  %s21375_s9 = inlined_call_operand.vmem [shape: f32[1,128], index: 9, kind: input, shape index: {}]   ;;  %s21376_s10 = inlined_call_operand.hbm [shape: bf16[8,256,128], index: 10, kind: output, shape index: {0}]   ;;  %s21377_s11 = inlined_call_operand.hbm [shape: f32[256,128], index: 11, kind: output, shape index: {1}]  }
   0x1   :  { %21444 = sst [smem:[#allocation361_spill]] %s21366_s0 }
   0x2   :  { %21445 = sst [smem:[#allocation362_spill]] %s21367_s1 }
   0x3   :  { %21446 = sst [smem:[#allocation363_spill]] %s21368_s2 }
   0x4   :  { %21447 = sst [smem:[#allocation364_spill]] %s21369_s3 }
   0x5   :  { %17 = vsyncpa [#allocation6], 0 }
   0x6   :  { %19 = vsyncpa [#allocation6 + $0x1], 0 }
   0x7   :  { %20 = vsyncpa [#allocation8], 0 }
   0x8   :  { %22 = vsyncpa [#allocation8 + $0x1], 0  ;;  %s16171_s17 = smov 0   ;;  %s16173_s18 = smov 0  }
   0x9   :  { %s16175_s19 = smov 0   ;;  %s16177_s20 = smov 0  }
   0xa LB: > { %s16192_s21 = sadd.s32 4294967295, %s16098_s20   ;;  %s11929_s22 = sadd.s32 4294967294, %s16098_s20   ;;  %s16098_s20 = sphi %s16177_s20, %s22317_s20   ;;  %s16094_s19 = sphi %s16175_s19, %s22316_s19   ;;  %s16090_s18 = sphi %s16173_s18, %s22315_s18   ;;  %s16086_s17 = sphi %s16171_s17, %s22314_s17  }
   0xb   : > { %s16196_s23 = sadd.s32 1, %s16098_s20   ;;  %s35_s24 = sadd.s32 1, %s16094_s19 }
   0xc   : > { %s32_s25 = ssub.s32 %s16098_s20, %s16196_s23  ;;  %p42_p0 = scmp.ne.s32.totalorder %s16094_s19, %s16090_s18 }
   0xd   : > { %p33_p1 = scmp.eq.s32.totalorder %s32_s25, 0  ;;  %p43_p2 = scmp.eq.s32.totalorder %s16098_s20, 0 }
   0xe   : > { %p266_p3 = scmp.eq.s32.totalorder %s16192_s21, 1  ;;  %p271_p4 = scmp.ne.s32.totalorder %s16090_s18, %s16086_s17 }
   0xf   : > { %s16208_s26 = scalar_select %p33_p1, %s16094_s19, %s35_s24  }
  0x10   : > { %p44_p5 = por %p43_p2, %p42_p0  ;;  %p16210_p6 = por %p266_p3, %p42_p0 }
  0x11   : > { %p272_p7 = scmp.eq.s32.totalorder %s11929_s22, 1  ;;  %p11931_p9 = scmp.ge.s32.totalorder %s16098_s20, 2 }
  0x13   : > { %p16214_p8 = por %p272_p7, %p271_p4  ;;  %338 = sbr.rel (%p11931_p9) target bundleno = 98 (0x62), region = 48 }
  0x18   : > { %341 = sbr.rel (!%p44_p5) target bundleno = 98 (0x62), region = 52  ;;  %s343_s29 = sand.u32 (%p44_p5), 1, %s16094_s19  }
  0x19   : > { %s12628_s30 = sshll.u32 (%p44_p5), %s16098_s20, 7  ;;  %s11932_s12 = sshll.u32 (%p44_p5), %s343_s29, 10 }
  0x1a   : > { %s21450_s0 = sld [smem:[#allocation361_spill]] (%p44_p5)  ;;  %s16231_s16 = scalar_lea.vmem (%p44_p5), [#allocation4], %s11932_s12 }
  0x20   : > { %s16226_s15 = scalar_lea.vmem %s21450_s0, %s12628_s30 }
  0x21   : > { %v631_v0 = vld [vmem:[%s16226_s15] sm:$0xff]  ;;  %v633_v1 = vld [vmem:[%s16226_s15 + $0x8] sm:$0xff]  ;;  %v635_v2 = vld [vmem:[%s16226_s15 + $0x10] sm:$0xff] }
  0x22   : > { %632 = vst [vmem:[%s16231_s16] sm:$0xff] %v631_v0  ;;  %634 = vst [vmem:[%s16231_s16 + $0x8] sm:$0xff] %v633_v1  ;;  %v637_v3 = vld [vmem:[%s16226_s15 + $0x18] sm:$0xff]  ;;  %v639_v4 = vld [vmem:[%s16226_s15 + $0x20] sm:$0xff] }
  0x23   : > { %636 = vst [vmem:[%s16231_s16 + $0x10] sm:$0xff] %v635_v2  ;;  %v641_v5 = vld [vmem:[%s16226_s15 + $0x28] sm:$0xff]  ;;  %638 = vst [vmem:[%s16231_s16 + $0x18] sm:$0xff] %v637_v3  ;;  %v643_v6 = vld [vmem:[%s16226_s15 + $0x30] sm:$0xff] }
  0x24   : > { %640 = vst [vmem:[%s16231_s16 + $0x20] sm:$0xff] %v639_v4  ;;  %642 = vst [vmem:[%s16231_s16 + $0x28] sm:$0xff] %v641_v5  ;;  %v645_v7 = vld [vmem:[%s16226_s15 + $0x38] sm:$0xff]  ;;  %v647_v8 = vld [vmem:[%s16226_s15 + $0x40] sm:$0xff] }
  0x25   : > { %644 = vst [vmem:[%s16231_s16 + $0x30] sm:$0xff] %v643_v6  ;;  %646 = vst [vmem:[%s16231_s16 + $0x38] sm:$0xff] %v645_v7  ;;  %v649_v9 = vld [vmem:[%s16226_s15 + $0x48] sm:$0xff]  ;;  %v651_v10 = vld [vmem:[%s16226_s15 + $0x50] sm:$0xff] }
  0x26   : > { %648 = vst [vmem:[%s16231_s16 + $0x40] sm:$0xff] %v647_v8  ;;  %v653_v11 = vld [vmem:[%s16226_s15 + $0x58] sm:$0xff]  ;;  %650 = vst [vmem:[%s16231_s16 + $0x48] sm:$0xff] %v649_v9  ;;  %v655_v12 = vld [vmem:[%s16226_s15 + $0x60] sm:$0xff] }
  0x27   : > { %652 = vst [vmem:[%s16231_s16 + $0x50] sm:$0xff] %v651_v10  ;;  %654 = vst [vmem:[%s16231_s16 + $0x58] sm:$0xff] %v653_v11  ;;  %v657_v13 = vld [vmem:[%s16226_s15 + $0x68] sm:$0xff]  ;;  %v659_v14 = vld [vmem:[%s16226_s15 + $0x70] sm:$0xff] }
  0x28   : > { %656 = vst [vmem:[%s16231_s16 + $0x60] sm:$0xff] %v655_v12  ;;  %658 = vst [vmem:[%s16231_s16 + $0x68] sm:$0xff] %v657_v13  ;;  %v661_v15 = vld [vmem:[%s16226_s15 + $0x78] sm:$0xff]  ;;  %v663_v16 = vld [vmem:[%s16226_s15 + $0x100] sm:$0xff] }
  0x29   : > { %660 = vst [vmem:[%s16231_s16 + $0x70] sm:$0xff] %v659_v14  ;;  %v665_v17 = vld [vmem:[%s16226_s15 + $0x108] sm:$0xff]  ;;  %662 = vst [vmem:[%s16231_s16 + $0x78] sm:$0xff] %v661_v15  ;;  %v667_v18 = vld [vmem:[%s16226_s15 + $0x110] sm:$0xff] }
  0x2a   : > { %664 = vst [vmem:[%s16231_s16 + $0x80] sm:$0xff] %v663_v16  ;;  %666 = vst [vmem:[%s16231_s16 + $0x88] sm:$0xff] %v665_v17  ;;  %v669_v19 = vld [vmem:[%s16226_s15 + $0x118] sm:$0xff]  ;;  %v671_v20 = vld [vmem:[%s16226_s15 + $0x120] sm:$0xff] }
  0x2b   : > { %668 = vst [vmem:[%s16231_s16 + $0x90] sm:$0xff] %v667_v18  ;;  %670 = vst [vmem:[%s16231_s16 + $0x98] sm:$0xff] %v669_v19  ;;  %v673_v21 = vld [vmem:[%s16226_s15 + $0x128] sm:$0xff]  ;;  %v675_v22 = vld [vmem:[%s16226_s15 + $0x130] sm:$0xff] }
  0x2c   : > { %672 = vst [vmem:[%s16231_s16 + $0xa0] sm:$0xff] %v671_v20  ;;  %v677_v23 = vld [vmem:[%s16226_s15 + $0x138] sm:$0xff]  ;;  %674 = vst [vmem:[%s16231_s16 + $0xa8] sm:$0xff] %v673_v21  ;;  %v679_v24 = vld [vmem:[%s16226_s15 + $0x140] sm:$0xff] }
  0x2d   : > { %676 = vst [vmem:[%s16231_s16 + $0xb0] sm:$0xff] %v675_v22  ;;  %678 = vst [vmem:[%s16231_s16 + $0xb8] sm:$0xff] %v677_v23  ;;  %v681_v25 = vld [vmem:[%s16226_s15 + $0x148] sm:$0xff]  ;;  %v683_v26 = vld [vmem:[%s16226_s15 + $0x150] sm:$0xff] }
  0x2e   : > { %680 = vst [vmem:[%s16231_s16 + $0xc0] sm:$0xff] %v679_v24  ;;  %682 = vst [vmem:[%s16231_s16 + $0xc8] sm:$0xff] %v681_v25  ;;  %v685_v27 = vld [vmem:[%s16226_s15 + $0x158] sm:$0xff]  ;;  %v687_v28 = vld [vmem:[%s16226_s15 + $0x160] sm:$0xff] }
  0x2f   : > { %684 = vst [vmem:[%s16231_s16 + $0xd0] sm:$0xff] %v683_v26  ;;  %v689_v29 = vld [vmem:[%s16226_s15 + $0x168] sm:$0xff]  ;;  %686 = vst [vmem:[%s16231_s16 + $0xd8] sm:$0xff] %v685_v27  ;;  %v691_v30 = vld [vmem:[%s16226_s15 + $0x170] sm:$0xff] }
  0x30   : > { %688 = vst [vmem:[%s16231_s16 + $0xe0] sm:$0xff] %v687_v28  ;;  %690 = vst [vmem:[%s16231_s16 + $0xe8] sm:$0xff] %v689_v29  ;;  %v693_v31 = vld [vmem:[%s16226_s15 + $0x178] sm:$0xff]  ;;  %v695_v32 = vld [vmem:[%s16226_s15 + $0x200] sm:$0xff] }
  0x31   : > { %692 = vst [vmem:[%s16231_s16 + $0xf0] sm:$0xff] %v691_v30  ;;  %694 = vst [vmem:[%s16231_s16 + $0xf8] sm:$0xff] %v693_v31  ;;  %v697_v33 = vld [vmem:[%s16226_s15 + $0x208] sm:$0xff]  ;;  %v699_v34 = vld [vmem:[%s16226_s15 + $0x210] sm:$0xff] }
  0x32   : > { %696 = vst [vmem:[%s16231_s16 + $0x100] sm:$0xff] %v695_v32  ;;  %v701_v35 = vld [vmem:[%s16226_s15 + $0x218] sm:$0xff]  ;;  %698 = vst [vmem:[%s16231_s16 + $0x108] sm:$0xff] %v697_v33  ;;  %v703_v36 = vld [vmem:[%s16226_s15 + $0x220] sm:$0xff] }
  0x33   : > { %700 = vst [vmem:[%s16231_s16 + $0x110] sm:$0xff] %v699_v34  ;;  %702 = vst [vmem:[%s16231_s16 + $0x118] sm:$0xff] %v701_v35  ;;  %v705_v37 = vld [vmem:[%s16226_s15 + $0x228] sm:$0xff]  ;;  %v707_v38 = vld [vmem:[%s16226_s15 + $0x230] sm:$0xff] }
  0x34   : > { %704 = vst [vmem:[%s16231_s16 + $0x120] sm:$0xff] %v703_v36  ;;  %706 = vst [vmem:[%s16231_s16 + $0x128] sm:$0xff] %v705_v37  ;;  %v709_v39 = vld [vmem:[%s16226_s15 + $0x238] sm:$0xff]  ;;  %v711_v40 = vld [vmem:[%s16226_s15 + $0x240] sm:$0xff] }
  0x35   : > { %708 = vst [vmem:[%s16231_s16 + $0x130] sm:$0xff] %v707_v38  ;;  %v713_v41 = vld [vmem:[%s16226_s15 + $0x248] sm:$0xff]  ;;  %710 = vst [vmem:[%s16231_s16 + $0x138] sm:$0xff] %v709_v39  ;;  %v715_v42 = vld [vmem:[%s16226_s15 + $0x250] sm:$0xff] }
  0x36   : > { %712 = vst [vmem:[%s16231_s16 + $0x140] sm:$0xff] %v711_v40  ;;  %714 = vst [vmem:[%s16231_s16 + $0x148] sm:$0xff] %v713_v41  ;;  %v717_v43 = vld [vmem:[%s16226_s15 + $0x258] sm:$0xff]  ;;  %v719_v44 = vld [vmem:[%s16226_s15 + $0x260] sm:$0xff] }
  0x37   : > { %716 = vst [vmem:[%s16231_s16 + $0x150] sm:$0xff] %v715_v42  ;;  %718 = vst [vmem:[%s16231_s16 + $0x158] sm:$0xff] %v717_v43  ;;  %v721_v45 = vld [vmem:[%s16226_s15 + $0x268] sm:$0xff]  ;;  %v723_v46 = vld [vmem:[%s16226_s15 + $0x270] sm:$0xff] }
  0x38   : > { %720 = vst [vmem:[%s16231_s16 + $0x160] sm:$0xff] %v719_v44  ;;  %v725_v47 = vld [vmem:[%s16226_s15 + $0x278] sm:$0xff]  ;;  %722 = vst [vmem:[%s16231_s16 + $0x168] sm:$0xff] %v721_v45  ;;  %v727_v48 = vld [vmem:[%s16226_s15 + $0x300] sm:$0xff] }
  0x39   : > { %724 = vst [vmem:[%s16231_s16 + $0x170] sm:$0xff] %v723_v46  ;;  %726 = vst [vmem:[%s16231_s16 + $0x178] sm:$0xff] %v725_v47  ;;  %v729_v49 = vld [vmem:[%s16226_s15 + $0x308] sm:$0xff]  ;;  %v731_v50 = vld [vmem:[%s16226_s15 + $0x310] sm:$0xff] }
  0x3a   : > { %728 = vst [vmem:[%s16231_s16 + $0x180] sm:$0xff] %v727_v48  ;;  %730 = vst [vmem:[%s16231_s16 + $0x188] sm:$0xff] %v729_v49  ;;  %v733_v51 = vld [vmem:[%s16226_s15 + $0x318] sm:$0xff]  ;;  %v735_v52 = vld [vmem:[%s16226_s15 + $0x320] sm:$0xff] }
  0x3b   : > { %732 = vst [vmem:[%s16231_s16 + $0x190] sm:$0xff] %v731_v50  ;;  %v737_v53 = vld [vmem:[%s16226_s15 + $0x328] sm:$0xff]  ;;  %734 = vst [vmem:[%s16231_s16 + $0x198] sm:$0xff] %v733_v51  ;;  %v739_v54 = vld [vmem:[%s16226_s15 + $0x330] sm:$0xff] }
  0x3c   : > { %736 = vst [vmem:[%s16231_s16 + $0x1a0] sm:$0xff] %v735_v52  ;;  %738 = vst [vmem:[%s16231_s16 + $0x1a8] sm:$0xff] %v737_v53  ;;  %v741_v55 = vld [vmem:[%s16226_s15 + $0x338] sm:$0xff]  ;;  %v743_v56 = vld [vmem:[%s16226_s15 + $0x340] sm:$0xff] }
  0x3d   : > { %740 = vst [vmem:[%s16231_s16 + $0x1b0] sm:$0xff] %v739_v54  ;;  %742 = vst [vmem:[%s16231_s16 + $0x1b8] sm:$0xff] %v741_v55  ;;  %v745_v57 = vld [vmem:[%s16226_s15 + $0x348] sm:$0xff]  ;;  %v747_v58 = vld [vmem:[%s16226_s15 + $0x350] sm:$0xff] }
  0x3e   : > { %744 = vst [vmem:[%s16231_s16 + $0x1c0] sm:$0xff] %v743_v56  ;;  %v749_v59 = vld [vmem:[%s16226_s15 + $0x358] sm:$0xff]  ;;  %746 = vst [vmem:[%s16231_s16 + $0x1c8] sm:$0xff] %v745_v57  ;;  %v751_v60 = vld [vmem:[%s16226_s15 + $0x360] sm:$0xff] }
  0x3f   : > { %748 = vst [vmem:[%s16231_s16 + $0x1d0] sm:$0xff] %v747_v58  ;;  %750 = vst [vmem:[%s16231_s16 + $0x1d8] sm:$0xff] %v749_v59  ;;  %v753_v61 = vld [vmem:[%s16226_s15 + $0x368] sm:$0xff]  ;;  %v755_v62 = vld [vmem:[%s16226_s15 + $0x370] sm:$0xff] }
  0x40   : > { %752 = vst [vmem:[%s16231_s16 + $0x1e0] sm:$0xff] %v751_v60  ;;  %754 = vst [vmem:[%s16231_s16 + $0x1e8] sm:$0xff] %v753_v61  ;;  %v757_v63 = vld [vmem:[%s16226_s15 + $0x378] sm:$0xff]  ;;  %v759_v0 = vld [vmem:[%s16226_s15 + $0x400] sm:$0xff] }
  0x41   : > { %756 = vst [vmem:[%s16231_s16 + $0x1f0] sm:$0xff] %v755_v62  ;;  %v761_v1 = vld [vmem:[%s16226_s15 + $0x408] sm:$0xff]  ;;  %758 = vst [vmem:[%s16231_s16 + $0x1f8] sm:$0xff] %v757_v63  ;;  %v763_v2 = vld [vmem:[%s16226_s15 + $0x410] sm:$0xff] }
  0x42   : > { %760 = vst [vmem:[%s16231_s16 + $0x200] sm:$0xff] %v759_v0  ;;  %762 = vst [vmem:[%s16231_s16 + $0x208] sm:$0xff] %v761_v1  ;;  %v765_v3 = vld [vmem:[%s16226_s15 + $0x418] sm:$0xff]  ;;  %v767_v4 = vld [vmem:[%s16226_s15 + $0x420] sm:$0xff] }
  0x43   : > { %764 = vst [vmem:[%s16231_s16 + $0x210] sm:$0xff] %v763_v2  ;;  %766 = vst [vmem:[%s16231_s16 + $0x218] sm:$0xff] %v765_v3  ;;  %v769_v5 = vld [vmem:[%s16226_s15 + $0x428] sm:$0xff]  ;;  %v771_v6 = vld [vmem:[%s16226_s15 + $0x430] sm:$0xff] }
  0x44   : > { %768 = vst [vmem:[%s16231_s16 + $0x220] sm:$0xff] %v767_v4  ;;  %v773_v7 = vld [vmem:[%s16226_s15 + $0x438] sm:$0xff]  ;;  %770 = vst [vmem:[%s16231_s16 + $0x228] sm:$0xff] %v769_v5  ;;  %v775_v8 = vld [vmem:[%s16226_s15 + $0x440] sm:$0xff] }
  0x45   : > { %772 = vst [vmem:[%s16231_s16 + $0x230] sm:$0xff] %v771_v6  ;;  %774 = vst [vmem:[%s16231_s16 + $0x238] sm:$0xff] %v773_v7  ;;  %v777_v9 = vld [vmem:[%s16226_s15 + $0x448] sm:$0xff]  ;;  %v779_v10 = vld [vmem:[%s16226_s15 + $0x450] sm:$0xff] }
  0x46   : > { %776 = vst [vmem:[%s16231_s16 + $0x240] sm:$0xff] %v775_v8  ;;  %778 = vst [vmem:[%s16231_s16 + $0x248] sm:$0xff] %v777_v9  ;;  %v781_v11 = vld [vmem:[%s16226_s15 + $0x458] sm:$0xff]  ;;  %v783_v12 = vld [vmem:[%s16226_s15 + $0x460] sm:$0xff] }
  0x47   : > { %780 = vst [vmem:[%s16231_s16 + $0x250] sm:$0xff] %v779_v10  ;;  %v785_v13 = vld [vmem:[%s16226_s15 + $0x468] sm:$0xff]  ;;  %782 = vst [vmem:[%s16231_s16 + $0x258] sm:$0xff] %v781_v11  ;;  %v787_v14 = vld [vmem:[%s16226_s15 + $0x470] sm:$0xff] }
  0x48   : > { %784 = vst [vmem:[%s16231_s16 + $0x260] sm:$0xff] %v783_v12  ;;  %786 = vst [vmem:[%s16231_s16 + $0x268] sm:$0xff] %v785_v13  ;;  %v789_v15 = vld [vmem:[%s16226_s15 + $0x478] sm:$0xff]  ;;  %v791_v16 = vld [vmem:[%s16226_s15 + $0x500] sm:$0xff] }
  0x49   : > { %788 = vst [vmem:[%s16231_s16 + $0x270] sm:$0xff] %v787_v14  ;;  %790 = vst [vmem:[%s16231_s16 + $0x278] sm:$0xff] %v789_v15  ;;  %v793_v17 = vld [vmem:[%s16226_s15 + $0x508] sm:$0xff]  ;;  %v795_v18 = vld [vmem:[%s16226_s15 + $0x510] sm:$0xff] }
  0x4a   : > { %792 = vst [vmem:[%s16231_s16 + $0x280] sm:$0xff] %v791_v16  ;;  %v797_v19 = vld [vmem:[%s16226_s15 + $0x518] sm:$0xff]  ;;  %794 = vst [vmem:[%s16231_s16 + $0x288] sm:$0xff] %v793_v17  ;;  %v799_v20 = vld [vmem:[%s16226_s15 + $0x520] sm:$0xff] }
  0x4b   : > { %796 = vst [vmem:[%s16231_s16 + $0x290] sm:$0xff] %v795_v18  ;;  %798 = vst [vmem:[%s16231_s16 + $0x298] sm:$0xff] %v797_v19  ;;  %v801_v21 = vld [vmem:[%s16226_s15 + $0x528] sm:$0xff]  ;;  %v803_v22 = vld [vmem:[%s16226_s15 + $0x530] sm:$0xff] }
  0x4c   : > { %800 = vst [vmem:[%s16231_s16 + $0x2a0] sm:$0xff] %v799_v20  ;;  %802 = vst [vmem:[%s16231_s16 + $0x2a8] sm:$0xff] %v801_v21  ;;  %v805_v23 = vld [vmem:[%s16226_s15 + $0x538] sm:$0xff]  ;;  %v807_v24 = vld [vmem:[%s16226_s15 + $0x540] sm:$0xff] }
  0x4d   : > { %804 = vst [vmem:[%s16231_s16 + $0x2b0] sm:$0xff] %v803_v22  ;;  %v809_v25 = vld [vmem:[%s16226_s15 + $0x548] sm:$0xff]  ;;  %806 = vst [vmem:[%s16231_s16 + $0x2b8] sm:$0xff] %v805_v23  ;;  %v811_v26 = vld [vmem:[%s16226_s15 + $0x550] sm:$0xff] }
  0x4e   : > { %808 = vst [vmem:[%s16231_s16 + $0x2c0] sm:$0xff] %v807_v24  ;;  %810 = vst [vmem:[%s16231_s16 + $0x2c8] sm:$0xff] %v809_v25  ;;  %v813_v27 = vld [vmem:[%s16226_s15 + $0x558] sm:$0xff]  ;;  %v815_v28 = vld [vmem:[%s16226_s15 + $0x560] sm:$0xff] }
  0x4f   : > { %812 = vst [vmem:[%s16231_s16 + $0x2d0] sm:$0xff] %v811_v26  ;;  %814 = vst [vmem:[%s16231_s16 + $0x2d8] sm:$0xff] %v813_v27  ;;  %v817_v29 = vld [vmem:[%s16226_s15 + $0x568] sm:$0xff]  ;;  %v819_v30 = vld [vmem:[%s16226_s15 + $0x570] sm:$0xff] }
  0x50   : > { %816 = vst [vmem:[%s16231_s16 + $0x2e0] sm:$0xff] %v815_v28  ;;  %v821_v31 = vld [vmem:[%s16226_s15 + $0x578] sm:$0xff]  ;;  %818 = vst [vmem:[%s16231_s16 + $0x2e8] sm:$0xff] %v817_v29  ;;  %v823_v32 = vld [vmem:[%s16226_s15 + $0x600] sm:$0xff] }
  0x51   : > { %820 = vst [vmem:[%s16231_s16 + $0x2f0] sm:$0xff] %v819_v30  ;;  %822 = vst [vmem:[%s16231_s16 + $0x2f8] sm:$0xff] %v821_v31  ;;  %v825_v33 = vld [vmem:[%s16226_s15 + $0x608] sm:$0xff]  ;;  %v827_v34 = vld [vmem:[%s16226_s15 + $0x610] sm:$0xff] }
  0x52   : > { %824 = vst [vmem:[%s16231_s16 + $0x300] sm:$0xff] %v823_v32  ;;  %826 = vst [vmem:[%s16231_s16 + $0x308] sm:$0xff] %v825_v33  ;;  %v829_v35 = vld [vmem:[%s16226_s15 + $0x618] sm:$0xff]  ;;  %v831_v36 = vld [vmem:[%s16226_s15 + $0x620] sm:$0xff] }
  0x53   : > { %828 = vst [vmem:[%s16231_s16 + $0x310] sm:$0xff] %v827_v34  ;;  %v833_v37 = vld [vmem:[%s16226_s15 + $0x628] sm:$0xff]  ;;  %830 = vst [vmem:[%s16231_s16 + $0x318] sm:$0xff] %v829_v35  ;;  %v835_v38 = vld [vmem:[%s16226_s15 + $0x630] sm:$0xff] }
  0x54   : > { %832 = vst [vmem:[%s16231_s16 + $0x320] sm:$0xff] %v831_v36  ;;  %834 = vst [vmem:[%s16231_s16 + $0x328] sm:$0xff] %v833_v37  ;;  %v837_v39 = vld [vmem:[%s16226_s15 + $0x638] sm:$0xff]  ;;  %v839_v40 = vld [vmem:[%s16226_s15 + $0x640] sm:$0xff] }
  0x55   : > { %836 = vst [vmem:[%s16231_s16 + $0x330] sm:$0xff] %v835_v38  ;;  %838 = vst [vmem:[%s16231_s16 + $0x338] sm:$0xff] %v837_v39  ;;  %v841_v41 = vld [vmem:[%s16226_s15 + $0x648] sm:$0xff]  ;;  %v843_v42 = vld [vmem:[%s16226_s15 + $0x650] sm:$0xff] }
  0x56   : > { %840 = vst [vmem:[%s16231_s16 + $0x340] sm:$0xff] %v839_v40  ;;  %v845_v43 = vld [vmem:[%s16226_s15 + $0x658] sm:$0xff]  ;;  %842 = vst [vmem:[%s16231_s16 + $0x348] sm:$0xff] %v841_v41  ;;  %v847_v44 = vld [vmem:[%s16226_s15 + $0x660] sm:$0xff] }
  0x57   : > { %844 = vst [vmem:[%s16231_s16 + $0x350] sm:$0xff] %v843_v42  ;;  %846 = vst [vmem:[%s16231_s16 + $0x358] sm:$0xff] %v845_v43  ;;  %v849_v45 = vld [vmem:[%s16226_s15 + $0x668] sm:$0xff]  ;;  %v851_v46 = vld [vmem:[%s16226_s15 + $0x670] sm:$0xff] }
  0x58   : > { %848 = vst [vmem:[%s16231_s16 + $0x360] sm:$0xff] %v847_v44  ;;  %850 = vst [vmem:[%s16231_s16 + $0x368] sm:$0xff] %v849_v45  ;;  %v853_v47 = vld [vmem:[%s16226_s15 + $0x678] sm:$0xff]  ;;  %v855_v48 = vld [vmem:[%s16226_s15 + $0x700] sm:$0xff] }
  0x59   : > { %852 = vst [vmem:[%s16231_s16 + $0x370] sm:$0xff] %v851_v46  ;;  %v857_v49 = vld [vmem:[%s16226_s15 + $0x708] sm:$0xff]  ;;  %854 = vst [vmem:[%s16231_s16 + $0x378] sm:$0xff] %v853_v47  ;;  %v859_v50 = vld [vmem:[%s16226_s15 + $0x710] sm:$0xff] }
  0x5a   : > { %856 = vst [vmem:[%s16231_s16 + $0x380] sm:$0xff] %v855_v48  ;;  %858 = vst [vmem:[%s16231_s16 + $0x388] sm:$0xff] %v857_v49  ;;  %v861_v51 = vld [vmem:[%s16226_s15 + $0x718] sm:$0xff]  ;;  %v863_v52 = vld [vmem:[%s16226_s15 + $0x720] sm:$0xff] }
  0x5b   : > { %860 = vst [vmem:[%s16231_s16 + $0x390] sm:$0xff] %v859_v50  ;;  %862 = vst [vmem:[%s16231_s16 + $0x398] sm:$0xff] %v861_v51  ;;  %v865_v53 = vld [vmem:[%s16226_s15 + $0x728] sm:$0xff]  ;;  %v867_v54 = vld [vmem:[%s16226_s15 + $0x730] sm:$0xff] }
  0x5c   : > { %864 = vst [vmem:[%s16231_s16 + $0x3a0] sm:$0xff] %v863_v52  ;;  %v869_v55 = vld [vmem:[%s16226_s15 + $0x738] sm:$0xff]  ;;  %866 = vst [vmem:[%s16231_s16 + $0x3a8] sm:$0xff] %v865_v53  ;;  %v871_v56 = vld [vmem:[%s16226_s15 + $0x740] sm:$0xff] }
  0x5d   : > { %868 = vst [vmem:[%s16231_s16 + $0x3b0] sm:$0xff] %v867_v54  ;;  %870 = vst [vmem:[%s16231_s16 + $0x3b8] sm:$0xff] %v869_v55  ;;  %v873_v57 = vld [vmem:[%s16226_s15 + $0x748] sm:$0xff]  ;;  %v875_v58 = vld [vmem:[%s16226_s15 + $0x750] sm:$0xff] }
  0x5e   : > { %872 = vst [vmem:[%s16231_s16 + $0x3c0] sm:$0xff] %v871_v56  ;;  %874 = vst [vmem:[%s16231_s16 + $0x3c8] sm:$0xff] %v873_v57  ;;  %v877_v59 = vld [vmem:[%s16226_s15 + $0x758] sm:$0xff]  ;;  %v879_v60 = vld [vmem:[%s16226_s15 + $0x760] sm:$0xff] }
  0x5f   : > { %876 = vst [vmem:[%s16231_s16 + $0x3d0] sm:$0xff] %v875_v58  ;;  %v881_v61 = vld [vmem:[%s16226_s15 + $0x768] sm:$0xff]  ;;  %878 = vst [vmem:[%s16231_s16 + $0x3d8] sm:$0xff] %v877_v59  ;;  %v883_v62 = vld [vmem:[%s16226_s15 + $0x770] sm:$0xff] }
  0x60   : > { %880 = vst [vmem:[%s16231_s16 + $0x3e0] sm:$0xff] %v879_v60  ;;  %882 = vst [vmem:[%s16231_s16 + $0x3e8] sm:$0xff] %v881_v61  ;;  %v885_v63 = vld [vmem:[%s16226_s15 + $0x778] sm:$0xff] }
  0x61   : > { %884 = vst [vmem:[%s16231_s16 + $0x3f0] sm:$0xff] %v883_v62  ;;  %886 = vst [vmem:[%s16231_s16 + $0x3f8] sm:$0xff] %v885_v63 }
  0x62 PF: > { %p11935_p10 = scmp.ge.s32.totalorder %s16098_s20, 1  ;;  %p900_p11 = scmp.lt.s32.totalorder %s16098_s20, 3 }
  0x64   : > { %p901_p12 = pnand %p11935_p10, %p900_p11 }
  0x66   : > { %904 = sbr.rel (%p901_p12) target bundleno = 3207 (0xc87), region = 94 }
  0x6b   : > { %s21451_s2 = sld [smem:[#allocation363_spill]]  ;;  %s16492_s25 = sand.u32 1, %s16090_s18   ;;  %vm1197_vm0 = vcmask 523264   ;;  %v14234_v22 = vld [vmem:[%s21370_s4 + $0xa8] ss:$12 sps:$4 sm:$0xff]  }
  0x6c   : > { %s11936_s12 = sshll.u32 %s16492_s25, 10  ;;  %v14236_v23 = vld [vmem:[%s21370_s4 + $0xac] ss:$12 sps:$4 sm:$0xff]   ;;  %v14237_v36 = vld [vmem:[%s21370_s4 + $0x90] ss:$12 sps:$4 sm:$0xff]   ;;  %s21452_s3 = sld [smem:[#allocation364_spill]] }
  0x6d   : > { %s16501_s15 = scalar_lea.vmem [#allocation4], %s11936_s12  ;;  %v14239_v37 = vld [vmem:[%s21370_s4 + $0x94] ss:$12 sps:$4 sm:$0xff]   ;;  %v14240_v50 = vld [vmem:[%s21370_s4 + $0x78] ss:$12 sps:$4 sm:$0xff]   ;;  %s11939_s12 = sshll.u32 %s16192_s21, 4 }
  0x6e   : > { %v966_v3 = vld [vmem:[%s16501_s15] sm:$0xff]  ;;  %v967_v4 = vld [vmem:[%s16501_s15 + $0x8] sm:$0xff]  ;;  %v968_v7 = vld [vmem:[%s16501_s15 + $0x10] sm:$0xff]  ;;  %p958_p13 = scmp.lt.s32.totalorder %s11939_s12, 31  ;;  %s21518_s1 = sld [smem:[#allocation362_spill]] }
  0x6f   : > { %v1094_v5 = vpack.c.bf16 %v967_v4, %v966_v3  ;;  %v969_v8 = vld [vmem:[%s16501_s15 + $0x18] sm:$0xff]  ;;  %v970_v9 = vld [vmem:[%s16501_s15 + $0x20] sm:$0xff]  ;;  %v971_v10 = vld [vmem:[%s16501_s15 + $0x28] sm:$0xff]  ;;  %s11938_s0 = sshll.u32 %s16492_s25, 7  ;;  %s11937_s14 = sshll.u32 %s16492_s25, 9 }
  0x70   : > { %v1095_v11 = vpack.c.bf16 %v969_v8, %v968_v7  ;;  %v1096_v12 = vpack.c.bf16 %v971_v10, %v970_v9  ;;  %v1030_v13 = vld [vmem:[%s16501_s15 + $0x200] sm:$0xff]  ;;  %v1031_v14 = vld [vmem:[%s16501_s15 + $0x208] sm:$0xff]  ;;  %v972_v15 = vld [vmem:[%s16501_s15 + $0x30] sm:$0xff]  ;;  %s22319_s12 = smov (!%p958_p13, %s11939_s12), 31  ;;  %s21064_s22 = scalar_lea.vmem [#allocation5], %s11937_s14 }
  0x71   : > { %v14230_v0 = vld [vmem:[%s21451_s2 + $0x18] sm:$0xff]   ;;  %v14231_v1 = vld [vmem:[%s21451_s2 + $0x10] sm:$0xff]   ;;  %v14232_v2 = vld [vmem:[%s21451_s2 + $0x8] sm:$0xff]   ;;  %13490 = vmatprep.mubr.msk.bf16.mxu0 %vm1197_vm0, %v1094_v5  ;;  %v1126_v16 = vpack.c.bf16 %v1031_v14, %v1030_v13  ;;  %s11760_s29 = scalar_lea.sflag [#allocation6], %s16492_s25 }
  0x72   : > { %13482 = vmatprep.subr.bf16.mxu0 %v14230_v0  ;;  %14162 = vmatprep.subr.bf16.mxu1 %v14230_v0  ;;  %v14233_v6 = vld [vmem:[%s21451_s2] sm:$0xff]   ;;  %v1032_v17 = vld [vmem:[%s16501_s15 + $0x210] sm:$0xff]  ;;  %v1033_v18 = vld [vmem:[%s16501_s15 + $0x218] sm:$0xff] }
  0x73   : > { %13483 = vmatpush3.bf16.msra.mxu0 %v14230_v0  ;;  %14166 = vmatpush3.bf16.msra.mxu1 %v14230_v0  ;;  %v973_v19 = vld [vmem:[%s16501_s15 + $0x38] sm:$0xff]  ;;  %v974_v20 = vld [vmem:[%s16501_s15 + $0x40] sm:$0xff]  ;;  %v1127_v21 = vpack.c.bf16 %v1033_v18, %v1032_v17  ;;  %v975_v24 = vld [vmem:[%s16501_s15 + $0x48] sm:$0xff] }
  0x74   : > { %13484 = vmatprep.subr.bf16.mxu0 %v14231_v1  ;;  %14163 = vmatprep.subr.bf16.mxu1 %v14231_v1  ;;  %v1034_v25 = vld [vmem:[%s16501_s15 + $0x220] sm:$0xff]  ;;  %v1035_v26 = vld [vmem:[%s16501_s15 + $0x228] sm:$0xff]  ;;  %v1036_v28 = vld [vmem:[%s16501_s15 + $0x230] sm:$0xff]  ;;  %v1097_v30 = vpack.c.bf16 %v973_v19, %v972_v15  ;;  %v1098_v32 = vpack.c.bf16 %v975_v24, %v974_v20 }
  0x75   : > { %13554 = vmatprep.mubr.msk.bf16.mxu1 %vm1197_vm0, %v1126_v16  ;;  %v1128_v27 = vpack.c.bf16 %v1035_v26, %v1034_v25  ;;  %v1037_v29 = vld [vmem:[%s16501_s15 + $0x238] sm:$0xff]  ;;  %v1038_v31 = vld [vmem:[%s16501_s15 + $0x240] sm:$0xff]  ;;  %v1039_v33 = vld [vmem:[%s16501_s15 + $0x248] sm:$0xff] }
  0x76   : > { %v1129_v34 = vpack.c.bf16 %v1037_v29, %v1036_v28  ;;  %v1130_v35 = vpack.c.bf16 %v1039_v33, %v1038_v31  ;;  %v976_v38 = vld [vmem:[%s16501_s15 + $0x50] sm:$0xff]  ;;  %v977_v39 = vld [vmem:[%s16501_s15 + $0x58] sm:$0xff]  ;;  %v978_v40 = vld [vmem:[%s16501_s15 + $0x60] sm:$0xff] }
  0x77   : > { %13485 = vmatpush3.bf16.msra.mxu0 %v14231_v1  ;;  %14167 = vmatpush3.bf16.msra.mxu1 %v14231_v1  ;;  %v979_v41 = vld [vmem:[%s16501_s15 + $0x68] sm:$0xff]  ;;  %v1040_v42 = vld [vmem:[%s16501_s15 + $0x250] sm:$0xff]  ;;  %v1041_v43 = vld [vmem:[%s16501_s15 + $0x258] sm:$0xff]  ;;  %v1099_v44 = vpack.c.bf16 %v977_v39, %v976_v38 }
  0x78   : > { %13486 = vmatprep.subr.bf16.mxu0 %v14232_v2  ;;  %14164 = vmatprep.subr.bf16.mxu1 %v14232_v2  ;;  %v1042_v45 = vld [vmem:[%s16501_s15 + $0x260] sm:$0xff]  ;;  %v1043_v46 = vld [vmem:[%s16501_s15 + $0x268] sm:$0xff]  ;;  %v1100_v47 = vpack.c.bf16 %v979_v41, %v978_v40  ;;  %v1131_v48 = vpack.c.bf16 %v1041_v43, %v1040_v42  ;;  %v980_v52 = vld [vmem:[%s16501_s15 + $0x70] sm:$0xff] }
  0x79   : > { %v1132_v49 = vpack.c.bf16 %v1043_v46, %v1042_v45  ;;  %v14242_v51 = vld [vmem:[%s21370_s4 + $0x7c] ss:$12 sps:$4 sm:$0xff]   ;;  %v982_v54 = vld [vmem:[%s16501_s15 + $0x80] sm:$0xff]  ;;  %v1044_v56 = vld [vmem:[%s16501_s15 + $0x270] sm:$0xff] }
  0x7a   : > { %v981_v53 = vld [vmem:[%s16501_s15 + $0x78] sm:$0xff]  ;;  %v983_v55 = vld [vmem:[%s16501_s15 + $0x88] sm:$0xff]  ;;  %v1046_v59 = vld [vmem:[%s16501_s15 + $0x280] sm:$0xff] }
  0x7b   : > { %13487 = vmatpush3.bf16.msra.mxu0 %v14232_v2  ;;  %14168 = vmatpush3.bf16.msra.mxu1 %v14232_v2  ;;  %v1045_v57 = vld [vmem:[%s16501_s15 + $0x278] sm:$0xff]  ;;  %v1101_v58 = vpack.c.bf16 %v981_v53, %v980_v52  ;;  %v1047_v60 = vld [vmem:[%s16501_s15 + $0x288] sm:$0xff]  ;;  %v1102_v61 = vpack.c.bf16 %v983_v55, %v982_v54  ;;  %v14245_v63 = vld [vmem:[%s21370_s4 + $0x64] ss:$12 sps:$4 sm:$0xff]  }
  0x7c   : > { %13488 = vmatprep.subr.bf16.mxu0 %v14233_v6  ;;  %14165 = vmatprep.subr.bf16.mxu1 %v14233_v6  ;;  %v14243_v62 = vld [vmem:[%s21370_s4 + $0x60] ss:$12 sps:$4 sm:$0xff]   ;;  %v1133_v0 = vpack.c.bf16 %v1045_v57, %v1044_v56  ;;  %v1134_v1 = vpack.c.bf16 %v1047_v60, %v1046_v59  ;;  %v984_v2 = vld [vmem:[%s16501_s15 + $0x90] sm:$0xff]  ;;  %v985_v3 = vld [vmem:[%s16501_s15 + $0x98] sm:$0xff] }
  0x7d   : > { %v14246_v4 = vld [vmem:[%s21370_s4 + $0x48] ss:$12 sps:$4 sm:$0xff]   ;;  %v14248_v5 = vld [vmem:[%s21370_s4 + $0x4c] ss:$12 sps:$4 sm:$0xff]   ;;  %v1103_v10 = vpack.c.bf16 %v985_v3, %v984_v2  ;;  %v14249_v14 = vld [vmem:[%s21370_s4 + $0x30] ss:$12 sps:$4 sm:$0xff]  }
  0x7e   : > { %v987_v7 = vld [vmem:[%s16501_s15 + $0xa8] sm:$0xff]  ;;  %v1048_v8 = vld [vmem:[%s16501_s15 + $0x290] sm:$0xff]  ;;  %v1049_v9 = vld [vmem:[%s16501_s15 + $0x298] sm:$0xff] }
  0x7f   : > { %13489 = vmatpush3.bf16.msra.mxu0 %v14233_v6  ;;  %14169 = vmatpush3.bf16.msra.mxu1 %v14233_v6  ;;  %v986_v6 = vld [vmem:[%s16501_s15 + $0xa0] sm:$0xff]  ;;  %v1135_v16 = vpack.c.bf16 %v1049_v9, %v1048_v8  ;;  %v988_v17 = vld [vmem:[%s16501_s15 + $0xb0] sm:$0xff]  ;;  %v989_v18 = vld [vmem:[%s16501_s15 + $0xb8] sm:$0xff] }
  0x80   : > { %2304 = vmatprep.subr.bf16.mxu1 %v14236_v23  ;;  %v1104_v13 = vpack.c.bf16 %v987_v7, %v986_v6  ;;  %v14251_v15 = vld [vmem:[%s21370_s4 + $0x34] ss:$12 sps:$4 sm:$0xff]   ;;  %v14254_v23 = vld [vmem:[%s21370_s4 + $0x1c] ss:$12 sps:$4 sm:$0xff]   ;;  %v1105_v28 = vpack.c.bf16 %v989_v18, %v988_v17  ;;  %v14256_v31 = vld [vmem:[%s21370_s4 + $0x98] ss:$12 sps:$4 sm:$0xff]  }
  0x81   : > { %v990_v20 = vld [vmem:[%s16501_s15 + $0xc0] sm:$0xff]  ;;  %v1052_v24 = vld [vmem:[%s16501_s15 + $0x2b0] sm:$0xff]  ;;  %v1053_v25 = vld [vmem:[%s16501_s15 + $0x2b8] sm:$0xff] }
  0x82   : > { %13491 = vmatmul.mubr.msk.bf16.vlgmr.msra.gmra.mxu0 %vm1197_vm0, %v1095_v11  ;;  %13555 = vmatmul.mubr.msk.bf16.vlgmr.msra.gmra.mxu1 %vm1197_vm0, %v1127_v21  ;;  %v1050_v11 = vld [vmem:[%s16501_s15 + $0x2a0] sm:$0xff]  ;;  %v991_v21 = vld [vmem:[%s16501_s15 + $0xc8] sm:$0xff]  ;;  %v992_v33 = vld [vmem:[%s16501_s15 + $0xd0] sm:$0xff] }
  0x83   : > { %13494 = vmatprep.mubr.msk.bf16.mxu0 %vm1197_vm0, %v1096_v12  ;;  %2305 = vmatpush1.bf16.msra.mxu1 %v14234_v22  ;;  %v1051_v12 = vld [vmem:[%s16501_s15 + $0x2a8] sm:$0xff]  ;;  %v14252_v22 = vld [vmem:[%s21370_s4 + $0x18] ss:$12 sps:$4 sm:$0xff]   ;;  %v1056_v41 = vld [vmem:[%s16501_s15 + $0x2d0] sm:$0xff] }
  0x84   : > { %13558 = vmatprep.mubr.msk.bf16.mxu1 %vm1197_vm0, %v1128_v27  ;;  %2306 = vmatprep.subr.bf16.mxu1 %v14239_v37  ;;  %v1136_v19 = vpack.c.bf16 %v1051_v12, %v1050_v11  ;;  %v1054_v26 = vld [vmem:[%s16501_s15 + $0x2c0] sm:$0xff]  ;;  %v14255_v27 = vld [vmem:[%s21370_s4 + $0xb0] ss:$12 sps:$4 sm:$0xff]   ;;  %v1055_v29 = vld [vmem:[%s16501_s15 + $0x2c8] sm:$0xff] }
  0x85   : > { %13618 = vmatprep.subr.bf16.mxu0 %v14255_v27  ;;  %v994_v37 = vld [vmem:[%s16501_s15 + $0xe0] sm:$0xff]  ;;  %v995_v38 = vld [vmem:[%s16501_s15 + $0xe8] sm:$0xff]  ;;  %v1057_v42 = vld [vmem:[%s16501_s15 + $0x2d8] sm:$0xff] }
  0x86   : > { %13619 = vmatpush3.bf16.msra.mxu0 %v14255_v27  ;;  %v14259_v39 = vld [vmem:[%s21370_s4] ss:$12 sps:$4 sm:$0xff]   ;;  %v14261_v40 = vld [vmem:[%s21370_s4 + $0x4] ss:$12 sps:$4 sm:$0xff]   ;;  %v1061_v56 = vld [vmem:[%s16501_s15 + $0x2f8] sm:$0xff] }
  0x87   : > { %2307 = vmatpush1.bf16.msra.mxu1 %v14237_v36  ;;  %13620 = vmatprep.subr.bf16.mxu0 %v14256_v31  ;;  %v14257_v36 = vld [vmem:[%s21370_s4 + $0x80] ss:$12 sps:$4 sm:$0xff]   ;;  %v1060_v55 = vld [vmem:[%s16501_s15 + $0x2f0] sm:$0xff]  ;;  %v1005_v11 = vld [vmem:[%s16501_s15 + $0x138] sm:$0xff] }
  0x88   : > { %2308 = vmatprep.subr.bf16.mxu1 %v14242_v51  ;;  %v1058_v43 = vld [vmem:[%s16501_s15 + $0x2e0] sm:$0xff]  ;;  %v1059_v46 = vld [vmem:[%s16501_s15 + $0x2e8] sm:$0xff]  ;;  %v997_v51 = vld [vmem:[%s16501_s15 + $0xf8] sm:$0xff] }
  0x89   : > { %v1140_v52 = vpack.c.bf16 %v1059_v46, %v1058_v43  ;;  %v998_v53 = vld [vmem:[%s16501_s15 + $0x100] sm:$0xff]  ;;  %v999_v54 = vld [vmem:[%s16501_s15 + $0x108] sm:$0xff]  ;;  %v1064_v3 = vld [vmem:[%s16501_s15 + $0x310] sm:$0xff] }
  0x8a   : > { %13495 = vmatmul.mubr.msk.bf16.gmra.mxu0 %vm1197_vm0, %v1097_v30  ;;  %13559 = vmatmul.mubr.msk.bf16.gmra.mxu1 %vm1197_vm0, %v1129_v34  ;;  %v1106_v30 = vpack.c.bf16 %v991_v21, %v990_v20  ;;  %v993_v34 = vld [vmem:[%s16501_s15 + $0xd8] sm:$0xff]  ;;  %v1062_v57 = vld [vmem:[%s16501_s15 + $0x300] sm:$0xff]  ;;  %v1110_v60 = vpack.c.bf16 %v999_v54, %v998_v53  ;;  %v1003_v2 = vld [vmem:[%s16501_s15 + $0x128] sm:$0xff] }
  0x8b   : > { %13498 = vmatprep.mubr.msk.bf16.mxu0 %vm1197_vm0, %v1098_v32  ;;  %13562 = vmatprep.mubr.msk.bf16.mxu1 %vm1197_vm0, %v1130_v35  ;;  %v1137_v32 = vpack.c.bf16 %v1053_v25, %v1052_v24  ;;  %v1138_v35 = vpack.c.bf16 %v1055_v29, %v1054_v26  ;;  %v1107_v45 = vpack.c.bf16 %v993_v34, %v992_v33  ;;  %v1067_v6 = vld [vmem:[%s16501_s15 + $0x328] sm:$0xff]  ;;  %v1069_v17 = vld [vmem:[%s16501_s15 + $0x338] sm:$0xff]  ;;  %v1070_v18 = vld [vmem:[%s16501_s15 + $0x340] sm:$0xff] }
  0x8c   : > { %2309 = vmatpush1.bf16.msra.mxu1 %v14240_v50  ;;  %13621 = vmatpush3.bf16.msra.mxu0 %v14256_v31  ;;  %v996_v50 = vld [vmem:[%s16501_s15 + $0xf0] sm:$0xff]  ;;  %v14264_v21 = vld [vmem:[%s21370_s4 + $0x20] ss:$12 sps:$4 sm:$0xff]   ;;  %v1009_v25 = vld [vmem:[%s16501_s15 + $0x158] sm:$0xff] }
  0x8d   : > { %2310 = vmatprep.subr.bf16.mxu1 %v14245_v63  ;;  %13622 = vmatprep.subr.bf16.mxu0 %v14257_v36  ;;  %v1109_v59 = vpack.c.bf16 %v997_v51, %v996_v50  ;;  %v1001_v63 = vld [vmem:[%s16501_s15 + $0x118] sm:$0xff]  ;;  %v1008_v24 = vld [vmem:[%s16501_s15 + $0x150] sm:$0xff]  ;;  %v1010_v27 = vld [vmem:[%s16501_s15 + $0x160] sm:$0xff] }
  0x8e   : > { %v14265_v29 = vld [vmem:[%s21370_s4 + $0x8] ss:$12 sps:$4 sm:$0xff]   ;;  %v1073_v31 = vld [vmem:[%s16501_s15 + $0x358] sm:$0xff]  ;;  %v1115_v34 = vpack.c.bf16 %v1009_v25, %v1008_v24  ;;  %v1018_v53 = vld [vmem:[%s16501_s15 + $0x1a0] sm:$0xff] }
  0x8f   : > { %v1075_v33 = vld [vmem:[%s16501_s15 + $0x368] sm:$0xff]  ;;  %v1077_v43 = vld [vmem:[%s16501_s15 + $0x378] sm:$0xff]  ;;  %v1016_v50 = vld [vmem:[%s16501_s15 + $0x190] sm:$0xff] }
  0x90   : > { %2311 = vmatpush1.bf16.msra.mxu1 %v14243_v62  ;;  %13623 = vmatpush3.bf16.msra.mxu0 %v14257_v36  ;;  %v1000_v62 = vld [vmem:[%s16501_s15 + $0x110] sm:$0xff]  ;;  %v1079_v46 = vld [vmem:[%s16501_s15 + $0x388] sm:$0xff]  ;;  %v1017_v51 = vld [vmem:[%s16501_s15 + $0x198] sm:$0xff] }
  0x91   : > { %2312 = vmatprep.subr.bf16.mxu1 %v14248_v5  ;;  %v1066_v5 = vld [vmem:[%s16501_s15 + $0x320] sm:$0xff]  ;;  %v1111_v7 = vpack.c.bf16 %v1001_v63, %v1000_v62  ;;  %v1019_v54 = vld [vmem:[%s16501_s15 + $0x1a8] sm:$0xff]  ;;  %v1020_v62 = vld [vmem:[%s16501_s15 + $0x1b0] sm:$0xff] }
  0x92   : > { %13499 = vmatmul.mubr.msk.bf16.gmra.mxu0 %vm1197_vm0, %v1099_v44  ;;  %13563 = vmatmul.mubr.msk.bf16.gmra.mxu1 %vm1197_vm0, %v1131_v48  ;;  %v14258_v44 = vld [vmem:[%s21370_s4 + $0x68] ss:$12 sps:$4 sm:$0xff]   ;;  %v14262_v48 = vld [vmem:[%s21370_s4 + $0x50] ss:$12 sps:$4 sm:$0xff]   ;;  %v1144_v12 = vpack.c.bf16 %v1067_v6, %v1066_v5  ;;  %v1086_v5 = vld [vmem:[%s16501_s15 + $0x3c0] sm:$0xff] }
  0x93   : > { %13502 = vmatprep.mubr.msk.bf16.mxu0 %vm1197_vm0, %v1100_v47  ;;  %13566 = vmatprep.mubr.msk.bf16.mxu1 %vm1197_vm0, %v1132_v49  ;;  %v1108_v47 = vpack.c.bf16 %v995_v38, %v994_v37  ;;  %v1139_v49 = vpack.c.bf16 %v1057_v42, %v1056_v41  ;;  %v1012_v37 = vld [vmem:[%s16501_s15 + $0x170] sm:$0xff]  ;;  %v1013_v38 = vld [vmem:[%s16501_s15 + $0x178] sm:$0xff]  ;;  %v1015_v41 = vld [vmem:[%s16501_s15 + $0x188] sm:$0xff] }
  0x94   : > { %2313 = vmatpush1.bf16.msra.mxu1 %v14246_v4  ;;  %13624 = vmatprep.subr.bf16.mxu0 %v14258_v44  ;;  %v1065_v4 = vld [vmem:[%s16501_s15 + $0x318] sm:$0xff]  ;;  %v1076_v42 = vld [vmem:[%s16501_s15 + $0x370] sm:$0xff]  ;;  %v1087_v6 = vld [vmem:[%s16501_s15 + $0x3c8] sm:$0xff] }
  0x95   : > { %2314 = vmatprep.subr.bf16.mxu1 %v14251_v15  ;;  %13625 = vmatpush3.bf16.msra.mxu0 %v14258_v44  ;;  %v1143_v9 = vpack.c.bf16 %v1065_v4, %v1064_v3  ;;  %v14263_v15 = vld [vmem:[%s21370_s4 + $0x38] ss:$12 sps:$4 sm:$0xff]   ;;  %v16723_v44 = vld [vmem:[%s21371_s5 + $0xb0] ss:$12 sps:$4 sm:$0xff]  }
  0x96   : > { %13626 = vmatprep.subr.bf16.mxu0 %v14262_v48  ;;  %v1021_v63 = vld [vmem:[%s16501_s15 + $0x1b8] sm:$0xff]  ;;  %v1084_v3 = vld [vmem:[%s16501_s15 + $0x3b0] sm:$0xff] }
  0x97   : > { %v1085_v4 = vld [vmem:[%s16501_s15 + $0x3b8] sm:$0xff]  ;;  %v1092_v25 = vld [vmem:[%s16501_s15 + $0x3f0] sm:$0xff] }
  0x98   : > { %2315 = vmatpush1.bf16.msra.mxu1 %v14249_v14  ;;  %v1007_v14 = vld [vmem:[%s16501_s15 + $0x148] sm:$0xff] }
  0x99   : > { %2316 = vmatprep.subr.bf16.mxu1 %v14254_v23  ;;  %13627 = vmatpush3.bf16.msra.mxu0 %v14262_v48 }
  0x9a   : > { %13503 = vmatmul.mubr.msk.bf16.gmra.mxu0 %vm1197_vm0, %v1101_v58  ;;  %13567 = vmatmul.mubr.msk.bf16.gmra.mxu1 %vm1197_vm0, %v1133_v0  ;;  %v1063_v58 = vld [vmem:[%s16501_s15 + $0x308] sm:$0xff] }
  0x9b   : > { %13506 = vmatprep.mubr.msk.bf16.mxu0 %vm1197_vm0, %v1102_v61  ;;  %13570 = vmatprep.mubr.msk.bf16.mxu1 %vm1197_vm0, %v1134_v1  ;;  %v1141_v61 = vpack.c.bf16 %v1061_v56, %v1060_v55  ;;  %v1142_v0 = vpack.c.bf16 %v1063_v58, %v1062_v57  ;;  %v1002_v1 = vld [vmem:[%s16501_s15 + $0x120] sm:$0xff]  ;;  %v1080_v55 = vld [vmem:[%s16501_s15 + $0x390] sm:$0xff]  ;;  %v1081_v56 = vld [vmem:[%s16501_s15 + $0x398] sm:$0xff] }
  0x9c   : > { %2317 = vmatpush1.bf16.msra.mxu1 %v14252_v22  ;;  %v1112_v8 = vpack.c.bf16 %v1003_v2, %v1002_v1  ;;  %13628 = vmatprep.subr.bf16.mxu0 %v14263_v15  ;;  %v1082_v57 = vld [vmem:[%s16501_s15 + $0x3a0] sm:$0xff]  ;;  %v1083_v58 = vld [vmem:[%s16501_s15 + $0x3a8] sm:$0xff] }
  0x9d   : > { %2318 = vmatprep.subr.bf16.mxu1 %v14261_v40  ;;  %13629 = vmatpush3.bf16.msra.mxu0 %v14263_v15  ;;  %v1014_v40 = vld [vmem:[%s16501_s15 + $0x180] sm:$0xff]  ;;  %v1023_v2 = vld [vmem:[%s16501_s15 + $0x1c8] sm:$0xff]  ;;  %v1088_v15 = vld [vmem:[%s16501_s15 + $0x3d0] sm:$0xff] }
  0x9e   : > { %13630 = vmatprep.subr.bf16.mxu0 %v14264_v21  ;;  %v1118_v48 = vpack.c.bf16 %v1015_v41, %v1014_v40  ;;  %v1022_v1 = vld [vmem:[%s16501_s15 + $0x1c0] sm:$0xff] }
  0xa0   : > { %2319 = vmatpush1.bf16.msra.mxu1 %v14259_v39 }
  0xa1   : > { %13631 = vmatpush3.bf16.msra.mxu0 %v14264_v21  ;;  %13762 = vmatprep.subr.bf16.mxu1 %v16723_v44 }
  0xa2   : > { %13507 = vmatmul.mubr.msk.bf16.gmra.mxu0 %vm1197_vm0, %v1103_v10  ;;  %13571 = vmatmul.mubr.msk.bf16.gmra.mxu1 %vm1197_vm0, %v1135_v16  ;;  %v1004_v10 = vld [vmem:[%s16501_s15 + $0x130] sm:$0xff] }
  0xa3   : > { %13510 = vmatprep.mubr.msk.bf16.mxu0 %vm1197_vm0, %v1104_v13  ;;  %13574 = vmatprep.mubr.msk.bf16.mxu1 %vm1197_vm0, %v1136_v19  ;;  %v1006_v13 = vld [vmem:[%s16501_s15 + $0x140] sm:$0xff]  ;;  %v1068_v16 = vld [vmem:[%s16501_s15 + $0x330] sm:$0xff]  ;;  %v1071_v19 = vld [vmem:[%s16501_s15 + $0x348] sm:$0xff]  ;;  %v1113_v20 = vpack.c.bf16 %v1005_v11, %v1004_v10 }
  0xa4   : > { %v1114_v22 = vpack.c.bf16 %v1007_v14, %v1006_v13  ;;  %v1145_v23 = vpack.c.bf16 %v1069_v17, %v1068_v16  ;;  %v1146_v26 = vpack.c.bf16 %v1071_v19, %v1070_v18  ;;  %13632 = vmatprep.subr.bf16.mxu0 %v14265_v29  ;;  %v1024_v10 = vld [vmem:[%s16501_s15 + $0x1d0] sm:$0xff]  ;;  %v1025_v11 = vld [vmem:[%s16501_s15 + $0x1d8] sm:$0xff]  ;;  %v1026_v13 = vld [vmem:[%s16501_s15 + $0x1e0] sm:$0xff] }
  0xa5   : > { %13633 = vmatpush3.bf16.msra.mxu0 %v14265_v29  ;;  %v1027_v14 = vld [vmem:[%s16501_s15 + $0x1e8] sm:$0xff]  ;;  %v1089_v16 = vld [vmem:[%s16501_s15 + $0x3d8] sm:$0xff]  ;;  %v1090_v17 = vld [vmem:[%s16501_s15 + $0x3e0] sm:$0xff]  ;;  %v1123_v19 = vpack.c.bf16 %v1025_v11, %v1024_v10  ;;  %v21378_v29 = vmov 0  }
  0xa6   : > { %v1091_v18 = vld [vmem:[%s16501_s15 + $0x3e8] sm:$0xff]  ;;  %v1155_v21 = vpack.c.bf16 %v1089_v16, %v1088_v15 }
  0xa7   : > { %v1156_v24 = vpack.c.bf16 %v1091_v18, %v1090_v17 }
  0xaa   : > { %13511 = vmatmul.mubr.msk.bf16.gmra.mxu0 %vm1197_vm0, %v1105_v28  ;;  %13575 = vmatmul.mubr.msk.bf16.gmra.mxu1 %vm1197_vm0, %v1137_v32  ;;  %v1011_v28 = vld [vmem:[%s16501_s15 + $0x168] sm:$0xff]  ;;  %v1074_v32 = vld [vmem:[%s16501_s15 + $0x360] sm:$0xff] }
  0xab   : > { %13514 = vmatprep.mubr.msk.bf16.mxu0 %vm1197_vm0, %v1106_v30  ;;  %13578 = vmatprep.mubr.msk.bf16.mxu1 %vm1197_vm0, %v1138_v35  ;;  %v1072_v30 = vld [vmem:[%s16501_s15 + $0x350] sm:$0xff]  ;;  %v1116_v35 = vpack.c.bf16 %v1011_v28, %v1010_v27  ;;  %v1148_v39 = vpack.c.bf16 %v1075_v33, %v1074_v32  ;;  %v16782_v33 = vld [vmem:[%s21452_s3] ss:$0 sm:$0xff] }
  0xac   : > { %v1147_v36 = vpack.c.bf16 %v1073_v31, %v1072_v30 }
  0xb2   : > { %13515 = vmatmul.mubr.msk.bf16.gmra.mxu0 %vm1197_vm0, %v1107_v45  ;;  %13579 = vmatmul.mubr.msk.bf16.gmra.mxu1 %vm1197_vm0, %v1139_v49  ;;  %v1078_v45 = vld [vmem:[%s16501_s15 + $0x380] sm:$0xff]  ;;  %v1149_v49 = vpack.c.bf16 %v1077_v43, %v1076_v42 }
  0xb3   : > { %13518 = vmatprep.mubr.msk.bf16.mxu0 %vm1197_vm0, %v1108_v47  ;;  %13582 = vmatprep.mubr.msk.bf16.mxu1 %vm1197_vm0, %v1140_v52  ;;  %v1117_v47 = vpack.c.bf16 %v1013_v38, %v1012_v37  ;;  %v1150_v52 = vpack.c.bf16 %v1079_v46, %v1078_v45 }
  0xba   : > { %13519 = vmatmul.mubr.msk.bf16.gmra.mxu0 %vm1197_vm0, %v1109_v59  ;;  %13583 = vmatmul.mubr.msk.bf16.gmra.mxu1 %vm1197_vm0, %v1141_v61  ;;  %v1119_v59 = vpack.c.bf16 %v1017_v51, %v1016_v50  ;;  %v1151_v61 = vpack.c.bf16 %v1081_v56, %v1080_v55 }
  0xbb   : > { %13522 = vmatprep.mubr.msk.bf16.mxu0 %vm1197_vm0, %v1110_v60  ;;  %13586 = vmatprep.mubr.msk.bf16.mxu1 %vm1197_vm0, %v1142_v0  ;;  %v1120_v60 = vpack.c.bf16 %v1019_v54, %v1018_v53  ;;  %v1152_v0 = vpack.c.bf16 %v1083_v58, %v1082_v57  ;;  %v14267_v54 = vld [vmem:[%s21371_s5 + $0x98] ss:$12 sps:$4 sm:$0xff]  }
  0xc2   : > { %13523 = vmatmul.mubr.msk.bf16.gmra.mxu0 %vm1197_vm0, %v1111_v7  ;;  %13587 = vmatmul.mubr.msk.bf16.gmra.mxu1 %vm1197_vm0, %v1143_v9  ;;  %v1121_v7 = vpack.c.bf16 %v1021_v63, %v1020_v62  ;;  %v1153_v9 = vpack.c.bf16 %v1085_v4, %v1084_v3 }
  0xc3   : > { %13526 = vmatprep.mubr.msk.bf16.mxu0 %vm1197_vm0, %v1112_v8  ;;  %13590 = vmatprep.mubr.msk.bf16.mxu1 %vm1197_vm0, %v1144_v12  ;;  %v1122_v8 = vpack.c.bf16 %v1023_v2, %v1022_v1  ;;  %v1154_v12 = vpack.c.bf16 %v1087_v6, %v1086_v5  ;;  %v14268_v1 = vld [vmem:[%s21371_s5 + $0x80] ss:$12 sps:$4 sm:$0xff]  }
  0xca   : > { %13527 = vmatmul.mubr.msk.bf16.gmra.mxu0 %vm1197_vm0, %v1113_v20  ;;  %13591 = vmatmul.mubr.msk.bf16.gmra.mxu1 %vm1197_vm0, %v1145_v23  ;;  %v1124_v20 = vpack.c.bf16 %v1027_v14, %v1026_v13  ;;  %v1029_v23 = vld [vmem:[%s16501_s15 + $0x1f8] sm:$0xff] }
  0xcb   : > { %13530 = vmatprep.mubr.msk.bf16.mxu0 %vm1197_vm0, %v1114_v22  ;;  %13594 = vmatprep.mubr.msk.bf16.mxu1 %vm1197_vm0, %v1146_v26  ;;  %v1028_v22 = vld [vmem:[%s16501_s15 + $0x1f0] sm:$0xff]  ;;  %v1093_v26 = vld [vmem:[%s16501_s15 + $0x3f8] sm:$0xff]  ;;  %s11940_s15 = sshll.u32 %s22319_s12, 3  ;;  %s20893_s12 = scalar_lea.vmem [#allocation7], %s11938_s0 }
  0xcc   : > { %v1125_v27 = vpack.c.bf16 %v1029_v23, %v1028_v22  ;;  %v1157_v28 = vpack.c.bf16 %v1093_v26, %v1092_v25  ;;  %s17520_s16 = scalar_lea.vmem %s21518_s1, %s11940_s15 }
  0xd2   : > { %13531 = vmatmul.mubr.msk.bf16.gmra.mxu0 %vm1197_vm0, %v1115_v34  ;;  %13595 = vmatmul.mubr.msk.bf16.gmra.mxu1 %vm1197_vm0, %v1147_v36 }
  0xd3   : > { %13534 = vmatprep.mubr.msk.bf16.mxu0 %vm1197_vm0, %v1116_v35  ;;  %13598 = vmatprep.mubr.msk.bf16.mxu1 %vm1197_vm0, %v1148_v39 }
  0xda   : > { %13535 = vmatmul.mubr.msk.bf16.gmra.mxu0 %vm1197_vm0, %v1117_v47  ;;  %13599 = vmatmul.mubr.msk.bf16.gmra.mxu1 %vm1197_vm0, %v1149_v49 }
  0xdb   : > { %13538 = vmatprep.mubr.msk.bf16.mxu0 %vm1197_vm0, %v1118_v48  ;;  %13602 = vmatprep.mubr.msk.bf16.mxu1 %vm1197_vm0, %v1150_v52 }
  0xe2   : > { %13539 = vmatmul.mubr.msk.bf16.gmra.mxu0 %vm1197_vm0, %v1119_v59  ;;  %13603 = vmatmul.mubr.msk.bf16.gmra.mxu1 %vm1197_vm0, %v1151_v61 }
  0xe3   : > { %13542 = vmatprep.mubr.msk.bf16.mxu0 %vm1197_vm0, %v1120_v60  ;;  %13606 = vmatprep.mubr.msk.bf16.mxu1 %vm1197_vm0, %v1152_v0 }
  0xea   : > { %13543 = vmatmul.mubr.msk.bf16.gmra.mxu0 %vm1197_vm0, %v1121_v7  ;;  %13607 = vmatmul.mubr.msk.bf16.gmra.mxu1 %vm1197_vm0, %v1153_v9 }
  0xeb   : > { %13546 = vmatprep.mubr.msk.bf16.mxu0 %vm1197_vm0, %v1122_v8  ;;  %13610 = vmatprep.mubr.msk.bf16.mxu1 %vm1197_vm0, %v1154_v12 }
  0xf2   : > { %13547 = vmatmul.mubr.msk.bf16.gmra.mxu0 %vm1197_vm0, %v1123_v19  ;;  %13611 = vmatmul.mubr.msk.bf16.gmra.mxu1 %vm1197_vm0, %v1155_v21 }
  0xf3   : > { %13550 = vmatprep.mubr.msk.bf16.mxu0 %vm1197_vm0, %v1124_v20  ;;  %13614 = vmatprep.mubr.msk.bf16.mxu1 %vm1197_vm0, %v1156_v24 }
  0xfa   : > { %13551 = vmatmul.mubr.msk.bf16.gmra.mxu0 %vm1197_vm0, %v1125_v27  ;;  %13615 = vmatmul.mubr.msk.bf16.gmra.mxu1 %vm1197_vm0, %v1157_v28 }
  0xfb   : > { %2336 = vmatprep.mubr.bf16.mxu1 %v21378_v29 }
 0x142   : > { %v13492_v30 = vpop.f32.mrf.mxu0  ;;  %v16777_v32 = vpop.f32.mrf.mxu1 }
 0x143   : > { %v1433_v38 = vadd.f32 %v13492_v30, %v16782_v33 }
 0x144   : > { %v1424_v31 = vpop.f32.mrf.mxu0  ;;  %v16784_v35 = vpop.f32.mrf.mxu1 }
 0x145   : > { %v1425_v36 = vadd.f32 %v16782_v33, %v1424_v31  ;;  %v1937_v48 = vmax.f32 %v1433_v38, 0.0 }
 0x146   : > { %v13493_v34 = vpop.f32.mrf.mxu0  ;;  %v16789_v40 = vpop.f32.mrf.mxu1 }
 0x147   : > { %v1436_v37 = vadd.f32 %v13493_v34, %v16782_v33  ;;  %v1935_v46 = vmax.f32 %v1425_v36, 0.0 }
 0x148   : > { %v1427_v39 = vpop.f32.mrf.mxu0  ;;  %v16792_v45 = vpop.f32.mrf.mxu1 }
 0x149   : > { %v1428_v41 = vadd.f32 %v16782_v33, %v1427_v39  ;;  %v1938_v42 = vmax.f32 %v1436_v37, 0.0 }
 0x14a   : > { %v13496_v43 = vpop.f32.mrf.mxu0  ;;  %v16795_v51 = vpop.f32.mrf.mxu1 }
 0x14b   : > { %v1936_v47 = vmax.f32 %v1428_v41, 0.0  ;;  %v1449_v49 = vadd.f32 %v13496_v43, %v16782_v33  ;;  %v2064_v55 = vpack.c.bf16 %v1938_v42, %v1937_v48 }
 0x14c   : > { %v1440_v50 = vpop.f32.mrf.mxu0  ;;  %v16801_v57 = vpop.f32.mrf.mxu1 }
 0x14d   : > { %v2063_v52 = vpack.c.bf16 %v1936_v47, %v1935_v46  ;;  %v1441_v53 = vadd.f32 %v16782_v33, %v1440_v50  ;;  %v1941_v59 = vmax.f32 %v1449_v49, 0.0 }
 0x14e   : > { %v13497_v56 = vpop.f32.mrf.mxu0  ;;  %v16805_v61 = vpop.f32.mrf.mxu1 }
 0x14f   : > { %v1452_v58 = vadd.f32 %v13497_v56, %v16782_v33  ;;  %2337 = vmatmul.mubr.bf16.vlgmr.msra.gmra.mxu1 %v2063_v52  ;;  %13634 = vmatprep.mubr.bf16.mxu0 %v2063_v52  ;;  %v1939_v62 = vmax.f32 %v1441_v53, 0.0 }
 0x150   : > { %13763 = vmatpush3.bf16.msra.mxu1 %v16723_v44  ;;  %v1443_v60 = vpop.f32.mrf.mxu0  ;;  %13635 = vmatmul.mubr.bf16.vlgmr.msra.gmra.mxu0 %v2064_v55  ;;  %v16812_v3 = vpop.f32.mrf.mxu1 }
 0x151   : > { %v1942_v63 = vmax.f32 %v1452_v58, 0.0  ;;  %v1444_v0 = vadd.f32 %v16782_v33, %v1443_v60  ;;  %2346 = vmatprep.mubr.bf16.mxu1 %v21378_v29  ;;  %13764 = vmatprep.subr.bf16.mxu1 %v14267_v54 }
 0x152   : > { %v13500_v2 = vpop.f32.mrf.mxu0  ;;  %v16815_v7 = vpop.f32.mrf.mxu1 }
 0x153   : > { %v1940_v4 = vmax.f32 %v1444_v0, 0.0  ;;  %v2066_v44 = vpack.c.bf16 %v1942_v63, %v1941_v59  ;;  %v1465_v5 = vadd.f32 %v13500_v2, %v16782_v33 }
 0x154   : > { %v1456_v6 = vpop.f32.mrf.mxu0  ;;  %13765 = vmatpush3.bf16.msra.mxu1 %v14267_v54  ;;  %v16818_v11 = vpop.f32.mrf.mxu1 }
 0x155   : > { %v1457_v8 = vadd.f32 %v16782_v33, %v1456_v6  ;;  %v2065_v9 = vpack.c.bf16 %v1940_v4, %v1939_v62  ;;  %13766 = vmatprep.subr.bf16.mxu1 %v14268_v1  ;;  %v1945_v13 = vmax.f32 %v1465_v5, 0.0 }
 0x156   : > { %v13501_v10 = vpop.f32.mrf.mxu0  ;;  %v16822_v15 = vpop.f32.mrf.mxu1 }
 0x157   : > { %v1468_v12 = vadd.f32 %v13501_v10, %v16782_v33  ;;  %2347 = vmatmul.mubr.bf16.gmra.mxu1 %v2064_v55  ;;  %13638 = vmatprep.mubr.bf16.mxu0 %v2065_v9  ;;  %v1943_v16 = vmax.f32 %v1457_v8, 0.0 }
 0x158   : > { %v1459_v14 = vpop.f32.mrf.mxu0  ;;  %13639 = vmatmul.mubr.bf16.gmra.mxu0 %v2066_v44  ;;  %2356 = vmatprep.mubr.bf16.mxu1 %v21378_v29  ;;  %v16825_v20 = vpop.f32.mrf.mxu1 }
 0x159   : > { %v1946_v17 = vmax.f32 %v1468_v12, 0.0  ;;  %v1460_v18 = vadd.f32 %v16782_v33, %v1459_v14  ;;  %13767 = vmatpush3.bf16.msra.mxu1 %v14268_v1 }
 0x15a   : > { %v13504_v19 = vpop.f32.mrf.mxu0  ;;  %v16830_v25 = vpop.f32.mrf.mxu1 }
 0x15b   : > { %v1944_v21 = vmax.f32 %v1460_v18, 0.0  ;;  %v16827_v22 = vpack.c.bf16 %v1946_v17, %v1945_v13  ;;  %v1481_v23 = vadd.f32 %v13504_v19, %v16782_v33 }
 0x15c   : > { %v1472_v24 = vpop.f32.mrf.mxu0  ;;  %v16833_v30 = vpop.f32.mrf.mxu1 }
 0x15d   : > { %v1473_v26 = vadd.f32 %v16782_v33, %v1472_v24  ;;  %v2067_v27 = vpack.c.bf16 %v1944_v21, %v1943_v16  ;;  %v1949_v34 = vmax.f32 %v1481_v23, 0.0 }
 0x15e   : > { %v13505_v28 = vpop.f32.mrf.mxu0  ;;  %v16838_v37 = vpop.f32.mrf.mxu1 }
 0x15f   : > { %v1484_v31 = vadd.f32 %v13505_v28, %v16782_v33  ;;  %2357 = vmatmul.mubr.bf16.gmra.mxu1 %v2065_v9  ;;  %13642 = vmatprep.mubr.bf16.mxu0 %v2067_v27  ;;  %v1947_v38 = vmax.f32 %v1473_v26, 0.0 }
 0x160   : > { %v1475_v36 = vpop.f32.mrf.mxu0  ;;  %13643 = vmatmul.mubr.bf16.gmra.mxu0 %v16827_v22  ;;  %2366 = vmatprep.mubr.bf16.mxu1 %v21378_v29  ;;  %v16841_v43 = vpop.f32.mrf.mxu1 }
 0x161   : > { %v1950_v39 = vmax.f32 %v1484_v31, 0.0  ;;  %v1476_v41 = vadd.f32 %v16782_v33, %v1475_v36 }
 0x162   : > { %v13508_v42 = vpop.f32.mrf.mxu0  ;;  %v16846_v50 = vpop.f32.mrf.mxu1 }
 0x163   : > { %v1948_v46 = vmax.f32 %v1476_v41, 0.0  ;;  %v16843_v47 = vpack.c.bf16 %v1950_v39, %v1949_v34  ;;  %v1497_v48 = vadd.f32 %v13508_v42, %v16782_v33 }
 0x164   : > { %v1488_v49 = vpop.f32.mrf.mxu0  ;;  %v16851_v55 = vpop.f32.mrf.mxu1 }
 0x165   : > { %v1489_v52 = vadd.f32 %v16782_v33, %v1488_v49  ;;  %v16849_v53 = vpack.c.bf16 %v1948_v46, %v1947_v38  ;;  %v1953_v58 = vmax.f32 %v1497_v48, 0.0 }
 0x166   : > { %v13509_v54 = vpop.f32.mrf.mxu0  ;;  %v16857_v60 = vpop.f32.mrf.mxu1 }
 0x167   : > { %v1500_v56 = vadd.f32 %v13509_v54, %v16782_v33  ;;  %2367 = vmatmul.mubr.bf16.gmra.mxu1 %v2066_v44  ;;  %13646 = vmatprep.mubr.bf16.mxu0 %v16849_v53  ;;  %v1951_v62 = vmax.f32 %v1489_v52, 0.0 }
 0x168   : > { %v1491_v59 = vpop.f32.mrf.mxu0  ;;  %13647 = vmatmul.mubr.bf16.gmra.mxu0 %v16843_v47  ;;  %2376 = vmatprep.mubr.bf16.mxu1 %v21378_v29  ;;  %v16860_v2 = vpop.f32.mrf.mxu1 }
 0x169   : > { %v1954_v63 = vmax.f32 %v1500_v56, 0.0  ;;  %v1492_v0 = vadd.f32 %v16782_v33, %v1491_v59 }
 0x16a   : > { %v13512_v1 = vpop.f32.mrf.mxu0  ;;  %v16865_v8 = vpop.f32.mrf.mxu1 }
 0x16b   : > { %v1952_v4 = vmax.f32 %v1492_v0, 0.0  ;;  %v16862_v5 = vpack.c.bf16 %v1954_v63, %v1953_v58  ;;  %v1513_v44 = vadd.f32 %v13512_v1, %v16782_v33 }
 0x16c   : > { %v1504_v6 = vpop.f32.mrf.mxu0  ;;  %v16870_v13 = vpop.f32.mrf.mxu1 }
 0x16d   : > { %v1505_v9 = vadd.f32 %v16782_v33, %v1504_v6  ;;  %v16868_v10 = vpack.c.bf16 %v1952_v4, %v1951_v62  ;;  %v1957_v16 = vmax.f32 %v1513_v44, 0.0 }
 0x16e   : > { %v13513_v12 = vpop.f32.mrf.mxu0  ;;  %v16876_v18 = vpop.f32.mrf.mxu1 }
 0x16f   : > { %v1516_v14 = vadd.f32 %v13513_v12, %v16782_v33  ;;  %2377 = vmatmul.mubr.bf16.gmra.mxu1 %v2067_v27  ;;  %13650 = vmatprep.mubr.bf16.mxu0 %v16868_v10  ;;  %v1955_v19 = vmax.f32 %v1505_v9, 0.0 }
 0x170   : > { %v1507_v17 = vpop.f32.mrf.mxu0  ;;  %13651 = vmatmul.mubr.bf16.gmra.mxu0 %v16862_v5  ;;  %2386 = vmatprep.mubr.bf16.mxu1 %v21378_v29  ;;  %v16879_v26 = vpop.f32.mrf.mxu1 }
 0x171   : > { %v1958_v21 = vmax.f32 %v1516_v14, 0.0  ;;  %v1508_v23 = vadd.f32 %v16782_v33, %v1507_v17 }
 0x172   : > { %v13516_v24 = vpop.f32.mrf.mxu0  ;;  %v16884_v36 = vpop.f32.mrf.mxu1 }
 0x173   : > { %v1956_v28 = vmax.f32 %v1508_v23, 0.0  ;;  %v16881_v31 = vpack.c.bf16 %v1958_v21, %v1957_v16  ;;  %v1529_v27 = vadd.f32 %v13516_v24, %v16782_v33 }
 0x174   : > { %v1520_v34 = vpop.f32.mrf.mxu0  ;;  %v16889_v42 = vpop.f32.mrf.mxu1 }
 0x175   : > { %v1521_v38 = vadd.f32 %v16782_v33, %v1520_v34  ;;  %v16887_v39 = vpack.c.bf16 %v1956_v28, %v1955_v19  ;;  %v1961_v48 = vmax.f32 %v1529_v27, 0.0 }
 0x176   : > { %v13517_v41 = vpop.f32.mrf.mxu0  ;;  %v16897_v58 = vpop.f32.mrf.mxu1 }
 0x177   : > { %v1532_v46 = vadd.f32 %v13517_v41, %v16782_v33  ;;  %2387 = vmatmul.mubr.bf16.gmra.mxu1 %v16827_v22  ;;  %13654 = vmatprep.mubr.bf16.mxu0 %v16887_v39  ;;  %v1959_v52 = vmax.f32 %v1521_v38, 0.0 }
 0x178   : > { %v1523_v49 = vpop.f32.mrf.mxu0  ;;  %13655 = vmatmul.mubr.bf16.gmra.mxu0 %v16881_v31  ;;  %2396 = vmatprep.mubr.bf16.mxu1 %v21378_v29  ;;  %v16905_v44 = vpop.f32.mrf.mxu1 }
 0x179   : > { %v1962_v54 = vmax.f32 %v1532_v46, 0.0  ;;  %v1524_v56 = vadd.f32 %v16782_v33, %v1523_v49 }
 0x17a   : > { %v13520_v59 = vpop.f32.mrf.mxu0  ;;  %v16913_v21 = vpop.f32.mrf.mxu1 }
 0x17b   : > { %v1960_v62 = vmax.f32 %v1524_v56, 0.0  ;;  %v16899_v63 = vpack.c.bf16 %v1962_v54, %v1961_v48  ;;  %v1545_v22 = vadd.f32 %v13520_v59, %v16782_v33 }
 0x17c   : > { %v1536_v0 = vpop.f32.mrf.mxu0  ;;  %v16921_v41 = vpop.f32.mrf.mxu1 }
 0x17d   : > { %v1537_v1 = vadd.f32 %v16782_v33, %v1536_v0  ;;  %v16903_v4 = vpack.c.bf16 %v1960_v62, %v1959_v52  ;;  %v1965_v12 = vmax.f32 %v1545_v22, 0.0  ;;  %v14269_v22 = vld [vmem:[%s21371_s5 + $0x68] ss:$12 sps:$4 sm:$0xff]  }
 0x17e   : > { %v13521_v6 = vpop.f32.mrf.mxu0  ;;  %v16929_v62 = vpop.f32.mrf.mxu1  ;;  %13768 = vmatprep.subr.bf16.mxu1 %v14269_v22 }
 0x17f   : > { %v1548_v9 = vadd.f32 %v13521_v6, %v16782_v33  ;;  %2397 = vmatmul.mubr.bf16.gmra.mxu1 %v16849_v53  ;;  %13658 = vmatprep.mubr.bf16.mxu0 %v16903_v4  ;;  %v1963_v16 = vmax.f32 %v1537_v1, 0.0 }
 0x180   : > { %v1539_v14 = vpop.f32.mrf.mxu0  ;;  %13659 = vmatmul.mubr.bf16.gmra.mxu0 %v16899_v63  ;;  %2406 = vmatprep.mubr.bf16.mxu1 %v21378_v29 }
 0x181   : > { %v1966_v17 = vmax.f32 %v1548_v9, 0.0  ;;  %v1540_v19 = vadd.f32 %v16782_v33, %v1539_v14  ;;  %13769 = vmatpush3.bf16.msra.mxu1 %v14269_v22 }
 0x182   : > { %v13524_v23 = vpop.f32.mrf.mxu0 }
 0x183   : > { %v1964_v24 = vmax.f32 %v1540_v19, 0.0  ;;  %v16915_v28 = vpack.c.bf16 %v1966_v17, %v1965_v12  ;;  %v1561_v53 = vadd.f32 %v13524_v23, %v16782_v33 }
 0x184   : > { %v1552_v27 = vpop.f32.mrf.mxu0 }
 0x185   : > { %v1553_v34 = vadd.f32 %v16782_v33, %v1552_v27  ;;  %v16919_v38 = vpack.c.bf16 %v1964_v24, %v1963_v16  ;;  %v1969_v49 = vmax.f32 %v1561_v53, 0.0  ;;  %v16940_v16 = vpop.f32.mrf.mxu1 }
 0x186   : > { %v13525_v46 = vpop.f32.mrf.mxu0 }
 0x187   : > { %v1564_v48 = vadd.f32 %v13525_v46, %v16782_v33  ;;  %2407 = vmatmul.mubr.bf16.gmra.mxu1 %v16843_v47  ;;  %13662 = vmatprep.mubr.bf16.mxu0 %v16919_v38  ;;  %v1967_v54 = vmax.f32 %v1553_v34, 0.0  ;;  %v16948_v46 = vpop.f32.mrf.mxu1 }
 0x188   : > { %v1555_v52 = vpop.f32.mrf.mxu0  ;;  %13663 = vmatmul.mubr.bf16.gmra.mxu0 %v16915_v28  ;;  %2416 = vmatprep.mubr.bf16.mxu1 %v21378_v29  ;;  %21453 = vst [vmem:[#allocation13_spill] sm:$0xff] %v16948_v46 }
 0x189   : > { %v1970_v56 = vmax.f32 %v1564_v48, 0.0  ;;  %v1556_v59 = vadd.f32 %v16782_v33, %v1555_v52  ;;  %v16956_v22 = vpop.f32.mrf.mxu1 }
 0x18a   : > { %v13528_v0 = vpop.f32.mrf.mxu0 }
 0x18b   : > { %v1968_v47 = vmax.f32 %v1556_v59, 0.0  ;;  %v16934_v1 = vpack.c.bf16 %v1970_v56, %v1969_v49  ;;  %v1577_v6 = vadd.f32 %v13528_v0, %v16782_v33 }
 0x18c   : > { %v1568_v9 = vpop.f32.mrf.mxu0 }
 0x18d   : > { %v1569_v12 = vadd.f32 %v16782_v33, %v1568_v9  ;;  %v16938_v14 = vpack.c.bf16 %v1968_v47, %v1967_v54  ;;  %v1973_v23 = vmax.f32 %v1577_v6, 0.0 }
 0x18e   : > { %v13529_v17 = vpop.f32.mrf.mxu0 }
 0x18f   : > { %v1580_v19 = vadd.f32 %v13529_v17, %v16782_v33  ;;  %2417 = vmatmul.mubr.bf16.gmra.mxu1 %v16868_v10  ;;  %13666 = vmatprep.mubr.bf16.mxu0 %v16938_v14  ;;  %v1971_v53 = vmax.f32 %v1569_v12, 0.0 }
 0x190   : > { %v1571_v24 = vpop.f32.mrf.mxu0  ;;  %13667 = vmatmul.mubr.bf16.gmra.mxu0 %v16934_v1  ;;  %2426 = vmatprep.mubr.bf16.mxu1 %v21378_v29 }
 0x191   : > { %v1974_v27 = vmax.f32 %v1580_v19, 0.0  ;;  %v1572_v34 = vadd.f32 %v16782_v33, %v1571_v24 }
 0x192   : > { %v13532_v48 = vpop.f32.mrf.mxu0 }
 0x193   : > { %v1972_v49 = vmax.f32 %v1572_v34, 0.0  ;;  %v16950_v52 = vpack.c.bf16 %v1974_v27, %v1973_v23  ;;  %v1593_v10 = vadd.f32 %v13532_v48, %v16782_v33  ;;  %v16964_v23 = vpop.f32.mrf.mxu1 }
 0x194   : > { %v1584_v54 = vpop.f32.mrf.mxu0  ;;  %21454 = vst [vmem:[#allocation14_spill] sm:$0xff] %v16964_v23 }
 0x195   : > { %v1585_v56 = vadd.f32 %v16782_v33, %v1584_v54  ;;  %v16954_v59 = vpack.c.bf16 %v1972_v49, %v1971_v53  ;;  %v1977_v6 = vmax.f32 %v1593_v10, 0.0  ;;  %v16972_v10 = vpop.f32.mrf.mxu1 }
 0x196   : > { %v13533_v0 = vpop.f32.mrf.mxu0 }
 0x197   : > { %v1596_v47 = vadd.f32 %v13533_v0, %v16782_v33  ;;  %2427 = vmatmul.mubr.bf16.gmra.mxu1 %v16862_v5  ;;  %13670 = vmatprep.mubr.bf16.mxu0 %v16954_v59  ;;  %v1975_v12 = vmax.f32 %v1585_v56, 0.0 }
 0x198   : > { %v1587_v9 = vpop.f32.mrf.mxu0  ;;  %13671 = vmatmul.mubr.bf16.gmra.mxu0 %v16950_v52  ;;  %2436 = vmatprep.mubr.bf16.mxu1 %v21378_v29 }
 0x199   : > { %v1978_v17 = vmax.f32 %v1596_v47, 0.0  ;;  %v1588_v19 = vadd.f32 %v16782_v33, %v1587_v9 }
 0x19a   : > { %v13536_v24 = vpop.f32.mrf.mxu0 }
 0x19b   : > { %v1976_v53 = vmax.f32 %v1588_v19, 0.0  ;;  %v16966_v27 = vpack.c.bf16 %v1978_v17, %v1977_v6  ;;  %v1609_v5 = vadd.f32 %v13536_v24, %v16782_v33  ;;  %v16980_v17 = vpop.f32.mrf.mxu1 }
 0x19c   : > { %v1600_v34 = vpop.f32.mrf.mxu0  ;;  %21455 = vst [vmem:[#allocation15_spill] sm:$0xff] %v16980_v17 }
 0x19d   : > { %v1601_v48 = vadd.f32 %v16782_v33, %v1600_v34  ;;  %v16970_v49 = vpack.c.bf16 %v1976_v53, %v1975_v12  ;;  %v1981_v0 = vmax.f32 %v1609_v5, 0.0  ;;  %v16988_v23 = vpop.f32.mrf.mxu1 }
 0x19e   : > { %v13537_v54 = vpop.f32.mrf.mxu0  ;;  %21457 = vst [vmem:[#allocation17_spill] sm:$0xff] %v16988_v23 }
 0x19f   : > { %v1612_v56 = vadd.f32 %v13537_v54, %v16782_v33  ;;  %2437 = vmatmul.mubr.bf16.gmra.mxu1 %v16887_v39  ;;  %13674 = vmatprep.mubr.bf16.mxu0 %v16970_v49  ;;  %v1979_v6 = vmax.f32 %v1601_v48, 0.0 }
 0x1a0   : > { %v1603_v47 = vpop.f32.mrf.mxu0  ;;  %13675 = vmatmul.mubr.bf16.gmra.mxu0 %v16966_v27  ;;  %2446 = vmatprep.mubr.bf16.mxu1 %v21378_v29 }
 0x1a1   : > { %v1982_v9 = vmax.f32 %v1612_v56, 0.0  ;;  %v1604_v12 = vadd.f32 %v16782_v33, %v1603_v47 }
 0x1a2   : > { %v13540_v19 = vpop.f32.mrf.mxu0 }
 0x1a3   : > { %v1980_v24 = vmax.f32 %v1604_v12, 0.0  ;;  %v16982_v53 = vpack.c.bf16 %v1982_v9, %v1981_v0  ;;  %v1625_v39 = vadd.f32 %v13540_v19, %v16782_v33  ;;  %v21458_v0 = vmov 0   ;;  %v16996_v19 = vpop.f32.mrf.mxu1 }
 0x1a4   : > { %v1616_v34 = vpop.f32.mrf.mxu0 }
 0x1a5   : > { %21456 = vst [vmem:[#allocation16_spill] sm:$0xff] %v16982_v53  ;;  %v1617_v5 = vadd.f32 %v16782_v33, %v1616_v34  ;;  %v16986_v54 = vpack.c.bf16 %v1980_v24, %v1979_v6  ;;  %v1985_v56 = vmax.f32 %v1625_v39, 0.0 }
 0x1a6   : > { %v13541_v29 = vpop.f32.mrf.mxu0 }
 0x1a7   : > { %v1628_v48 = vadd.f32 %v13541_v29, %v16782_v33  ;;  %2447 = vmatmul.mubr.bf16.gmra.mxu1 %v16881_v31  ;;  %13678 = vmatprep.mubr.bf16.mxu0 %v16986_v54  ;;  %v1983_v9 = vmax.f32 %v1617_v5, 0.0  ;;  %v14272_v5 = vld [vmem:[%s21371_s5 + $0xac] ss:$12 sps:$4 sm:$0xff]  }
 0x1a8   : > { %v1619_v47 = vpop.f32.mrf.mxu0  ;;  %13679 = vmatmul.mubr.bf16.gmra.mxu0 %v16982_v53  ;;  %2456 = vmatprep.mubr.bf16.mxu1 %v21458_v0  ;;  %v17004_v53 = vpop.f32.mrf.mxu1 }
 0x1a9   : > { %v1986_v12 = vmax.f32 %v1628_v48, 0.0  ;;  %v1620_v6 = vadd.f32 %v16782_v33, %v1619_v47  ;;  %4145 = vmatprep.subr.bf16.mxu0 %v14272_v5 }
 0x1aa   : > { %v13544_v24 = vpop.f32.mrf.mxu0 }
 0x1ab   : > { %v1984_v34 = vmax.f32 %v1620_v6, 0.0  ;;  %v16998_v17 = vpack.c.bf16 %v1986_v12, %v1985_v56  ;;  %v1641_v29 = vadd.f32 %v13544_v24, %v16782_v33  ;;  %v14270_v56 = vld [vmem:[%s21371_s5 + $0xa8] ss:$12 sps:$4 sm:$0xff]  }
 0x1ac   : > { %v1632_v31 = vpop.f32.mrf.mxu0  ;;  %4146 = vmatpush1.bf16.msra.mxu0 %v14270_v56 }
 0x1ad   : > { %21459 = vst [vmem:[#allocation18_spill] sm:$0xff] %v16998_v17  ;;  %v1633_v39 = vadd.f32 %v16782_v33, %v1632_v31  ;;  %v17002_v23 = vpack.c.bf16 %v1984_v34, %v1983_v9  ;;  %v1989_v47 = vmax.f32 %v1641_v29, 0.0  ;;  %v17018_v34 = vpop.f32.mrf.mxu1  ;;  %v14273_v29 = vld [vmem:[%s21371_s5 + $0x90] ss:$12 sps:$4 sm:$0xff]  }
 0x1ae   : > { %v13545_v46 = vpop.f32.mrf.mxu0  ;;  %21461 = vst [vmem:[#allocation20_spill] sm:$0xff] %v17018_v34 }
 0x1af   : > { %21460 = vst [vmem:[#allocation19_spill] sm:$0xff] %v17002_v23  ;;  %v1644_v48 = vadd.f32 %v13545_v46, %v16782_v33  ;;  %2457 = vmatmul.mubr.bf16.gmra.mxu1 %v16903_v4  ;;  %13682 = vmatprep.mubr.bf16.mxu0 %v17002_v23  ;;  %v1987_v12 = vmax.f32 %v1633_v39, 0.0  ;;  %v14275_v46 = vld [vmem:[%s21371_s5 + $0x94] ss:$12 sps:$4 sm:$0xff]   ;;  %v17032_v56 = vpop.f32.mrf.mxu1 }
 0x1b0   : > { %v1635_v9 = vpop.f32.mrf.mxu0  ;;  %13683 = vmatmul.mubr.bf16.gmra.mxu0 %v16998_v17  ;;  %2466 = vmatprep.mubr.bf16.mxu1 %v21458_v0 }
 0x1b1   : > { %v1990_v6 = vmax.f32 %v1644_v48, 0.0  ;;  %v1636_v24 = vadd.f32 %v16782_v33, %v1635_v9  ;;  %4147 = vmatprep.subr.bf16.mxu0 %v14275_v46 }
 0x1b2   : > { %v13548_v4 = vpop.f32.mrf.mxu0  ;;  %4148 = vmatpush1.bf16.msra.mxu0 %v14273_v29  ;;  %v17046_v29 = vpop.f32.mrf.mxu1 }
 0x1b3   : > { %v1988_v31 = vmax.f32 %v1636_v24, 0.0  ;;  %v17026_v17 = vpack.c.bf16 %v1990_v6, %v1989_v47  ;;  %v1657_v39 = vadd.f32 %v13548_v4, %v16782_v33  ;;  %v14278_v24 = vld [vmem:[%s21371_s5 + $0x7c] ss:$12 sps:$4 sm:$0xff]   ;;  %v14276_v47 = vld [vmem:[%s21371_s5 + $0x78] ss:$12 sps:$4 sm:$0xff]   ;;  %21464 = vst [vmem:[#allocation23_spill] sm:$0xff] %v17046_v29 }
 0x1b4   : > { %v1648_v48 = vpop.f32.mrf.mxu0  ;;  %4149 = vmatprep.subr.bf16.mxu0 %v14278_v24 }
 0x1b5   : > { %21462 = vst [vmem:[#allocation21_spill] sm:$0xff] %v17026_v17  ;;  %v1649_v9 = vadd.f32 %v16782_v33, %v1648_v48  ;;  %v17030_v5 = vpack.c.bf16 %v1988_v31, %v1987_v12  ;;  %v1993_v12 = vmax.f32 %v1657_v39, 0.0  ;;  %v14279_v39 = vld [vmem:[%s21371_s5 + $0x60] ss:$12 sps:$4 sm:$0xff]  }
 0x1b6   : > { %v13549_v34 = vpop.f32.mrf.mxu0  ;;  %4150 = vmatpush1.bf16.msra.mxu0 %v14276_v47  ;;  %v17060_v47 = vpop.f32.mrf.mxu1 }
 0x1b7   : > { %21463 = vst [vmem:[#allocation22_spill] sm:$0xff] %v17030_v5  ;;  %v1660_v23 = vadd.f32 %v13549_v34, %v16782_v33  ;;  %2467 = vmatmul.mubr.bf16.gmra.mxu1 %v16899_v63  ;;  %13686 = vmatprep.mubr.bf16.mxu0 %v17030_v5  ;;  %v1991_v4 = vmax.f32 %v1649_v9, 0.0  ;;  %v14281_v34 = vld [vmem:[%s21371_s5 + $0x64] ss:$12 sps:$4 sm:$0xff]  }
 0x1b8   : > { %v1651_v6 = vpop.f32.mrf.mxu0  ;;  %13687 = vmatmul.mubr.bf16.gmra.mxu0 %v17026_v17  ;;  %2476 = vmatprep.mubr.bf16.mxu1 %v21458_v0 }
 0x1b9   : > { %v1994_v46 = vmax.f32 %v1660_v23, 0.0  ;;  %v1652_v31 = vadd.f32 %v16782_v33, %v1651_v6  ;;  %4151 = vmatprep.subr.bf16.mxu0 %v14281_v34 }
 0x1ba   : > { %v13552_v63 = vpop.f32.mrf.mxu0  ;;  %4152 = vmatpush1.bf16.msra.mxu0 %v14279_v39 }
 0x1bb   : > { %v1992_v48 = vmax.f32 %v1652_v31, 0.0  ;;  %v17054_v17 = vpack.c.bf16 %v1994_v46, %v1993_v12  ;;  %v1673_v23 = vadd.f32 %v13552_v63, %v16782_v33  ;;  %v14284_v31 = vld [vmem:[%s21371_s5 + $0x4c] ss:$12 sps:$4 sm:$0xff]   ;;  %v1681_v12 = vadd.f32 %v16782_v33, %v16784_v35 }
 0x1bc   : > { %v1664_v9 = vpop.f32.mrf.mxu0  ;;  %v1684_v46 = vadd.f32 %v16782_v33, %v16792_v45  ;;  %4153 = vmatprep.subr.bf16.mxu0 %v14284_v31  ;;  %v1689_v31 = vadd.f32 %v16777_v32, %v16782_v33  ;;  %v14288_v32 = vld [vmem:[%s21371_s5 + $0x18] ss:$12 sps:$4 sm:$0xff]  }
 0x1bd   : > { %21465 = vst [vmem:[#allocation24_spill] sm:$0xff] %v17054_v17  ;;  %v1665_v6 = vadd.f32 %v16782_v33, %v1664_v9  ;;  %v17058_v24 = vpack.c.bf16 %v1992_v48, %v1991_v4  ;;  %v14282_v4 = vld [vmem:[%s21371_s5 + $0x48] ss:$12 sps:$4 sm:$0xff]   ;;  %v1997_v34 = vmax.f32 %v1673_v23, 0.0  ;;  %v17078_v9 = vpop.f32.mrf.mxu1 }
 0x1be   : > { %v13553_v5 = vpop.f32.mrf.mxu0  ;;  %4154 = vmatpush1.bf16.msra.mxu0 %v14282_v4  ;;  %v1692_v4 = vadd.f32 %v16789_v40, %v16782_v33 }
 0x1bf   : > { %21466 = vst [vmem:[#allocation25_spill] sm:$0xff] %v17058_v24  ;;  %v1676_v63 = vadd.f32 %v13553_v5, %v16782_v33  ;;  %2477 = vmatmul.mubr.bf16.gmra.mxu1 %v16919_v38  ;;  %13690 = vmatprep.mubr.bf16.mxu0 %v17058_v24  ;;  %v1995_v35 = vmax.f32 %v1665_v6, 0.0  ;;  %v14287_v38 = vld [vmem:[%s21371_s5 + $0x34] ss:$12 sps:$4 sm:$0xff]   ;;  %v1999_v5 = vmax.f32 %v1681_v12, 0.0  ;;  %v2000_v24 = vmax.f32 %v1684_v46, 0.0 }
 0x1c0   : > { %v1667_v48 = vpop.f32.mrf.mxu0  ;;  %13691 = vmatmul.mubr.bf16.gmra.mxu0 %v17054_v17  ;;  %2486 = vmatprep.mubr.bf16.mxu1 %v21458_v0  ;;  %v14285_v17 = vld [vmem:[%s21371_s5 + $0x30] ss:$12 sps:$4 sm:$0xff]   ;;  %v1697_v46 = vadd.f32 %v16782_v33, %v16801_v57  ;;  %v2001_v57 = vmax.f32 %v1689_v31, 0.0  ;;  %v1716_v31 = vadd.f32 %v16782_v33, %v16825_v20 }
 0x1c1   : > { %v1998_v39 = vmax.f32 %v1676_v63, 0.0  ;;  %v1668_v45 = vadd.f32 %v16782_v33, %v1667_v48  ;;  %4155 = vmatprep.subr.bf16.mxu0 %v14287_v38  ;;  %v17090_v63 = vpop.f32.mrf.mxu1  ;;  %v14290_v12 = vld [vmem:[%s21371_s5 + $0x1c] ss:$12 sps:$4 sm:$0xff]   ;;  %v17105_v48 = vpack.c.bf16 %v2000_v24, %v1999_v5  ;;  %v1705_v38 = vadd.f32 %v16795_v51, %v16782_v33 }
 0x1c2   : > { %4156 = vmatpush1.bf16.msra.mxu0 %v14285_v17  ;;  %v2003_v17 = vmax.f32 %v1697_v46, 0.0  ;;  %v1708_v5 = vadd.f32 %v16805_v61, %v16782_v33 }
 0x1c3   : > { %v1996_v23 = vmax.f32 %v1668_v45, 0.0  ;;  %v17086_v29 = vpack.c.bf16 %v1998_v39, %v1997_v34  ;;  %v1700_v34 = vadd.f32 %v16782_v33, %v16812_v3  ;;  %v17113_v40 = vpop.f32.mrf.mxu1  ;;  %4157 = vmatprep.subr.bf16.mxu0 %v14290_v12  ;;  %v2002_v3 = vmax.f32 %v1692_v4, 0.0  ;;  %v14294_v12 = vld [vmem:[%s21371_s5 + $0x50] ss:$12 sps:$4 sm:$0xff]  }
 0x1c4   : > { %13770 = vmatprep.subr.bf16.mxu1 %v14294_v12  ;;  %v2005_v61 = vmax.f32 %v1705_v38, 0.0 }
 0x1c5   : > { %v17088_v6 = vpack.c.bf16 %v1996_v23, %v1995_v35  ;;  %v2004_v24 = vmax.f32 %v1700_v34, 0.0  ;;  %v14291_v35 = vld [vmem:[%s21371_s5] ss:$12 sps:$4 sm:$0xff]   ;;  %v17121_v39 = vpop.f32.mrf.mxu1  ;;  %v17123_v45 = vpack.c.bf16 %v2002_v3, %v2001_v57  ;;  %v1713_v23 = vadd.f32 %v16782_v33, %v16818_v11  ;;  %13771 = vmatpush3.bf16.msra.mxu1 %v14294_v12 }
 0x1c6   : > { %4158 = vmatpush1.bf16.msra.mxu0 %v14288_v32  ;;  %v2006_v11 = vmax.f32 %v1708_v5, 0.0  ;;  %v1721_v32 = vadd.f32 %v16815_v7, %v16782_v33  ;;  %v1724_v57 = vadd.f32 %v16822_v15, %v16782_v33  ;;  %v1729_v3 = vadd.f32 %v16782_v33, %v16833_v30 }
 0x1c7   : > { %2487 = vmatmul.mubr.bf16.gmra.mxu1 %v16915_v28  ;;  %13694 = vmatprep.mubr.bf16.mxu0 %v17088_v6  ;;  %v14293_v28 = vld [vmem:[%s21371_s5 + $0x4] ss:$12 sps:$4 sm:$0xff]   ;;  %v17134_v4 = vpack.c.bf16 %v2004_v24, %v2003_v17  ;;  %v17142_v51 = vpop.f32.mrf.mxu1  ;;  %v2007_v20 = vmax.f32 %v1713_v23, 0.0  ;;  %v1745_v23 = vadd.f32 %v16782_v33, %v16851_v55 }
 0x1c8   : > { %13695 = vmatmul.mubr.bf16.gmra.mxu0 %v17086_v29  ;;  %2496 = vmatprep.mubr.bf16.mxu1 %v21458_v0  ;;  %v17146_v34 = vpack.c.bf16 %v2006_v11, %v2005_v61  ;;  %v2009_v24 = vmax.f32 %v1721_v32, 0.0  ;;  %v2010_v15 = vmax.f32 %v1724_v57, 0.0  ;;  %v1761_v32 = vadd.f32 %v16782_v33, %v16870_v13 }
 0x1c9   : > { %13698 = vmatprep.mubr.bf16.mxu0 %v17105_v48  ;;  %4159 = vmatprep.subr.bf16.mxu0 %v14293_v28  ;;  %v17144_v46 = vpop.f32.mrf.mxu1  ;;  %v1732_v28 = vadd.f32 %v16782_v33, %v16841_v43  ;;  %v1737_v43 = vadd.f32 %v16830_v25, %v16782_v33  ;;  %v2015_v11 = vmax.f32 %v1745_v23, 0.0  ;;  %v1764_v57 = vadd.f32 %v16782_v33, %v16879_v26 }
 0x1ca   : > { %4160 = vmatpush1.bf16.msra.mxu0 %v14291_v35  ;;  %v2011_v35 = vmax.f32 %v1729_v3, 0.0  ;;  %v17166_v5 = vpack.c.bf16 %v2010_v15, %v2009_v24  ;;  %v2019_v24 = vmax.f32 %v1761_v32, 0.0  ;;  %v1769_v26 = vadd.f32 %v16865_v8, %v16782_v33 }
 0x1cb   : > { %v17162_v7 = vpop.f32.mrf.mxu1  ;;  %v2012_v38 = vmax.f32 %v1732_v28, 0.0  ;;  %v2013_v61 = vmax.f32 %v1737_v43, 0.0  ;;  %v2020_v15 = vmax.f32 %v1764_v57, 0.0  ;;  %v1780_v43 = vadd.f32 %v16782_v33, %v16905_v44 }
 0x1cc   : > { %v2021_v23 = vmax.f32 %v1769_v26, 0.0  ;;  %v1785_v44 = vadd.f32 %v16884_v36, %v16782_v33 }
 0x1cd   : > { %v17164_v30 = vpop.f32.mrf.mxu1  ;;  %v17177_v12 = vpack.c.bf16 %v2012_v38, %v2011_v35  ;;  %v1777_v38 = vadd.f32 %v16782_v33, %v16889_v42 }
 0x1cf   : > { %2497 = vmatmul.mubr.bf16.gmra.mxu1 %v16938_v14  ;;  %v2008_v14 = vmax.f32 %v1716_v31, 0.0  ;;  %v1748_v31 = vadd.f32 %v16782_v33, %v16860_v2  ;;  %v17182_v25 = vpop.f32.mrf.mxu1  ;;  %v1753_v2 = vadd.f32 %v16846_v50, %v16782_v33 }
 0x1d0   : > { %13699 = vmatmul.mubr.bf16.gmra.mxu0 %v17123_v45  ;;  %2506 = vmatprep.mubr.bf16.mxu1 %v21458_v0 }
 0x1d1   : > { %13702 = vmatprep.mubr.bf16.mxu0 %v17134_v4  ;;  %v17157_v17 = vpack.c.bf16 %v2008_v14, %v2007_v20  ;;  %v2016_v20 = vmax.f32 %v1748_v31, 0.0  ;;  %v17184_v55 = vpop.f32.mrf.mxu1  ;;  %v2017_v28 = vmax.f32 %v1753_v2, 0.0  ;;  %v2023_v31 = vmax.f32 %v1777_v38, 0.0 }
 0x1d3   : > { %v17197_v3 = vpack.c.bf16 %v2016_v20, %v2015_v11  ;;  %v17202_v50 = vpop.f32.mrf.mxu1  ;;  %v1793_v11 = vadd.f32 %v16782_v33, %v16921_v41  ;;  %v1796_v20 = vadd.f32 %v16782_v33, %v16940_v16  ;;  %v1801_v16 = vadd.f32 %v16913_v21, %v16782_v33 }
 0x1d5   : > { %v17204_v13 = vpop.f32.mrf.mxu1  ;;  %v2027_v32 = vmax.f32 %v1793_v11, 0.0  ;;  %v2028_v57 = vmax.f32 %v1796_v20, 0.0  ;;  %v2029_v21 = vmax.f32 %v1801_v16, 0.0 }
 0x1d7   : > { %2507 = vmatmul.mubr.bf16.gmra.mxu1 %v16934_v1  ;;  %v1740_v1 = vadd.f32 %v16838_v37, %v16782_v33  ;;  %v17222_v8 = vpop.f32.mrf.mxu1 }
 0x1d8   : > { %13703 = vmatmul.mubr.bf16.gmra.mxu0 %v17146_v34  ;;  %2516 = vmatprep.mubr.bf16.mxu1 %v21458_v0 }
 0x1d9   : > { %13706 = vmatprep.mubr.bf16.mxu0 %v17157_v17  ;;  %v2014_v37 = vmax.f32 %v1740_v1, 0.0  ;;  %v17217_v1 = vpack.c.bf16 %v2020_v15, %v2019_v24  ;;  %v17224_v42 = vpop.f32.mrf.mxu1  ;;  %v1812_v24 = vadd.f32 %v16782_v33, %v16972_v10  ;;  %v17257_v15 = vpack.c.bf16 %v2028_v57, %v2027_v32  ;;  %v21467_v10 = vld [vmem:[#allocation13_spill] sm:$0xff] }
 0x1db   : > { %v17186_v14 = vpack.c.bf16 %v2014_v37, %v2013_v61  ;;  %v2024_v61 = vmax.f32 %v1780_v43, 0.0  ;;  %v17242_v36 = vpop.f32.mrf.mxu1  ;;  %v2032_v38 = vmax.f32 %v1812_v24, 0.0 }
 0x1dd   : > { %v17237_v2 = vpack.c.bf16 %v2024_v61, %v2023_v31  ;;  %v17244_v41 = vpop.f32.mrf.mxu1  ;;  %v21469_v31 = vld [vmem:[#allocation17_spill] sm:$0xff] }
 0x1de   : > { %v1825_v61 = vadd.f32 %v16782_v33, %v21469_v31 }
 0x1df   : > { %2517 = vmatmul.mubr.bf16.gmra.mxu1 %v16954_v59  ;;  %v1756_v59 = vadd.f32 %v16857_v60, %v16782_v33  ;;  %v17261_v26 = vpop.f32.mrf.mxu1 }
 0x1e0   : > { %13707 = vmatmul.mubr.bf16.gmra.mxu0 %v17166_v5  ;;  %2526 = vmatprep.mubr.bf16.mxu1 %v21458_v0  ;;  %v2035_v32 = vmax.f32 %v1825_v61, 0.0 }
 0x1e1   : > { %13710 = vmatprep.mubr.bf16.mxu0 %v17177_v12  ;;  %v2018_v60 = vmax.f32 %v1756_v59, 0.0  ;;  %v2025_v59 = vmax.f32 %v1785_v44, 0.0  ;;  %v1828_v44 = vadd.f32 %v16782_v33, %v17004_v53  ;;  %v21471_v53 = vld [vmem:[#allocation15_spill] sm:$0xff] }
 0x1e3   : > { %v17206_v35 = vpack.c.bf16 %v2018_v60, %v2017_v28  ;;  %v1809_v60 = vadd.f32 %v16782_v33, %v16956_v22  ;;  %v17264_v22 = vpop.f32.mrf.mxu1  ;;  %v2036_v57 = vmax.f32 %v1828_v44, 0.0 }
 0x1e5   : > { %v17281_v20 = vpop.f32.mrf.mxu1 }
 0x1e7   : > { %2527 = vmatmul.mubr.bf16.gmra.mxu1 %v16950_v52  ;;  %v1772_v52 = vadd.f32 %v16876_v18, %v16782_v33  ;;  %v17284_v16 = vpop.f32.mrf.mxu1 }
 0x1e8   : > { %13711 = vmatmul.mubr.bf16.gmra.mxu0 %v17186_v14  ;;  %2536 = vmatprep.mubr.bf16.mxu1 %v21458_v0 }
 0x1e9   : > { %13714 = vmatprep.mubr.bf16.mxu0 %v17197_v3  ;;  %v2022_v18 = vmax.f32 %v1772_v52, 0.0  ;;  %v2031_v52 = vmax.f32 %v1809_v60, 0.0 }
 0x1eb   : > { %v17226_v37 = vpack.c.bf16 %v2022_v18, %v2021_v23  ;;  %v21468_v23 = vld [vmem:[#allocation14_spill] sm:$0xff]  ;;  %v17277_v11 = vpack.c.bf16 %v2032_v38, %v2031_v52  ;;  %v21472_v38 = vld [vmem:[#allocation19_spill] sm:$0xff] }
 0x1ec   : > { %v1820_v18 = vadd.f32 %v21468_v23, %v16782_v33 }
 0x1ef   : > { %2537 = vmatmul.mubr.bf16.gmra.mxu1 %v16970_v49  ;;  %v1788_v49 = vadd.f32 %v16897_v58, %v16782_v33 }
 0x1f0   : > { %13715 = vmatmul.mubr.bf16.gmra.mxu0 %v17206_v35  ;;  %2546 = vmatprep.mubr.bf16.mxu1 %v21458_v0 }
 0x1f1   : > { %13718 = vmatprep.mubr.bf16.mxu0 %v17217_v1  ;;  %v2026_v58 = vmax.f32 %v1788_v49, 0.0  ;;  %v21470_v49 = vld [vmem:[#allocation16_spill] sm:$0xff] }
 0x1f3   : > { %v17246_v28 = vpack.c.bf16 %v2026_v58, %v2025_v59  ;;  %v2034_v58 = vmax.f32 %v1820_v18, 0.0 }
 0x1f7   : > { %2547 = vmatmul.mubr.bf16.gmra.mxu1 %v16966_v27  ;;  %v1804_v27 = vadd.f32 %v16929_v62, %v16782_v33 }
 0x1f8   : > { %13719 = vmatmul.mubr.bf16.gmra.mxu0 %v17226_v37  ;;  %2556 = vmatprep.mubr.bf16.mxu1 %v21458_v0 }
 0x1f9   : > { %13722 = vmatprep.mubr.bf16.mxu0 %v17237_v2  ;;  %v2030_v62 = vmax.f32 %v1804_v27, 0.0 }
 0x1fb   : > { %v17266_v43 = vpack.c.bf16 %v2030_v62, %v2029_v21 }
 0x1ff   : > { %2557 = vmatmul.mubr.bf16.gmra.mxu1 %v16986_v54  ;;  %v1817_v54 = vadd.f32 %v21467_v10, %v16782_v33  ;;  %v17291_v33 = vld [vmem:[%s21452_s3] ss:$0 sm:$0xff]  ;;  %v17304_v10 = vpack.c.bf16 %v2036_v57, %v2035_v32  ;;  %v21476_v32 = vld [vmem:[#allocation20_spill] sm:$0xff] }
 0x200   : > { %13723 = vmatmul.mubr.bf16.gmra.mxu0 %v17246_v28  ;;  %2566 = vmatprep.mubr.bf16.mxu1 %v21458_v0  ;;  %v1833_v60 = vadd.f32 %v17291_v33, %v21471_v53  ;;  %v1836_v24 = vadd.f32 %v17291_v33, %v16996_v19  ;;  %v1841_v21 = vadd.f32 %v17291_v33, %v17032_v56  ;;  %v21477_v53 = vld [vmem:[#allocation23_spill] sm:$0xff] }
 0x201   : > { %13726 = vmatprep.mubr.bf16.mxu0 %v17257_v15  ;;  %v2033_v59 = vmax.f32 %v1817_v54, 0.0  ;;  %v1844_v62 = vadd.f32 %v17291_v33, %v17060_v47  ;;  %v14295_v54 = vld [vmem:[%s21371_s5 + $0x38] ss:$12 sps:$4 sm:$0xff]   ;;  %v1849_v57 = vadd.f32 %v17291_v33, %v21476_v32 }
 0x202   : > { %13772 = vmatprep.subr.bf16.mxu1 %v14295_v54  ;;  %v2037_v56 = vmax.f32 %v1833_v60, 0.0  ;;  %v2038_v47 = vmax.f32 %v1836_v24, 0.0  ;;  %v2039_v31 = vmax.f32 %v1841_v21, 0.0  ;;  %v1852_v60 = vadd.f32 %v17291_v33, %v21477_v53 }
 0x203   : > { %v17286_v27 = vpack.c.bf16 %v2034_v58, %v2033_v59  ;;  %13773 = vmatpush3.bf16.msra.mxu1 %v14295_v54  ;;  %v2040_v61 = vmax.f32 %v1844_v62, 0.0  ;;  %v1857_v21 = vadd.f32 %v17291_v33, %v17090_v63  ;;  %v1860_v62 = vadd.f32 %v17291_v33, %v17121_v39  ;;  %v21479_v54 = vld [vmem:[#allocation18_spill] sm:$0xff] }
 0x204   : > { %v17324_v58 = vpack.c.bf16 %v2038_v47, %v2037_v56  ;;  %v2041_v63 = vmax.f32 %v1849_v57, 0.0  ;;  %v2042_v53 = vmax.f32 %v1852_v60, 0.0  ;;  %v1873_v60 = vadd.f32 %v17291_v33, %v17144_v46 }
 0x205   : > { %v17339_v56 = vpack.c.bf16 %v2040_v61, %v2039_v31  ;;  %v2043_v39 = vmax.f32 %v1857_v21, 0.0  ;;  %v1876_v21 = vadd.f32 %v17291_v33, %v17164_v30 }
 0x206   : > { %v2047_v30 = vmax.f32 %v1873_v60, 0.0  ;;  %v1892_v60 = vadd.f32 %v17291_v33, %v17204_v13 }
 0x207   : > { %2567 = vmatmul.mubr.bf16.gmra.mxu1 %v21470_v49 }
 0x208   : > { %13727 = vmatmul.mubr.bf16.gmra.mxu0 %v17266_v43  ;;  %2576 = vmatprep.mubr.bf16.mxu1 %v21458_v0 }
 0x209   : > { %13730 = vmatprep.mubr.bf16.mxu0 %v17277_v11 }
 0x20f   : > { %v17301_v52 = vpop.f32.mrf.mxu1  ;;  %2577 = vmatmul.mubr.bf16.gmra.mxu1 %v21472_v38 }
 0x210   : > { %v17309_v23 = vpop.f32.mrf.mxu0  ;;  %13731 = vmatmul.mubr.bf16.gmra.mxu0 %v17286_v27  ;;  %2586 = vmatprep.mubr.bf16.mxu1 %v21458_v0 }
 0x211   : > { %21473 = vst [vmem:[#allocation13_spill] sm:$0xff] %v17309_v23  ;;  %v17313_v19 = vpop.f32.mrf.mxu1  ;;  %13734 = vmatprep.mubr.bf16.mxu0 %v17304_v10  ;;  %v1868_v23 = vadd.f32 %v17291_v33, %v17113_v40 }
 0x212   : > { %v17316_v18 = vpop.f32.mrf.mxu0 }
 0x213   : > { %21474 = vst [vmem:[#allocation14_spill] sm:$0xff] %v17316_v18  ;;  %v17318_v44 = vpop.f32.mrf.mxu1  ;;  %v2046_v46 = vmax.f32 %v1868_v23, 0.0  ;;  %v1889_v23 = vadd.f32 %v17291_v33, %v17184_v55 }
 0x214   : > { %v17320_v49 = vpop.f32.mrf.mxu0 }
 0x215   : > { %21475 = vst [vmem:[#allocation17_spill] sm:$0xff] %v17320_v49  ;;  %v17322_v59 = vpop.f32.mrf.mxu1  ;;  %v2044_v49 = vmax.f32 %v1860_v62, 0.0  ;;  %v2051_v13 = vmax.f32 %v1889_v23, 0.0  ;;  %v1908_v23 = vadd.f32 %v17291_v33, %v17244_v41 }
 0x216   : > { %v17330_v24 = vpop.f32.mrf.mxu0 }
 0x217   : > { %21478 = vst [vmem:[#allocation16_spill] sm:$0xff] %v17330_v24  ;;  %v17336_v38 = vpop.f32.mrf.mxu1  ;;  %2587 = vmatmul.mubr.bf16.gmra.mxu1 %v21479_v54  ;;  %v17356_v54 = vpack.c.bf16 %v2042_v53, %v2041_v63  ;;  %v17371_v63 = vpack.c.bf16 %v2044_v49, %v2043_v39 }
 0x218   : > { %v17341_v47 = vpop.f32.mrf.mxu0  ;;  %13735 = vmatmul.mubr.bf16.gmra.mxu0 %v17324_v58  ;;  %2596 = vmatprep.mubr.bf16.mxu1 %v21458_v0 }
 0x219   : > { %21480 = vst [vmem:[#allocation15_spill] sm:$0xff] %v17341_v47  ;;  %v17345_v32 = vpop.f32.mrf.mxu1  ;;  %13738 = vmatprep.mubr.bf16.mxu0 %v17339_v56  ;;  %v1865_v47 = vadd.f32 %v17291_v33, %v17078_v9 }
 0x21a   : > { %v17348_v24 = vpop.f32.mrf.mxu0 }
 0x21b   : > { %21481 = vst [vmem:[#allocation19_spill] sm:$0xff] %v17348_v24  ;;  %v17350_v18 = vpop.f32.mrf.mxu1  ;;  %v2045_v40 = vmax.f32 %v1865_v47, 0.0  ;;  %v2048_v24 = vmax.f32 %v1876_v21, 0.0 }
 0x21c   : > { %v17352_v31 = vpop.f32.mrf.mxu0 }
 0x21d   : > { %21482 = vst [vmem:[#allocation20_spill] sm:$0xff] %v17352_v31  ;;  %v17354_v61 = vpop.f32.mrf.mxu1  ;;  %v21485_v31 = vld [vmem:[#allocation22_spill] sm:$0xff] }
 0x21e   : > { %v17362_v57 = vpop.f32.mrf.mxu0 }
 0x21f   : > { %21483 = vst [vmem:[#allocation23_spill] sm:$0xff] %v17362_v57  ;;  %v17368_v62 = vpop.f32.mrf.mxu1  ;;  %2597 = vmatmul.mubr.bf16.gmra.mxu1 %v21485_v31  ;;  %v17388_v31 = vpack.c.bf16 %v2046_v46, %v2045_v40  ;;  %v17403_v40 = vpack.c.bf16 %v2048_v24, %v2047_v30 }
 0x220   : > { %21484 = vst [vmem:[#allocation18_spill] sm:$0xff] %v17368_v62  ;;  %v17373_v53 = vpop.f32.mrf.mxu0  ;;  %13739 = vmatmul.mubr.bf16.gmra.mxu0 %v17356_v54  ;;  %2606 = vmatprep.mubr.bf16.mxu1 %v21458_v0 }
 0x221   : > { %21486 = vst [vmem:[#allocation22_spill] sm:$0xff] %v17373_v53  ;;  %v17377_v9 = vpop.f32.mrf.mxu1  ;;  %13742 = vmatprep.mubr.bf16.mxu0 %v17371_v63  ;;  %v1881_v53 = vadd.f32 %v17291_v33, %v17142_v51 }
 0x222   : > { %21487 = vst [vmem:[#allocation26_spill] sm:$0xff] %v17377_v9  ;;  %v17380_v57 = vpop.f32.mrf.mxu0  ;;  %v1884_v9 = vadd.f32 %v17291_v33, %v17162_v7 }
 0x223   : > { %21488 = vst [vmem:[#allocation27_spill] sm:$0xff] %v17380_v57  ;;  %v17382_v62 = vpop.f32.mrf.mxu1  ;;  %v2049_v7 = vmax.f32 %v1881_v53, 0.0  ;;  %v2052_v57 = vmax.f32 %v1892_v60, 0.0 }
 0x224   : > { %v17384_v49 = vpop.f32.mrf.mxu0  ;;  %v2050_v55 = vmax.f32 %v1884_v9, 0.0  ;;  %v1905_v9 = vadd.f32 %v17291_v33, %v17224_v42 }
 0x225   : > { %21489 = vst [vmem:[#allocation28_spill] sm:$0xff] %v17384_v49  ;;  %v17386_v39 = vpop.f32.mrf.mxu1  ;;  %v21492_v49 = vld [vmem:[#allocation21_spill] sm:$0xff] }
 0x226   : > { %v17394_v47 = vpop.f32.mrf.mxu0  ;;  %v2055_v41 = vmax.f32 %v1905_v9, 0.0  ;;  %v1921_v9 = vadd.f32 %v17291_v33, %v17264_v22 }
 0x227   : > { %21490 = vst [vmem:[#allocation29_spill] sm:$0xff] %v17394_v47  ;;  %v17400_v21 = vpop.f32.mrf.mxu1  ;;  %2607 = vmatmul.mubr.bf16.gmra.mxu1 %v21492_v49  ;;  %v17420_v49 = vpack.c.bf16 %v2050_v55, %v2049_v7  ;;  %v17435_v7 = vpack.c.bf16 %v2052_v57, %v2051_v13 }
 0x228   : > { %21491 = vst [vmem:[#allocation30_spill] sm:$0xff] %v17400_v21  ;;  %v17405_v46 = vpop.f32.mrf.mxu0  ;;  %13743 = vmatmul.mubr.bf16.gmra.mxu0 %v17388_v31  ;;  %2616 = vmatprep.mubr.bf16.mxu1 %v21458_v0 }
 0x229   : > { %21493 = vst [vmem:[#allocation21_spill] sm:$0xff] %v17405_v46  ;;  %v17409_v51 = vpop.f32.mrf.mxu1  ;;  %13746 = vmatprep.mubr.bf16.mxu0 %v17403_v40  ;;  %v1897_v46 = vadd.f32 %v17291_v33, %v17182_v25 }
 0x22a   : > { %21494 = vst [vmem:[#allocation31_spill] sm:$0xff] %v17409_v51  ;;  %v17412_v47 = vpop.f32.mrf.mxu0  ;;  %v1900_v51 = vadd.f32 %v17291_v33, %v17202_v50 }
 0x22b   : > { %21495 = vst [vmem:[#allocation32_spill] sm:$0xff] %v17412_v47  ;;  %v17414_v21 = vpop.f32.mrf.mxu1  ;;  %v2053_v50 = vmax.f32 %v1897_v46, 0.0  ;;  %v2056_v47 = vmax.f32 %v1908_v23, 0.0  ;;  %v1916_v46 = vadd.f32 %v17291_v33, %v17242_v36  ;;  %v1924_v23 = vadd.f32 %v17291_v33, %v17284_v16 }
 0x22c   : > { %v17416_v24 = vpop.f32.mrf.mxu0  ;;  %v2054_v42 = vmax.f32 %v1900_v51, 0.0 }
 0x22d   : > { %21496 = vst [vmem:[#allocation33_spill] sm:$0xff] %v17416_v24  ;;  %v17418_v30 = vpop.f32.mrf.mxu1  ;;  %v21498_v24 = vld [vmem:[#allocation25_spill] sm:$0xff]  ;;  %v2058_v22 = vmax.f32 %v1916_v46, 0.0 }
 0x22e   : > { %v17426_v53 = vpop.f32.mrf.mxu0 }
 0x22f   : > { %21497 = vst [vmem:[#allocation34_spill] sm:$0xff] %v17426_v53  ;;  %v17432_v60 = vpop.f32.mrf.mxu1  ;;  %2617 = vmatmul.mubr.bf16.gmra.mxu1 %v21498_v24 }
 0x230   : > { %v17437_v55 = vpop.f32.mrf.mxu0  ;;  %13747 = vmatmul.mubr.bf16.gmra.mxu0 %v17420_v49  ;;  %2626 = vmatprep.mubr.bf16.mxu1 %v21458_v0 }
 0x231   : > { %21499 = vst [vmem:[#allocation25_spill] sm:$0xff] %v17437_v55  ;;  %v17441_v25 = vpop.f32.mrf.mxu1  ;;  %13750 = vmatprep.mubr.bf16.mxu0 %v17435_v7  ;;  %v17452_v55 = vpack.c.bf16 %v2054_v42, %v2053_v50  ;;  %v17467_v50 = vpack.c.bf16 %v2056_v47, %v2055_v41 }
 0x232   : > { %21500 = vst [vmem:[#allocation35_spill] sm:$0xff] %v17441_v25  ;;  %v17444_v53 = vpop.f32.mrf.mxu0  ;;  %v1913_v25 = vadd.f32 %v17291_v33, %v17222_v8 }
 0x233   : > { %21501 = vst [vmem:[#allocation36_spill] sm:$0xff] %v17444_v53  ;;  %v17446_v24 = vpop.f32.mrf.mxu1 }
 0x234   : > { %v17448_v57 = vpop.f32.mrf.mxu0  ;;  %v2057_v36 = vmax.f32 %v1913_v25, 0.0  ;;  %v1932_v25 = vadd.f32 %v17291_v33, %v17281_v20 }
 0x235   : > { %21502 = vst [vmem:[#allocation37_spill] sm:$0xff] %v17448_v57  ;;  %v17450_v13 = vpop.f32.mrf.mxu1  ;;  %v21505_v57 = vld [vmem:[#allocation24_spill] sm:$0xff] }
 0x236   : > { %v17458_v51 = vpop.f32.mrf.mxu0  ;;  %v2062_v20 = vmax.f32 %v1932_v25, 0.0 }
 0x237   : > { %21503 = vst [vmem:[#allocation38_spill] sm:$0xff] %v17458_v51  ;;  %v17464_v53 = vpop.f32.mrf.mxu1  ;;  %2627 = vmatmul.mubr.bf16.gmra.mxu1 %v21505_v57  ;;  %v2059_v51 = vmax.f32 %v1921_v9, 0.0 }
 0x238   : > { %21504 = vst [vmem:[#allocation39_spill] sm:$0xff] %v17464_v53  ;;  %v17469_v42 = vpop.f32.mrf.mxu0  ;;  %13751 = vmatmul.mubr.bf16.gmra.mxu0 %v17452_v55  ;;  %2636 = vmatprep.mubr.bf16.mxu1 %v21458_v0  ;;  %v2060_v53 = vmax.f32 %v1924_v23, 0.0 }
 0x239   : > { %21506 = vst [vmem:[#allocation24_spill] sm:$0xff] %v17469_v42  ;;  %v17474_v8 = vpop.f32.mrf.mxu1  ;;  %13754 = vmatprep.mubr.bf16.mxu0 %v17467_v50  ;;  %v17485_v42 = vpack.c.bf16 %v2058_v22, %v2057_v36 }
 0x23a   : > { %21507 = vst [vmem:[#allocation40_spill] sm:$0xff] %v17474_v8  ;;  %v17477_v16 = vpop.f32.mrf.mxu0  ;;  %v1929_v8 = vadd.f32 %v17291_v33, %v17261_v26  ;;  %v17496_v9 = vpack.c.bf16 %v2060_v53, %v2059_v51 }
 0x23b   : > { %21508 = vst [vmem:[#allocation41_spill] sm:$0xff] %v17477_v16  ;;  %v17479_v57 = vpop.f32.mrf.mxu1 }
 0x23c   : > { %v17481_v47 = vpop.f32.mrf.mxu0  ;;  %v2061_v26 = vmax.f32 %v1929_v8, 0.0 }
 0x23d   : > { %21509 = vst [vmem:[#allocation42_spill] sm:$0xff] %v17481_v47  ;;  %v17483_v41 = vpop.f32.mrf.mxu1 }
 0x23e   : > { %v17491_v46 = vpop.f32.mrf.mxu0  ;;  %v17513_v51 = vpack.c.bf16 %v2062_v20, %v2061_v26  ;;  %v3913_v20 = vld [vmem:[%s17520_s16] sm:$0xff] }
 0x23f   : > { %21510 = vst [vmem:[#allocation43_spill] sm:$0xff] %v17491_v46  ;;  %v17493_v16 = vpop.f32.mrf.mxu1  ;;  %2637 = vmatmul.mubr.bf16.gmra.mxu1 %v17088_v6 }
 0x240   : > { %v17498_v23 = vpop.f32.mrf.mxu0  ;;  %13755 = vmatmul.mubr.bf16.gmra.mxu0 %v17485_v42  ;;  %2646 = vmatprep.mubr.bf16.mxu1 %v21458_v0 }
 0x241   : > { %21511 = vst [vmem:[#allocation44_spill] sm:$0xff] %v17498_v23  ;;  %v17502_v36 = vpop.f32.mrf.mxu1  ;;  %13758 = vmatprep.mubr.bf16.mxu0 %v17496_v9 }
 0x242   : > { %21512 = vst [vmem:[#allocation45_spill] sm:$0xff] %v17502_v36  ;;  %v17505_v33 = vpop.f32.mrf.mxu0 }
 0x243   : > { %21513 = vst [vmem:[#allocation46_spill] sm:$0xff] %v17505_v33  ;;  %v17507_v22 = vpop.f32.mrf.mxu1 }
 0x244   : > { %21514 = vst [vmem:[#allocation47_spill] sm:$0xff] %v17507_v22  ;;  %v17509_v6 = vpop.f32.mrf.mxu0 }
 0x245   : > { %21515 = vst [vmem:[#allocation48_spill] sm:$0xff] %v17509_v6  ;;  %v17511_v53 = vpop.f32.mrf.mxu1  ;;  %v3914_v6 = vld [vmem:[%s17520_s16 + $0x8] sm:$0xff] }
 0x246   : > { %21516 = vst [vmem:[#allocation49_spill] sm:$0xff] %v17511_v53  ;;  %v17515_v23 = vpop.f32.mrf.mxu0 }
 0x247   : > { %21517 = vst [vmem:[#allocation50_spill] sm:$0xff] %v17515_v23  ;;  %v17522_v8 = vpop.f32.mrf.mxu1  ;;  %2647 = vmatmul.mubr.bf16.gmra.mxu1 %v17086_v29  ;;  %v17540_v29 = vpack.c.bf16 %v3914_v6, %v3913_v20  ;;  %v3915_v20 = vld [vmem:[%s17520_s16 + $0x10] sm:$0xff] }
 0x248   : > { %v17525_v25 = vpop.f32.mrf.mxu0  ;;  %13759 = vmatmul.mubr.bf16.gmra.mxu0 %v17513_v51  ;;  %2656 = vmatprep.mubr.bf16.mxu1 %v21458_v0 }
 0x249   : > { %21519 = vst [vmem:[#allocation51_spill] sm:$0xff] %v17525_v25  ;;  %v17529_v26 = vpop.f32.mrf.mxu1  ;;  %4177 = vmatprep.mubr.bf16.mxu0 %v21458_v0 }
 0x24a   : > { %21520 = vst [vmem:[#allocation52_spill] sm:$0xff] %v17529_v26  ;;  %v17534_v23 = vpop.f32.mrf.mxu0  ;;  %v14296_v26 = vld [vmem:[%s21371_s5 + $0x20] ss:$12 sps:$4 sm:$0xff]  }
 0x24b   : > { %21521 = vst [vmem:[#allocation53_spill] sm:$0xff] %v17534_v23  ;;  %v17536_v33 = vpop.f32.mrf.mxu1  ;;  %13774 = vmatprep.subr.bf16.mxu1 %v14296_v26 }
 0x24c   : > { %v17538_v46 = vpop.f32.mrf.mxu0  ;;  %13775 = vmatpush3.bf16.msra.mxu1 %v14296_v26 }
 0x24d   : > { %21522 = vst [vmem:[#allocation54_spill] sm:$0xff] %v17538_v46  ;;  %v17542_v25 = vpop.f32.mrf.mxu1  ;;  %v3916_v46 = vld [vmem:[%s17520_s16 + $0x18] sm:$0xff] }
 0x24e   : > { %21523 = vst [vmem:[#allocation55_spill] sm:$0xff] %v17542_v25  ;;  %v17544_v47 = vpop.f32.mrf.mxu0 }
 0x24f   : > { %21524 = vst [vmem:[#allocation56_spill] sm:$0xff] %v17544_v47  ;;  %v17546_v53 = vpop.f32.mrf.mxu1  ;;  %2657 = vmatmul.mubr.bf16.gmra.mxu1 %v17105_v48 }
 0x250   : > { %21525 = vst [vmem:[#allocation57_spill] sm:$0xff] %v17546_v53  ;;  %v17552_v36 = vpop.f32.mrf.mxu0  ;;  %4178 = vmatmul.mubr.bf16.vlgmr.msra.gmra.mxu0 %v17540_v29  ;;  %2666 = vmatprep.mubr.bf16.mxu1 %v21458_v0 }
 0x251   : > { %21526 = vst [vmem:[#allocation58_spill] sm:$0xff] %v17552_v36  ;;  %v17556_v6 = vpop.f32.mrf.mxu1  ;;  %4187 = vmatprep.mubr.bf16.mxu0 %v21458_v0  ;;  %v17567_v36 = vpack.c.bf16 %v3916_v46, %v3915_v20  ;;  %v3917_v46 = vld [vmem:[%s17520_s16 + $0x20] sm:$0xff]  ;;  %v3918_v20 = vld [vmem:[%s17520_s16 + $0x28] sm:$0xff] }
 0x252   : > { %21527 = vst [vmem:[#allocation59_spill] sm:$0xff] %v17556_v6  ;;  %v17561_v48 = vpop.f32.mrf.mxu0 }
 0x253   : > { %21528 = vst [vmem:[#allocation60_spill] sm:$0xff] %v17561_v48  ;;  %v17563_v47 = vpop.f32.mrf.mxu1 }
 0x254   : > { %v17565_v23 = vpop.f32.mrf.mxu0 }
 0x255   : > { %21529 = vst [vmem:[#allocation61_spill] sm:$0xff] %v17565_v23  ;;  %v17569_v53 = vpop.f32.mrf.mxu1 }
 0x256   : > { %21530 = vst [vmem:[#allocation62_spill] sm:$0xff] %v17569_v53  ;;  %v17571_v25 = vpop.f32.mrf.mxu0 }
 0x257   : > { %21531 = vst [vmem:[#allocation63_spill] sm:$0xff] %v17571_v25  ;;  %v17573_v6 = vpop.f32.mrf.mxu1  ;;  %2667 = vmatmul.mubr.bf16.gmra.mxu1 %v17123_v45  ;;  %v17591_v45 = vpack.c.bf16 %v3918_v20, %v3917_v46  ;;  %v3919_v46 = vld [vmem:[%s17520_s16 + $0x30] sm:$0xff]  ;;  %v3920_v20 = vld [vmem:[%s17520_s16 + $0x38] sm:$0xff] }
 0x258   : > { %21532 = vst [vmem:[#allocation64_spill] sm:$0xff] %v17573_v6  ;;  %v17576_v22 = vpop.f32.mrf.mxu0  ;;  %4188 = vmatmul.mubr.bf16.gmra.mxu0 %v17567_v36  ;;  %2676 = vmatprep.mubr.bf16.mxu1 %v21458_v0 }
 0x259   : > { %21533 = vst [vmem:[#allocation65_spill] sm:$0xff] %v17576_v22  ;;  %v17580_v26 = vpop.f32.mrf.mxu1  ;;  %4197 = vmatprep.mubr.bf16.mxu0 %v21458_v0 }
 0x25a   : > { %21534 = vst [vmem:[#allocation66_spill] sm:$0xff] %v17580_v26  ;;  %v17585_v23 = vpop.f32.mrf.mxu0 }
 0x25b   : > { %21535 = vst [vmem:[#allocation67_spill] sm:$0xff] %v17585_v23  ;;  %v17587_v25 = vpop.f32.mrf.mxu1 }
 0x25c   : > { %21536 = vst [vmem:[#allocation68_spill] sm:$0xff] %v17587_v25  ;;  %v17589_v48 = vpop.f32.mrf.mxu0 }
 0x25d   : > { %21537 = vst [vmem:[#allocation69_spill] sm:$0xff] %v17589_v48  ;;  %v17593_v22 = vpop.f32.mrf.mxu1 }
 0x25e   : > { %21538 = vst [vmem:[#allocation70_spill] sm:$0xff] %v17593_v22  ;;  %v17595_v53 = vpop.f32.mrf.mxu0 }
 0x25f   : > { %21539 = vst [vmem:[#allocation71_spill] sm:$0xff] %v17595_v53  ;;  %v17597_v6 = vpop.f32.mrf.mxu1  ;;  %2677 = vmatmul.mubr.bf16.gmra.mxu1 %v17134_v4  ;;  %v17615_v4 = vpack.c.bf16 %v3920_v20, %v3919_v46  ;;  %v3921_v46 = vld [vmem:[%s17520_s16 + $0x40] sm:$0xff]  ;;  %v3922_v20 = vld [vmem:[%s17520_s16 + $0x48] sm:$0xff] }
 0x260   : > { %21540 = vst [vmem:[#allocation72_spill] sm:$0xff] %v17597_v6  ;;  %v17600_v26 = vpop.f32.mrf.mxu0  ;;  %4198 = vmatmul.mubr.bf16.gmra.mxu0 %v17591_v45  ;;  %2686 = vmatprep.mubr.bf16.mxu1 %v21458_v0 }
 0x261   : > { %21541 = vst [vmem:[#allocation73_spill] sm:$0xff] %v17600_v26  ;;  %v17604_v23 = vpop.f32.mrf.mxu1  ;;  %4207 = vmatprep.mubr.bf16.mxu0 %v21458_v0 }
 0x262   : > { %21542 = vst [vmem:[#allocation74_spill] sm:$0xff] %v17604_v23  ;;  %v17609_v48 = vpop.f32.mrf.mxu0 }
 0x263   : > { %21543 = vst [vmem:[#allocation75_spill] sm:$0xff] %v17609_v48  ;;  %v17611_v53 = vpop.f32.mrf.mxu1 }
 0x264   : > { %21544 = vst [vmem:[#allocation76_spill] sm:$0xff] %v17611_v53  ;;  %v17613_v22 = vpop.f32.mrf.mxu0 }
 0x265   : > { %21545 = vst [vmem:[#allocation77_spill] sm:$0xff] %v17613_v22  ;;  %v17617_v26 = vpop.f32.mrf.mxu1 }
 0x266   : > { %21546 = vst [vmem:[#allocation78_spill] sm:$0xff] %v17617_v26  ;;  %v17619_v6 = vpop.f32.mrf.mxu0 }
 0x267   : > { %21547 = vst [vmem:[#allocation79_spill] sm:$0xff] %v17619_v6  ;;  %v17621_v25 = vpop.f32.mrf.mxu1  ;;  %2687 = vmatmul.mubr.bf16.gmra.mxu1 %v17146_v34  ;;  %v17639_v34 = vpack.c.bf16 %v3922_v20, %v3921_v46  ;;  %v3923_v46 = vld [vmem:[%s17520_s16 + $0x50] sm:$0xff]  ;;  %v3924_v20 = vld [vmem:[%s17520_s16 + $0x58] sm:$0xff] }
 0x268   : > { %21548 = vst [vmem:[#allocation80_spill] sm:$0xff] %v17621_v25  ;;  %v17624_v23 = vpop.f32.mrf.mxu0  ;;  %4208 = vmatmul.mubr.bf16.gmra.mxu0 %v17615_v4  ;;  %2696 = vmatprep.mubr.bf16.mxu1 %v21458_v0 }
 0x269   : > { %21549 = vst [vmem:[#allocation81_spill] sm:$0xff] %v17624_v23  ;;  %v17628_v48 = vpop.f32.mrf.mxu1  ;;  %4217 = vmatprep.mubr.bf16.mxu0 %v21458_v0 }
 0x26a   : > { %21550 = vst [vmem:[#allocation82_spill] sm:$0xff] %v17628_v48  ;;  %v17633_v22 = vpop.f32.mrf.mxu0 }
 0x26b   : > { %21551 = vst [vmem:[#allocation83_spill] sm:$0xff] %v17633_v22  ;;  %v17635_v6 = vpop.f32.mrf.mxu1 }
 0x26c   : > { %21552 = vst [vmem:[#allocation84_spill] sm:$0xff] %v17635_v6  ;;  %v17637_v26 = vpop.f32.mrf.mxu0 }
 0x26d   : > { %21553 = vst [vmem:[#allocation85_spill] sm:$0xff] %v17637_v26  ;;  %v17641_v23 = vpop.f32.mrf.mxu1 }
 0x26e   : > { %21554 = vst [vmem:[#allocation86_spill] sm:$0xff] %v17641_v23  ;;  %v17643_v25 = vpop.f32.mrf.mxu0 }
 0x26f   : > { %21555 = vst [vmem:[#allocation87_spill] sm:$0xff] %v17643_v25  ;;  %v17645_v53 = vpop.f32.mrf.mxu1  ;;  %2697 = vmatmul.mubr.bf16.gmra.mxu1 %v17157_v17  ;;  %v17663_v17 = vpack.c.bf16 %v3924_v20, %v3923_v46  ;;  %v3925_v46 = vld [vmem:[%s17520_s16 + $0x60] sm:$0xff]  ;;  %v3926_v20 = vld [vmem:[%s17520_s16 + $0x68] sm:$0xff] }
 0x270   : > { %21556 = vst [vmem:[#allocation88_spill] sm:$0xff] %v17645_v53  ;;  %v17648_v48 = vpop.f32.mrf.mxu0  ;;  %4218 = vmatmul.mubr.bf16.gmra.mxu0 %v17639_v34  ;;  %2706 = vmatprep.mubr.bf16.mxu1 %v21458_v0 }
 0x271   : > { %21557 = vst [vmem:[#allocation89_spill] sm:$0xff] %v17648_v48  ;;  %v17652_v22 = vpop.f32.mrf.mxu1  ;;  %4227 = vmatprep.mubr.bf16.mxu0 %v21458_v0 }
 0x272   : > { %21558 = vst [vmem:[#allocation90_spill] sm:$0xff] %v17652_v22  ;;  %v17657_v26 = vpop.f32.mrf.mxu0 }
 0x273   : > { %21559 = vst [vmem:[#allocation91_spill] sm:$0xff] %v17657_v26  ;;  %v17659_v25 = vpop.f32.mrf.mxu1 }
 0x274   : > { %21560 = vst [vmem:[#allocation92_spill] sm:$0xff] %v17659_v25  ;;  %v17661_v23 = vpop.f32.mrf.mxu0 }
 0x275   : > { %21561 = vst [vmem:[#allocation93_spill] sm:$0xff] %v17661_v23  ;;  %v17665_v48 = vpop.f32.mrf.mxu1 }
 0x276   : > { %21562 = vst [vmem:[#allocation94_spill] sm:$0xff] %v17665_v48  ;;  %v17667_v53 = vpop.f32.mrf.mxu0 }
 0x277   : > { %21563 = vst [vmem:[#allocation95_spill] sm:$0xff] %v17667_v53  ;;  %v17669_v6 = vpop.f32.mrf.mxu1  ;;  %2707 = vmatmul.mubr.bf16.gmra.mxu1 %v17166_v5  ;;  %v17687_v5 = vpack.c.bf16 %v3926_v20, %v3925_v46  ;;  %v3927_v46 = vld [vmem:[%s17520_s16 + $0x70] sm:$0xff]  ;;  %v3928_v20 = vld [vmem:[%s17520_s16 + $0x78] sm:$0xff] }
 0x278   : > { %21564 = vst [vmem:[#allocation96_spill] sm:$0xff] %v17669_v6  ;;  %v17672_v22 = vpop.f32.mrf.mxu0  ;;  %4228 = vmatmul.mubr.bf16.gmra.mxu0 %v17663_v17  ;;  %2716 = vmatprep.mubr.bf16.mxu1 %v21458_v0 }
 0x279   : > { %21565 = vst [vmem:[#allocation97_spill] sm:$0xff] %v17672_v22  ;;  %v17676_v26 = vpop.f32.mrf.mxu1  ;;  %4237 = vmatprep.mubr.bf16.mxu0 %v21458_v0 }
 0x27a   : > { %21566 = vst [vmem:[#allocation98_spill] sm:$0xff] %v17676_v26  ;;  %v17681_v23 = vpop.f32.mrf.mxu0 }
 0x27b   : > { %21567 = vst [vmem:[#allocation99_spill] sm:$0xff] %v17681_v23  ;;  %v17683_v53 = vpop.f32.mrf.mxu1 }
 0x27c   : > { %21568 = vst [vmem:[#allocation100_spill] sm:$0xff] %v17683_v53  ;;  %v17685_v48 = vpop.f32.mrf.mxu0 }
 0x27d   : > { %21569 = vst [vmem:[#allocation101_spill] sm:$0xff] %v17685_v48  ;;  %v17689_v22 = vpop.f32.mrf.mxu1 }
 0x27e   : > { %21570 = vst [vmem:[#allocation102_spill] sm:$0xff] %v17689_v22  ;;  %v17691_v6 = vpop.f32.mrf.mxu0 }
 0x27f   : > { %21571 = vst [vmem:[#allocation103_spill] sm:$0xff] %v17691_v6  ;;  %v17693_v25 = vpop.f32.mrf.mxu1  ;;  %2717 = vmatmul.mubr.bf16.gmra.mxu1 %v17177_v12 }
 0x280   : > { %21572 = vst [vmem:[#allocation104_spill] sm:$0xff] %v17693_v25  ;;  %v17696_v26 = vpop.f32.mrf.mxu0  ;;  %4238 = vmatmul.mubr.bf16.gmra.mxu0 %v17687_v5  ;;  %2726 = vmatprep.mubr.bf16.mxu1 %v21458_v0  ;;  %v17711_v25 = vpack.c.bf16 %v3928_v20, %v3927_v46 }
 0x281   : > { %21573 = vst [vmem:[#allocation105_spill] sm:$0xff] %v17696_v26  ;;  %v17700_v23 = vpop.f32.mrf.mxu1  ;;  %4247 = vmatprep.mubr.bf16.mxu0 %v21458_v0 }
 0x282   : > { %21574 = vst [vmem:[#allocation106_spill] sm:$0xff] %v17700_v23  ;;  %v17705_v48 = vpop.f32.mrf.mxu0 }
 0x283   : > { %21575 = vst [vmem:[#allocation107_spill] sm:$0xff] %v17705_v48  ;;  %v17707_v22 = vpop.f32.mrf.mxu1 }
 0x284   : > { %21576 = vst [vmem:[#allocation108_spill] sm:$0xff] %v17707_v22  ;;  %v17709_v6 = vpop.f32.mrf.mxu0 }
 0x285   : > { %21577 = vst [vmem:[#allocation109_spill] sm:$0xff] %v17709_v6  ;;  %v17713_v12 = vpop.f32.mrf.mxu1 }
 0x286   : > { %21578 = vst [vmem:[#allocation110_spill] sm:$0xff] %v17713_v12  ;;  %v17715_v26 = vpop.f32.mrf.mxu0 }
 0x287   : > { %21579 = vst [vmem:[#allocation111_spill] sm:$0xff] %v17715_v26  ;;  %v17717_v53 = vpop.f32.mrf.mxu1  ;;  %2727 = vmatmul.mubr.bf16.gmra.mxu1 %v17186_v14  ;;  %v14297_v14 = vld [vmem:[%s21371_s5 + $0x8] ss:$12 sps:$4 sm:$0xff]  }
 0x288   : > { %v17720_v23 = vpop.f32.mrf.mxu0  ;;  %4248 = vmatmul.mubr.bf16.gmra.mxu0 %v17711_v25  ;;  %2736 = vmatprep.mubr.bf16.mxu1 %v21458_v0 }
 0x289   : > { %21580 = vst [vmem:[#allocation112_spill] sm:$0xff] %v17720_v23  ;;  %v17724_v48 = vpop.f32.mrf.mxu1  ;;  %13776 = vmatprep.subr.bf16.mxu1 %v14297_v14 }
 0x28a   : > { %21581 = vst [vmem:[#allocation113_spill] sm:$0xff] %v17724_v48  ;;  %v17726_v22 = vpop.f32.mrf.mxu0  ;;  %13777 = vmatpush3.bf16.msra.mxu1 %v14297_v14 }
 0x28b   : > { %21582 = vst [vmem:[#allocation114_spill] sm:$0xff] %v17726_v22  ;;  %v17728_v46 = vpop.f32.mrf.mxu1 }
 0x28c   : > { %v17730_v20 = vpop.f32.mrf.mxu0 }
 0x28d   : > { %21583 = vst [vmem:[#allocation115_spill] sm:$0xff] %v17730_v20  ;;  %v17732_v6 = vpop.f32.mrf.mxu1 }
 0x28e   : > { %21584 = vst [vmem:[#allocation116_spill] sm:$0xff] %v17732_v6  ;;  %v17734_v26 = vpop.f32.mrf.mxu0 }
 0x28f   : > { %21585 = vst [vmem:[#allocation117_spill] sm:$0xff] %v17734_v26  ;;  %v17736_v12 = vpop.f32.mrf.mxu1  ;;  %2737 = vmatmul.mubr.bf16.gmra.mxu1 %v17197_v3 }
 0x290   : > { %21586 = vst [vmem:[#allocation118_spill] sm:$0xff] %v17736_v12  ;;  %v17742_v23 = vpop.f32.mrf.mxu0  ;;  %2746 = vmatprep.mubr.bf16.mxu1 %v21458_v0 }
 0x291   : > { %21587 = vst [vmem:[#allocation119_spill] sm:$0xff] %v17742_v23  ;;  %v17745_v22 = vpop.f32.mrf.mxu1 }
 0x292   : > { %21588 = vst [vmem:[#allocation120_spill] sm:$0xff] %v17745_v22  ;;  %v17747_v20 = vpop.f32.mrf.mxu0 }
 0x293   : > { %21589 = vst [vmem:[#allocation121_spill] sm:$0xff] %v17747_v20  ;;  %v17749_v6 = vpop.f32.mrf.mxu1 }
 0x294   : > { %21590 = vst [vmem:[#allocation122_spill] sm:$0xff] %v17749_v6  ;;  %v17751_v26 = vpop.f32.mrf.mxu0 }
 0x295   : > { %21591 = vst [vmem:[#allocation123_spill] sm:$0xff] %v17751_v26  ;;  %v17753_v12 = vpop.f32.mrf.mxu1 }
 0x296   : > { %21592 = vst [vmem:[#allocation124_spill] sm:$0xff] %v17753_v12  ;;  %v17755_v3 = vpop.f32.mrf.mxu0 }
 0x297   : > { %21593 = vst [vmem:[#allocation125_spill] sm:$0xff] %v17755_v3  ;;  %v17757_v48 = vpop.f32.mrf.mxu1  ;;  %2747 = vmatmul.mubr.bf16.gmra.mxu1 %v17206_v35 }
 0x298   : > { %v17760_v23 = vpop.f32.mrf.mxu0  ;;  %2756 = vmatprep.mubr.bf16.mxu1 %v21458_v0 }
 0x299   : > { %21594 = vst [vmem:[#allocation126_spill] sm:$0xff] %v17760_v23  ;;  %v17763_v22 = vpop.f32.mrf.mxu1 }
 0x29a   : > { %21595 = vst [vmem:[#allocation127_spill] sm:$0xff] %v17763_v22  ;;  %v17767_v14 = vpop.f32.mrf.mxu0 }
 0x29b   : > { %v17765_v20 = vpop.f32.mrf.mxu1  ;;  %21597 = vst [vmem:[#allocation129_spill] sm:$0xff] %v17767_v14 }
 0x29c   : > { %21596 = vst [vmem:[#allocation128_spill] sm:$0xff] %v17765_v20  ;;  %v17774_v3 = vpop.f32.mrf.mxu0 }
 0x29d   : > { %v17769_v6 = vpop.f32.mrf.mxu1  ;;  %21599 = vst [vmem:[#allocation131_spill] sm:$0xff] %v17774_v3 }
 0x29e   : > { %21598 = vst [vmem:[#allocation130_spill] sm:$0xff] %v17769_v6  ;;  %v17781_v12 = vpop.f32.mrf.mxu0 }
 0x29f   : > { %v17771_v26 = vpop.f32.mrf.mxu1  ;;  %2757 = vmatmul.mubr.bf16.gmra.mxu1 %v17217_v1  ;;  %21602 = vst [vmem:[#allocation134_spill] sm:$0xff] %v17781_v12 }
 0x2a0   : > { %2766 = vmatprep.mubr.bf16.mxu1 %v21458_v0  ;;  %v17788_v14 = vpop.f32.mrf.mxu0 }
 0x2a1   : > { %v17777_v35 = vpop.f32.mrf.mxu1  ;;  %21605 = vst [vmem:[#allocation137_spill] sm:$0xff] %v17788_v14 }
 0x2a2   : > { %21600 = vst [vmem:[#allocation132_spill] sm:$0xff] %v17777_v35  ;;  %v17795_v6 = vpop.f32.mrf.mxu0 }
 0x2a3   : > { %v17779_v23 = vpop.f32.mrf.mxu1  ;;  %21608 = vst [vmem:[#allocation140_spill] sm:$0xff] %v17795_v6 }
 0x2a4   : > { %21601 = vst [vmem:[#allocation133_spill] sm:$0xff] %v17779_v23  ;;  %v17802_v12 = vpop.f32.mrf.mxu0 }
 0x2a5   : > { %v17783_v22 = vpop.f32.mrf.mxu1  ;;  %21611 = vst [vmem:[#allocation143_spill] sm:$0xff] %v17802_v12 }
 0x2a6   : > { %21603 = vst [vmem:[#allocation135_spill] sm:$0xff] %v17783_v22  ;;  %v17809_v22 = vpop.f32.mrf.mxu0 }
 0x2a7   : > { %v17785_v20 = vpop.f32.mrf.mxu1  ;;  %2767 = vmatmul.mubr.bf16.gmra.mxu1 %v17226_v37  ;;  %21614 = vst [vmem:[#allocation146_spill] sm:$0xff] %v17809_v22 }
 0x2a8   : > { %21604 = vst [vmem:[#allocation136_spill] sm:$0xff] %v17785_v20  ;;  %2776 = vmatprep.mubr.bf16.mxu1 %v21458_v0  ;;  %v17816_v6 = vpop.f32.mrf.mxu0 }
 0x2a9   : > { %v17791_v1 = vpop.f32.mrf.mxu1  ;;  %21617 = vst [vmem:[#allocation149_spill] sm:$0xff] %v17816_v6 }
 0x2aa   : > { %21606 = vst [vmem:[#allocation138_spill] sm:$0xff] %v17791_v1 }
 0x2ab   : > { %v17793_v3 = vpop.f32.mrf.mxu1 }
 0x2ac   : > { %21607 = vst [vmem:[#allocation139_spill] sm:$0xff] %v17793_v3 }
 0x2ad   : > { %v17797_v35 = vpop.f32.mrf.mxu1 }
 0x2ae   : > { %21609 = vst [vmem:[#allocation141_spill] sm:$0xff] %v17797_v35  ;;  %v17823_v35 = vpop.f32.mrf.mxu0 }
 0x2af   : > { %v17799_v23 = vpop.f32.mrf.mxu1  ;;  %2777 = vmatmul.mubr.bf16.gmra.mxu1 %v17237_v2  ;;  %21620 = vst [vmem:[#allocation152_spill] sm:$0xff] %v17823_v35 }
 0x2b0   : > { %21610 = vst [vmem:[#allocation142_spill] sm:$0xff] %v17799_v23  ;;  %2786 = vmatprep.mubr.bf16.mxu1 %v21458_v0  ;;  %v17830_v22 = vpop.f32.mrf.mxu0 }
 0x2b1   : > { %v17805_v37 = vpop.f32.mrf.mxu1  ;;  %21623 = vst [vmem:[#allocation155_spill] sm:$0xff] %v17830_v22 }
 0x2b2   : > { %21612 = vst [vmem:[#allocation144_spill] sm:$0xff] %v17805_v37 }
 0x2b3   : > { %v17807_v14 = vpop.f32.mrf.mxu1 }
 0x2b4   : > { %21613 = vst [vmem:[#allocation145_spill] sm:$0xff] %v17807_v14 }
 0x2b5   : > { %v17811_v1 = vpop.f32.mrf.mxu1 }
 0x2b6   : > { %21615 = vst [vmem:[#allocation147_spill] sm:$0xff] %v17811_v1  ;;  %v17837_v1 = vpop.f32.mrf.mxu0 }
 0x2b7   : > { %v17813_v3 = vpop.f32.mrf.mxu1  ;;  %2787 = vmatmul.mubr.bf16.gmra.mxu1 %v17246_v28  ;;  %21626 = vst [vmem:[#allocation158_spill] sm:$0xff] %v17837_v1 }
 0x2b8   : > { %21616 = vst [vmem:[#allocation148_spill] sm:$0xff] %v17813_v3  ;;  %2796 = vmatprep.mubr.bf16.mxu1 %v21458_v0  ;;  %v17844_v35 = vpop.f32.mrf.mxu0 }
 0x2b9   : > { %v17819_v2 = vpop.f32.mrf.mxu1  ;;  %21629 = vst [vmem:[#allocation161_spill] sm:$0xff] %v17844_v35 }
 0x2ba   : > { %21618 = vst [vmem:[#allocation150_spill] sm:$0xff] %v17819_v2 }
 0x2bb   : > { %v17821_v12 = vpop.f32.mrf.mxu1 }
 0x2bc   : > { %21619 = vst [vmem:[#allocation151_spill] sm:$0xff] %v17821_v12 }
 0x2bd   : > { %v17825_v37 = vpop.f32.mrf.mxu1 }
 0x2be   : > { %21621 = vst [vmem:[#allocation153_spill] sm:$0xff] %v17825_v37  ;;  %v17851_v37 = vpop.f32.mrf.mxu0 }
 0x2bf   : > { %v17827_v14 = vpop.f32.mrf.mxu1  ;;  %2797 = vmatmul.mubr.bf16.gmra.mxu1 %v17257_v15  ;;  %21632 = vst [vmem:[#allocation164_spill] sm:$0xff] %v17851_v37 }
 0x2c0   : > { %21622 = vst [vmem:[#allocation154_spill] sm:$0xff] %v17827_v14  ;;  %2806 = vmatprep.mubr.bf16.mxu1 %v21458_v0  ;;  %v17858_v1 = vpop.f32.mrf.mxu0 }
 0x2c1   : > { %v17833_v28 = vpop.f32.mrf.mxu1  ;;  %21635 = vst [vmem:[#allocation167_spill] sm:$0xff] %v17858_v1 }
 0x2c2   : > { %21624 = vst [vmem:[#allocation156_spill] sm:$0xff] %v17833_v28 }
 0x2c3   : > { %v17835_v6 = vpop.f32.mrf.mxu1 }
 0x2c4   : > { %21625 = vst [vmem:[#allocation157_spill] sm:$0xff] %v17835_v6 }
 0x2c5   : > { %v17839_v2 = vpop.f32.mrf.mxu1 }
 0x2c6   : > { %21627 = vst [vmem:[#allocation159_spill] sm:$0xff] %v17839_v2  ;;  %v17865_v2 = vpop.f32.mrf.mxu0 }
 0x2c7   : > { %v17841_v12 = vpop.f32.mrf.mxu1  ;;  %2807 = vmatmul.mubr.bf16.gmra.mxu1 %v17266_v43  ;;  %21638 = vst [vmem:[#allocation170_spill] sm:$0xff] %v17865_v2 }
 0x2c8   : > { %21628 = vst [vmem:[#allocation160_spill] sm:$0xff] %v17841_v12  ;;  %2816 = vmatprep.mubr.bf16.mxu1 %v21458_v0  ;;  %v17872_v37 = vpop.f32.mrf.mxu0 }
 0x2c9   : > { %v17847_v15 = vpop.f32.mrf.mxu1  ;;  %21641 = vst [vmem:[#allocation173_spill] sm:$0xff] %v17872_v37 }
 0x2ca   : > { %21630 = vst [vmem:[#allocation162_spill] sm:$0xff] %v17847_v15 }
 0x2cb   : > { %v17849_v22 = vpop.f32.mrf.mxu1 }
 0x2cc   : > { %21631 = vst [vmem:[#allocation163_spill] sm:$0xff] %v17849_v22 }
 0x2cd   : > { %v17853_v28 = vpop.f32.mrf.mxu1 }
 0x2ce   : > { %21633 = vst [vmem:[#allocation165_spill] sm:$0xff] %v17853_v28 }
 0x2cf   : > { %v17855_v6 = vpop.f32.mrf.mxu1  ;;  %2817 = vmatmul.mubr.bf16.gmra.mxu1 %v17277_v11 }
 0x2d0   : > { %21634 = vst [vmem:[#allocation166_spill] sm:$0xff] %v17855_v6  ;;  %2826 = vmatprep.mubr.bf16.mxu1 %v21458_v0  ;;  %v17879_v6 = vpop.f32.mrf.mxu0 }
 0x2d1   : > { %v17861_v43 = vpop.f32.mrf.mxu1  ;;  %21644 = vst [vmem:[#allocation176_spill] sm:$0xff] %v17879_v6 }
 0x2d2   : > { %21636 = vst [vmem:[#allocation168_spill] sm:$0xff] %v17861_v43  ;;  %v17886_v2 = vpop.f32.mrf.mxu0 }
 0x2d3   : > { %v17863_v35 = vpop.f32.mrf.mxu1  ;;  %21647 = vst [vmem:[#allocation179_spill] sm:$0xff] %v17886_v2 }
 0x2d4   : > { %21637 = vst [vmem:[#allocation169_spill] sm:$0xff] %v17863_v35 }
 0x2d5   : > { %v17867_v15 = vpop.f32.mrf.mxu1 }
 0x2d6   : > { %21639 = vst [vmem:[#allocation171_spill] sm:$0xff] %v17867_v15  ;;  %v17893_v15 = vpop.f32.mrf.mxu0 }
 0x2d7   : > { %v17869_v22 = vpop.f32.mrf.mxu1  ;;  %2827 = vmatmul.mubr.bf16.gmra.mxu1 %v17286_v27  ;;  %21650 = vst [vmem:[#allocation182_spill] sm:$0xff] %v17893_v15 }
 0x2d8   : > { %21640 = vst [vmem:[#allocation172_spill] sm:$0xff] %v17869_v22  ;;  %2836 = vmatprep.mubr.bf16.mxu1 %v21458_v0  ;;  %v17900_v6 = vpop.f32.mrf.mxu0 }
 0x2d9   : > { %v17875_v11 = vpop.f32.mrf.mxu1  ;;  %21653 = vst [vmem:[#allocation185_spill] sm:$0xff] %v17900_v6 }
 0x2da   : > { %21642 = vst [vmem:[#allocation174_spill] sm:$0xff] %v17875_v11 }
 0x2db   : > { %v17877_v1 = vpop.f32.mrf.mxu1 }
 0x2dc   : > { %21643 = vst [vmem:[#allocation175_spill] sm:$0xff] %v17877_v1 }
 0x2dd   : > { %v17881_v43 = vpop.f32.mrf.mxu1 }
 0x2de   : > { %21645 = vst [vmem:[#allocation177_spill] sm:$0xff] %v17881_v43 }
 0x2df   : > { %v17883_v35 = vpop.f32.mrf.mxu1  ;;  %2837 = vmatmul.mubr.bf16.gmra.mxu1 %v17304_v10 }
 0x2e0   : > { %21646 = vst [vmem:[#allocation178_spill] sm:$0xff] %v17883_v35  ;;  %2846 = vmatprep.mubr.bf16.mxu1 %v21458_v0  ;;  %v17907_v35 = vpop.f32.mrf.mxu0 }
 0x2e1   : > { %v17889_v27 = vpop.f32.mrf.mxu1  ;;  %21656 = vst [vmem:[#allocation188_spill] sm:$0xff] %v17907_v35 }
 0x2e2   : > { %21648 = vst [vmem:[#allocation180_spill] sm:$0xff] %v17889_v27  ;;  %v17914_v15 = vpop.f32.mrf.mxu0 }
 0x2e3   : > { %v17891_v37 = vpop.f32.mrf.mxu1  ;;  %21659 = vst [vmem:[#allocation191_spill] sm:$0xff] %v17914_v15 }
 0x2e4   : > { %21649 = vst [vmem:[#allocation181_spill] sm:$0xff] %v17891_v37 }
 0x2e5   : > { %v17895_v11 = vpop.f32.mrf.mxu1 }
 0x2e6   : > { %21651 = vst [vmem:[#allocation183_spill] sm:$0xff] %v17895_v11 }
 0x2e7   : > { %v17897_v1 = vpop.f32.mrf.mxu1  ;;  %2847 = vmatmul.mubr.bf16.gmra.mxu1 %v17324_v58 }
 0x2e8   : > { %21652 = vst [vmem:[#allocation184_spill] sm:$0xff] %v17897_v1  ;;  %2856 = vmatprep.mubr.bf16.mxu1 %v21458_v0  ;;  %v17921_v1 = vpop.f32.mrf.mxu0 }
 0x2e9   : > { %v17903_v10 = vpop.f32.mrf.mxu1  ;;  %21662 = vst [vmem:[#allocation194_spill] sm:$0xff] %v17921_v1 }
 0x2ea   : > { %21654 = vst [vmem:[#allocation186_spill] sm:$0xff] %v17903_v10  ;;  %v17928_v35 = vpop.f32.mrf.mxu0 }
 0x2eb   : > { %v17905_v2 = vpop.f32.mrf.mxu1  ;;  %21665 = vst [vmem:[#allocation197_spill] sm:$0xff] %v17928_v35 }
 0x2ec   : > { %21655 = vst [vmem:[#allocation187_spill] sm:$0xff] %v17905_v2 }
 0x2ed   : > { %v17909_v27 = vpop.f32.mrf.mxu1 }
 0x2ee   : > { %21657 = vst [vmem:[#allocation189_spill] sm:$0xff] %v17909_v27 }
 0x2ef   : > { %v17911_v37 = vpop.f32.mrf.mxu1  ;;  %2857 = vmatmul.mubr.bf16.gmra.mxu1 %v17339_v56 }
 0x2f0   : > { %21658 = vst [vmem:[#allocation190_spill] sm:$0xff] %v17911_v37  ;;  %2866 = vmatprep.mubr.bf16.mxu1 %v21458_v0  ;;  %v17935_v37 = vpop.f32.mrf.mxu0 }
 0x2f1   : > { %v17917_v58 = vpop.f32.mrf.mxu1  ;;  %21668 = vst [vmem:[#allocation200_spill] sm:$0xff] %v17935_v37 }
 0x2f2   : > { %21660 = vst [vmem:[#allocation192_spill] sm:$0xff] %v17917_v58  ;;  %v17942_v1 = vpop.f32.mrf.mxu0 }
 0x2f3   : > { %v17919_v6 = vpop.f32.mrf.mxu1  ;;  %21671 = vst [vmem:[#allocation203_spill] sm:$0xff] %v17942_v1 }
 0x2f4   : > { %21661 = vst [vmem:[#allocation193_spill] sm:$0xff] %v17919_v6 }
 0x2f5   : > { %v17923_v10 = vpop.f32.mrf.mxu1 }
 0x2f6   : > { %21663 = vst [vmem:[#allocation195_spill] sm:$0xff] %v17923_v10  ;;  %v17949_v10 = vpop.f32.mrf.mxu0 }
 0x2f7   : > { %v17925_v2 = vpop.f32.mrf.mxu1  ;;  %2867 = vmatmul.mubr.bf16.gmra.mxu1 %v17356_v54  ;;  %21674 = vst [vmem:[#allocation206_spill] sm:$0xff] %v17949_v10 }
 0x2f8   : > { %21664 = vst [vmem:[#allocation196_spill] sm:$0xff] %v17925_v2  ;;  %2876 = vmatprep.mubr.bf16.mxu1 %v21458_v0  ;;  %v17956_v37 = vpop.f32.mrf.mxu0 }
 0x2f9   : > { %v17931_v56 = vpop.f32.mrf.mxu1  ;;  %21677 = vst [vmem:[#allocation209_spill] sm:$0xff] %v17956_v37 }
 0x2fa   : > { %21666 = vst [vmem:[#allocation198_spill] sm:$0xff] %v17931_v56 }
 0x2fb   : > { %v17933_v15 = vpop.f32.mrf.mxu1 }
 0x2fc   : > { %21667 = vst [vmem:[#allocation199_spill] sm:$0xff] %v17933_v15 }
 0x2fd   : > { %v17937_v58 = vpop.f32.mrf.mxu1 }
 0x2fe   : > { %21669 = vst [vmem:[#allocation201_spill] sm:$0xff] %v17937_v58 }
 0x2ff   : > { %v17939_v6 = vpop.f32.mrf.mxu1  ;;  %2877 = vmatmul.mubr.bf16.gmra.mxu1 %v17371_v63 }
 0x300   : > { %21670 = vst [vmem:[#allocation202_spill] sm:$0xff] %v17939_v6  ;;  %2886 = vmatprep.mubr.bf16.mxu1 %v21458_v0  ;;  %v17963_v6 = vpop.f32.mrf.mxu0 }
 0x301   : > { %v17945_v54 = vpop.f32.mrf.mxu1  ;;  %21680 = vst [vmem:[#allocation212_spill] sm:$0xff] %v17963_v6 }
 0x302   : > { %21672 = vst [vmem:[#allocation204_spill] sm:$0xff] %v17945_v54  ;;  %v17970_v10 = vpop.f32.mrf.mxu0 }
 0x303   : > { %v17947_v35 = vpop.f32.mrf.mxu1  ;;  %21683 = vst [vmem:[#allocation215_spill] sm:$0xff] %v17970_v10 }
 0x304   : > { %21673 = vst [vmem:[#allocation205_spill] sm:$0xff] %v17947_v35 }
 0x305   : > { %v17951_v56 = vpop.f32.mrf.mxu1 }
 0x306   : > { %21675 = vst [vmem:[#allocation207_spill] sm:$0xff] %v17951_v56  ;;  %v17977_v56 = vpop.f32.mrf.mxu0 }
 0x307   : > { %v17953_v15 = vpop.f32.mrf.mxu1  ;;  %2887 = vmatmul.mubr.bf16.gmra.mxu1 %v17388_v31  ;;  %21686 = vst [vmem:[#allocation218_spill] sm:$0xff] %v17977_v56 }
 0x308   : > { %21676 = vst [vmem:[#allocation208_spill] sm:$0xff] %v17953_v15  ;;  %2896 = vmatprep.mubr.bf16.mxu1 %v21458_v0  ;;  %v17984_v6 = vpop.f32.mrf.mxu0 }
 0x309   : > { %v17959_v63 = vpop.f32.mrf.mxu1  ;;  %21689 = vst [vmem:[#allocation221_spill] sm:$0xff] %v17984_v6 }
 0x30a   : > { %21678 = vst [vmem:[#allocation210_spill] sm:$0xff] %v17959_v63 }
 0x30b   : > { %v17961_v1 = vpop.f32.mrf.mxu1 }
 0x30c   : > { %21679 = vst [vmem:[#allocation211_spill] sm:$0xff] %v17961_v1 }
 0x30d   : > { %v17965_v54 = vpop.f32.mrf.mxu1 }
 0x30e   : > { %21681 = vst [vmem:[#allocation213_spill] sm:$0xff] %v17965_v54 }
 0x30f   : > { %v17967_v35 = vpop.f32.mrf.mxu1  ;;  %2897 = vmatmul.mubr.bf16.gmra.mxu1 %v17403_v40 }
 0x310   : > { %21682 = vst [vmem:[#allocation214_spill] sm:$0xff] %v17967_v35  ;;  %2906 = vmatprep.mubr.bf16.mxu1 %v21458_v0  ;;  %v17991_v35 = vpop.f32.mrf.mxu0 }
 0x311   : > { %v17973_v31 = vpop.f32.mrf.mxu1  ;;  %21692 = vst [vmem:[#allocation224_spill] sm:$0xff] %v17991_v35 }
 0x312   : > { %21684 = vst [vmem:[#allocation216_spill] sm:$0xff] %v17973_v31  ;;  %v17998_v56 = vpop.f32.mrf.mxu0 }
 0x313   : > { %v17975_v37 = vpop.f32.mrf.mxu1  ;;  %21695 = vst [vmem:[#allocation227_spill] sm:$0xff] %v17998_v56 }
 0x314   : > { %21685 = vst [vmem:[#allocation217_spill] sm:$0xff] %v17975_v37 }
 0x315   : > { %v17979_v63 = vpop.f32.mrf.mxu1 }
 0x316   : > { %21687 = vst [vmem:[#allocation219_spill] sm:$0xff] %v17979_v63  ;;  %v18005_v63 = vpop.f32.mrf.mxu0 }
 0x317   : > { %v17981_v1 = vpop.f32.mrf.mxu1  ;;  %2907 = vmatmul.mubr.bf16.gmra.mxu1 %v17420_v49  ;;  %21698 = vst [vmem:[#allocation230_spill] sm:$0xff] %v18005_v63 }
 0x318   : > { %21688 = vst [vmem:[#allocation220_spill] sm:$0xff] %v17981_v1  ;;  %2916 = vmatprep.mubr.bf16.mxu1 %v21458_v0  ;;  %v18012_v35 = vpop.f32.mrf.mxu0 }
 0x319   : > { %v17987_v40 = vpop.f32.mrf.mxu1  ;;  %21701 = vst [vmem:[#allocation233_spill] sm:$0xff] %v18012_v35 }
 0x31a   : > { %21690 = vst [vmem:[#allocation222_spill] sm:$0xff] %v17987_v40 }
 0x31b   : > { %v17989_v10 = vpop.f32.mrf.mxu1 }
 0x31c   : > { %21691 = vst [vmem:[#allocation223_spill] sm:$0xff] %v17989_v10 }
 0x31d   : > { %v17993_v31 = vpop.f32.mrf.mxu1 }
 0x31e   : > { %21693 = vst [vmem:[#allocation225_spill] sm:$0xff] %v17993_v31  ;;  %v18019_v31 = vpop.f32.mrf.mxu0 }
 0x31f   : > { %v17995_v37 = vpop.f32.mrf.mxu1  ;;  %2917 = vmatmul.mubr.bf16.gmra.mxu1 %v17435_v7  ;;  %21704 = vst [vmem:[#allocation236_spill] sm:$0xff] %v18019_v31 }
 0x320   : > { %21694 = vst [vmem:[#allocation226_spill] sm:$0xff] %v17995_v37  ;;  %2926 = vmatprep.mubr.bf16.mxu1 %v21458_v0  ;;  %v18026_v63 = vpop.f32.mrf.mxu0 }
 0x321   : > { %v18001_v49 = vpop.f32.mrf.mxu1  ;;  %21707 = vst [vmem:[#allocation239_spill] sm:$0xff] %v18026_v63 }
 0x322   : > { %21696 = vst [vmem:[#allocation228_spill] sm:$0xff] %v18001_v49 }
 0x323   : > { %v18003_v6 = vpop.f32.mrf.mxu1 }
 0x324   : > { %21697 = vst [vmem:[#allocation229_spill] sm:$0xff] %v18003_v6 }
 0x325   : > { %v18007_v40 = vpop.f32.mrf.mxu1 }
 0x326   : > { %21699 = vst [vmem:[#allocation231_spill] sm:$0xff] %v18007_v40  ;;  %v18033_v40 = vpop.f32.mrf.mxu0 }
 0x327   : > { %v18009_v10 = vpop.f32.mrf.mxu1  ;;  %2927 = vmatmul.mubr.bf16.gmra.mxu1 %v17452_v55  ;;  %21710 = vst [vmem:[#allocation242_spill] sm:$0xff] %v18033_v40 }
 0x328   : > { %21700 = vst [vmem:[#allocation232_spill] sm:$0xff] %v18009_v10  ;;  %2936 = vmatprep.mubr.bf16.mxu1 %v21458_v0  ;;  %v18040_v31 = vpop.f32.mrf.mxu0 }
 0x329   : > { %v18015_v7 = vpop.f32.mrf.mxu1  ;;  %21713 = vst [vmem:[#allocation245_spill] sm:$0xff] %v18040_v31 }
 0x32a   : > { %21702 = vst [vmem:[#allocation234_spill] sm:$0xff] %v18015_v7 }
 0x32b   : > { %v18017_v56 = vpop.f32.mrf.mxu1 }
 0x32c   : > { %21703 = vst [vmem:[#allocation235_spill] sm:$0xff] %v18017_v56 }
 0x32d   : > { %v18021_v49 = vpop.f32.mrf.mxu1 }
 0x32e   : > { %21705 = vst [vmem:[#allocation237_spill] sm:$0xff] %v18021_v49 }
 0x32f   : > { %v18023_v6 = vpop.f32.mrf.mxu1  ;;  %2937 = vmatmul.mubr.bf16.gmra.mxu1 %v17467_v50 }
 0x330   : > { %21706 = vst [vmem:[#allocation238_spill] sm:$0xff] %v18023_v6  ;;  %2946 = vmatprep.mubr.bf16.mxu1 %v21458_v0  ;;  %v18047_v6 = vpop.f32.mrf.mxu0 }
 0x331   : > { %v18029_v55 = vpop.f32.mrf.mxu1  ;;  %21716 = vst [vmem:[#allocation248_spill] sm:$0xff] %v18047_v6 }
 0x332   : > { %21708 = vst [vmem:[#allocation240_spill] sm:$0xff] %v18029_v55  ;;  %v18054_v40 = vpop.f32.mrf.mxu0 }
 0x333   : > { %v18031_v35 = vpop.f32.mrf.mxu1  ;;  %21719 = vst [vmem:[#allocation251_spill] sm:$0xff] %v18054_v40 }
 0x334   : > { %21709 = vst [vmem:[#allocation241_spill] sm:$0xff] %v18031_v35 }
 0x335   : > { %v18035_v7 = vpop.f32.mrf.mxu1 }
 0x336   : > { %21711 = vst [vmem:[#allocation243_spill] sm:$0xff] %v18035_v7  ;;  %v18061_v7 = vpop.f32.mrf.mxu0 }
 0x337   : > { %v18037_v56 = vpop.f32.mrf.mxu1  ;;  %2947 = vmatmul.mubr.bf16.gmra.mxu1 %v17485_v42  ;;  %21722 = vst [vmem:[#allocation254_spill] sm:$0xff] %v18061_v7 }
 0x338   : > { %21712 = vst [vmem:[#allocation244_spill] sm:$0xff] %v18037_v56  ;;  %2956 = vmatprep.mubr.bf16.mxu1 %v21458_v0  ;;  %v18068_v6 = vpop.f32.mrf.mxu0 }
 0x339   : > { %v18043_v50 = vpop.f32.mrf.mxu1  ;;  %21725 = vst [vmem:[#allocation257_spill] sm:$0xff] %v18068_v6 }
 0x33a   : > { %21714 = vst [vmem:[#allocation246_spill] sm:$0xff] %v18043_v50 }
 0x33b   : > { %v18045_v63 = vpop.f32.mrf.mxu1 }
 0x33c   : > { %21715 = vst [vmem:[#allocation247_spill] sm:$0xff] %v18045_v63 }
 0x33d   : > { %v18049_v55 = vpop.f32.mrf.mxu1 }
 0x33e   : > { %21717 = vst [vmem:[#allocation249_spill] sm:$0xff] %v18049_v55  ;;  %v18075_v55 = vpop.f32.mrf.mxu0 }
 0x33f   : > { %v18051_v35 = vpop.f32.mrf.mxu1  ;;  %2957 = vmatmul.mubr.bf16.gmra.mxu1 %v17496_v9  ;;  %21728 = vst [vmem:[#allocation260_spill] sm:$0xff] %v18075_v55 }
 0x340   : > { %21718 = vst [vmem:[#allocation250_spill] sm:$0xff] %v18051_v35  ;;  %2966 = vmatprep.mubr.bf16.mxu1 %v21458_v0  ;;  %v18082_v7 = vpop.f32.mrf.mxu0 }
 0x341   : > { %v18057_v42 = vpop.f32.mrf.mxu1  ;;  %21731 = vst [vmem:[#allocation263_spill] sm:$0xff] %v18082_v7 }
 0x342   : > { %21720 = vst [vmem:[#allocation252_spill] sm:$0xff] %v18057_v42 }
 0x343   : > { %v18059_v31 = vpop.f32.mrf.mxu1 }
 0x344   : > { %21721 = vst [vmem:[#allocation253_spill] sm:$0xff] %v18059_v31 }
 0x345   : > { %v18063_v50 = vpop.f32.mrf.mxu1 }
 0x346   : > { %21723 = vst [vmem:[#allocation255_spill] sm:$0xff] %v18063_v50 }
 0x347   : > { %v18065_v63 = vpop.f32.mrf.mxu1  ;;  %2967 = vmatmul.mubr.bf16.gmra.mxu1 %v17513_v51 }
 0x348   : > { %21724 = vst [vmem:[#allocation256_spill] sm:$0xff] %v18065_v63  ;;  %13778 = vmatprep.mubr.bf16.mxu1 %v17540_v29  ;;  %v18089_v29 = vpop.f32.mrf.mxu0  ;;  %v14326_v63 = vld [vmem:[%s21371_s5] ss:$12 sps:$4 sm:$0xff]  }
 0x349   : > { %v18071_v9 = vpop.f32.mrf.mxu1  ;;  %21734 = vst [vmem:[#allocation266_spill] sm:$0xff] %v18089_v29 }
 0x34a   : > { %21726 = vst [vmem:[#allocation258_spill] sm:$0xff] %v18071_v9  ;;  %v18096_v55 = vpop.f32.mrf.mxu0 }
 0x34b   : > { %v18073_v40 = vpop.f32.mrf.mxu1  ;;  %21737 = vst [vmem:[#allocation269_spill] sm:$0xff] %v18096_v55 }
 0x34c   : > { %21727 = vst [vmem:[#allocation259_spill] sm:$0xff] %v18073_v40  ;;  %v14322_v40 = vld [vmem:[%s21371_s5 + $0x18] ss:$12 sps:$4 sm:$0xff]  }
 0x34d   : > { %v18077_v42 = vpop.f32.mrf.mxu1 }
 0x34e   : > { %21729 = vst [vmem:[#allocation261_spill] sm:$0xff] %v18077_v42  ;;  %v14318_v42 = vld [vmem:[%s21371_s5 + $0x30] ss:$12 sps:$4 sm:$0xff]  }
 0x34f   : > { %v18079_v31 = vpop.f32.mrf.mxu1  ;;  %13779 = vmatmul.mubr.bf16.vlgmr.msra.gmra.mxu1 %v17567_v36 }
 0x350   : > { %21730 = vst [vmem:[#allocation262_spill] sm:$0xff] %v18079_v31  ;;  %13782 = vmatprep.mubr.bf16.mxu1 %v17591_v45  ;;  %v18103_v45 = vpop.f32.mrf.mxu0  ;;  %v14314_v31 = vld [vmem:[%s21371_s5 + $0x48] ss:$12 sps:$4 sm:$0xff]  }
 0x351   : > { %v18085_v51 = vpop.f32.mrf.mxu1  ;;  %21740 = vst [vmem:[#allocation272_spill] sm:$0xff] %v18103_v45 }
 0x352   : > { %21732 = vst [vmem:[#allocation264_spill] sm:$0xff] %v18085_v51  ;;  %v18110_v29 = vpop.f32.mrf.mxu0 }
 0x353   : > { %v18087_v6 = vpop.f32.mrf.mxu1  ;;  %21743 = vst [vmem:[#allocation275_spill] sm:$0xff] %v18110_v29 }
 0x354   : > { %21733 = vst [vmem:[#allocation265_spill] sm:$0xff] %v18087_v6 }
 0x355   : > { %v18091_v9 = vpop.f32.mrf.mxu1 }
 0x356   : > { %21735 = vst [vmem:[#allocation267_spill] sm:$0xff] %v18091_v9 }
 0x357   : > { %v18093_v50 = vpop.f32.mrf.mxu1  ;;  %13783 = vmatmul.mubr.bf16.gmra.mxu1 %v17615_v4 }
 0x358   : > { %21736 = vst [vmem:[#allocation268_spill] sm:$0xff] %v18093_v50  ;;  %13786 = vmatprep.mubr.bf16.mxu1 %v17639_v34  ;;  %v18117_v34 = vpop.f32.mrf.mxu0  ;;  %v14310_v50 = vld [vmem:[%s21371_s5 + $0x60] ss:$12 sps:$4 sm:$0xff]  }
 0x359   : > { %v18099_v36 = vpop.f32.mrf.mxu1  ;;  %21746 = vst [vmem:[#allocation278_spill] sm:$0xff] %v18117_v34 }
 0x35a   : > { %21738 = vst [vmem:[#allocation270_spill] sm:$0xff] %v18099_v36  ;;  %v18124_v45 = vpop.f32.mrf.mxu0 }
 0x35b   : > { %v18101_v7 = vpop.f32.mrf.mxu1  ;;  %21749 = vst [vmem:[#allocation281_spill] sm:$0xff] %v18124_v45 }
 0x35c   : > { %21739 = vst [vmem:[#allocation271_spill] sm:$0xff] %v18101_v7 }
 0x35d   : > { %v18105_v51 = vpop.f32.mrf.mxu1 }
 0x35e   : > { %21741 = vst [vmem:[#allocation273_spill] sm:$0xff] %v18105_v51 }
 0x35f   : > { %v18107_v6 = vpop.f32.mrf.mxu1  ;;  %13787 = vmatmul.mubr.bf16.gmra.mxu1 %v17663_v17 }
 0x360   : > { %21742 = vst [vmem:[#allocation274_spill] sm:$0xff] %v18107_v6  ;;  %13790 = vmatprep.mubr.bf16.mxu1 %v17687_v5  ;;  %v18131_v5 = vpop.f32.mrf.mxu0 }
 0x361   : > { %v18113_v4 = vpop.f32.mrf.mxu1  ;;  %21752 = vst [vmem:[#allocation284_spill] sm:$0xff] %v18131_v5 }
 0x362   : > { %21744 = vst [vmem:[#allocation276_spill] sm:$0xff] %v18113_v4  ;;  %v18137_v34 = vpop.f32.mrf.mxu0 }
 0x363   : > { %v18115_v55 = vpop.f32.mrf.mxu1  ;;  %21755 = vst [vmem:[#allocation287_spill] sm:$0xff] %v18137_v34 }
 0x364   : > { %21745 = vst [vmem:[#allocation277_spill] sm:$0xff] %v18115_v55 }
 0x365   : > { %v18119_v36 = vpop.f32.mrf.mxu1 }
 0x366   : > { %21747 = vst [vmem:[#allocation279_spill] sm:$0xff] %v18119_v36 }
 0x367   : > { %v18121_v9 = vpop.f32.mrf.mxu1  ;;  %13791 = vmatmul.mubr.bf16.gmra.mxu1 %v17711_v25  ;;  %v18143_v25 = vpop.f32.mrf.mxu0 }
 0x368   : > { %21748 = vst [vmem:[#allocation280_spill] sm:$0xff] %v18121_v9  ;;  %4956 = vmatprep.mubr.bf16.mxu1 %v21458_v0  ;;  %21758 = vst [vmem:[#allocation290_spill] sm:$0xff] %v18143_v25 }
 0x369   : > { %v18127_v17 = vpop.f32.mrf.mxu1 }
 0x36a   : > { %21750 = vst [vmem:[#allocation282_spill] sm:$0xff] %v18127_v17  ;;  %v18149_v17 = vpop.f32.mrf.mxu0 }
 0x36b   : > { %v18129_v29 = vpop.f32.mrf.mxu1  ;;  %21761 = vst [vmem:[#allocation293_spill] sm:$0xff] %v18149_v17 }
 0x36c   : > { %21751 = vst [vmem:[#allocation283_spill] sm:$0xff] %v18129_v29 }
 0x36d   : > { %v18133_v4 = vpop.f32.mrf.mxu1 }
 0x36e   : > { %21753 = vst [vmem:[#allocation285_spill] sm:$0xff] %v18133_v4  ;;  %v18155_v4 = vpop.f32.mrf.mxu0 }
 0x36f   : > { %v18135_v55 = vpop.f32.mrf.mxu1  ;;  %21764 = vst [vmem:[#allocation296_spill] sm:$0xff] %v18155_v4 }
 0x370   : > { %21754 = vst [vmem:[#allocation286_spill] sm:$0xff] %v18135_v55 }
 0x371   : > { %v18139_v36 = vpop.f32.mrf.mxu1 }
 0x372   : > { %21756 = vst [vmem:[#allocation288_spill] sm:$0xff] %v18139_v36  ;;  %v18161_v36 = vpop.f32.mrf.mxu0 }
 0x373   : > { %v18141_v9 = vpop.f32.mrf.mxu1  ;;  %21767 = vst [vmem:[#allocation299_spill] sm:$0xff] %v18161_v36 }
 0x374   : > { %21757 = vst [vmem:[#allocation289_spill] sm:$0xff] %v18141_v9 }
 0x375   : > { %v18145_v45 = vpop.f32.mrf.mxu1 }
 0x376   : > { %21759 = vst [vmem:[#allocation291_spill] sm:$0xff] %v18145_v45  ;;  %v18167_v45 = vpop.f32.mrf.mxu0 }
 0x377   : > { %v18147_v51 = vpop.f32.mrf.mxu1  ;;  %21770 = vst [vmem:[#allocation302_spill] sm:$0xff] %v18167_v45  ;;  %v18192_v45 = vld [vmem:[%s21371_s5 + $0xac] ss:$12 sps:$4 sm:$0xff]  }
 0x378   : > { %21760 = vst [vmem:[#allocation292_spill] sm:$0xff] %v18147_v51  ;;  %4924 = vmatprep.subr.bf16.mxu1 %v18192_v45 }
 0x379   : > { %v18151_v29 = vpop.f32.mrf.mxu1 }
 0x37a   : > { %21762 = vst [vmem:[#allocation294_spill] sm:$0xff] %v18151_v29  ;;  %v18173_v29 = vpop.f32.mrf.mxu0 }
 0x37b   : > { %v18153_v5 = vpop.f32.mrf.mxu1 }
 0x37c   : > { %21763 = vst [vmem:[#allocation295_spill] sm:$0xff] %v18153_v5 }
 0x37d   : > { %v18157_v55 = vpop.f32.mrf.mxu1 }
 0x37e   : > { %21765 = vst [vmem:[#allocation297_spill] sm:$0xff] %v18157_v55  ;;  %v18179_v55 = vpop.f32.mrf.mxu0 }
 0x37f   : > { %v18159_v34 = vpop.f32.mrf.mxu1 }
 0x380   : > { %21766 = vst [vmem:[#allocation298_spill] sm:$0xff] %v18159_v34 }
 0x381   : > { %v18163_v9 = vpop.f32.mrf.mxu1 }
 0x382   : > { %21768 = vst [vmem:[#allocation300_spill] sm:$0xff] %v18163_v9  ;;  %v18185_v9 = vpop.f32.mrf.mxu0 }
 0x383   : > { %v18165_v25 = vpop.f32.mrf.mxu1 }
 0x384   : > { %21769 = vst [vmem:[#allocation301_spill] sm:$0xff] %v18165_v25 }
 0x385   : > { %v18169_v51 = vpop.f32.mrf.mxu1 }
 0x386   : > { %21771 = vst [vmem:[#allocation303_spill] sm:$0xff] %v18169_v51  ;;  %v14299_v51 = vld [vmem:[%s21371_s5 + $0xa8] ss:$12 sps:$4 sm:$0xff]  }
 0x387   : > { %v18171_v17 = vpop.f32.mrf.mxu1  ;;  %4925 = vmatpush1.bf16.msra.mxu1 %v14299_v51 }
 0x388   : > { %21772 = vst [vmem:[#allocation304_spill] sm:$0xff] %v18171_v17  ;;  %v14302_v17 = vld [vmem:[%s21371_s5 + $0x90] ss:$12 sps:$4 sm:$0xff]  }
 0x389   : > { %v18175_v5 = vpop.f32.mrf.mxu1 }
 0x38a   : > { %21773 = vst [vmem:[#allocation305_spill] sm:$0xff] %v18175_v5  ;;  %v14298_v5 = vld [vmem:[%s21371_s5 + $0xb0] ss:$12 sps:$4 sm:$0xff]  }
 0x38b   : > { %v18177_v4 = vpop.f32.mrf.mxu1  ;;  %13794 = vmatprep.subr.bf16.mxu0 %v14298_v5 }
 0x38c   : > { %21774 = vst [vmem:[#allocation306_spill] sm:$0xff] %v18177_v4  ;;  %13795 = vmatpush3.bf16.msra.mxu0 %v14298_v5  ;;  %v14304_v4 = vld [vmem:[%s21371_s5 + $0x94] ss:$12 sps:$4 sm:$0xff]   ;;  %v14308_v5 = vld [vmem:[%s21371_s5 + $0x7c] ss:$12 sps:$4 sm:$0xff]  }
 0x38d   : > { %v18181_v34 = vpop.f32.mrf.mxu1  ;;  %4926 = vmatprep.subr.bf16.mxu1 %v14304_v4 }
 0x38e   : > { %21775 = vst [vmem:[#allocation307_spill] sm:$0xff] %v18181_v34  ;;  %4927 = vmatpush1.bf16.msra.mxu1 %v14302_v17 }
 0x38f   : > { %v18183_v36 = vpop.f32.mrf.mxu1  ;;  %4928 = vmatprep.subr.bf16.mxu1 %v14308_v5 }
 0x390   : > { %21776 = vst [vmem:[#allocation308_spill] sm:$0xff] %v18183_v36  ;;  %v18203_v36 = vpop.f32.mrf.mxu0 }
 0x391   : > { %v18187_v25 = vpop.f32.mrf.mxu1 }
 0x392   : > { %21777 = vst [vmem:[#allocation309_spill] sm:$0xff] %v18187_v25  ;;  %v18218_v7 = vpop.f32.mrf.mxu0 }
 0x393   : > { %v18200_v34 = vpop.f32.mrf.mxu1 }
 0x394   : > { %21778 = vst [vmem:[#allocation310_spill] sm:$0xff] %v18200_v34  ;;  %v14305_v34 = vld [vmem:[%s21371_s5 + $0x98] ss:$12 sps:$4 sm:$0xff]   ;;  %v18233_v17 = vpop.f32.mrf.mxu0 }
 0x395   : > { %v18205_v25 = vpop.f32.mrf.mxu1  ;;  %13796 = vmatprep.subr.bf16.mxu0 %v14305_v34 }
 0x396   : > { %21779 = vst [vmem:[#allocation311_spill] sm:$0xff] %v18205_v25  ;;  %13797 = vmatpush3.bf16.msra.mxu0 %v14305_v34  ;;  %v14306_v25 = vld [vmem:[%s21371_s5 + $0x78] ss:$12 sps:$4 sm:$0xff]  }
 0x397   : > { %v18216_v6 = vpop.f32.mrf.mxu1  ;;  %4929 = vmatpush1.bf16.msra.mxu1 %v14306_v25  ;;  %v18248_v25 = vpop.f32.mrf.mxu0 }
 0x398   : > { %21780 = vst [vmem:[#allocation312_spill] sm:$0xff] %v18216_v6  ;;  %v14309_v6 = vld [vmem:[%s21371_s5 + $0x80] ss:$12 sps:$4 sm:$0xff]  }
 0x399   : > { %v18220_v51 = vpop.f32.mrf.mxu1  ;;  %13798 = vmatprep.subr.bf16.mxu0 %v14309_v6 }
 0x39a   : > { %21781 = vst [vmem:[#allocation313_spill] sm:$0xff] %v18220_v51  ;;  %13799 = vmatpush3.bf16.msra.mxu0 %v14309_v6  ;;  %v14312_v51 = vld [vmem:[%s21371_s5 + $0x64] ss:$12 sps:$4 sm:$0xff]  }
 0x39b   : > { %v18231_v4 = vpop.f32.mrf.mxu1  ;;  %4930 = vmatprep.subr.bf16.mxu1 %v14312_v51 }
 0x39c   : > { %21782 = vst [vmem:[#allocation314_spill] sm:$0xff] %v18231_v4  ;;  %v14313_v4 = vld [vmem:[%s21371_s5 + $0x68] ss:$12 sps:$4 sm:$0xff]   ;;  %4931 = vmatpush1.bf16.msra.mxu1 %v14310_v50  ;;  %v18263_v50 = vpop.f32.mrf.mxu0 }
 0x39d   : > { %v18235_v34 = vpop.f32.mrf.mxu1  ;;  %13800 = vmatprep.subr.bf16.mxu0 %v14313_v4 }
 0x39e   : > { %21783 = vst [vmem:[#allocation315_spill] sm:$0xff] %v18235_v34  ;;  %13801 = vmatpush3.bf16.msra.mxu0 %v14313_v4  ;;  %v14316_v34 = vld [vmem:[%s21371_s5 + $0x4c] ss:$12 sps:$4 sm:$0xff]  }
 0x39f   : > { %v18246_v5 = vpop.f32.mrf.mxu1  ;;  %4932 = vmatprep.subr.bf16.mxu1 %v14316_v34 }
 0x3a0   : > { %21784 = vst [vmem:[#allocation316_spill] sm:$0xff] %v18246_v5  ;;  %v14317_v5 = vld [vmem:[%s21371_s5 + $0x50] ss:$12 sps:$4 sm:$0xff]   ;;  %4933 = vmatpush1.bf16.msra.mxu1 %v14314_v31  ;;  %v18278_v31 = vpop.f32.mrf.mxu0 }
 0x3a1   : > { %v18250_v6 = vpop.f32.mrf.mxu1  ;;  %13802 = vmatprep.subr.bf16.mxu0 %v14317_v5 }
 0x3a2   : > { %21785 = vst [vmem:[#allocation317_spill] sm:$0xff] %v18250_v6  ;;  %13803 = vmatpush3.bf16.msra.mxu0 %v14317_v5  ;;  %v14320_v6 = vld [vmem:[%s21371_s5 + $0x34] ss:$12 sps:$4 sm:$0xff]  }
 0x3a3   : > { %v18261_v51 = vpop.f32.mrf.mxu1  ;;  %4934 = vmatprep.subr.bf16.mxu1 %v14320_v6 }
 0x3a4   : > { %21786 = vst [vmem:[#allocation318_spill] sm:$0xff] %v18261_v51  ;;  %v14321_v51 = vld [vmem:[%s21371_s5 + $0x38] ss:$12 sps:$4 sm:$0xff]   ;;  %4935 = vmatpush1.bf16.msra.mxu1 %v14318_v42  ;;  %v18293_v42 = vpop.f32.mrf.mxu0 }
 0x3a5   : > { %v18265_v4 = vpop.f32.mrf.mxu1  ;;  %13804 = vmatprep.subr.bf16.mxu0 %v14321_v51 }
 0x3a6   : > { %21787 = vst [vmem:[#allocation319_spill] sm:$0xff] %v18265_v4  ;;  %13805 = vmatpush3.bf16.msra.mxu0 %v14321_v51  ;;  %v14324_v4 = vld [vmem:[%s21371_s5 + $0x1c] ss:$12 sps:$4 sm:$0xff]  }
 0x3a7   : > { %v18276_v34 = vpop.f32.mrf.mxu1  ;;  %4936 = vmatprep.subr.bf16.mxu1 %v14324_v4 }
 0x3a8   : > { %21788 = vst [vmem:[#allocation320_spill] sm:$0xff] %v18276_v34  ;;  %v14325_v34 = vld [vmem:[%s21371_s5 + $0x20] ss:$12 sps:$4 sm:$0xff]   ;;  %4937 = vmatpush1.bf16.msra.mxu1 %v14322_v40  ;;  %v18308_v40 = vpop.f32.mrf.mxu0 }
 0x3a9   : > { %v18280_v5 = vpop.f32.mrf.mxu1  ;;  %13806 = vmatprep.subr.bf16.mxu0 %v14325_v34 }
 0x3aa   : > { %21789 = vst [vmem:[#allocation321_spill] sm:$0xff] %v18280_v5  ;;  %13807 = vmatpush3.bf16.msra.mxu0 %v14325_v34  ;;  %v14328_v5 = vld [vmem:[%s21371_s5 + $0x4] ss:$12 sps:$4 sm:$0xff]   ;;  %v18315_v35 = vpop.f32.mrf.mxu0 }
 0x3ab   : > { %v18291_v6 = vpop.f32.mrf.mxu1  ;;  %4938 = vmatprep.subr.bf16.mxu1 %v14328_v5 }
 0x3ac   : > { %21790 = vst [vmem:[#allocation322_spill] sm:$0xff] %v18291_v6  ;;  %v14329_v6 = vld [vmem:[%s21371_s5 + $0x8] ss:$12 sps:$4 sm:$0xff]   ;;  %4939 = vmatpush1.bf16.msra.mxu1 %v14326_v63  ;;  %v18321_v10 = vpop.f32.mrf.mxu0 }
 0x3ad   : > { %v18295_v51 = vpop.f32.mrf.mxu1  ;;  %13808 = vmatprep.subr.bf16.mxu0 %v14329_v6 }
 0x3ae   : > { %21791 = vst [vmem:[#allocation323_spill] sm:$0xff] %v18295_v51  ;;  %13809 = vmatpush3.bf16.msra.mxu0 %v14329_v6  ;;  %v18327_v63 = vpop.f32.mrf.mxu0  ;;  %v2161_v6 = vlaneseq }
 0x3af   : > { %v18306_v4 = vpop.f32.mrf.mxu1  ;;  %5704 = vmatprep.subr.bf16.mxu0 %v18192_v45 }
 0x3b0   : > { %21792 = vst [vmem:[#allocation324_spill] sm:$0xff] %v18306_v4 }
 0x3b1   : > { %v18310_v34 = vpop.f32.mrf.mxu1 }
 0x3b2   : > { %21793 = vst [vmem:[#allocation325_spill] sm:$0xff] %v18310_v34 }
 0x3b3   : > { %v18313_v51 = vpop.f32.mrf.mxu1 }
 0x3b4   : > { %21794 = vst [vmem:[#allocation326_spill] sm:$0xff] %v18313_v51  ;;  %v18333_v51 = vpop.f32.mrf.mxu0 }
 0x3b5   : > { %v18317_v56 = vpop.f32.mrf.mxu1 }
 0x3b6   : > { %21795 = vst [vmem:[#allocation327_spill] sm:$0xff] %v18317_v56  ;;  %v18337_v56 = vshrl.u32 %v2161_v6, 7  ;;  %v18341_v1 = vpop.f32.mrf.mxu0 }
 0x3b7   : > { %v18319_v49 = vpop.f32.mrf.mxu1 }
 0x3b8   : > { %21796 = vst [vmem:[#allocation328_spill] sm:$0xff] %v18319_v49  ;;  %v18353_v54 = vpop.f32.mrf.mxu0  ;;  %v2167_v6 = vsub.s32 1, %v18337_v56 }
 0x3b9   : > { %v18323_v5 = vpop.f32.mrf.mxu1 }
 0x3ba   : > { %21797 = vst [vmem:[#allocation329_spill] sm:$0xff] %v18323_v5 }
 0x3bb   : > { %v18325_v4 = vpop.f32.mrf.mxu1 }
 0x3bc   : > { %21798 = vst [vmem:[#allocation330_spill] sm:$0xff] %v18325_v4  ;;  %v2163_v4 = vsub.s32 0, %v18337_v56 }
 0x3bd   : > { %v18329_v34 = vpop.f32.mrf.mxu1 }
 0x3be   : > { %21799 = vst [vmem:[#allocation331_spill] sm:$0xff] %v18329_v34  ;;  %v18349_v34 = vld [vmem:[%s21372_s6] sm:$0x7] }
 0x3bf   : > { %v18331_v45 = vpop.f32.mrf.mxu1  ;;  %v18366_v58 = vrot.slane %v18349_v34, %v2167_v6 }
 0x3c0   : > { %21800 = vst [vmem:[#allocation332_spill] sm:$0xff] %v18331_v45 }
 0x3c1   : > { %v18335_v37 = vpop.f32.mrf.mxu1 }
 0x3c2   : > { %21801 = vst [vmem:[#allocation333_spill] sm:$0xff] %v18335_v37 }
 0x3c3   : > { %v18339_v49 = vpop.f32.mrf.mxu1 }
 0x3c4   : > { %21802 = vst [vmem:[#allocation334_spill] sm:$0xff] %v18339_v49  ;;  %v18359_v49 = vrot.slane %v18349_v34, %v2163_v4  ;;  %v2341_v4 = vadd.f32 %v17313_v19, %v18366_v58 }
 0x3c5   : > { %v18343_v5 = vpop.f32.mrf.mxu1 }
 0x3c6   : > { %21803 = vst [vmem:[#allocation335_spill] sm:$0xff] %v18343_v5  ;;  %v18363_v5 = vpop.f32.mrf.mxu0  ;;  %v2343_v6 = vadd.f32 %v17318_v44, %v18359_v49  ;;  %v4356_v43 = vadd.f32 %v18179_v55, %v2341_v4  ;;  %v2349_v19 = vadd.f32 %v17336_v38, %v18359_v49 }
 0x3c7   : > { %v18351_v45 = vpop.f32.mrf.mxu1 }
 0x3c8   : > { %21804 = vst [vmem:[#allocation336_spill] sm:$0xff] %v18351_v45  ;;  %v2339_v45 = vadd.f32 %v17301_v52, %v18359_v49  ;;  %v4359_v4 = vadd.f32 %v18218_v7, %v2349_v19  ;;  %v21816_v19 = vld [vmem:[#allocation18_spill] sm:$0xff] }
 0x3c9   : > { %v18356_v37 = vpop.f32.mrf.mxu1 }
 0x3ca   : > { %21805 = vst [vmem:[#allocation337_spill] sm:$0xff] %v18356_v37  ;;  %v4355_v11 = vadd.f32 %v18173_v29, %v2339_v45  ;;  %v18375_v37 = vpop.f32.mrf.mxu0  ;;  %v2345_v29 = vadd.f32 %v17322_v59, %v18366_v58  ;;  %v4357_v45 = vadd.f32 %v18185_v9, %v2343_v6  ;;  %v2353_v59 = vadd.f32 %v17350_v18, %v18359_v49 }
 0x3cb   : > { %v18361_v15 = vpop.f32.mrf.mxu1  ;;  %v12063_v18 = vmul.f32 -1.442695, %v4359_v4 }
 0x3cc   : > { %21806 = vst [vmem:[#allocation338_spill] sm:$0xff] %v18361_v15  ;;  %v12059_v22 = vmul.f32 -1.442695, %v4355_v11  ;;  %v18386_v52 = vpop.f32.mrf.mxu0  ;;  %v4358_v44 = vadd.f32 %v18203_v36, %v2345_v29  ;;  %v2351_v11 = vadd.f32 %v17345_v32, %v18366_v58  ;;  %v12061_v9 = vmul.f32 -1.442695, %v4357_v45 }
 0x3cd   : > { %v18368_v2 = vpop.f32.mrf.mxu1  ;;  %v4361_v32 = vadd.f32 %v18248_v25, %v2353_v59  ;;  %v21818_v59 = vld [vmem:[#allocation26_spill] sm:$0xff] }
 0x3ce   : > { %21807 = vst [vmem:[#allocation339_spill] sm:$0xff] %v18368_v2  ;;  %14458 = vpow2.f32 %v12059_v22  ;;  %v18400_v55 = vpop.f32.mrf.mxu0  ;;  %v4360_v38 = vadd.f32 %v18233_v17, %v2351_v11  ;;  %v12062_v36 = vmul.f32 -1.442695, %v4358_v44  ;;  %v2359_v17 = vadd.f32 %v21816_v19, %v18359_v49 }
 0x3cf   : > { %v18372_v27 = vpop.f32.mrf.mxu1 }
 0x3d0   : > { %21808 = vst [vmem:[#allocation340_spill] sm:$0xff] %v18372_v27  ;;  %v18413_v29 = vpop.f32.mrf.mxu0  ;;  %v12064_v11 = vmul.f32 -1.442695, %v4360_v38  ;;  %v4363_v25 = vadd.f32 %v18278_v31, %v2359_v17  ;;  %v2365_v31 = vadd.f32 %v17386_v39, %v18366_v58  ;;  %v21824_v39 = vld [vmem:[#allocation31_spill] sm:$0xff] }
 0x3d1   : > { %v18379_v15 = vpop.f32.mrf.mxu1 }
 0x3d2   : > { %21809 = vst [vmem:[#allocation341_spill] sm:$0xff] %v18379_v15  ;;  %v12060_v15 = vmul.f32 -1.442695, %v4356_v43  ;;  %v2355_v43 = vadd.f32 %v17354_v61, %v18366_v58  ;;  %v12065_v61 = vmul.f32 -1.442695, %v4361_v32  ;;  %v18423_v44 = vpop.f32.mrf.mxu0 }
 0x3d3   : > { %v18384_v2 = vpop.f32.mrf.mxu1  ;;  %v12067_v32 = vmul.f32 -1.442695, %v4363_v25  ;;  %v2371_v25 = vadd.f32 %v21824_v39, %v18366_v58 }
 0x3d4   : > { %21810 = vst [vmem:[#allocation342_spill] sm:$0xff] %v18384_v2  ;;  %14460 = vpow2.f32 %v12060_v15  ;;  %v4362_v45 = vadd.f32 %v18263_v50, %v2355_v43  ;;  %v2363_v43 = vadd.f32 %v17382_v62, %v18359_v49  ;;  %v18436_v19 = vpop.f32.mrf.mxu0 }
 0x3d5   : > { %v18391_v27 = vpop.f32.mrf.mxu1  ;;  %14462 = vpow2.f32 %v12061_v9  ;;  %v2361_v9 = vadd.f32 %v21818_v59, %v18366_v58 }
 0x3d6   : > { %21811 = vst [vmem:[#allocation343_spill] sm:$0xff] %v18391_v27  ;;  %14464 = vpow2.f32 %v12062_v36  ;;  %v12066_v4 = vmul.f32 -1.442695, %v4362_v45 }
 0x3d7   : > { %v18396_v28 = vpop.f32.mrf.mxu1  ;;  %14466 = vpow2.f32 %v12063_v18  ;;  %v4364_v38 = vadd.f32 %v18293_v42, %v2361_v9  ;;  %v4365_v18 = vadd.f32 %v18308_v40, %v2363_v43 }
 0x3d8   : > { %21812 = vst [vmem:[#allocation344_spill] sm:$0xff] %v18396_v28  ;;  %14468 = vpow2.f32 %v12064_v11  ;;  %v21822_v11 = vld [vmem:[#allocation30_spill] sm:$0xff] }
 0x3d9   : > { %v18405_v6 = vpop.f32.mrf.mxu1  ;;  %14470 = vpow2.f32 %v12065_v61  ;;  %v2369_v62 = vadd.f32 %v21822_v11, %v18359_v49  ;;  %v4366_v61 = vadd.f32 %v18315_v35, %v2365_v31  ;;  %v12068_v42 = vmul.f32 -1.442695, %v4364_v38 }
 0x3da   : > { %21813 = vst [vmem:[#allocation345_spill] sm:$0xff] %v18405_v6  ;;  %14472 = vpow2.f32 %v12066_v4  ;;  %v12069_v40 = vmul.f32 -1.442695, %v4365_v18  ;;  %v2373_v35 = vadd.f32 %v17414_v21, %v18359_v49  ;;  %v4368_v31 = vadd.f32 %v18327_v63, %v2371_v25 }
 0x3db   : > { %v18411_v22 = vpop.f32.mrf.mxu1  ;;  %v14459_v17 = vpop.eup %14458  ;;  %14474 = vpow2.f32 %v12067_v32  ;;  %v4367_v4 = vadd.f32 %v18321_v10, %v2369_v62  ;;  %v12070_v38 = vmul.f32 -1.442695, %v4366_v61  ;;  %v2375_v21 = vadd.f32 %v17418_v30, %v18366_v58 }
 0x3dc   : > { %21814 = vst [vmem:[#allocation346_spill] sm:$0xff] %v18411_v22  ;;  %14476 = vpow2.f32 %v12068_v42  ;;  %v4369_v10 = vadd.f32 %v18333_v51, %v2373_v35  ;;  %v12072_v63 = vmul.f32 -1.442695, %v4368_v31  ;;  %v2379_v51 = vadd.f32 %v17432_v60, %v18359_v49 }
 0x3dd   : > { %v18416_v7 = vpop.f32.mrf.mxu1  ;;  %v12071_v32 = vmul.f32 -1.442695, %v4367_v4  ;;  %v4370_v25 = vadd.f32 %v18341_v1, %v2375_v21  ;;  %v2383_v60 = vadd.f32 %v17446_v24, %v18359_v49  ;;  %v21833_v24 = vld [vmem:[#allocation39_spill] sm:$0xff] }
 0x3de   : > { %21815 = vst [vmem:[#allocation347_spill] sm:$0xff] %v18416_v7 }
 0x3df   : > { %v18420_v15 = vpop.f32.mrf.mxu1 }
 0x3e0   : > { %21817 = vst [vmem:[#allocation18_spill] sm:$0xff] %v18420_v15 }
 0x3e1   : > { %v18427_v50 = vpop.f32.mrf.mxu1  ;;  %v14461_v9 = vpop.eup %14460 }
 0x3e2   : > { %21819 = vst [vmem:[#allocation26_spill] sm:$0xff] %v18427_v50  ;;  %v4483_v50 = vadd.f32 1.0, %v14459_v17  ;;  %v4484_v11 = vadd.f32 1.0, %v14461_v9 }
 0x3e3   : > { %v18432_v36 = vpop.f32.mrf.mxu1 }
 0x3e4   : > { %21820 = vst [vmem:[#allocation348_spill] sm:$0xff] %v18432_v36  ;;  %v18449_v36 = vpop.f32.mrf.mxu0  ;;  %14478 = vrcp.f32 %v4483_v50 }
 0x3e5   : > { %v18439_v45 = vpop.f32.mrf.mxu1  ;;  %14480 = vpow2.f32 %v12069_v40  ;;  %v21829_v40 = vld [vmem:[#allocation35_spill] sm:$0xff] }
 0x3e6   : > { %21821 = vst [vmem:[#allocation349_spill] sm:$0xff] %v18439_v45  ;;  %v14463_v45 = vpop.eup %14462  ;;  %v18459_v62 = vpop.f32.mrf.mxu0  ;;  %14482 = vpow2.f32 %v12070_v38  ;;  %v2381_v30 = vadd.f32 %v21829_v40, %v18366_v58 }
 0x3e7   : > { %v18444_v59 = vpop.f32.mrf.mxu1  ;;  %v14465_v17 = vpop.eup %14464  ;;  %v4485_v18 = vadd.f32 1.0, %v14463_v45  ;;  %14484 = vrcp.f32 %v4484_v11  ;;  %v12073_v45 = vmul.f32 -1.442695, %v4369_v10 }
 0x3e8   : > { %21823 = vst [vmem:[#allocation30_spill] sm:$0xff] %v18444_v59  ;;  %v4486_v42 = vadd.f32 1.0, %v14465_v17  ;;  %14486 = vpow2.f32 %v12071_v32  ;;  %v18470_v4 = vpop.f32.mrf.mxu0  ;;  %v4371_v17 = vadd.f32 %v18353_v54, %v2379_v51  ;;  %v4372_v1 = vadd.f32 %v18363_v5, %v2381_v30 }
 0x3e9   : > { %v18451_v43 = vpop.f32.mrf.mxu1  ;;  %14488 = vrcp.f32 %v4485_v18  ;;  %v2385_v18 = vadd.f32 %v17450_v13, %v18366_v58  ;;  %v4373_v54 = vadd.f32 %v18375_v37, %v2383_v60 }
 0x3ea   : > { %21825 = vst [vmem:[#allocation31_spill] sm:$0xff] %v18451_v43  ;;  %v14467_v43 = vpop.eup %14466  ;;  %14490 = vpow2.f32 %v12072_v63  ;;  %v18484_v21 = vpop.f32.mrf.mxu0  ;;  %v12075_v5 = vmul.f32 -1.442695, %v4371_v17  ;;  %v12076_v13 = vmul.f32 -1.442695, %v4372_v1  ;;  %v21836_v1 = vld [vmem:[#allocation40_spill] sm:$0xff] }
 0x3eb   : > { %v18456_v59 = vpop.f32.mrf.mxu1  ;;  %v14469_v61 = vpop.eup %14468  ;;  %v4487_v35 = vadd.f32 1.0, %v14467_v43  ;;  %14492 = vrcp.f32 %v4486_v42  ;;  %v12074_v43 = vmul.f32 -1.442695, %v4370_v25  ;;  %v2389_v42 = vadd.f32 %v21833_v24, %v18359_v49 }
 0x3ec   : > { %21826 = vst [vmem:[#allocation350_spill] sm:$0xff] %v18456_v59  ;;  %v14471_v50 = vpop.eup %14470  ;;  %v4488_v11 = vadd.f32 1.0, %v14469_v61  ;;  %14494 = vpow2.f32 %v12073_v45 }
 0x3ed   : > { %v18461_v39 = vpop.f32.mrf.mxu1  ;;  %v14473_v31 = vpop.eup %14472  ;;  %v4489_v32 = vadd.f32 1.0, %v14471_v50  ;;  %14496 = vrcp.f32 %v4487_v35  ;;  %v4374_v50 = vadd.f32 %v18386_v52, %v2385_v18  ;;  %v4375_v30 = vadd.f32 %v18400_v55, %v2389_v42 }
 0x3ee   : > { %21827 = vst [vmem:[#allocation351_spill] sm:$0xff] %v18461_v39  ;;  %v14475_v61 = vpop.eup %14474  ;;  %v4490_v63 = vadd.f32 1.0, %v14473_v31  ;;  %14498 = vrcp.f32 %v4488_v11  ;;  %v4249_v35 = vpop.f32.mrf.mxu0  ;;  %v2393_v31 = vadd.f32 %v17479_v57, %v18359_v49  ;;  %v12077_v11 = vmul.f32 -1.442695, %v4373_v54 }
 0x3ef   : > { %v18465_v9 = vpop.f32.mrf.mxu1  ;;  %14500 = vrcp.f32 %v4489_v32  ;;  %v14477_v25 = vpop.eup %14476  ;;  %v4491_v40 = vadd.f32 1.0, %v14475_v61  ;;  %v12078_v60 = vmul.f32 -1.442695, %v4374_v50  ;;  %v2391_v18 = vadd.f32 %v21836_v1, %v18366_v58 }
 0x3f0   : > { %21828 = vst [vmem:[#allocation352_spill] sm:$0xff] %v18465_v9  ;;  %14502 = vpow2.f32 %v12074_v43  ;;  %v4492_v43 = vadd.f32 1.0, %v14477_v25  ;;  %v4377_v55 = vadd.f32 %v18423_v44, %v2393_v31  ;;  %v12079_v57 = vmul.f32 -1.442695, %v4375_v30 }
 0x3f1   : > { %v18474_v38 = vpop.f32.mrf.mxu1  ;;  %v18495_v37 = vpop.eup %14478  ;;  %14504 = vrcp.f32 %v4490_v63  ;;  %v2399_v42 = vadd.f32 %v17493_v16, %v18359_v49  ;;  %v4376_v50 = vadd.f32 %v18413_v29, %v2391_v18  ;;  %v2395_v29 = vadd.f32 %v17483_v41, %v18366_v58  ;;  %v21841_v41 = vld [vmem:[#allocation47_spill] sm:$0xff] }
 0x3f2   : > { %21830 = vst [vmem:[#allocation35_spill] sm:$0xff] %v18474_v38  ;;  %v14481_v52 = vpop.eup %14480  ;;  %14506 = vpow2.f32 %v12075_v5  ;;  %v18508_v63 = vpop.f32.mrf.mxu0  ;;  %v12081_v30 = vmul.f32 -1.442695, %v4377_v55 }
 0x3f3   : > { %v18480_v10 = vpop.f32.mrf.mxu1  ;;  %v14483_v32 = vpop.eup %14482  ;;  %14508 = vpow2.f32 %v12076_v13  ;;  %v4493_v5 = vadd.f32 1.0, %v14481_v52  ;;  %v4379_v1 = vadd.f32 %v18449_v36, %v2399_v42  ;;  %v4378_v42 = vadd.f32 %v18436_v19, %v2395_v29  ;;  %v21844_v29 = vld [vmem:[#allocation45_spill] sm:$0xff] }
 0x3f4   : > { %21831 = vst [vmem:[#allocation353_spill] sm:$0xff] %v18480_v10  ;;  %v18506_v24 = vpop.eup %14484  ;;  %14510 = vrcp.f32 %v4491_v40  ;;  %v4494_v44 = vadd.f32 1.0, %v14483_v32  ;;  %v2409_v40 = vadd.f32 %v17522_v8, %v18359_v49  ;;  %v4253_v52 = vpop.f32.mrf.mxu0  ;;  %v12080_v8 = vmul.f32 -1.442695, %v4376_v50 }
 0x3f5   : > { %v18487_v51 = vpop.f32.mrf.mxu1  ;;  %v14487_v54 = vpop.eup %14486  ;;  %14512 = vpow2.f32 %v12077_v11 }
 0x3f6   : > { %21832 = vst [vmem:[#allocation354_spill] sm:$0xff] %v18487_v51  ;;  %v18515_v13 = vpop.eup %14488  ;;  %14514 = vpow2.f32 %v12078_v60  ;;  %v4495_v11 = vadd.f32 1.0, %v14487_v54  ;;  %v2413_v60 = vadd.f32 %v17536_v33, %v18359_v49  ;;  %v4383_v18 = vadd.f32 %v4249_v35, %v2409_v40 }
 0x3f7   : > { %v18492_v45 = vpop.f32.mrf.mxu1  ;;  %v14491_v31 = vpop.eup %14490  ;;  %14516 = vrcp.f32 %v4492_v43  ;;  %v12083_v54 = vmul.f32 -1.442695, %v4379_v1  ;;  %v12082_v1 = vmul.f32 -1.442695, %v4378_v42  ;;  %v2171_v42 = vsub.s32 2, %v18337_v56 }
 0x3f8   : > { %21834 = vst [vmem:[#allocation39_spill] sm:$0xff] %v18492_v45  ;;  %v18522_v16 = vpop.eup %14492  ;;  %14518 = vpow2.f32 %v12079_v57  ;;  %v4496_v55 = vadd.f32 1.0, %v14491_v31  ;;  %v2403_v57 = vadd.f32 %v21841_v41, %v18359_v49  ;;  %v12087_v31 = vmul.f32 -1.442695, %v4383_v18  ;;  %v21846_v18 = vld [vmem:[#allocation49_spill] sm:$0xff] }
 0x3f9   : > { %v18499_v17 = vpop.f32.mrf.mxu1  ;;  %v14495_v32 = vpop.eup %14494  ;;  %14520 = vrcp.f32 %v4493_v5 }
 0x3fa   : > { %21835 = vst [vmem:[#allocation355_spill] sm:$0xff] %v18499_v17  ;;  %v18530_v36 = vpop.eup %14496  ;;  %14522 = vrcp.f32 %v4494_v44  ;;  %v4497_v35 = vadd.f32 1.0, %v14495_v32  ;;  %v4381_v44 = vadd.f32 %v18470_v4, %v2403_v57  ;;  %v2405_v57 = vadd.f32 %v21846_v18, %v18366_v58 }
 0x3fb   : > { %v18504_v61 = vpop.f32.mrf.mxu1  ;;  %14524 = vpow2.f32 %v12081_v30  ;;  %v2401_v30 = vadd.f32 %v21844_v29, %v18366_v58 }
 0x3fc   : > { %21837 = vst [vmem:[#allocation40_spill] sm:$0xff] %v18504_v61  ;;  %14526 = vrcp.f32 %v4495_v11 }
 0x3fd   : > { %v18513_v25 = vpop.f32.mrf.mxu1  ;;  %14528 = vpow2.f32 %v12080_v8  ;;  %v4380_v4 = vadd.f32 %v18459_v62, %v2401_v30  ;;  %v4382_v62 = vadd.f32 %v18484_v21, %v2405_v57 }
 0x3fe   : > { %21838 = vst [vmem:[#allocation356_spill] sm:$0xff] %v18513_v25  ;;  %v4385_v25 = vadd.f32 %v4253_v52, %v2413_v60 }
 0x3ff   : > { %v18520_v61 = vpop.f32.mrf.mxu1  ;;  %v12086_v57 = vmul.f32 -1.442695, %v4382_v62 }
 0x400   : > { %21839 = vst [vmem:[#allocation357_spill] sm:$0xff] %v18520_v61  ;;  %v18533_v61 = vpop.eup %14498  ;;  %14530 = vrcp.f32 %v4496_v55  ;;  %v12089_v60 = vmul.f32 -1.442695, %v4385_v25 }
 0x401   : > { %v18528_v43 = vpop.f32.mrf.mxu1  ;;  %v18539_v5 = vpop.eup %14500  ;;  %14532 = vpow2.f32 %v12083_v54 }
 0x402   : > { %21840 = vst [vmem:[#allocation358_spill] sm:$0xff] %v18528_v43  ;;  %v14503_v50 = vpop.eup %14502  ;;  %14534 = vrcp.f32 %v4497_v35  ;;  %v21848_v35 = vld [vmem:[#allocation52_spill] sm:$0xff] }
 0x403   : > { %v18537_v33 = vpop.f32.mrf.mxu1  ;;  %v18544_v40 = vpop.eup %14504  ;;  %v4498_v32 = vadd.f32 1.0, %v14503_v50  ;;  %14536 = vpow2.f32 %v12087_v31  ;;  %v2411_v50 = vadd.f32 %v21848_v35, %v18366_v58 }
 0x404   : > { %21842 = vst [vmem:[#allocation47_spill] sm:$0xff] %v18537_v33  ;;  %v14507_v52 = vpop.eup %14506  ;;  %14538 = vpow2.f32 %v12082_v1  ;;  %v21852_v33 = vld [vmem:[#allocation13_spill] sm:$0xff] }
 0x405   : > { %v18542_v19 = vpop.f32.mrf.mxu1  ;;  %v14509_v11 = vpop.eup %14508  ;;  %v4499_v25 = vadd.f32 1.0, %v14507_v52  ;;  %14540 = vpow2.f32 %v12089_v60  ;;  %v4384_v56 = vadd.f32 %v18508_v63, %v2411_v50  ;;  %v18571_v52 = vld [vmem:[%s21373_s7] ss:$0 sm:$0xff]  ;;  %v18576_v60 = vrot.slane %v18349_v34, %v2171_v42 }
 0x406   : > { %21843 = vst [vmem:[#allocation359_spill] sm:$0xff] %v18542_v19  ;;  %v18551_v8 = vpop.eup %14510  ;;  %v12085_v19 = vmul.f32 -1.442695, %v4381_v44  ;;  %14542 = vrcp.f32 %v4498_v32  ;;  %v12084_v44 = vmul.f32 -1.442695, %v4380_v4  ;;  %v4255_v32 = vpop.f32.mrf.mxu0 }
 0x407   : > { %v18548_v41 = vpop.f32.mrf.mxu1  ;;  %v14513_v55 = vpop.eup %14512  ;;  %v12088_v34 = vmul.f32 -1.442695, %v4384_v56  ;;  %v3020_v43 = vadd.f32 %v21852_v33, %v18576_v60 }
 0x408   : > { %21845 = vst [vmem:[#allocation45_spill] sm:$0xff] %v18548_v41  ;;  %v14515_v54 = vpop.eup %14514  ;;  %v4500_v41 = vadd.f32 1.0, %v14509_v11  ;;  %14544 = vpow2.f32 %v12085_v19  ;;  %v21851_v19 = vld [vmem:[#allocation55_spill] sm:$0xff] }
 0x409   : > { %v18555_v29 = vpop.f32.mrf.mxu1  ;;  %v18563_v18 = vpop.eup %14516  ;;  %14546 = vrcp.f32 %v4499_v25  ;;  %v4502_v11 = vadd.f32 1.0, %v14515_v54  ;;  %v2415_v63 = vadd.f32 %v21851_v19, %v18366_v58 }
 0x40a   : > { %21847 = vst [vmem:[#allocation49_spill] sm:$0xff] %v18555_v29  ;;  %v14519_v31 = vpop.eup %14518  ;;  %v4501_v29 = vadd.f32 1.0, %v14513_v55  ;;  %14548 = vrcp.f32 %v4500_v41 }
 0x40b   : > { %v18561_v30 = vpop.f32.mrf.mxu1  ;;  %v18573_v21 = vpop.eup %14520  ;;  %v4503_v50 = vadd.f32 1.0, %v14519_v31  ;;  %14550 = vpow2.f32 %v12084_v44  ;;  %v4386_v42 = vadd.f32 %v4255_v32, %v2415_v63  ;;  %v21853_v44 = vld [vmem:[#allocation14_spill] sm:$0xff] }
 0x40c   : > { %21849 = vst [vmem:[#allocation52_spill] sm:$0xff] %v18561_v30  ;;  %v18578_v4 = vpop.eup %14522  ;;  %14552 = vrcp.f32 %v4501_v29  ;;  %v3012_v31 = vadd.f32 %v21853_v44, %v18576_v60 }
 0x40d   : > { %v18566_v1 = vpop.f32.mrf.mxu1  ;;  %v14525_v35 = vpop.eup %14524  ;;  %14554 = vrcp.f32 %v4502_v11 }
 0x40e   : > { %21850 = vst [vmem:[#allocation360_spill] sm:$0xff] %v18566_v1  ;;  %v14527_v30 = vpop.eup %14526  ;;  %14556 = vpow2.f32 %v12086_v57 }
 0x40f   : > { %v13780_v55 = vpop.f32.mrf.mxu1  ;;  %v18583_v54 = vpop.eup %14528  ;;  %14558 = vrcp.f32 %v4503_v50 }
 0x410   : > { %v4581_v1 = vadd.f32 %v13780_v55, %v18571_v52  ;;  %v18589_v19 = vpop.eup %14530  ;;  %v4505_v55 = vadd.f32 1.0, %v14525_v35  ;;  %14560 = vpow2.f32 %v12088_v34 }
 0x411   : > { %v4292_v25 = vpop.f32.mrf.mxu1  ;;  %v14533_v56 = vpop.eup %14532 }
 0x412   : > { %v4597_v41 = vmul.f32 %v18530_v36, %v4581_v1  ;;  %v4579_v62 = vadd.f32 %v18571_v52, %v4292_v25  ;;  %v14535_v11 = vpop.eup %14534  ;;  %v21854_v36 = vld [vmem:[#allocation17_spill] sm:$0xff]  ;;  %v12090_v25 = vmul.f32 -1.442695, %v4386_v42 }
 0x413   : > { %v13781_v29 = vpop.f32.mrf.mxu1  ;;  %v3023_v1 = vadd.f32 %v21854_v36, %v18576_v60  ;;  %v14537_v45 = vpop.eup %14536 }
 0x414   : > { %v4613_v32 = vadd.f32 %v4597_v41, %v3020_v43  ;;  %v4595_v63 = vmul.f32 %v18495_v37, %v4579_v62  ;;  %v4582_v33 = vadd.f32 %v13781_v29, %v18571_v52  ;;  %v14539_v50 = vpop.eup %14538  ;;  %v21855_v43 = vld [vmem:[#allocation16_spill] sm:$0xff]  ;;  %v4507_v41 = vadd.f32 1.0, %v14533_v56 }
 0x415   : > { %v4295_v17 = vpop.f32.mrf.mxu1  ;;  %v3015_v37 = vadd.f32 %v21855_v43, %v18576_v60  ;;  %v14541_v29 = vpop.eup %14540 }
 0x416   : > { %14562 = vtanh.f32 %v4613_v32  ;;  %v4611_v44 = vadd.f32 %v4595_v63, %v3012_v31  ;;  %v4598_v57 = vmul.f32 %v18539_v5, %v4582_v33  ;;  %v4580_v35 = vadd.f32 %v18571_v52, %v4295_v17  ;;  %v18603_v32 = vpop.eup %14542  ;;  %v21856_v5 = vld [vmem:[#allocation15_spill] sm:$0xff] }
 0x417   : > { %14564 = vrcp.f32 %v4505_v55  ;;  %v13784_v62 = vpop.f32.mrf.mxu1  ;;  %v3036_v31 = vadd.f32 %v21856_v5, %v18576_v60  ;;  %v4511_v17 = vadd.f32 1.0, %v14537_v45  ;;  %v14545_v33 = vpop.eup %14544 }
 0x418   : > { %14566 = vtanh.f32 %v4611_v44  ;;  %v4614_v36 = vadd.f32 %v4598_v57, %v3023_v1  ;;  %v4596_v34 = vmul.f32 %v18515_v13, %v4580_v35  ;;  %v4585_v42 = vadd.f32 %v13784_v62, %v18571_v52  ;;  %v14547_v44 = vpop.eup %14546  ;;  %v21857_v1 = vld [vmem:[#allocation19_spill] sm:$0xff] }
 0x419   : > { %14568 = vpow2.f32 %v12090_v25  ;;  %v4308_v63 = vpop.f32.mrf.mxu1  ;;  %v3028_v13 = vadd.f32 %v21857_v1, %v18576_v60  ;;  %v4513_v57 = vadd.f32 1.0, %v14541_v29  ;;  %v18610_v62 = vpop.eup %14548 }
 0x41a   : > { %14570 = vtanh.f32 %v4614_v36  ;;  %v4612_v55 = vadd.f32 %v4596_v34, %v3015_v37  ;;  %v4601_v56 = vmul.f32 %v14527_v30, %v4585_v42  ;;  %v4583_v43 = vadd.f32 %v18571_v52, %v4308_v63  ;;  %v14551_v36 = vpop.eup %14550  ;;  %v21858_v30 = vld [vmem:[#allocation20_spill] sm:$0xff] }
 0x41b   : > { %14572 = vrcp.f32 %v4507_v41  ;;  %v13785_v35 = vpop.f32.mrf.mxu1  ;;  %v3039_v37 = vadd.f32 %v21858_v30, %v18576_v60  ;;  %v4509_v34 = vadd.f32 1.0, %v14545_v33  ;;  %v18616_v63 = vpop.eup %14552  ;;  %v4508_v51 = vadd.f32 1.0, %v14551_v36 }
 0x41c   : > { %14574 = vtanh.f32 %v4612_v55  ;;  %v4617_v5 = vadd.f32 %v4601_v56, %v3036_v31  ;;  %v4599_v45 = vmul.f32 %v18551_v8, %v4583_v43  ;;  %v4586_v25 = vadd.f32 %v13785_v35, %v18571_v52  ;;  %v18619_v55 = vpop.eup %14554  ;;  %v21859_v8 = vld [vmem:[#allocation23_spill] sm:$0xff] }
 0x41d   : > { %14576 = vrcp.f32 %v4511_v17  ;;  %v4311_v42 = vpop.f32.mrf.mxu1  ;;  %v3031_v31 = vadd.f32 %v21859_v8, %v18576_v60  ;;  %v4504_v56 = vadd.f32 1.0, %v18583_v54  ;;  %v18624_v35 = vpop.eup %14556 }
 0x41e   : > { %14578 = vtanh.f32 %v4617_v5  ;;  %v4615_v41 = vadd.f32 %v4599_v45, %v3028_v13  ;;  %v4602_v29 = vmul.f32 %v14535_v11, %v4586_v25  ;;  %v4584_v1 = vadd.f32 %v18571_v52, %v4311_v42  ;;  %v14559_v11 = vpop.eup %14558  ;;  %v21860_v5 = vld [vmem:[#allocation22_spill] sm:$0xff]  ;;  %v21861_v25 = vld [vmem:[#allocation27_spill] sm:$0xff] }
 0x41f   : > { %14580 = vrcp.f32 %v4513_v57  ;;  %v13788_v43 = vpop.f32.mrf.mxu1  ;;  %v3052_v45 = vadd.f32 %v21860_v5, %v18576_v60  ;;  %v3044_v30 = vadd.f32 %v21861_v25, %v18576_v60  ;;  %v4506_v42 = vadd.f32 1.0, %v14539_v50  ;;  %v14561_v57 = vpop.eup %14560 }
 0x420   : > { %14582 = vtanh.f32 %v4615_v41  ;;  %v4618_v17 = vadd.f32 %v4602_v29, %v3039_v37  ;;  %v4600_v33 = vmul.f32 %v18573_v21, %v4584_v1  ;;  %v4589_v13 = vadd.f32 %v13788_v43, %v18571_v52  ;;  %v21862_v29 = vld [vmem:[#allocation28_spill] sm:$0xff]  ;;  %v21863_v43 = vld [vmem:[#allocation29_spill] sm:$0xff] }
 0x421   : > { %14584 = vrcp.f32 %v4509_v34  ;;  %v4324_v54 = vpop.f32.mrf.mxu1  ;;  %v3055_v1 = vadd.f32 %v21862_v29, %v18576_v60  ;;  %v3047_v5 = vadd.f32 %v21863_v43, %v18576_v60  ;;  %v15995_v34 = vld [vmem:[%s17520_s16 + $0x10] sm:$0xff]  ;;  %v15996_v43 = vld [vmem:[%s17520_s16] sm:$0xff] }
 0x422   : > { %14586 = vtanh.f32 %v4618_v17  ;;  %v4616_v8 = vadd.f32 %v4600_v33, %v3031_v31  ;;  %v4605_v41 = vmul.f32 %v14559_v11, %v4589_v13  ;;  %v4587_v37 = vadd.f32 %v18571_v52, %v4324_v54  ;;  %v21864_v13 = vld [vmem:[#allocation21_spill] sm:$0xff] }
 0x423   : > { %v14563_v21 = vpop.eup %14562  ;;  %14588 = vrcp.f32 %v4504_v56  ;;  %v13789_v25 = vpop.f32.mrf.mxu1  ;;  %v3068_v11 = vadd.f32 %v21864_v13, %v18576_v60  ;;  %v4512_v54 = vadd.f32 1.0, %v14561_v57 }
 0x424   : > { %v14565_v50 = vpop.eup %14564  ;;  %v4645_v10 = vsub.f32 %v15995_v34, %v14563_v21  ;;  %14590 = vtanh.f32 %v4616_v8  ;;  %v4621_v17 = vadd.f32 %v4605_v41, %v3052_v45  ;;  %v4603_v31 = vmul.f32 %v14547_v44, %v4587_v37  ;;  %v21865_v44 = vld [vmem:[#allocation32_spill] sm:$0xff] }
 0x425   : > { %v14567_v33 = vpop.eup %14566  ;;  %14592 = vrcp.f32 %v4506_v42  ;;  %v4590_v29 = vadd.f32 %v13789_v25, %v18571_v52  ;;  %v4327_v38 = vpop.f32.mrf.mxu1  ;;  %v3060_v45 = vadd.f32 %v21865_v44, %v18576_v60 }
 0x426   : > { %v14569_v56 = vpop.eup %14568  ;;  %v4661_v36 = vmul.f32 %v18533_v61, %v4645_v10  ;;  %v4643_v9 = vsub.f32 %v15996_v43, %v14567_v33  ;;  %14594 = vtanh.f32 %v4621_v17  ;;  %v4619_v34 = vadd.f32 %v4603_v31, %v3044_v30  ;;  %v15997_v10 = vld [vmem:[%s17520_s16 + $0x18] sm:$0xff] }
 0x427   : > { %v14571_v8 = vpop.eup %14570  ;;  %14596 = vrcp.f32 %v4508_v51  ;;  %v4606_v41 = vmul.f32 %v14565_v50, %v4590_v29  ;;  %v4588_v42 = vadd.f32 %v18571_v52, %v4327_v38  ;;  %v13792_v57 = vpop.f32.mrf.mxu1 }
 0x428   : > { %v14573_v37 = vpop.eup %14572  ;;  %v18646_v25 = vadd.f32 %v14563_v21, %v4661_v36  ;;  %v4659_v13 = vmul.f32 %v18506_v24, %v4643_v9  ;;  %v4646_v61 = vsub.f32 %v15997_v10, %v14571_v8  ;;  %14598 = vtanh.f32 %v4619_v34  ;;  %v15998_v21 = vld [vmem:[%s17520_s16 + $0x8] sm:$0xff]  ;;  %v21866_v34 = vld [vmem:[#allocation33_spill] sm:$0xff] }
 0x429   : > { %v14575_v17 = vpop.eup %14574  ;;  %14600 = vrcp.f32 %v4512_v54  ;;  %v4622_v30 = vadd.f32 %v4606_v41, %v3055_v1  ;;  %v4604_v31 = vmul.f32 %v18616_v63, %v4588_v42  ;;  %v4593_v51 = vadd.f32 %v13792_v57, %v18571_v52  ;;  %v4340_v50 = vpop.f32.mrf.mxu1  ;;  %v21867_v10 = vld [vmem:[#allocation34_spill] sm:$0xff] }
 0x42a   : > { %v14577_v29 = vpop.eup %14576  ;;  %v18652_v38 = vadd.f32 %v14567_v33, %v4659_v13  ;;  %v4662_v43 = vmul.f32 %v18544_v40, %v4646_v61  ;;  %v4644_v36 = vsub.f32 %v15998_v21, %v14575_v17  ;;  %v4591_v9 = vadd.f32 %v18571_v52, %v4340_v50 }
 0x42b   : > { %v14579_v24 = vpop.eup %14578  ;;  %v3071_v54 = vadd.f32 %v21866_v34, %v18576_v60  ;;  %14602 = vtanh.f32 %v4622_v30  ;;  %v4620_v1 = vadd.f32 %v4604_v31, %v3047_v5  ;;  %v4609_v63 = vmul.f32 %v14577_v29, %v4593_v51  ;;  %v13793_v44 = vpop.f32.mrf.mxu1  ;;  %v15999_v30 = vld [vmem:[%s17520_s16 + $0x30] sm:$0xff] }
 0x42c   : > { %v14581_v41 = vpop.eup %14580  ;;  %v18659_v42 = vadd.f32 %v14571_v8, %v4662_v43  ;;  %v4607_v33 = vmul.f32 %v14573_v37, %v4591_v9  ;;  %v4594_v57 = vadd.f32 %v13793_v44, %v18571_v52  ;;  %v4660_v40 = vmul.f32 %v18522_v16, %v4644_v36  ;;  %v16000_v36 = vld [vmem:[%s17520_s16 + $0x20] sm:$0xff] }
 0x42d   : > { %v14583_v13 = vpop.eup %14582  ;;  %v3063_v61 = vadd.f32 %v21867_v10, %v18576_v60  ;;  %14604 = vtanh.f32 %v4620_v1  ;;  %v4625_v50 = vadd.f32 %v4609_v63, %v3068_v11  ;;  %v4343_v21 = vpop.f32.mrf.mxu1  ;;  %v4649_v5 = vsub.f32 %v15999_v30, %v14579_v24  ;;  %v16002_v10 = vld [vmem:[%s17520_s16 + $0x28] sm:$0xff]  ;;  %v16003_v30 = vld [vmem:[%s17520_s16 + $0x50] sm:$0xff] }
 0x42e   : > { %v14585_v31 = vpop.eup %14584  ;;  %v4623_v51 = vadd.f32 %v4607_v33, %v3060_v45  ;;  %v4610_v29 = vmul.f32 %v14581_v41, %v4594_v57  ;;  %v4592_v8 = vadd.f32 %v18571_v52, %v4343_v21  ;;  %v18667_v37 = vadd.f32 %v14575_v17, %v4660_v40  ;;  %v16001_v41 = vld [vmem:[%s17520_s16 + $0x38] sm:$0xff] }
 0x42f   : > { %v14587_v43 = vpop.eup %14586  ;;  %v4514_v16 = vadd.f32 1.0, %v14569_v56  ;;  %14606 = vtanh.f32 %v4625_v50  ;;  %v4647_v9 = vsub.f32 %v16000_v36, %v14583_v13  ;;  %v4665_v34 = vmul.f32 %v18589_v19, %v4649_v5 }
 0x430   : > { %v14589_v1 = vpop.eup %14588  ;;  %14608 = vtanh.f32 %v4623_v51  ;;  %v4626_v11 = vadd.f32 %v4610_v29, %v3071_v54  ;;  %v4608_v63 = vmul.f32 %v14585_v31, %v4592_v8  ;;  %v18673_v45 = vpack.c.bf16 %v18667_v37, %v18652_v38  ;;  %v16004_v31 = vld [vmem:[%s21371_s5 + $0xa8] ss:$12 sps:$4 sm:$0xff]  }
 0x431   : > { %v14591_v44 = vpop.eup %14590  ;;  %v18677_v17 = vpack.c.bf16 %v18659_v42, %v18646_v25  ;;  %v4663_v56 = vmul.f32 %v18563_v18, %v4647_v9  ;;  %v4650_v33 = vsub.f32 %v16001_v41, %v14587_v43  ;;  %v18681_v57 = vadd.f32 %v14579_v24, %v4665_v34  ;;  %v16009_v41 = vld [vmem:[%s21371_s5 + $0x7c] ss:$12 sps:$4 sm:$0xff]  }
 0x432   : > { %21868 = vst [vmem:[#allocation55_spill] sm:$0xff] %v18673_v45  ;;  %v14593_v19 = vpop.eup %14592  ;;  %v4510_v40 = vadd.f32 1.0, %v18624_v35  ;;  %14610 = vtanh.f32 %v4626_v11  ;;  %v4624_v54 = vadd.f32 %v4608_v63, %v3063_v61  ;;  %4957 = vmatmul.mubr.bf16.vlgmr.msra.gmra.mxu1 %v18673_v45  ;;  %13810 = vmatprep.mubr.bf16.mxu0 %v18673_v45  ;;  %v4648_v50 = vsub.f32 %v16002_v10, %v14591_v44  ;;  %v16007_v63 = vld [vmem:[%s21371_s5 + $0x90] ss:$12 sps:$4 sm:$0xff]  }
 0x433   : > { %21869 = vst [vmem:[#allocation13_spill] sm:$0xff] %v18677_v17  ;;  %v14595_v21 = vpop.eup %14594  ;;  %14612 = vrcp.f32 %v4514_v16  ;;  %13811 = vmatmul.mubr.bf16.vlgmr.msra.gmra.mxu0 %v18677_v17  ;;  %4966 = vmatprep.mubr.bf16.mxu1 %v21458_v0  ;;  %v18689_v18 = vadd.f32 %v14583_v13, %v4663_v56  ;;  %v4666_v35 = vmul.f32 %v18603_v32, %v4650_v33  ;;  %v16005_v13 = vld [vmem:[%s21371_s5 + $0x94] ss:$12 sps:$4 sm:$0xff]  }
 0x434   : > { %v14597_v24 = vpop.eup %14596  ;;  %14614 = vtanh.f32 %v4624_v54  ;;  %v4664_v61 = vmul.f32 %v18578_v4, %v4648_v50  ;;  %v4653_v5 = vsub.f32 %v16003_v30, %v14595_v21  ;;  %5705 = vmatpush1.bf16.msra.mxu0 %v16004_v31  ;;  %v16006_v4 = vld [vmem:[%s17520_s16 + $0x40] sm:$0xff] }
 0x435   : > { %v14599_v51 = vpop.eup %14598  ;;  %v18697_v29 = vadd.f32 %v14587_v43, %v4666_v35  ;;  %5706 = vmatprep.subr.bf16.mxu0 %v16005_v13  ;;  %14616 = vrcp.f32 %v4510_v40  ;;  %v16010_v40 = vld [vmem:[%s17520_s16 + $0x48] sm:$0xff] }
 0x436   : > { %v14601_v32 = vpop.eup %14600  ;;  %v18702_v8 = vadd.f32 %v14591_v44, %v4664_v61  ;;  %v4651_v16 = vsub.f32 %v16006_v4, %v14599_v51  ;;  %v4669_v36 = vmul.f32 %v14589_v1, %v4653_v5  ;;  %v16008_v1 = vld [vmem:[%s17520_s16 + $0x58] sm:$0xff]  ;;  %v16012_v5 = vld [vmem:[%s17520_s16 + $0x70] sm:$0xff] }
 0x437   : > { %v18717_v44 = vpack.c.bf16 %v18697_v29, %v18681_v57 }
 0x438   : > { %v14603_v9 = vpop.eup %14602  ;;  %v18707_v34 = vpack.c.bf16 %v18702_v8, %v18689_v18  ;;  %v4667_v43 = vmul.f32 %v18610_v62, %v4651_v16  ;;  %v18710_v11 = vadd.f32 %v14595_v21, %v4669_v36  ;;  %5707 = vmatpush1.bf16.msra.mxu0 %v16007_v63  ;;  %v16011_v21 = vld [vmem:[%s21371_s5 + $0x78] ss:$12 sps:$4 sm:$0xff]  }
 0x439   : > { %21871 = vst [vmem:[#allocation17_spill] sm:$0xff] %v18717_v44  ;;  %v4654_v56 = vsub.f32 %v16008_v1, %v14603_v9  ;;  %5708 = vmatprep.subr.bf16.mxu0 %v16009_v41  ;;  %v16015_v1 = vld [vmem:[%s17520_s16 + $0x78] sm:$0xff] }
 0x43a   : > { %21870 = vst [vmem:[#allocation14_spill] sm:$0xff] %v18707_v34  ;;  %v14605_v62 = vpop.eup %14604  ;;  %4967 = vmatmul.mubr.bf16.gmra.mxu1 %v18677_v17  ;;  %13814 = vmatprep.mubr.bf16.mxu0 %v18707_v34  ;;  %v18725_v33 = vadd.f32 %v14599_v51, %v4667_v43  ;;  %v16013_v51 = vld [vmem:[%s21371_s5 + $0x64] ss:$12 sps:$4 sm:$0xff]  }
 0x43b   : > { %13815 = vmatmul.mubr.bf16.gmra.mxu0 %v18717_v44  ;;  %4976 = vmatprep.mubr.bf16.mxu1 %v21458_v0  ;;  %v4652_v54 = vsub.f32 %v16010_v40, %v14605_v62  ;;  %v4670_v10 = vmul.f32 %v14593_v19, %v4654_v56  ;;  %v16014_v19 = vld [vmem:[%s17520_s16 + $0x60] sm:$0xff] }
 0x43c   : > { %v14607_v50 = vpop.eup %14606  ;;  %5709 = vmatpush1.bf16.msra.mxu0 %v16011_v21 }
 0x43d   : > { %v14609_v35 = vpop.eup %14608  ;;  %v4668_v61 = vmul.f32 %v18619_v55, %v4652_v54  ;;  %v18734_v30 = vadd.f32 %v14603_v9, %v4670_v10  ;;  %v4657_v31 = vsub.f32 %v16012_v5, %v14607_v50  ;;  %5710 = vmatprep.subr.bf16.mxu0 %v16013_v51  ;;  %v16016_v9 = vld [vmem:[%s21371_s5 + $0x60] ss:$12 sps:$4 sm:$0xff]  }
 0x43e   : > { %v4655_v13 = vsub.f32 %v16014_v19, %v14609_v35 }
 0x43f   : > { %v14611_v4 = vpop.eup %14610  ;;  %v18741_v16 = vadd.f32 %v14605_v62, %v4668_v61  ;;  %v4673_v36 = vmul.f32 %v14601_v32, %v4657_v31  ;;  %v16017_v32 = vld [vmem:[%s21371_s5 + $0x4c] ss:$12 sps:$4 sm:$0xff]   ;;  %v16019_v31 = vld [vmem:[%s21371_s5 + $0x48] ss:$12 sps:$4 sm:$0xff]  }
 0x440   : > { %v14613_v43 = vpop.eup %14612  ;;  %v4671_v63 = vmul.f32 %v14597_v24, %v4655_v13  ;;  %v4658_v55 = vsub.f32 %v16015_v1, %v14611_v4  ;;  %5711 = vmatpush1.bf16.msra.mxu0 %v16016_v9  ;;  %v18759_v24 = vpack.c.bf16 %v18734_v30, %v18710_v11  ;;  %v16018_v62 = vld [vmem:[%s17520_s16 + $0x68] sm:$0xff]  ;;  %v16021_v13 = vld [vmem:[%s21371_s5 + $0x30] ss:$12 sps:$4 sm:$0xff]   ;;  %v14331_v9 = vld [vmem:[%s21371_s5 + $0x98] ss:$12 sps:$4 sm:$0xff]  }
 0x441   : > { %v14615_v56 = vpop.eup %14614  ;;  %v18749_v41 = vpack.c.bf16 %v18741_v16, %v18725_v33  ;;  %v18751_v40 = vadd.f32 %v14607_v50, %v4673_v36  ;;  %5712 = vmatprep.subr.bf16.mxu0 %v16017_v32  ;;  %v16022_v36 = vld [vmem:[%s21371_s5 + $0x1c] ss:$12 sps:$4 sm:$0xff]   ;;  %v16025_v1 = vld [vmem:[%s21371_s5] ss:$12 sps:$4 sm:$0xff]  }
 0x442   : > { %4977 = vmatmul.mubr.bf16.gmra.mxu1 %v18707_v34  ;;  %21873 = vst [vmem:[#allocation15_spill] sm:$0xff] %v18759_v24  ;;  %v4656_v54 = vsub.f32 %v16018_v62, %v14615_v56  ;;  %v18762_v10 = vadd.f32 %v14609_v35, %v4671_v63  ;;  %v4674_v21 = vmul.f32 %v14613_v43, %v4658_v55  ;;  %v14617_v61 = vpop.eup %14616  ;;  %v16020_v35 = vld [vmem:[%s21371_s5 + $0x34] ss:$12 sps:$4 sm:$0xff]   ;;  %v16023_v43 = vld [vmem:[%s21371_s5 + $0x18] ss:$12 sps:$4 sm:$0xff]  }
 0x443   : > { %21872 = vst [vmem:[#allocation16_spill] sm:$0xff] %v18749_v41  ;;  %13818 = vmatprep.mubr.bf16.mxu0 %v18749_v41  ;;  %4986 = vmatprep.mubr.bf16.mxu1 %v21458_v0  ;;  %v16024_v63 = vld [vmem:[%s21371_s5 + $0x4] ss:$12 sps:$4 sm:$0xff]   ;;  %v14333_v32 = vld [vmem:[%s21371_s5 + $0x68] ss:$12 sps:$4 sm:$0xff]  }
 0x444   : > { %13819 = vmatmul.mubr.bf16.gmra.mxu0 %v18759_v24  ;;  %v4672_v50 = vmul.f32 %v14617_v61, %v4656_v54  ;;  %v18767_v5 = vadd.f32 %v14611_v4, %v4674_v21  ;;  %v14330_v55 = vld [vmem:[%s21371_s5 + $0xb0] ss:$12 sps:$4 sm:$0xff]   ;;  %v14335_v54 = vld [vmem:[%s21371_s5 + $0x38] ss:$12 sps:$4 sm:$0xff]   ;;  %v14336_v21 = vld [vmem:[%s21371_s5 + $0x20] ss:$12 sps:$4 sm:$0xff]  }
 0x445   : > { %5713 = vmatpush1.bf16.msra.mxu0 %v16019_v31  ;;  %13826 = vmatprep.subr.bf16.mxu1 %v14330_v55  ;;  %v14334_v62 = vld [vmem:[%s21371_s5 + $0x50] ss:$12 sps:$4 sm:$0xff]   ;;  %v14337_v61 = vld [vmem:[%s21371_s5 + $0x8] ss:$12 sps:$4 sm:$0xff]  }
 0x446   : > { %v18772_v51 = vadd.f32 %v14615_v56, %v4672_v50  ;;  %5714 = vmatprep.subr.bf16.mxu0 %v16020_v35  ;;  %v18788_v4 = vpack.c.bf16 %v18767_v5, %v18751_v40  ;;  %13827 = vmatpush3.bf16.msra.mxu1 %v14330_v55  ;;  %v14332_v56 = vld [vmem:[%s21371_s5 + $0x80] ss:$12 sps:$4 sm:$0xff]  }
 0x447   : > { %13828 = vmatprep.subr.bf16.mxu1 %v14331_v9  ;;  %v21876_v50 = vld [vmem:[#allocation57_spill] sm:$0xff] }
 0x448   : > { %v18779_v19 = vpack.c.bf16 %v18772_v51, %v18762_v10  ;;  %21875 = vst [vmem:[#allocation20_spill] sm:$0xff] %v18788_v4  ;;  %v2419_v31 = vadd.f32 %v21876_v50, %v18359_v49 }
 0x449   : > { %5715 = vmatpush1.bf16.msra.mxu0 %v16021_v13 }
 0x44a   : > { %21874 = vst [vmem:[#allocation19_spill] sm:$0xff] %v18779_v19  ;;  %4987 = vmatmul.mubr.bf16.gmra.mxu1 %v18717_v44  ;;  %13822 = vmatprep.mubr.bf16.mxu0 %v18779_v19 }
 0x44b   : > { %4996 = vmatprep.mubr.bf16.mxu1 %v21458_v0  ;;  %5716 = vmatprep.subr.bf16.mxu0 %v16022_v36  ;;  %v21877_v36 = vld [vmem:[#allocation59_spill] sm:$0xff] }
 0x44c   : > { %13823 = vmatmul.mubr.bf16.gmra.mxu0 %v18788_v4  ;;  %13829 = vmatpush3.bf16.msra.mxu1 %v14331_v9 }
 0x44d   : > { %5717 = vmatpush1.bf16.msra.mxu0 %v16023_v43  ;;  %5736 = vmatprep.mubr.bf16.mxu0 %v21458_v0  ;;  %v2421_v43 = vadd.f32 %v21877_v36, %v18366_v58 }
 0x44e   : > { %5718 = vmatprep.subr.bf16.mxu0 %v16024_v63  ;;  %13830 = vmatprep.subr.bf16.mxu1 %v14332_v56 }
 0x450   : > { %13831 = vmatpush3.bf16.msra.mxu1 %v14332_v56 }
 0x451   : > { %5719 = vmatpush1.bf16.msra.mxu0 %v16025_v1  ;;  %13832 = vmatprep.subr.bf16.mxu1 %v14333_v32  ;;  %v2423_v1 = vadd.f32 %v17563_v47, %v18359_v49  ;;  %v21880_v47 = vld [vmem:[#allocation68_spill] sm:$0xff] }
 0x452   : > { %4997 = vmatmul.mubr.bf16.gmra.mxu1 %v18749_v41 }
 0x453   : > { %5006 = vmatprep.mubr.bf16.mxu1 %v21458_v0 }
 0x454   : > { %13833 = vmatpush3.bf16.msra.mxu1 %v14333_v32 }
 0x455   : > { %13834 = vmatprep.subr.bf16.mxu1 %v14334_v62 }
 0x458   : > { %13835 = vmatpush3.bf16.msra.mxu1 %v14334_v62 }
 0x459   : > { %13836 = vmatprep.subr.bf16.mxu1 %v14335_v54 }
 0x45a   : > { %5007 = vmatmul.mubr.bf16.gmra.mxu1 %v18759_v24 }
 0x45b   : > { %5016 = vmatprep.mubr.bf16.mxu1 %v21458_v0 }
 0x45c   : > { %13837 = vmatpush3.bf16.msra.mxu1 %v14335_v54  ;;  %v21878_v54 = vld [vmem:[#allocation64_spill] sm:$0xff] }
 0x45d   : > { %13838 = vmatprep.subr.bf16.mxu1 %v14336_v21 }
 0x460   : > { %13839 = vmatpush3.bf16.msra.mxu1 %v14336_v21  ;;  %v2429_v21 = vadd.f32 %v21878_v54, %v18359_v49 }
 0x461   : > { %13840 = vmatprep.subr.bf16.mxu1 %v14337_v61 }
 0x462   : > { %5017 = vmatmul.mubr.bf16.gmra.mxu1 %v18779_v19 }
 0x463   : > { %5026 = vmatprep.mubr.bf16.mxu1 %v21458_v0 }
 0x464   : > { %13841 = vmatpush3.bf16.msra.mxu1 %v14337_v61 }
 0x46a   : > { %5027 = vmatmul.mubr.bf16.gmra.mxu1 %v18788_v4  ;;  %v21892_v4 = vld [vmem:[#allocation86_spill] sm:$0xff] }
 0x4f2   : > { %v4958_v35 = vpop.f32.mrf.mxu1 }
 0x4f3   : > { %v5134_v13 = vadd.f32 %v4958_v35, %v2419_v31  ;;  %v21879_v35 = vld [vmem:[#allocation62_spill] sm:$0xff] }
 0x4f4   : > { %v4960_v63 = vpop.f32.mrf.mxu1  ;;  %v2425_v36 = vadd.f32 %v21879_v35, %v18366_v58 }
 0x4f5   : > { %v12115_v55 = vmul.f32 -1.442695, %v5134_v13  ;;  %v5135_v9 = vadd.f32 %v4960_v63, %v2421_v43  ;;  %v2433_v13 = vadd.f32 %v21880_v47, %v18359_v49 }
 0x4f6   : > { %v4962_v56 = vpop.f32.mrf.mxu1 }
 0x4f7   : > { %14618 = vpow2.f32 %v12115_v55  ;;  %v5136_v32 = vadd.f32 %v4962_v56, %v2423_v1  ;;  %v12116_v50 = vmul.f32 -1.442695, %v5135_v9 }
 0x4f8   : > { %v4964_v62 = vpop.f32.mrf.mxu1 }
 0x4f9   : > { %v12117_v61 = vmul.f32 -1.442695, %v5136_v32  ;;  %v5137_v63 = vadd.f32 %v4964_v62, %v2425_v36  ;;  %v21881_v32 = vld [vmem:[#allocation72_spill] sm:$0xff] }
 0x4fa   : > { %v4968_v39 = vpop.f32.mrf.mxu1  ;;  %v2439_v9 = vadd.f32 %v21881_v32, %v18359_v49  ;;  %v21884_v36 = vld [vmem:[#allocation76_spill] sm:$0xff]  ;;  %v18856_v32 = vpop.f32.mrf.mxu0 }
 0x4fb   : > { %14620 = vpow2.f32 %v12117_v61  ;;  %v5138_v31 = vadd.f32 %v4968_v39, %v2429_v21  ;;  %v12118_v61 = vmul.f32 -1.442695, %v5137_v63  ;;  %v21882_v21 = vld [vmem:[#allocation66_spill] sm:$0xff]  ;;  %v2443_v47 = vadd.f32 %v21884_v36, %v18359_v49 }
 0x4fc   : > { %v4970_v59 = vpop.f32.mrf.mxu1  ;;  %14622 = vpow2.f32 %v12116_v50  ;;  %v2431_v35 = vadd.f32 %v21882_v21, %v18366_v58  ;;  %v5071_v36 = vpop.f32.mrf.mxu0 }
 0x4fd   : > { %v12119_v43 = vmul.f32 -1.442695, %v5138_v31  ;;  %v21883_v31 = vld [vmem:[#allocation70_spill] sm:$0xff] }
 0x4fe   : > { %v4972_v1 = vpop.f32.mrf.mxu1  ;;  %v2435_v50 = vadd.f32 %v21883_v31, %v18366_v58  ;;  %v18866_v28 = vpop.f32.mrf.mxu0 }
 0x4ff   : > { %14624 = vpow2.f32 %v12119_v43  ;;  %v5140_v55 = vadd.f32 %v4972_v1, %v2433_v13  ;;  %v5139_v43 = vadd.f32 %v4970_v59, %v2431_v35  ;;  %v21886_v35 = vld [vmem:[#allocation74_spill] sm:$0xff] }
 0x500   : > { %v4974_v56 = vpop.f32.mrf.mxu1 }
 0x501   : > { %v12121_v54 = vmul.f32 -1.442695, %v5140_v55  ;;  %v5141_v63 = vadd.f32 %v4974_v56, %v2435_v50  ;;  %v12120_v27 = vmul.f32 -1.442695, %v5139_v43 }
 0x502   : > { %v4978_v39 = vpop.f32.mrf.mxu1 }
 0x503   : > { %14626 = vpow2.f32 %v12121_v54  ;;  %v5142_v15 = vadd.f32 %v4978_v39, %v2439_v9  ;;  %v21885_v39 = vld [vmem:[#allocation80_spill] sm:$0xff] }
 0x504   : > { %v14619_v7 = vpop.eup %14618  ;;  %v4980_v62 = vpop.f32.mrf.mxu1  ;;  %14628 = vpow2.f32 %v12118_v61  ;;  %v2449_v31 = vadd.f32 %v21885_v39, %v18359_v49  ;;  %v2441_v61 = vadd.f32 %v21886_v35, %v18366_v58 }
 0x505   : > { %v5262_v13 = vadd.f32 1.0, %v14619_v7  ;;  %v12123_v1 = vmul.f32 -1.442695, %v5142_v15  ;;  %v12122_v7 = vmul.f32 -1.442695, %v5141_v63 }
 0x506   : > { %v4982_v55 = vpop.f32.mrf.mxu1 }
 0x507   : > { %14630 = vrcp.f32 %v5262_v13  ;;  %v5144_v21 = vadd.f32 %v4982_v55, %v2443_v47  ;;  %v21887_v47 = vld [vmem:[#allocation78_spill] sm:$0xff] }
 0x508   : > { %v14621_v54 = vpop.eup %14620  ;;  %14632 = vpow2.f32 %v12123_v1  ;;  %v4984_v9 = vpop.f32.mrf.mxu1  ;;  %v2445_v13 = vadd.f32 %v21887_v47, %v18366_v58  ;;  %v21888_v1 = vld [vmem:[#allocation84_spill] sm:$0xff]  ;;  %v21889_v47 = vld [vmem:[#allocation82_spill] sm:$0xff] }
 0x509   : > { %v5264_v6 = vadd.f32 1.0, %v14621_v54  ;;  %v12125_v22 = vmul.f32 -1.442695, %v5144_v21  ;;  %v14623_v15 = vpop.eup %14622  ;;  %v2453_v55 = vadd.f32 %v21888_v1, %v18359_v49  ;;  %v5143_v21 = vadd.f32 %v4980_v62, %v2441_v61 }
 0x50a   : > { %v4988_v59 = vpop.f32.mrf.mxu1  ;;  %v5263_v39 = vadd.f32 1.0, %v14623_v15  ;;  %v5145_v35 = vadd.f32 %v4984_v9, %v2445_v13  ;;  %v2451_v2 = vadd.f32 %v21889_v47, %v18366_v58  ;;  %v5074_v15 = vpop.f32.mrf.mxu0  ;;  %v5358_v13 = vadd.f32 %v18571_v52, %v5071_v36 }
 0x50b   : > { %14634 = vrcp.f32 %v5264_v6  ;;  %v5146_v56 = vadd.f32 %v4988_v59, %v2449_v31  ;;  %v12124_v62 = vmul.f32 -1.442695, %v5143_v21  ;;  %v21893_v21 = vld [vmem:[#allocation92_spill] sm:$0xff]  ;;  %v5359_v19 = vadd.f32 %v18571_v52, %v5074_v15  ;;  %v21894_v15 = vld [vmem:[#allocation38_spill] sm:$0xff] }
 0x50c   : > { %v14625_v50 = vpop.eup %14624  ;;  %14636 = vpow2.f32 %v12125_v22  ;;  %v4990_v54 = vpop.f32.mrf.mxu1  ;;  %v21890_v22 = vld [vmem:[#allocation88_spill] sm:$0xff] }
 0x50d   : > { %v5266_v43 = vadd.f32 1.0, %v14625_v50  ;;  %14638 = vpow2.f32 %v12120_v27  ;;  %v12127_v63 = vmul.f32 -1.442695, %v5146_v56  ;;  %v2459_v50 = vadd.f32 %v21890_v22, %v18359_v49  ;;  %v18880_v41 = vpop.f32.mrf.mxu0 }
 0x50e   : > { %14640 = vpow2.f32 %v12122_v7  ;;  %v4992_v6 = vpop.f32.mrf.mxu1  ;;  %v12126_v56 = vmul.f32 -1.442695, %v5145_v35  ;;  %v2455_v22 = vadd.f32 %v21892_v4, %v18366_v58 }
 0x50f   : > { %14642 = vrcp.f32 %v5266_v43  ;;  %v5148_v31 = vadd.f32 %v4992_v6, %v2453_v55  ;;  %v5147_v55 = vadd.f32 %v4990_v54, %v2451_v2 }
 0x510   : > { %v14627_v59 = vpop.eup %14626  ;;  %14644 = vpow2.f32 %v12127_v63  ;;  %v4994_v1 = vpop.f32.mrf.mxu1  ;;  %v21891_v63 = vld [vmem:[#allocation36_spill] sm:$0xff] }
 0x511   : > { %v5268_v27 = vadd.f32 1.0, %v14627_v59  ;;  %v12129_v61 = vmul.f32 -1.442695, %v5148_v31  ;;  %14646 = vrcp.f32 %v5263_v39  ;;  %v14629_v9 = vpop.eup %14628  ;;  %v3076_v47 = vadd.f32 %v21891_v63, %v18576_v60 }
 0x512   : > { %v4998_v7 = vpop.f32.mrf.mxu1  ;;  %v2463_v31 = vadd.f32 %v21893_v21, %v18359_v49  ;;  %v5265_v2 = vadd.f32 1.0, %v14629_v9  ;;  %v12128_v63 = vmul.f32 -1.442695, %v5147_v55 }
 0x513   : > { %14648 = vrcp.f32 %v5268_v27  ;;  %v5150_v43 = vadd.f32 %v4998_v7, %v2459_v50  ;;  %v5149_v50 = vadd.f32 %v4994_v1, %v2455_v22 }
 0x514   : > { %v14631_v6 = vpop.eup %14630  ;;  %14650 = vpow2.f32 %v12129_v61  ;;  %v5000_v39 = vpop.f32.mrf.mxu1 }
 0x515   : > { %v14633_v35 = vpop.eup %14632  ;;  %v5374_v59 = vmul.f32 %v14631_v6, %v5358_v13  ;;  %14652 = vpow2.f32 %v12124_v62  ;;  %v12131_v36 = vmul.f32 -1.442695, %v5150_v43  ;;  %v3079_v62 = vadd.f32 %v21894_v15, %v18576_v60 }
 0x516   : > { %v5270_v54 = vadd.f32 1.0, %v14633_v35  ;;  %14654 = vpow2.f32 %v12126_v56  ;;  %v5002_v27 = vpop.f32.mrf.mxu1  ;;  %v12130_v56 = vmul.f32 -1.442695, %v5149_v50  ;;  %v21895_v35 = vld [vmem:[#allocation25_spill] sm:$0xff] }
 0x517   : > { %v5390_v7 = vadd.f32 %v5374_v59, %v3076_v47  ;;  %14656 = vpow2.f32 %v12131_v36  ;;  %v5152_v4 = vadd.f32 %v5002_v27, %v2463_v31  ;;  %v5360_v47 = vadd.f32 %v18856_v32, %v18571_v52  ;;  %v21896_v36 = vld [vmem:[#allocation90_spill] sm:$0xff]  ;;  %v21897_v50 = vld [vmem:[#allocation37_spill] sm:$0xff]  ;;  %v21898_v32 = vld [vmem:[#allocation96_spill] sm:$0xff] }
 0x518   : > { %v14635_v24 = vpop.eup %14634  ;;  %14658 = vrcp.f32 %v5270_v54  ;;  %v18882_v61 = vpop.f32.mrf.mxu1  ;;  %v3084_v59 = vadd.f32 %v21895_v35, %v18576_v60  ;;  %v2461_v54 = vadd.f32 %v21896_v36, %v18366_v58  ;;  %v3087_v27 = vadd.f32 %v21897_v50, %v18576_v60  ;;  %v21899_v50 = vld [vmem:[#allocation24_spill] sm:$0xff] }
 0x519   : > { %v14637_v13 = vpop.eup %14636  ;;  %14660 = vtanh.f32 %v5390_v7  ;;  %v5375_v9 = vmul.f32 %v14635_v24, %v5359_v19  ;;  %v12133_v21 = vmul.f32 -1.442695, %v5152_v4  ;;  %v5087_v24 = vpop.f32.mrf.mxu0  ;;  %v2469_v7 = vadd.f32 %v21898_v32, %v18359_v49  ;;  %v21903_v32 = vld [vmem:[#allocation100_spill] sm:$0xff] }
 0x51a   : > { %v14639_v43 = vpop.eup %14638  ;;  %14662 = vrcp.f32 %v5265_v2  ;;  %v5272_v1 = vadd.f32 1.0, %v14637_v13  ;;  %v5008_v6 = vpop.f32.mrf.mxu1  ;;  %v5151_v15 = vadd.f32 %v5000_v39, %v2461_v54  ;;  %v18902_v34 = vadd.f32 %v21899_v50, %v18576_v60 }
 0x51b   : > { %v14641_v55 = vpop.eup %14640  ;;  %v5391_v22 = vadd.f32 %v5375_v9, %v3079_v62  ;;  %14664 = vpow2.f32 %v12128_v63  ;;  %v5267_v4 = vadd.f32 1.0, %v14639_v43  ;;  %v18906_v43 = vpop.f32.mrf.mxu0  ;;  %v5154_v39 = vadd.f32 %v5008_v6, %v2469_v7 }
 0x51c   : > { %v14643_v31 = vpop.eup %14642  ;;  %14666 = vrcp.f32 %v5272_v1  ;;  %v18892_v19 = vpop.f32.mrf.mxu1  ;;  %v5361_v1 = vadd.f32 %v18866_v28, %v18571_v52  ;;  %v5269_v36 = vadd.f32 1.0, %v14641_v55  ;;  %v21901_v28 = vld [vmem:[#allocation42_spill] sm:$0xff]  ;;  %v21902_v55 = vld [vmem:[#allocation43_spill] sm:$0xff] }
 0x51d   : > { %v14645_v2 = vpop.eup %14644  ;;  %14668 = vtanh.f32 %v5391_v22  ;;  %v5376_v63 = vmul.f32 %v14643_v31, %v5360_v47  ;;  %v21900_v22 = vld [vmem:[#allocation41_spill] sm:$0xff] }
 0x51e   : > { %v5274_v13 = vadd.f32 1.0, %v14645_v2  ;;  %14670 = vpow2.f32 %v12130_v56  ;;  %v5012_v62 = vpop.f32.mrf.mxu1  ;;  %v14647_v9 = vpop.eup %14646  ;;  %v3092_v47 = vadd.f32 %v21900_v22, %v18576_v60  ;;  %v21904_v22 = vld [vmem:[#allocation46_spill] sm:$0xff] }
 0x51f   : > { %v5392_v35 = vadd.f32 %v5376_v63, %v3084_v59  ;;  %14672 = vpow2.f32 %v12133_v21  ;;  %v18912_v59 = vadd.f32 %v21901_v28, %v18576_v60  ;;  %v3095_v21 = vadd.f32 %v21902_v55, %v18576_v60  ;;  %v21905_v28 = vld [vmem:[#allocation94_spill] sm:$0xff] }
 0x520   : > { %v14649_v44 = vpop.eup %14648  ;;  %14674 = vrcp.f32 %v5274_v13  ;;  %v18908_v56 = vpop.f32.mrf.mxu1  ;;  %v2473_v63 = vadd.f32 %v21903_v32, %v18359_v49  ;;  %v12132_v13 = vmul.f32 -1.442695, %v5151_v15  ;;  %v18920_v17 = vadd.f32 %v21904_v22, %v18576_v60 }
 0x521   : > { %v14651_v31 = vpop.eup %14650  ;;  %14676 = vtanh.f32 %v5392_v35  ;;  %v5377_v54 = vmul.f32 %v14649_v44, %v5361_v1  ;;  %v2465_v45 = vadd.f32 %v21905_v28, %v18366_v58  ;;  %v5362_v44 = vadd.f32 %v18571_v52, %v5087_v24  ;;  %v5090_v1 = vpop.f32.mrf.mxu0  ;;  %v21906_v28 = vld [vmem:[#allocation98_spill] sm:$0xff] }
 0x522   : > { %v14653_v2 = vpop.eup %14652  ;;  %14678 = vrcp.f32 %v5267_v4  ;;  %v5276_v50 = vadd.f32 1.0, %v14651_v31  ;;  %v5018_v6 = vpop.f32.mrf.mxu1  ;;  %v12135_v55 = vmul.f32 -1.442695, %v5154_v39  ;;  %v5156_v4 = vadd.f32 %v5012_v62, %v2473_v63 }
 0x523   : > { %v14655_v7 = vpop.eup %14654  ;;  %v5393_v12 = vadd.f32 %v5377_v54, %v3087_v27  ;;  %14680 = vrcp.f32 %v5269_v36  ;;  %v5271_v32 = vadd.f32 1.0, %v14653_v2  ;;  %v5153_v22 = vadd.f32 %v18882_v61, %v2465_v45  ;;  %v21907_v36 = vld [vmem:[#allocation104_spill] sm:$0xff] }
 0x524   : > { %v14657_v35 = vpop.eup %14656  ;;  %14682 = vrcp.f32 %v5276_v50  ;;  %v18925_v31 = vpop.f32.mrf.mxu1  ;;  %v2471_v27 = vadd.f32 %v21906_v28, %v18366_v58  ;;  %v2479_v54 = vadd.f32 %v21907_v36, %v18359_v49  ;;  %v5363_v63 = vadd.f32 %v18571_v52, %v5090_v1  ;;  %v21908_v36 = vld [vmem:[#allocation102_spill] sm:$0xff] }
 0x525   : > { %v14659_v15 = vpop.eup %14658  ;;  %14684 = vtanh.f32 %v5393_v12  ;;  %v5278_v14 = vadd.f32 1.0, %v14657_v35  ;;  %v5273_v12 = vadd.f32 1.0, %v14655_v7  ;;  %v12137_v45 = vmul.f32 -1.442695, %v5156_v4 }
 0x526   : > { %v14661_v3 = vpop.eup %14660  ;;  %v5378_v24 = vmul.f32 %v14659_v15, %v5362_v44  ;;  %14686 = vpow2.f32 %v12132_v13  ;;  %v5022_v50 = vpop.f32.mrf.mxu1  ;;  %v5158_v61 = vadd.f32 %v5018_v6, %v2479_v54  ;;  %v2475_v44 = vadd.f32 %v21908_v36, %v18366_v58 }
 0x527   : > { %v14663_v39 = vpop.eup %14662  ;;  %v5422_v62 = vsub.f32 %v18652_v38, %v14661_v3  ;;  %14688 = vrcp.f32 %v5278_v14  ;;  %v12134_v15 = vmul.f32 -1.442695, %v5153_v22  ;;  %v21909_v38 = vld [vmem:[#allocation108_spill] sm:$0xff]  ;;  %v2489_v14 = vadd.f32 %v17717_v53, %v18359_v49  ;;  %v18952_v22 = vpop.f32.mrf.mxu0 }
 0x528   : > { %v14665_v2 = vpop.eup %14664  ;;  %v5394_v35 = vadd.f32 %v5378_v24, %v3092_v47  ;;  %14690 = vpow2.f32 %v12135_v55  ;;  %v18934_v23 = vpop.f32.mrf.mxu1  ;;  %v2483_v52 = vadd.f32 %v21909_v38, %v18359_v49  ;;  %v12139_v54 = vmul.f32 -1.442695, %v5158_v61  ;;  %v21910_v38 = vld [vmem:[#allocation106_spill] sm:$0xff] }
 0x529   : > { %v14667_v28 = vpop.eup %14666  ;;  %v5438_v13 = vmul.f32 %v14647_v9, %v5422_v62  ;;  %14692 = vrcp.f32 %v5271_v32  ;;  %v18948_v9 = vld [vmem:[%s21373_s7] ss:$0 sm:$0xff]  ;;  %v5275_v62 = vadd.f32 1.0, %v14665_v2  ;;  %v5103_v61 = vpop.f32.mrf.mxu0 }
 0x52a   : > { %v14669_v20 = vpop.eup %14668  ;;  %14694 = vtanh.f32 %v5394_v35  ;;  %v5379_v47 = vmul.f32 %v14667_v28, %v5363_v63  ;;  %v5364_v55 = vadd.f32 %v18948_v9, %v18880_v41  ;;  %v5028_v4 = vpop.f32.mrf.mxu1  ;;  %v5155_v63 = vadd.f32 %v18892_v19, %v2471_v27 }
 0x52b   : > { %v14671_v7 = vpop.eup %14670  ;;  %v18942_v6 = vadd.f32 %v14661_v3, %v5438_v13  ;;  %v5423_v1 = vsub.f32 %v18667_v37, %v14669_v20  ;;  %14696 = vrcp.f32 %v5273_v12  ;;  %v5160_v3 = vadd.f32 %v5022_v50, %v2483_v52 }
 0x52c   : > { %v14673_v32 = vpop.eup %14672  ;;  %v5395_v53 = vadd.f32 %v5379_v47, %v3095_v21  ;;  %14698 = vpow2.f32 %v12137_v45  ;;  %v5365_v28 = vadd.f32 %v18948_v9, %v18906_v43  ;;  %v5277_v13 = vadd.f32 1.0, %v14671_v7  ;;  %v18957_v45 = vpop.f32.mrf.mxu1 }
 0x52d   : > { %v14675_v24 = vpop.eup %14674  ;;  %v5280_v37 = vadd.f32 1.0, %v14673_v32  ;;  %14700 = vpow2.f32 %v12134_v15  ;;  %v5439_v12 = vmul.f32 %v14663_v39, %v5423_v1  ;;  %v5162_v21 = vadd.f32 %v5028_v4, %v2489_v14 }
 0x52e   : > { %v14677_v35 = vpop.eup %14676  ;;  %14702 = vtanh.f32 %v5395_v53  ;;  %v5380_v41 = vmul.f32 %v14675_v24, %v5364_v55  ;;  %v12141_v19 = vmul.f32 -1.442695, %v5160_v3  ;;  %v2481_v39 = vadd.f32 %v21910_v38, %v18366_v58  ;;  %v5032_v4 = vpop.f32.mrf.mxu1 }
 0x52f   : > { %v14679_v36 = vpop.eup %14678  ;;  %14704 = vrcp.f32 %v5280_v37  ;;  %v5424_v50 = vsub.f32 %v18646_v25, %v14677_v35  ;;  %v18961_v27 = vadd.f32 %v14669_v20, %v5439_v12  ;;  %v12136_v52 = vmul.f32 -1.442695, %v5155_v63 }
 0x530   : > { %v14681_v2 = vpop.eup %14680  ;;  %v5396_v15 = vadd.f32 %v5380_v41, %v18902_v34  ;;  %14706 = vpow2.f32 %v12139_v54  ;;  %v5157_v14 = vadd.f32 %v18908_v56, %v2475_v44  ;;  %v5366_v20 = vadd.f32 %v18948_v9, %v5103_v61  ;;  %v18974_v44 = vpop.f32.mrf.mxu0 }
 0x531   : > { %v14683_v43 = vpop.eup %14682  ;;  %14708 = vrcp.f32 %v5275_v62  ;;  %v18968_v25 = vpack.c.bf16 %v18961_v27, %v18942_v6  ;;  %v5440_v34 = vmul.f32 %v14679_v36, %v5424_v50  ;;  %v12143_v55 = vmul.f32 -1.442695, %v5162_v21 }
 0x532   : > { %v14685_v47 = vpop.eup %14684  ;;  %14710 = vtanh.f32 %v5396_v15  ;;  %v5381_v7 = vmul.f32 %v14683_v43, %v5365_v28  ;;  %v2493_v56 = vadd.f32 %v17728_v46, %v18359_v49  ;;  %v12138_v37 = vmul.f32 -1.442695, %v5157_v14  ;;  %v5106_v21 = vpop.f32.mrf.mxu0 }
 0x533   : > { %21911 = vst [vmem:[#allocation23_spill] sm:$0xff] %v18968_v25  ;;  %v14687_v1 = vpop.eup %14686  ;;  %14712 = vrcp.f32 %v5277_v13  ;;  %v5425_v32 = vsub.f32 %v18659_v42, %v14685_v47  ;;  %5737 = vmatmul.mubr.bf16.vlgmr.msra.gmra.mxu0 %v18968_v25  ;;  %13842 = vmatprep.mubr.bf16.mxu1 %v18968_v25  ;;  %v18979_v3 = vadd.f32 %v14677_v35, %v5440_v34 }
 0x534   : > { %v14689_v53 = vpop.eup %14688  ;;  %v5397_v54 = vadd.f32 %v5381_v7, %v18912_v59  ;;  %14714 = vpow2.f32 %v12141_v19  ;;  %5746 = vmatprep.mubr.bf16.mxu0 %v21458_v0  ;;  %v5279_v46 = vadd.f32 1.0, %v14687_v1  ;;  %v5164_v41 = vadd.f32 %v5032_v4, %v2493_v56  ;;  %v21913_v19 = vld [vmem:[#allocation113_spill] sm:$0xff]  ;;  %v21915_v4 = vld [vmem:[#allocation50_spill] sm:$0xff] }
 0x535   : > { %v14691_v24 = vpop.eup %14690  ;;  %v5382_v62 = vmul.f32 %v14689_v53, %v5366_v20  ;;  %14716 = vpow2.f32 %v12136_v52  ;;  %v5441_v42 = vmul.f32 %v14681_v2, %v5425_v32  ;;  %v5159_v36 = vadd.f32 %v18925_v31, %v2481_v39  ;;  %v21912_v2 = vld [vmem:[#allocation110_spill] sm:$0xff] }
 0x536   : > { %v14693_v63 = vpop.eup %14692  ;;  %14718 = vtanh.f32 %v5397_v54  ;;  %v5282_v28 = vadd.f32 1.0, %v14691_v24  ;;  %v2485_v15 = vadd.f32 %v21912_v2, %v18366_v58  ;;  %v2491_v43 = vadd.f32 %v21913_v19, %v18366_v58  ;;  %v21917_v2 = vld [vmem:[#allocation116_spill] sm:$0xff] }
 0x537   : > { %v14695_v59 = vpop.eup %14694  ;;  %v5398_v12 = vadd.f32 %v5382_v62, %v18920_v17  ;;  %14720 = vpow2.f32 %v12143_v55  ;;  %v18984_v35 = vadd.f32 %v14685_v47, %v5441_v42  ;;  %v12145_v39 = vmul.f32 -1.442695, %v5164_v41 }
 0x538   : > { %v14697_v13 = vpop.eup %14696  ;;  %14722 = vrcp.f32 %v5282_v28  ;;  %v5426_v50 = vsub.f32 %v18689_v18, %v14695_v59  ;;  %v5367_v18 = vadd.f32 %v18948_v9, %v5106_v21  ;;  %v12140_v47 = vmul.f32 -1.442695, %v5159_v36  ;;  %v5034_v21 = vpop.f32.mrf.mxu1 }
 0x539   : > { %v14699_v61 = vpop.eup %14698  ;;  %14724 = vtanh.f32 %v5398_v12  ;;  %v18993_v17 = vpack.c.bf16 %v18984_v35, %v18979_v3  ;;  %v5161_v7 = vadd.f32 %v18934_v23, %v2485_v15  ;;  %v3111_v32 = vadd.f32 %v21915_v4, %v18576_v60 }
 0x53a   : > { %v14701_v31 = vpop.eup %14700  ;;  %14726 = vrcp.f32 %v5279_v46  ;;  %v5284_v38 = vadd.f32 1.0, %v14699_v61  ;;  %v5442_v52 = vmul.f32 %v14693_v63, %v5426_v50  ;;  %v5163_v56 = vadd.f32 %v18957_v45, %v2491_v43 }
 0x53b   : > { %21914 = vst [vmem:[#allocation22_spill] sm:$0xff] %v18993_v17  ;;  %v14703_v14 = vpop.eup %14702  ;;  %14728 = vpow2.f32 %v12138_v37  ;;  %13843 = vmatmul.mubr.bf16.vlgmr.msra.gmra.mxu1 %v18993_v17  ;;  %5747 = vmatmul.mubr.bf16.gmra.mxu0 %v18993_v17  ;;  %v5281_v54 = vadd.f32 1.0, %v14701_v31  ;;  %v2495_v15 = vadd.f32 %v21917_v2, %v18366_v58  ;;  %v5368_v19 = vadd.f32 %v18948_v9, %v18952_v22  ;;  %v21921_v2 = vld [vmem:[#allocation53_spill] sm:$0xff] }
 0x53c   : > { %v14705_v34 = vpop.eup %14704  ;;  %14730 = vrcp.f32 %v5284_v38  ;;  %v5427_v1 = vsub.f32 %v18702_v8, %v14703_v14  ;;  %v19000_v20 = vadd.f32 %v14695_v59, %v5442_v52  ;;  %5756 = vmatprep.mubr.bf16.mxu0 %v21458_v0  ;;  %v12142_v8 = vmul.f32 -1.442695, %v5161_v7  ;;  %v19009_v59 = vpop.f32.mrf.mxu0  ;;  %v21953_v17 = vld [vmem:[#allocation141_spill] sm:$0xff] }
 0x53d   : > { %v14707_v55 = vpop.eup %14706  ;;  %v5383_v53 = vmul.f32 %v14705_v34, %v5367_v18  ;;  %14732 = vpow2.f32 %v12145_v39  ;;  %v12144_v45 = vmul.f32 -1.442695, %v5163_v56  ;;  %v5369_v4 = vadd.f32 %v18948_v9, %v18974_v44 }
 0x53e   : > { %v14709_v23 = vpop.eup %14708  ;;  %v5286_v24 = vadd.f32 1.0, %v14707_v55  ;;  %v5443_v62 = vmul.f32 %v14697_v13, %v5427_v1  ;;  %14734 = vpow2.f32 %v12140_v47  ;;  %v5119_v39 = vpop.f32.mrf.mxu0  ;;  %v21918_v47 = vld [vmem:[#allocation44_spill] sm:$0xff] }
 0x53f   : > { %v14711_v37 = vpop.eup %14710  ;;  %v5399_v42 = vadd.f32 %v5383_v53, %v3111_v32  ;;  %v3116_v7 = vadd.f32 %v21918_v47, %v18576_v60  ;;  %v5370_v44 = vadd.f32 %v18948_v9, %v5119_v39 }
 0x540   : > { %v14713_v63 = vpop.eup %14712  ;;  %14736 = vrcp.f32 %v5286_v24  ;;  %v19006_v46 = vadd.f32 %v14703_v14, %v5443_v62  ;;  %v5428_v28 = vsub.f32 %v18681_v57, %v14711_v37  ;;  %v5165_v14 = vadd.f32 %v5034_v21, %v2495_v15 }
 0x541   : > { %v14715_v41 = vpop.eup %14714  ;;  %14738 = vtanh.f32 %v5399_v42  ;;  %v3124_v15 = vadd.f32 %v21921_v2, %v18576_v60  ;;  %v21926_v2 = vld [vmem:[#allocation54_spill] sm:$0xff] }
 0x542   : > { %v14717_v12 = vpop.eup %14716  ;;  %14740 = vrcp.f32 %v5281_v54  ;;  %v5288_v36 = vadd.f32 1.0, %v14715_v41  ;;  %v19013_v13 = vpack.c.bf16 %v19006_v46, %v19000_v20  ;;  %v5444_v50 = vmul.f32 %v14709_v23, %v5428_v28  ;;  %v13825_v54 = vpop.f32.mrf.mxu0 }
 0x543   : > { %v14719_v61 = vpop.eup %14718  ;;  %14742 = vpow2.f32 %v12142_v8  ;;  %v5283_v53 = vadd.f32 1.0, %v14717_v12  ;;  %v12146_v24 = vmul.f32 -1.442695, %v5165_v14 }
 0x544   : > { %21916 = vst [vmem:[#allocation27_spill] sm:$0xff] %v19013_v13  ;;  %v14721_v57 = vpop.eup %14720  ;;  %14744 = vrcp.f32 %v5288_v36  ;;  %5757 = vmatmul.mubr.bf16.gmra.mxu0 %v19013_v13  ;;  %13846 = vmatprep.mubr.bf16.mxu1 %v19013_v13  ;;  %v5429_v43 = vsub.f32 %v18697_v29, %v14719_v61  ;;  %v19022_v31 = vadd.f32 %v14711_v37, %v5444_v50  ;;  %v21919_v37 = vld [vmem:[#allocation48_spill] sm:$0xff]  ;;  %v5122_v50 = vpop.f32.mrf.mxu0 }
 0x545   : > { %v14723_v38 = vpop.eup %14722  ;;  %v5290_v52 = vadd.f32 1.0, %v14721_v57  ;;  %5766 = vmatprep.mubr.bf16.mxu0 %v21458_v0  ;;  %14746 = vpow2.f32 %v12144_v45  ;;  %v3119_v42 = vadd.f32 %v21919_v37, %v18576_v60  ;;  %v5371_v39 = vadd.f32 %v18948_v9, %v5122_v50 }
 0x546   : > { %v14725_v18 = vpop.eup %14724  ;;  %v5384_v22 = vmul.f32 %v14723_v38, %v5368_v19  ;;  %v5445_v34 = vmul.f32 %v14713_v63, %v5429_v43 }
 0x547   : > { %v14727_v1 = vpop.eup %14726  ;;  %14748 = vrcp.f32 %v5290_v52  ;;  %v5430_v55 = vsub.f32 %v18725_v33, %v14725_v18 }
 0x548   : > { %v14729_v29 = vpop.eup %14728  ;;  %v5400_v32 = vadd.f32 %v5384_v22, %v3116_v7  ;;  %v19030_v56 = vadd.f32 %v14719_v61, %v5445_v34  ;;  %v21922_v7 = vld [vmem:[#allocation56_spill] sm:$0xff] }
 0x549   : > { %v14731_v23 = vpop.eup %14730  ;;  %v5446_v62 = vmul.f32 %v14727_v1, %v5430_v55  ;;  %v5285_v12 = vadd.f32 1.0, %v14729_v29  ;;  %v3127_v22 = vadd.f32 %v21922_v7, %v18576_v60  ;;  %v5372_v55 = vadd.f32 %v18948_v9, %v19009_v59 }
 0x54a   : > { %14750 = vtanh.f32 %v5400_v32  ;;  %v5385_v8 = vmul.f32 %v14731_v23, %v5369_v4  ;;  %v19036_v33 = vpack.c.bf16 %v19030_v56, %v19022_v31  ;;  %v14733_v63 = vpop.eup %14732 }
 0x54b   : > { %v19039_v28 = vadd.f32 %v14725_v18, %v5446_v62  ;;  %v14735_v41 = vpop.eup %14734  ;;  %14752 = vrcp.f32 %v5283_v53  ;;  %v5292_v36 = vadd.f32 1.0, %v14733_v63  ;;  %v21923_v53 = vld [vmem:[#allocation51_spill] sm:$0xff] }
 0x54c   : > { %21920 = vst [vmem:[#allocation28_spill] sm:$0xff] %v19036_v33  ;;  %v5401_v45 = vadd.f32 %v5385_v8, %v3119_v42  ;;  %5767 = vmatmul.mubr.bf16.gmra.mxu0 %v19036_v33  ;;  %13847 = vmatmul.mubr.bf16.gmra.mxu1 %v19036_v33  ;;  %14754 = vpow2.f32 %v12146_v24  ;;  %v5287_v14 = vadd.f32 1.0, %v14735_v41  ;;  %v3132_v23 = vadd.f32 %v21923_v53, %v18576_v60 }
 0x54d   : > { %v14737_v21 = vpop.eup %14736  ;;  %5776 = vmatprep.mubr.bf16.mxu0 %v21458_v0 }
 0x54e   : > { %v14739_v61 = vpop.eup %14738  ;;  %14756 = vtanh.f32 %v5401_v45  ;;  %v5386_v57 = vmul.f32 %v14737_v21, %v5370_v44 }
 0x54f   : > { %v14741_v19 = vpop.eup %14740  ;;  %14758 = vrcp.f32 %v5292_v36  ;;  %v5431_v43 = vsub.f32 %v18741_v16, %v14739_v61 }
 0x550   : > { %v14743_v38 = vpop.eup %14742  ;;  %14760 = vrcp.f32 %v5285_v12  ;;  %v5402_v52 = vadd.f32 %v5386_v57, %v3124_v15  ;;  %v5373_v12 = vadd.f32 %v18948_v9, %v13825_v54  ;;  %v3135_v15 = vadd.f32 %v21926_v2, %v18576_v60  ;;  %v19162_v2 = vld [vmem:[%s21371_s5 + $0x4c] ss:$12 sps:$4 sm:$0xff]  }
 0x551   : > { %v14745_v18 = vpop.eup %14744  ;;  %v5447_v47 = vmul.f32 %v14741_v19, %v5431_v43  ;;  %v5289_v32 = vadd.f32 1.0, %v14743_v38 }
 0x552   : > { %14762 = vtanh.f32 %v5402_v52  ;;  %v5387_v34 = vmul.f32 %v14745_v18, %v5371_v39  ;;  %v14747_v1 = vpop.eup %14746 }
 0x553   : > { %v19052_v29 = vadd.f32 %v14739_v61, %v5447_v47  ;;  %14764 = vrcp.f32 %v5287_v14  ;;  %v5291_v8 = vadd.f32 1.0, %v14747_v1 }
 0x554   : > { %v14749_v16 = vpop.eup %14748  ;;  %v5403_v4 = vadd.f32 %v5387_v34, %v3127_v22 }
 0x555   : > { %v5388_v24 = vmul.f32 %v14749_v16, %v5372_v55  ;;  %v19058_v62 = vpack.c.bf16 %v19052_v29, %v19039_v28 }
 0x556   : > { %14766 = vtanh.f32 %v5403_v4 }
 0x557   : > { %21924 = vst [vmem:[#allocation29_spill] sm:$0xff] %v19058_v62  ;;  %v14751_v37 = vpop.eup %14750  ;;  %v5404_v42 = vadd.f32 %v5388_v24, %v3132_v23  ;;  %5777 = vmatmul.mubr.bf16.gmra.mxu0 %v19058_v62  ;;  %13850 = vmatprep.mubr.bf16.mxu1 %v19058_v62  ;;  %14768 = vrcp.f32 %v5289_v32  ;;  %v21944_v62 = vld [vmem:[#allocation130_spill] sm:$0xff] }
 0x558   : > { %5786 = vmatprep.mubr.bf16.mxu0 %v21458_v0  ;;  %v5432_v59 = vsub.f32 %v18710_v11, %v14751_v37  ;;  %v14753_v63 = vpop.eup %14752 }
 0x559   : > { %14770 = vtanh.f32 %v5404_v42  ;;  %v14755_v44 = vpop.eup %14754 }
 0x55a   : > { %v5448_v41 = vmul.f32 %v14753_v63, %v5432_v59  ;;  %14772 = vrcp.f32 %v5291_v8  ;;  %v5293_v38 = vadd.f32 1.0, %v14755_v44  ;;  %v14341_v8 = vld [vmem:[%s21371_s5 + $0xac] ss:$12 sps:$4 sm:$0xff]   ;;  %v19117_v59 = vld [vmem:[%s21371_s5 + $0x94] ss:$12 sps:$4 sm:$0xff]  }
 0x55b   : > { %v14757_v45 = vpop.eup %14756  ;;  %6484 = vmatprep.subr.bf16.mxu1 %v14341_v8  ;;  %v19122_v63 = vld [vmem:[%s21371_s5 + $0x90] ss:$12 sps:$4 sm:$0xff]  }
 0x55c   : > { %v14759_v36 = vpop.eup %14758  ;;  %v5433_v21 = vsub.f32 %v18734_v30, %v14757_v45  ;;  %v19066_v50 = vadd.f32 %v14751_v37, %v5448_v41  ;;  %v14338_v44 = vld [vmem:[%s21371_s5 + $0xb0] ss:$12 sps:$4 sm:$0xff]  }
 0x55d   : > { %v14761_v61 = vpop.eup %14760  ;;  %v5389_v57 = vmul.f32 %v14759_v36, %v5373_v12  ;;  %v19132_v41 = vld [vmem:[%s21371_s5 + $0x7c] ss:$12 sps:$4 sm:$0xff]   ;;  %13858 = vmatprep.subr.bf16.mxu0 %v14338_v44  ;;  %v14345_v12 = vld [vmem:[%s21371_s5 + $0x98] ss:$12 sps:$4 sm:$0xff]  }
 0x55e   : > { %21925 = vst [vmem:[#allocation21_spill] sm:$0xff] %v19066_v50  ;;  %v5449_v19 = vmul.f32 %v14761_v61, %v5433_v21  ;;  %13859 = vmatpush3.bf16.msra.mxu0 %v14338_v44  ;;  %v19147_v36 = vld [vmem:[%s21371_s5 + $0x64] ss:$12 sps:$4 sm:$0xff]   ;;  %v19152_v21 = vld [vmem:[%s21371_s5 + $0x60] ss:$12 sps:$4 sm:$0xff]  }
 0x55f   : > { %v14763_v11 = vpop.eup %14762  ;;  %v5405_v43 = vadd.f32 %v5389_v57, %v3135_v15  ;;  %13860 = vmatprep.subr.bf16.mxu0 %v14345_v12  ;;  %v14352_v61 = vld [vmem:[%s21371_s5 + $0x80] ss:$12 sps:$4 sm:$0xff]   ;;  %v19167_v15 = vld [vmem:[%s21371_s5 + $0x48] ss:$12 sps:$4 sm:$0xff]  }
 0x560   : > { %v19070_v39 = vadd.f32 %v14757_v45, %v5449_v19  ;;  %v5434_v52 = vsub.f32 %v18762_v10, %v14763_v11  ;;  %v14765_v54 = vpop.eup %14764  ;;  %v19137_v45 = vld [vmem:[%s21371_s5 + $0x78] ss:$12 sps:$4 sm:$0xff]   ;;  %v19174_v57 = vld [vmem:[%s21371_s5 + $0x34] ss:$12 sps:$4 sm:$0xff]  }
 0x561   : > { %14774 = vtanh.f32 %v5405_v43  ;;  %v14359_v19 = vld [vmem:[%s21371_s5 + $0x68] ss:$12 sps:$4 sm:$0xff]  }
 0x562   : > { %21927 = vst [vmem:[#allocation32_spill] sm:$0xff] %v19070_v39  ;;  %v19075_v30 = vpack.c.bf16 %v19070_v39, %v19066_v50  ;;  %v5450_v14 = vmul.f32 %v14765_v54, %v5434_v52  ;;  %14776 = vrcp.f32 %v5293_v38  ;;  %13861 = vmatpush3.bf16.msra.mxu0 %v14345_v12  ;;  %v19189_v43 = vld [vmem:[%s21371_s5 + $0x1c] ss:$12 sps:$4 sm:$0xff]   ;;  %v19197_v52 = vld [vmem:[%s21371_s5 + $0x18] ss:$12 sps:$4 sm:$0xff]  }
 0x563   : > { %v14767_v18 = vpop.eup %14766  ;;  %13862 = vmatprep.subr.bf16.mxu0 %v14352_v61  ;;  %v14363_v38 = vld [vmem:[%s21371_s5 + $0x50] ss:$12 sps:$4 sm:$0xff]  }
 0x564   : > { %21928 = vst [vmem:[#allocation33_spill] sm:$0xff] %v19075_v30  ;;  %5787 = vmatmul.mubr.bf16.gmra.mxu0 %v19075_v30  ;;  %13851 = vmatmul.mubr.bf16.gmra.mxu1 %v19075_v30  ;;  %v5435_v47 = vsub.f32 %v18772_v51, %v14767_v18  ;;  %v19080_v7 = vadd.f32 %v14763_v11, %v5450_v14  ;;  %v14769_v22 = vpop.eup %14768  ;;  %v19182_v11 = vld [vmem:[%s21371_s5 + $0x30] ss:$12 sps:$4 sm:$0xff]   ;;  %v14367_v14 = vld [vmem:[%s21371_s5 + $0x38] ss:$12 sps:$4 sm:$0xff]  }
 0x565   : > { %5796 = vmatprep.mubr.bf16.mxu0 %v21458_v0  ;;  %v19204_v54 = vld [vmem:[%s21371_s5 + $0x4] ss:$12 sps:$4 sm:$0xff]   ;;  %v21939_v12 = vld [vmem:[#allocation120_spill] sm:$0xff] }
 0x566   : > { %21929 = vst [vmem:[#allocation34_spill] sm:$0xff] %v19080_v7  ;;  %v14771_v10 = vpop.eup %14770  ;;  %v5451_v34 = vmul.f32 %v14769_v22, %v5435_v47  ;;  %13863 = vmatpush3.bf16.msra.mxu0 %v14352_v61  ;;  %21935 = vst [vmem:[#allocation72_spill] sm:$0xff] %v19204_v54  ;;  %v14368_v47 = vld [vmem:[%s21371_s5 + $0x20] ss:$12 sps:$4 sm:$0xff]   ;;  %v14369_v22 = vld [vmem:[%s21371_s5 + $0x8] ss:$12 sps:$4 sm:$0xff]   ;;  %v2501_v61 = vadd.f32 %v21939_v12, %v18366_v58 }
 0x567   : > { %v5436_v1 = vsub.f32 %v18751_v40, %v14771_v10  ;;  %v14773_v55 = vpop.eup %14772  ;;  %13864 = vmatprep.subr.bf16.mxu0 %v14359_v19 }
 0x568   : > { %v19084_v16 = vadd.f32 %v14767_v18, %v5451_v34  ;;  %v19212_v18 = vld [vmem:[%s21371_s5] ss:$12 sps:$4 sm:$0xff]  }
 0x569   : > { %v5452_v4 = vmul.f32 %v14773_v55, %v5436_v1  ;;  %21936 = vst [vmem:[#allocation66_spill] sm:$0xff] %v19212_v18 }
 0x56a   : > { %21930 = vst [vmem:[#allocation57_spill] sm:$0xff] %v19084_v16  ;;  %v19088_v32 = vpack.c.bf16 %v19084_v16, %v19080_v7  ;;  %13865 = vmatpush3.bf16.msra.mxu0 %v14359_v19 }
 0x56b   : > { %v19090_v53 = vadd.f32 %v14771_v10, %v5452_v4  ;;  %13866 = vmatprep.subr.bf16.mxu0 %v14363_v38  ;;  %v21937_v10 = vld [vmem:[#allocation118_spill] sm:$0xff] }
 0x56c   : > { %21931 = vst [vmem:[#allocation59_spill] sm:$0xff] %v19088_v32  ;;  %5797 = vmatmul.mubr.bf16.gmra.mxu0 %v19088_v32  ;;  %13854 = vmatprep.mubr.bf16.mxu1 %v19088_v32  ;;  %v2499_v34 = vadd.f32 %v21937_v10, %v18359_v49 }
 0x56d   : > { %21932 = vst [vmem:[#allocation64_spill] sm:$0xff] %v19090_v53  ;;  %5806 = vmatprep.mubr.bf16.mxu0 %v21458_v0 }
 0x56e   : > { %v14775_v51 = vpop.eup %14774  ;;  %13867 = vmatpush3.bf16.msra.mxu0 %v14363_v38 }
 0x56f   : > { %v5437_v23 = vsub.f32 %v18767_v5, %v14775_v51  ;;  %v14777_v40 = vpop.eup %14776  ;;  %v19111_v5 = vld [vmem:[%s21371_s5 + $0xa8] ss:$12 sps:$4 sm:$0xff]   ;;  %13868 = vmatprep.subr.bf16.mxu0 %v14367_v14 }
 0x570   : > { %6485 = vmatpush1.bf16.msra.mxu1 %v19111_v5 }
 0x571   : > { %v5453_v24 = vmul.f32 %v14777_v40, %v5437_v23  ;;  %6486 = vmatprep.subr.bf16.mxu1 %v19117_v59 }
 0x572   : > { %13869 = vmatpush3.bf16.msra.mxu0 %v14367_v14 }
 0x573   : > { %v19096_v37 = vadd.f32 %v14775_v51, %v5453_v24  ;;  %13870 = vmatprep.subr.bf16.mxu0 %v14368_v47  ;;  %v21938_v51 = vld [vmem:[#allocation122_spill] sm:$0xff] }
 0x574   : > { %6487 = vmatpush1.bf16.msra.mxu1 %v19122_v63  ;;  %v2503_v23 = vadd.f32 %v21938_v51, %v18359_v49 }
 0x575   : > { %21933 = vst [vmem:[#allocation62_spill] sm:$0xff] %v19096_v37  ;;  %v19100_v42 = vpack.c.bf16 %v19096_v37, %v19090_v53  ;;  %6488 = vmatprep.subr.bf16.mxu1 %v19132_v41 }
 0x576   : > { %13871 = vmatpush3.bf16.msra.mxu0 %v14368_v47 }
 0x577   : > { %21934 = vst [vmem:[#allocation68_spill] sm:$0xff] %v19100_v42  ;;  %5807 = vmatmul.mubr.bf16.gmra.mxu0 %v19100_v42  ;;  %13855 = vmatmul.mubr.bf16.gmra.mxu1 %v19100_v42  ;;  %v21942_v42 = vld [vmem:[#allocation127_spill] sm:$0xff] }
 0x578   : > { %6516 = vmatprep.mubr.bf16.mxu1 %v21458_v0  ;;  %6489 = vmatpush1.bf16.msra.mxu1 %v19137_v45 }
 0x579   : > { %6490 = vmatprep.subr.bf16.mxu1 %v19147_v36  ;;  %13872 = vmatprep.subr.bf16.mxu0 %v14369_v22 }
 0x57a   : > { %13873 = vmatpush3.bf16.msra.mxu0 %v14369_v22 }
 0x57b   : > { %7264 = vmatprep.subr.bf16.mxu0 %v14341_v8  ;;  %v2509_v8 = vadd.f32 %v17757_v48, %v18359_v49  ;;  %v2511_v48 = vadd.f32 %v21942_v42, %v18366_v58 }
 0x57c   : > { %6491 = vmatpush1.bf16.msra.mxu1 %v19152_v21 }
 0x57d   : > { %6492 = vmatprep.subr.bf16.mxu1 %v19162_v2 }
 0x580   : > { %6493 = vmatpush1.bf16.msra.mxu1 %v19167_v15 }
 0x581   : > { %6494 = vmatprep.subr.bf16.mxu1 %v19174_v57 }
 0x584   : > { %6495 = vmatpush1.bf16.msra.mxu1 %v19182_v11 }
 0x585   : > { %6496 = vmatprep.subr.bf16.mxu1 %v19189_v43 }
 0x588   : > { %6497 = vmatpush1.bf16.msra.mxu1 %v19197_v52 }
 0x589   : > { %6498 = vmatprep.subr.bf16.mxu1 %v19204_v54 }
 0x58c   : > { %6499 = vmatpush1.bf16.msra.mxu1 %v19212_v18 }
 0x5f3   : > { %v5738_v1 = vpop.f32.mrf.mxu0 }
 0x5f4   : > { %v5914_v55 = vadd.f32 %v5738_v1, %v2499_v34  ;;  %v21940_v34 = vld [vmem:[#allocation128_spill] sm:$0xff] }
 0x5f5   : > { %v5740_v4 = vpop.f32.mrf.mxu0  ;;  %v2513_v1 = vadd.f32 %v21940_v34, %v18359_v49 }
 0x5f6   : > { %v12171_v40 = vmul.f32 -1.442695, %v5914_v55  ;;  %v5915_v14 = vadd.f32 %v5740_v4, %v2501_v61  ;;  %v2519_v4 = vadd.f32 %v17771_v26, %v18359_v49  ;;  %v2515_v26 = vadd.f32 %v21944_v62, %v18366_v58 }
 0x5f7   : > { %v5742_v24 = vpop.f32.mrf.mxu0 }
 0x5f8   : > { %14778 = vpow2.f32 %v12171_v40  ;;  %v5916_v44 = vadd.f32 %v5742_v24, %v2503_v23  ;;  %v12172_v51 = vmul.f32 -1.442695, %v5915_v14  ;;  %v21941_v23 = vld [vmem:[#allocation124_spill] sm:$0xff] }
 0x5f9   : > { %v5744_v19 = vpop.f32.mrf.mxu0  ;;  %v2505_v24 = vadd.f32 %v21941_v23, %v18366_v58  ;;  %v21943_v23 = vld [vmem:[#allocation133_spill] sm:$0xff] }
 0x5fa   : > { %v12173_v38 = vmul.f32 -1.442695, %v5916_v44 }
 0x5fb   : > { %v5748_v47 = vpop.f32.mrf.mxu0  ;;  %v5917_v61 = vadd.f32 %v5744_v19, %v2505_v24 }
 0x5fc   : > { %14780 = vpow2.f32 %v12173_v38  ;;  %v5918_v22 = vadd.f32 %v5748_v47, %v2509_v8 }
 0x5fd   : > { %v5750_v10 = vpop.f32.mrf.mxu0 }
 0x5fe   : > { %v12175_v55 = vmul.f32 -1.442695, %v5918_v22  ;;  %v5919_v38 = vadd.f32 %v5750_v10, %v2511_v48  ;;  %v21945_v10 = vld [vmem:[#allocation132_spill] sm:$0xff] }
 0x5ff   : > { %v5752_v40 = vpop.f32.mrf.mxu0  ;;  %v2521_v24 = vadd.f32 %v21945_v10, %v18366_v58 }
 0x600   : > { %14782 = vpow2.f32 %v12175_v55  ;;  %v5920_v12 = vadd.f32 %v5752_v40, %v2513_v1  ;;  %v2523_v55 = vadd.f32 %v21943_v23, %v18359_v49  ;;  %v12174_v40 = vmul.f32 -1.442695, %v5917_v61  ;;  %v21947_v23 = vld [vmem:[#allocation135_spill] sm:$0xff] }
 0x601   : > { %v5754_v44 = vpop.f32.mrf.mxu0  ;;  %14784 = vpow2.f32 %v12172_v51  ;;  %v12176_v42 = vmul.f32 -1.442695, %v5919_v38 }
 0x602   : > { %v12177_v8 = vmul.f32 -1.442695, %v5920_v12  ;;  %v21946_v12 = vld [vmem:[#allocation136_spill] sm:$0xff]  ;;  %v5921_v38 = vadd.f32 %v5754_v44, %v2515_v26 }
 0x603   : > { %v2529_v48 = vadd.f32 %v21946_v12, %v18359_v49  ;;  %v21948_v12 = vld [vmem:[#allocation139_spill] sm:$0xff] }
 0x604   : > { %v5758_v47 = vpop.f32.mrf.mxu0  ;;  %14786 = vpow2.f32 %v12177_v8 }
 0x605   : > { %v5922_v14 = vadd.f32 %v5758_v47, %v2519_v4  ;;  %v14779_v22 = vpop.eup %14778  ;;  %v19246_v4 = vpop.f32.mrf.mxu1 }
 0x606   : > { %v5760_v34 = vpop.f32.mrf.mxu0  ;;  %v6042_v1 = vadd.f32 1.0, %v14779_v22 }
 0x607   : > { %v12179_v32 = vmul.f32 -1.442695, %v5922_v14  ;;  %v5923_v14 = vadd.f32 %v5760_v34, %v2521_v24 }
 0x608   : > { %v5762_v30 = vpop.f32.mrf.mxu0  ;;  %14788 = vrcp.f32 %v6042_v1  ;;  %v5851_v1 = vpop.f32.mrf.mxu1 }
 0x609   : > { %v5924_v19 = vadd.f32 %v5762_v30, %v2523_v55  ;;  %v14781_v51 = vpop.eup %14780  ;;  %14790 = vpow2.f32 %v12179_v32  ;;  %v2525_v55 = vadd.f32 %v21947_v23, %v18366_v58  ;;  %v2533_v32 = vadd.f32 %v21948_v12, %v18359_v49 }
 0x60a   : > { %v5764_v8 = vpop.f32.mrf.mxu0  ;;  %v6044_v61 = vadd.f32 1.0, %v14781_v51  ;;  %14792 = vpow2.f32 %v12174_v40  ;;  %v12178_v51 = vmul.f32 -1.442695, %v5921_v38  ;;  %v12180_v44 = vmul.f32 -1.442695, %v5923_v14 }
 0x60b   : > { %v12181_v47 = vmul.f32 -1.442695, %v5924_v19  ;;  %14794 = vpow2.f32 %v12176_v42  ;;  %v5925_v34 = vadd.f32 %v5764_v8, %v2525_v55  ;;  %v6138_v14 = vadd.f32 %v18948_v9, %v5851_v1 }
 0x60c   : > { %v5768_v62 = vpop.f32.mrf.mxu0  ;;  %14796 = vrcp.f32 %v6044_v61 }
 0x60d   : > { %v5926_v30 = vadd.f32 %v5768_v62, %v2529_v48  ;;  %v14783_v22 = vpop.eup %14782  ;;  %14798 = vpow2.f32 %v12181_v47  ;;  %v21949_v48 = vld [vmem:[#allocation138_spill] sm:$0xff]  ;;  %v19254_v62 = vpop.f32.mrf.mxu1 }
 0x60e   : > { %v5770_v10 = vpop.f32.mrf.mxu0  ;;  %v6046_v33 = vadd.f32 1.0, %v14783_v22  ;;  %v14785_v42 = vpop.eup %14784  ;;  %v2531_v61 = vadd.f32 %v21949_v48, %v18366_v58 }
 0x60f   : > { %v12183_v40 = vmul.f32 -1.442695, %v5926_v30  ;;  %v6043_v22 = vadd.f32 1.0, %v14785_v42  ;;  %v21950_v30 = vld [vmem:[#allocation142_spill] sm:$0xff] }
 0x610   : > { %v5772_v26 = vpop.f32.mrf.mxu0  ;;  %14800 = vrcp.f32 %v6046_v33  ;;  %v5927_v38 = vadd.f32 %v5770_v10, %v2531_v61  ;;  %v12182_v33 = vmul.f32 -1.442695, %v5925_v34  ;;  %v2539_v55 = vadd.f32 %v21950_v30, %v18359_v49 }
 0x611   : > { %v5928_v19 = vadd.f32 %v5772_v26, %v2533_v32  ;;  %v14787_v24 = vpop.eup %14786  ;;  %14802 = vpow2.f32 %v12183_v40  ;;  %v5854_v32 = vpop.f32.mrf.mxu1  ;;  %v21951_v40 = vld [vmem:[#allocation60_spill] sm:$0xff] }
 0x612   : > { %v6048_v47 = vadd.f32 1.0, %v14787_v24  ;;  %14804 = vpow2.f32 %v12178_v51  ;;  %v5774_v12 = vpop.f32.mrf.mxu0  ;;  %v3140_v24 = vadd.f32 %v21951_v40, %v18576_v60  ;;  %v12184_v10 = vmul.f32 -1.442695, %v5927_v38  ;;  %v21954_v38 = vld [vmem:[#allocation145_spill] sm:$0xff] }
 0x613   : > { %v12185_v23 = vmul.f32 -1.442695, %v5928_v19  ;;  %14806 = vpow2.f32 %v12180_v44  ;;  %v6139_v34 = vadd.f32 %v18948_v9, %v5854_v32  ;;  %v2535_v40 = vadd.f32 %v21953_v17, %v18366_v58 }
 0x614   : > { %14808 = vrcp.f32 %v6048_v47  ;;  %v6140_v32 = vadd.f32 %v18948_v9, %v19246_v4 }
 0x615   : > { %v14789_v8 = vpop.eup %14788  ;;  %14810 = vpow2.f32 %v12185_v23  ;;  %v21952_v23 = vld [vmem:[#allocation63_spill] sm:$0xff] }
 0x616   : > { %v14791_v26 = vpop.eup %14790  ;;  %v6154_v51 = vmul.f32 %v14789_v8, %v6138_v14  ;;  %14812 = vrcp.f32 %v6043_v22  ;;  %v3143_v13 = vadd.f32 %v21952_v23, %v18576_v60  ;;  %v19266_v14 = vpop.f32.mrf.mxu1 }
 0x617   : > { %v5778_v19 = vpop.f32.mrf.mxu0  ;;  %v14793_v48 = vpop.eup %14792  ;;  %v6050_v44 = vadd.f32 1.0, %v14791_v26  ;;  %14814 = vpow2.f32 %v12182_v33 }
 0x618   : > { %v5930_v42 = vadd.f32 %v5778_v19, %v2539_v55  ;;  %v14795_v1 = vpop.eup %14794  ;;  %v6170_v61 = vadd.f32 %v6154_v51, %v3140_v24  ;;  %v2543_v55 = vadd.f32 %v21954_v38, %v18359_v49  ;;  %v6045_v24 = vadd.f32 1.0, %v14793_v48  ;;  %v21955_v38 = vld [vmem:[#allocation58_spill] sm:$0xff] }
 0x619   : > { %v5780_v47 = vpop.f32.mrf.mxu0  ;;  %v14797_v30 = vpop.eup %14796  ;;  %14816 = vrcp.f32 %v6050_v44  ;;  %v5929_v19 = vadd.f32 %v5774_v12, %v2535_v40  ;;  %v6047_v23 = vadd.f32 1.0, %v14795_v1  ;;  %v3148_v53 = vadd.f32 %v21955_v38, %v18576_v60 }
 0x61a   : > { %v12187_v22 = vmul.f32 -1.442695, %v5930_v42  ;;  %v14799_v8 = vpop.eup %14798  ;;  %14818 = vtanh.f32 %v6170_v61  ;;  %v6155_v33 = vmul.f32 %v14797_v30, %v6139_v34  ;;  %v5867_v42 = vpop.f32.mrf.mxu1  ;;  %v21956_v61 = vld [vmem:[#allocation144_spill] sm:$0xff]  ;;  %v6141_v30 = vadd.f32 %v18948_v9, %v19254_v62  ;;  %v21960_v62 = vld [vmem:[#allocation67_spill] sm:$0xff] }
 0x61b   : > { %v5782_v26 = vpop.f32.mrf.mxu0  ;;  %v6052_v51 = vadd.f32 1.0, %v14799_v8  ;;  %14820 = vpow2.f32 %v12184_v10  ;;  %v2541_v48 = vadd.f32 %v21956_v61, %v18366_v58  ;;  %v12186_v12 = vmul.f32 -1.442695, %v5929_v19  ;;  %v21957_v8 = vld [vmem:[#allocation61_spill] sm:$0xff] }
 0x61c   : > { %v6171_v17 = vadd.f32 %v6155_v33, %v3143_v13  ;;  %14822 = vpow2.f32 %v12187_v22  ;;  %v5932_v44 = vadd.f32 %v5782_v26, %v2543_v55  ;;  %v21958_v55 = vld [vmem:[#allocation65_spill] sm:$0xff]  ;;  %v19284_v33 = vpop.f32.mrf.mxu1  ;;  %v21959_v26 = vld [vmem:[#allocation148_spill] sm:$0xff] }
 0x61d   : > { %v14801_v25 = vpop.eup %14800  ;;  %14824 = vrcp.f32 %v6052_v51  ;;  %v5784_v1 = vpop.f32.mrf.mxu0  ;;  %v3156_v51 = vadd.f32 %v21960_v62, %v18576_v60 }
 0x61e   : > { %v14803_v37 = vpop.eup %14802  ;;  %v6156_v16 = vmul.f32 %v14801_v25, %v6140_v32  ;;  %14826 = vtanh.f32 %v6171_v17  ;;  %v12189_v40 = vmul.f32 -1.442695, %v5932_v44  ;;  %v3151_v25 = vadd.f32 %v21957_v8, %v18576_v60 }
 0x61f   : > { %v14805_v4 = vpop.eup %14804  ;;  %14828 = vrcp.f32 %v6045_v24  ;;  %v6054_v10 = vadd.f32 1.0, %v14803_v37  ;;  %v19282_v32 = vadd.f32 %v21958_v55, %v18576_v60  ;;  %v5931_v24 = vadd.f32 %v5780_v47, %v2541_v48  ;;  %v21961_v55 = vld [vmem:[#allocation71_spill] sm:$0xff]  ;;  %v5870_v48 = vpop.f32.mrf.mxu1 }
 0x620   : > { %v14807_v13 = vpop.eup %14806  ;;  %v6172_v34 = vadd.f32 %v6156_v16, %v3148_v53  ;;  %14830 = vrcp.f32 %v6047_v23  ;;  %v2549_v16 = vadd.f32 %v21959_v26, %v18359_v49  ;;  %v6049_v19 = vadd.f32 1.0, %v14805_v4  ;;  %v21964_v26 = vld [vmem:[#allocation150_spill] sm:$0xff] }
 0x621   : > { %v14809_v22 = vpop.eup %14808  ;;  %14832 = vrcp.f32 %v6054_v10  ;;  %v6051_v61 = vadd.f32 1.0, %v14807_v13  ;;  %v3159_v7 = vadd.f32 %v21961_v55, %v18576_v60  ;;  %v6142_v47 = vadd.f32 %v18948_v9, %v5867_v42 }
 0x622   : > { %v14811_v37 = vpop.eup %14810  ;;  %14834 = vtanh.f32 %v6172_v34  ;;  %v6157_v53 = vmul.f32 %v14809_v22, %v6141_v30  ;;  %v21962_v34 = vld [vmem:[#allocation147_spill] sm:$0xff]  ;;  %v12188_v13 = vmul.f32 -1.442695, %v5931_v24 }
 0x623   : > { %v6056_v23 = vadd.f32 1.0, %v14811_v37  ;;  %14836 = vpow2.f32 %v12186_v12  ;;  %v14813_v44 = vpop.eup %14812  ;;  %v2545_v30 = vadd.f32 %v21962_v34, %v18366_v58  ;;  %v21963_v12 = vld [vmem:[#allocation151_spill] sm:$0xff]  ;;  %v6143_v34 = vadd.f32 %v18948_v9, %v5870_v48 }
 0x624   : > { %v5788_v17 = vpop.f32.mrf.mxu0  ;;  %v6173_v38 = vadd.f32 %v6157_v53, %v3151_v25  ;;  %14838 = vpow2.f32 %v12189_v40  ;;  %v14815_v8 = vpop.eup %14814  ;;  %v2553_v37 = vadd.f32 %v21963_v12, %v18359_v49  ;;  %v21965_v53 = vld [vmem:[#allocation154_spill] sm:$0xff] }
 0x625   : > { %v5934_v10 = vadd.f32 %v5788_v17, %v2549_v16  ;;  %14840 = vrcp.f32 %v6056_v23  ;;  %v2551_v16 = vadd.f32 %v21964_v26, %v18366_v58  ;;  %v2559_v62 = vadd.f32 %v21965_v53, %v18359_v49 }
 0x626   : > { %v5790_v4 = vpop.f32.mrf.mxu0  ;;  %v14817_v22 = vpop.eup %14816  ;;  %14842 = vtanh.f32 %v6173_v38  ;;  %v6053_v24 = vadd.f32 1.0, %v14815_v8  ;;  %v5933_v39 = vadd.f32 %v5784_v1, %v2545_v30 }
 0x627   : > { %v12191_v40 = vmul.f32 -1.442695, %v5934_v10  ;;  %v14819_v25 = vpop.eup %14818  ;;  %14844 = vrcp.f32 %v6049_v19  ;;  %v6158_v17 = vmul.f32 %v14817_v22, %v6142_v47 }
 0x628   : > { %v5792_v42 = vpop.f32.mrf.mxu0  ;;  %v14821_v23 = vpop.eup %14820  ;;  %v6202_v55 = vsub.f32 %v18942_v6, %v14819_v25  ;;  %14846 = vrcp.f32 %v6051_v61  ;;  %v19306_v6 = vld [vmem:[%s21373_s7] ss:$0 sm:$0xff] }
 0x629   : > { %v5936_v12 = vadd.f32 %v5792_v42, %v2553_v37  ;;  %v14823_v38 = vpop.eup %14822  ;;  %v6174_v10 = vadd.f32 %v6158_v17, %v3156_v51  ;;  %14848 = vpow2.f32 %v12191_v40  ;;  %v6144_v9 = vadd.f32 %v19306_v6, %v19266_v14  ;;  %v21966_v14 = vld [vmem:[#allocation157_spill] sm:$0xff] }
 0x62a   : > { %v5794_v18 = vpop.f32.mrf.mxu0  ;;  %v14825_v26 = vpop.eup %14824  ;;  %v6218_v50 = vmul.f32 %v14813_v44, %v6202_v55  ;;  %v6058_v54 = vadd.f32 1.0, %v14823_v38  ;;  %14850 = vpow2.f32 %v12188_v13  ;;  %v6055_v61 = vadd.f32 1.0, %v14821_v23 }
 0x62b   : > { %v12193_v19 = vmul.f32 -1.442695, %v5936_v12  ;;  %v14827_v47 = vpop.eup %14826  ;;  %14852 = vtanh.f32 %v6174_v10  ;;  %v6159_v51 = vmul.f32 %v14825_v26, %v6143_v34  ;;  %v12190_v13 = vmul.f32 -1.442695, %v5933_v39  ;;  %v19326_v10 = vpop.f32.mrf.mxu1 }
 0x62c   : > { %v5798_v1 = vpop.f32.mrf.mxu0  ;;  %v14829_v8 = vpop.eup %14828  ;;  %v19310_v30 = vadd.f32 %v14819_v25, %v6218_v50  ;;  %v6203_v44 = vsub.f32 %v18961_v27, %v14827_v47  ;;  %14854 = vrcp.f32 %v6058_v54  ;;  %v5935_v40 = vadd.f32 %v5790_v4, %v2551_v16  ;;  %v21967_v25 = vld [vmem:[#allocation69_spill] sm:$0xff] }
 0x62d   : > { %v5938_v48 = vadd.f32 %v5798_v1, %v2559_v62  ;;  %v14831_v22 = vpop.eup %14830  ;;  %v6175_v37 = vadd.f32 %v6159_v51, %v3159_v7  ;;  %14856 = vpow2.f32 %v12193_v19  ;;  %v2563_v42 = vadd.f32 %v21966_v14, %v18359_v49  ;;  %v21968_v54 = vld [vmem:[#allocation153_spill] sm:$0xff]  ;;  %v5883_v14 = vpop.f32.mrf.mxu1 }
 0x62e   : > { %v19313_v53 = vpop.f32.mrf.mxu0  ;;  %v14833_v17 = vpop.eup %14832  ;;  %14858 = vrcp.f32 %v6053_v24  ;;  %v6219_v55 = vmul.f32 %v14829_v8, %v6203_v44  ;;  %v3167_v27 = vadd.f32 %v21967_v25, %v18576_v60  ;;  %v2555_v62 = vadd.f32 %v21968_v54, %v18366_v58  ;;  %v21971_v54 = vld [vmem:[#allocation156_spill] sm:$0xff] }
 0x62f   : > { %v12195_v23 = vmul.f32 -1.442695, %v5938_v48  ;;  %v14835_v50 = vpop.eup %14834  ;;  %v6160_v7 = vmul.f32 %v14833_v17, %v6144_v9  ;;  %14860 = vtanh.f32 %v6175_v37  ;;  %v6145_v16 = vadd.f32 %v19306_v6, %v19284_v33 }
 0x630   : > { %v5802_v39 = vpop.f32.mrf.mxu0  ;;  %v14837_v4 = vpop.eup %14836  ;;  %14862 = vrcp.f32 %v6055_v61  ;;  %v19323_v12 = vadd.f32 %v14827_v47, %v6219_v55  ;;  %v12192_v26 = vmul.f32 -1.442695, %v5935_v40  ;;  %v6204_v19 = vsub.f32 %v18979_v3, %v14835_v50  ;;  %v21970_v40 = vld [vmem:[#allocation160_spill] sm:$0xff] }
 0x631   : > { %v5940_v34 = vadd.f32 %v5802_v39, %v2563_v42  ;;  %v14839_v38 = vpop.eup %14838  ;;  %v6176_v24 = vadd.f32 %v6160_v7, %v19282_v32  ;;  %14864 = vpow2.f32 %v12190_v13  ;;  %v5937_v1 = vadd.f32 %v5794_v18, %v2555_v62 }
 0x632   : > { %v14841_v9 = vpop.eup %14840  ;;  %v6060_v51 = vadd.f32 1.0, %v14839_v38  ;;  %14866 = vpow2.f32 %v12195_v23  ;;  %v5804_v8 = vpop.f32.mrf.mxu0  ;;  %v19331_v47 = vpack.c.bf16 %v19323_v12, %v19310_v30  ;;  %v6220_v32 = vmul.f32 %v14831_v22, %v6204_v19 }
 0x633   : > { %v12197_v61 = vmul.f32 -1.442695, %v5940_v34  ;;  %v14843_v44 = vpop.eup %14842  ;;  %14868 = vtanh.f32 %v6176_v24  ;;  %v6161_v33 = vmul.f32 %v14841_v9, %v6145_v16  ;;  %v6057_v37 = vadd.f32 1.0, %v14837_v4  ;;  %v21972_v4 = vld [vmem:[#allocation75_spill] sm:$0xff]  ;;  %v19352_v9 = vpop.f32.mrf.mxu1 }
 0x634   : > { %21969 = vst [vmem:[#allocation70_spill] sm:$0xff] %v19331_v47  ;;  %v14845_v48 = vpop.eup %14844  ;;  %14870 = vrcp.f32 %v6060_v51  ;;  %v6205_v13 = vsub.f32 %v18984_v35, %v14843_v44  ;;  %v2569_v18 = vadd.f32 %v21970_v40, %v18359_v49  ;;  %6517 = vmatmul.mubr.bf16.vlgmr.msra.gmra.mxu1 %v19331_v47  ;;  %13874 = vmatprep.mubr.bf16.mxu0 %v19331_v47  ;;  %v12194_v22 = vmul.f32 -1.442695, %v5937_v1 }
 0x635   : > { %v14847_v3 = vpop.eup %14846  ;;  %v6177_v17 = vadd.f32 %v6161_v33, %v3167_v27  ;;  %14872 = vpow2.f32 %v12192_v26  ;;  %v19338_v42 = vadd.f32 %v14835_v50, %v6220_v32  ;;  %6526 = vmatprep.mubr.bf16.mxu1 %v21458_v0  ;;  %v2561_v62 = vadd.f32 %v21971_v54, %v18366_v58  ;;  %v21973_v26 = vld [vmem:[#allocation163_spill] sm:$0xff] }
 0x636   : > { %v14849_v23 = vpop.eup %14848  ;;  %14874 = vpow2.f32 %v12197_v61  ;;  %v6221_v35 = vmul.f32 %v14845_v48, %v6205_v13  ;;  %v3172_v16 = vadd.f32 %v21972_v4, %v18576_v60  ;;  %v6146_v50 = vadd.f32 %v19306_v6, %v5883_v14  ;;  %v21975_v13 = vld [vmem:[#allocation159_spill] sm:$0xff] }
 0x637   : > { %v5808_v55 = vpop.f32.mrf.mxu0  ;;  %v14851_v25 = vpop.eup %14850  ;;  %14876 = vtanh.f32 %v6177_v17  ;;  %v6062_v27 = vadd.f32 1.0, %v14849_v23  ;;  %v2573_v19 = vadd.f32 %v21973_v26, %v18359_v49  ;;  %v5939_v51 = vadd.f32 %v19313_v53, %v2561_v62 }
 0x638   : > { %v5942_v7 = vadd.f32 %v5808_v55, %v2569_v18  ;;  %v14853_v39 = vpop.eup %14852  ;;  %14878 = vrcp.f32 %v6057_v37  ;;  %v19348_v38 = vadd.f32 %v14843_v44, %v6221_v35  ;;  %v2565_v40 = vadd.f32 %v21975_v13, %v18366_v58  ;;  %v5886_v35 = vpop.f32.mrf.mxu1 }
 0x639   : > { %v19346_v34 = vpop.f32.mrf.mxu0  ;;  %v14855_v24 = vpop.eup %14854  ;;  %14880 = vrcp.f32 %v6062_v27  ;;  %v6206_v44 = vsub.f32 %v19000_v20, %v14853_v39  ;;  %v6059_v18 = vadd.f32 1.0, %v14851_v25  ;;  %v12196_v54 = vmul.f32 -1.442695, %v5939_v51 }
 0x63a   : > { %v12199_v1 = vmul.f32 -1.442695, %v5942_v7  ;;  %v14857_v61 = vpop.eup %14856  ;;  %v6162_v33 = vmul.f32 %v14855_v24, %v6146_v50  ;;  %14882 = vpow2.f32 %v12194_v22  ;;  %v19357_v48 = vpack.c.bf16 %v19348_v38, %v19338_v42 }
 0x63b   : > { %v5812_v32 = vpop.f32.mrf.mxu0  ;;  %v14859_v37 = vpop.eup %14858  ;;  %v6064_v17 = vadd.f32 1.0, %v14857_v61  ;;  %v6222_v22 = vmul.f32 %v14847_v3, %v6206_v44  ;;  %v5941_v62 = vadd.f32 %v5804_v8, %v2565_v40  ;;  %v6147_v8 = vadd.f32 %v19306_v6, %v5886_v35 }
 0x63c   : > { %21974 = vst [vmem:[#allocation76_spill] sm:$0xff] %v19357_v48  ;;  %v5944_v14 = vadd.f32 %v5812_v32, %v2573_v19  ;;  %v14861_v23 = vpop.eup %14860  ;;  %v6178_v53 = vadd.f32 %v6162_v33, %v3172_v16  ;;  %14884 = vpow2.f32 %v12199_v1  ;;  %13875 = vmatmul.mubr.bf16.vlgmr.msra.gmra.mxu0 %v19357_v48  ;;  %6527 = vmatmul.mubr.bf16.gmra.mxu1 %v19357_v48 }
 0x63d   : > { %v14863_v55 = vpop.eup %14862  ;;  %14886 = vrcp.f32 %v6064_v17  ;;  %7265 = vmatpush1.bf16.msra.mxu0 %v19111_v5  ;;  %6536 = vmatprep.mubr.bf16.mxu1 %v21458_v0  ;;  %v6207_v25 = vsub.f32 %v19006_v46, %v14861_v23  ;;  %v19367_v7 = vadd.f32 %v14853_v39, %v6222_v22  ;;  %v21976_v5 = vld [vmem:[#allocation79_spill] sm:$0xff]  ;;  %v12198_v19 = vmul.f32 -1.442695, %v5941_v62 }
 0x63e   : > { %v12201_v27 = vmul.f32 -1.442695, %v5944_v14  ;;  %v14865_v20 = vpop.eup %14864  ;;  %14888 = vtanh.f32 %v6178_v53  ;;  %7266 = vmatprep.subr.bf16.mxu0 %v19117_v59  ;;  %v3175_v26 = vadd.f32 %v21976_v5, %v18576_v60  ;;  %v21977_v59 = vld [vmem:[#allocation162_spill] sm:$0xff]  ;;  %v6148_v14 = vadd.f32 %v19306_v6, %v19326_v10  ;;  %v21980_v10 = vld [vmem:[#allocation73_spill] sm:$0xff] }
 0x63f   : > { %v14867_v3 = vpop.eup %14866  ;;  %14890 = vrcp.f32 %v6059_v18  ;;  %v6223_v50 = vmul.f32 %v14859_v37, %v6207_v25  ;;  %v2571_v51 = vadd.f32 %v21977_v59, %v18366_v58  ;;  %v6061_v32 = vadd.f32 1.0, %v14865_v20  ;;  %v19380_v18 = vpop.f32.mrf.mxu1 }
 0x640   : > { %v14869_v4 = vpop.eup %14868  ;;  %v6066_v16 = vadd.f32 1.0, %v14867_v3  ;;  %14892 = vpow2.f32 %v12201_v27  ;;  %v3180_v62 = vadd.f32 %v21980_v10, %v18576_v60 }
 0x641   : > { %v14871_v24 = vpop.eup %14870  ;;  %14894 = vpow2.f32 %v12196_v54  ;;  %v6208_v46 = vsub.f32 %v19022_v31, %v14869_v4  ;;  %7267 = vmatpush1.bf16.msra.mxu0 %v19122_v63  ;;  %v19377_v61 = vadd.f32 %v14861_v23, %v6223_v50  ;;  %v5943_v31 = vadd.f32 %v19346_v34, %v2571_v51  ;;  %v5899_v20 = vpop.f32.mrf.mxu1 }
 0x642   : > { %v14873_v39 = vpop.eup %14872  ;;  %v6163_v1 = vmul.f32 %v14871_v24, %v6147_v8  ;;  %14896 = vrcp.f32 %v6066_v16  ;;  %7268 = vmatprep.subr.bf16.mxu0 %v19132_v41  ;;  %v5814_v41 = vpop.f32.mrf.mxu0  ;;  %v6149_v8 = vadd.f32 %v19306_v6, %v19352_v9 }
 0x643   : > { %v14875_v33 = vpop.eup %14874  ;;  %v6224_v44 = vmul.f32 %v14863_v55, %v6208_v46  ;;  %v19385_v63 = vpack.c.bf16 %v19377_v61, %v19367_v7  ;;  %14898 = vpow2.f32 %v12198_v19  ;;  %v21979_v55 = vld [vmem:[#allocation165_spill] sm:$0xff]  ;;  %v6063_v35 = vadd.f32 1.0, %v14873_v39  ;;  %v13857_v59 = vpop.f32.mrf.mxu1 }
 0x644   : > { %v14877_v37 = vpop.eup %14876  ;;  %v6179_v13 = vadd.f32 %v6163_v1, %v3175_v26  ;;  %v6068_v40 = vadd.f32 1.0, %v14875_v33  ;;  %v2575_v34 = vadd.f32 %v21979_v55, %v18366_v58  ;;  %v21981_v26 = vld [vmem:[#allocation77_spill] sm:$0xff] }
 0x645   : > { %21978 = vst [vmem:[#allocation80_spill] sm:$0xff] %v19385_v63  ;;  %v14879_v17 = vpop.eup %14878  ;;  %v6209_v23 = vsub.f32 %v19030_v56, %v14877_v37  ;;  %v19390_v53 = vadd.f32 %v14869_v4, %v6224_v44  ;;  %7269 = vmatpush1.bf16.msra.mxu0 %v19137_v45  ;;  %6537 = vmatmul.mubr.bf16.gmra.mxu1 %v19385_v63  ;;  %v12200_v45 = vmul.f32 -1.442695, %v5943_v31 }
 0x646   : > { %v14881_v22 = vpop.eup %14880  ;;  %14900 = vtanh.f32 %v6179_v13  ;;  %13878 = vmatprep.mubr.bf16.mxu0 %v19385_v63  ;;  %6546 = vmatprep.mubr.bf16.mxu1 %v21458_v0  ;;  %v5945_v25 = vadd.f32 %v5814_v41, %v2575_v34  ;;  %v3183_v19 = vadd.f32 %v21981_v26, %v18576_v60 }
 0x647   : > { %v14883_v54 = vpop.eup %14882  ;;  %v6164_v27 = vmul.f32 %v14881_v22, %v6148_v14  ;;  %14902 = vrcp.f32 %v6068_v40  ;;  %v6225_v56 = vmul.f32 %v14879_v17, %v6209_v23  ;;  %7270 = vmatprep.subr.bf16.mxu0 %v19147_v36  ;;  %v5902_v17 = vpop.f32.mrf.mxu1 }
 0x648   : > { %14904 = vrcp.f32 %v6061_v32  ;;  %v6065_v24 = vadd.f32 1.0, %v14883_v54  ;;  %v6150_v32 = vadd.f32 %v19306_v6, %v5899_v20  ;;  %v6151_v55 = vadd.f32 %v19306_v6, %v5902_v17  ;;  %v21984_v54 = vld [vmem:[#allocation87_spill] sm:$0xff]  ;;  %v21985_v20 = vld [vmem:[#allocation72_spill] sm:$0xff] }
 0x649   : > { %v14885_v3 = vpop.eup %14884  ;;  %v6180_v4 = vadd.f32 %v6164_v27, %v3180_v62  ;;  %v19403_v16 = vadd.f32 %v14877_v37, %v6225_v56  ;;  %7271 = vmatpush1.bf16.msra.mxu0 %v19152_v21  ;;  %14906 = vrcp.f32 %v6063_v35  ;;  %v12202_v21 = vmul.f32 -1.442695, %v5945_v25 }
 0x64a   : > { %v14887_v50 = vpop.eup %14886  ;;  %v6070_v5 = vadd.f32 1.0, %v14885_v3  ;;  %7272 = vmatprep.subr.bf16.mxu0 %v19162_v2  ;;  %v3191_v10 = vadd.f32 %v21984_v54, %v18576_v60  ;;  %v21994_v54 = vld [vmem:[#allocation57_spill] sm:$0xff] }
 0x64b   : > { %v14889_v36 = vpop.eup %14888  ;;  %14908 = vtanh.f32 %v6180_v4  ;;  %v6165_v46 = vmul.f32 %v14887_v50, %v6149_v8  ;;  %v19411_v39 = vpack.c.bf16 %v19403_v16, %v19390_v53  ;;  %v21986_v4 = vld [vmem:[#allocation21_spill] sm:$0xff] }
 0x64c   : > { %v14891_v9 = vpop.eup %14890  ;;  %14910 = vpow2.f32 %v12200_v45  ;;  %v6210_v51 = vsub.f32 %v19039_v28, %v14889_v36  ;;  %v21983_v28 = vld [vmem:[#allocation83_spill] sm:$0xff] }
 0x64d   : > { %21982 = vst [vmem:[#allocation74_spill] sm:$0xff] %v19411_v39  ;;  %v14893_v1 = vpop.eup %14892  ;;  %v6181_v33 = vadd.f32 %v6165_v46, %v3183_v19  ;;  %14912 = vrcp.f32 %v6070_v5  ;;  %13879 = vmatmul.mubr.bf16.gmra.mxu0 %v19411_v39  ;;  %6547 = vmatmul.mubr.bf16.gmra.mxu1 %v19411_v39  ;;  %v3188_v40 = vadd.f32 %v21983_v28, %v18576_v60 }
 0x64e   : > { %v14895_v2 = vpop.eup %14894  ;;  %14914 = vrcp.f32 %v6065_v24  ;;  %v6072_v44 = vadd.f32 1.0, %v14893_v1  ;;  %v6226_v37 = vmul.f32 %v14891_v9, %v6210_v51  ;;  %7273 = vmatpush1.bf16.msra.mxu0 %v19167_v15  ;;  %6556 = vmatprep.mubr.bf16.mxu1 %v21458_v0 }
 0x64f   : > { %v14897_v13 = vpop.eup %14896  ;;  %14916 = vtanh.f32 %v6181_v33  ;;  %7274 = vmatprep.subr.bf16.mxu0 %v19174_v57  ;;  %v6067_v23 = vadd.f32 1.0, %v14895_v2  ;;  %v21990_v33 = vld [vmem:[#allocation32_spill] sm:$0xff] }
 0x650   : > { %v6166_v31 = vmul.f32 %v14897_v13, %v6150_v32  ;;  %14918 = vpow2.f32 %v12202_v21  ;;  %v19422_v14 = vadd.f32 %v14889_v36, %v6226_v37  ;;  %v14899_v41 = vpop.eup %14898  ;;  %v21989_v36 = vld [vmem:[#allocation81_spill] sm:$0xff] }
 0x651   : > { %14920 = vrcp.f32 %v6072_v44  ;;  %v3196_v26 = vadd.f32 %v21989_v36, %v18576_v60  ;;  %v21991_v37 = vld [vmem:[#allocation85_spill] sm:$0xff] }
 0x652   : > { %v6182_v22 = vadd.f32 %v6166_v31, %v3188_v40  ;;  %7275 = vmatpush1.bf16.msra.mxu0 %v19182_v11  ;;  %v6069_v11 = vadd.f32 1.0, %v14899_v41  ;;  %v3199_v13 = vadd.f32 %v21991_v37, %v18576_v60 }
 0x653   : > { %v14901_v15 = vpop.eup %14900  ;;  %7276 = vmatprep.subr.bf16.mxu0 %v19189_v43 }
 0x654   : > { %v14903_v57 = vpop.eup %14902  ;;  %14922 = vtanh.f32 %v6182_v22  ;;  %v6211_v34 = vsub.f32 %v19052_v29, %v14901_v15  ;;  %v6152_v29 = vadd.f32 %v19306_v6, %v19380_v18  ;;  %v6153_v18 = vadd.f32 %v19306_v6, %v13857_v59 }
 0x655   : > { %v14905_v35 = vpop.eup %14904  ;;  %v6167_v62 = vmul.f32 %v14903_v57, %v6151_v55  ;;  %14924 = vrcp.f32 %v6067_v23  ;;  %v21992_v23 = vld [vmem:[#allocation34_spill] sm:$0xff] }
 0x656   : > { %v6227_v27 = vmul.f32 %v14905_v35, %v6211_v34  ;;  %7277 = vmatpush1.bf16.msra.mxu0 %v19197_v52  ;;  %v14907_v56 = vpop.eup %14906  ;;  %v21988_v52 = vld [vmem:[#allocation66_spill] sm:$0xff] }
 0x657   : > { %v6183_v45 = vadd.f32 %v6167_v62, %v3191_v10  ;;  %7278 = vmatprep.subr.bf16.mxu0 %v21985_v20  ;;  %v21996_v20 = vld [vmem:[#allocation64_spill] sm:$0xff] }
 0x658   : > { %v14909_v25 = vpop.eup %14908  ;;  %v19432_v43 = vadd.f32 %v14901_v15, %v6227_v27 }
 0x659   : > { %v14911_v3 = vpop.eup %14910  ;;  %14926 = vtanh.f32 %v6183_v45  ;;  %v6212_v8 = vsub.f32 %v21986_v4, %v14909_v25 }
 0x65a   : > { %v14913_v50 = vpop.eup %14912  ;;  %v19439_v24 = vpack.c.bf16 %v19432_v43, %v19422_v14  ;;  %7279 = vmatpush1.bf16.msra.mxu0 %v21988_v52  ;;  %14928 = vrcp.f32 %v6069_v11  ;;  %v6071_v1 = vadd.f32 1.0, %v14911_v3 }
 0x65b   : > { %v14915_v5 = vpop.eup %14914  ;;  %v6168_v19 = vmul.f32 %v14913_v50, %v6152_v29  ;;  %v6228_v46 = vmul.f32 %v14907_v56, %v6212_v8  ;;  %v21997_v8 = vld [vmem:[#allocation62_spill] sm:$0xff] }
 0x65c   : > { %21987 = vst [vmem:[#allocation78_spill] sm:$0xff] %v19439_v24  ;;  %v14917_v9 = vpop.eup %14916  ;;  %6557 = vmatmul.mubr.bf16.gmra.mxu1 %v19439_v24  ;;  %13882 = vmatprep.mubr.bf16.mxu0 %v19439_v24  ;;  %v22077_v24 = vld [vmem:[#allocation234_spill] sm:$0xff] }
 0x65d   : > { %v14919_v21 = vpop.eup %14918  ;;  %v6184_v51 = vadd.f32 %v6168_v19, %v3196_v26  ;;  %6566 = vmatprep.mubr.bf16.mxu1 %v21458_v0  ;;  %v6213_v2 = vsub.f32 %v21990_v33, %v14917_v9  ;;  %v19449_v32 = vadd.f32 %v14909_v25, %v6228_v46  ;;  %v14370_v46 = vld [vmem:[%s21371_s5 + $0xb0] ss:$12 sps:$4 sm:$0xff]   ;;  %v14376_v33 = vld [vmem:[%s21371_s5 + $0x20] ss:$12 sps:$4 sm:$0xff]   ;;  %v2691_v39 = vadd.f32 %v22077_v24, %v18366_v58 }
 0x65e   : > { %v14921_v44 = vpop.eup %14920  ;;  %v6073_v17 = vadd.f32 1.0, %v14919_v21  ;;  %13890 = vmatprep.subr.bf16.mxu1 %v14370_v46  ;;  %v14373_v21 = vld [vmem:[%s21371_s5 + $0x68] ss:$12 sps:$4 sm:$0xff]  }
 0x65f   : > { %14930 = vtanh.f32 %v6184_v51  ;;  %v6169_v28 = vmul.f32 %v14921_v44, %v6153_v18  ;;  %v6229_v59 = vmul.f32 %v14915_v5, %v6213_v2  ;;  %13891 = vmatpush3.bf16.msra.mxu1 %v14370_v46  ;;  %v14372_v18 = vld [vmem:[%s21371_s5 + $0x80] ss:$12 sps:$4 sm:$0xff]   ;;  %v14374_v51 = vld [vmem:[%s21371_s5 + $0x50] ss:$12 sps:$4 sm:$0xff]   ;;  %v14377_v2 = vld [vmem:[%s21371_s5 + $0x8] ss:$12 sps:$4 sm:$0xff]  }
 0x660   : > { %14932 = vrcp.f32 %v6071_v1  ;;  %v14375_v1 = vld [vmem:[%s21371_s5 + $0x38] ss:$12 sps:$4 sm:$0xff]   ;;  %v21999_v44 = vld [vmem:[#allocation166_spill] sm:$0xff] }
 0x661   : > { %v14923_v40 = vpop.eup %14922  ;;  %v6185_v31 = vadd.f32 %v6169_v28, %v3199_v13  ;;  %v19453_v41 = vadd.f32 %v14917_v9, %v6229_v59  ;;  %v14371_v9 = vld [vmem:[%s21371_s5 + $0x98] ss:$12 sps:$4 sm:$0xff]   ;;  %v2579_v37 = vadd.f32 %v21999_v44, %v18359_v49 }
 0x662   : > { %v6214_v22 = vsub.f32 %v21992_v23, %v14923_v40  ;;  %v14925_v15 = vpop.eup %14924  ;;  %13892 = vmatprep.subr.bf16.mxu1 %v14371_v9 }
 0x663   : > { %14934 = vtanh.f32 %v6185_v31  ;;  %v19458_v55 = vpack.c.bf16 %v19453_v41, %v19449_v32  ;;  %13893 = vmatpush3.bf16.msra.mxu1 %v14371_v9 }
 0x664   : > { %v6230_v57 = vmul.f32 %v14925_v15, %v6214_v22  ;;  %14936 = vrcp.f32 %v6073_v17  ;;  %13894 = vmatprep.subr.bf16.mxu1 %v14372_v18  ;;  %v22001_v15 = vld [vmem:[#allocation168_spill] sm:$0xff] }
 0x665   : > { %21993 = vst [vmem:[#allocation84_spill] sm:$0xff] %v19458_v55  ;;  %6567 = vmatmul.mubr.bf16.gmra.mxu1 %v19458_v55  ;;  %13883 = vmatmul.mubr.bf16.gmra.mxu0 %v19458_v55 }
 0x666   : > { %v14927_v34 = vpop.eup %14926  ;;  %6576 = vmatprep.mubr.bf16.mxu1 %v21458_v0  ;;  %v19463_v35 = vadd.f32 %v14923_v40, %v6230_v57  ;;  %v22000_v40 = vld [vmem:[#allocation169_spill] sm:$0xff]  ;;  %v2581_v57 = vadd.f32 %v22001_v15, %v18366_v58 }
 0x667   : > { %v6215_v10 = vsub.f32 %v21994_v54, %v14927_v34  ;;  %v14929_v62 = vpop.eup %14928  ;;  %13895 = vmatpush3.bf16.msra.mxu1 %v14372_v18  ;;  %v2583_v31 = vadd.f32 %v22000_v40, %v18359_v49  ;;  %v22002_v54 = vld [vmem:[#allocation172_spill] sm:$0xff] }
 0x668   : > { %13896 = vmatprep.subr.bf16.mxu1 %v14373_v21 }
 0x669   : > { %v6231_v27 = vmul.f32 %v14929_v62, %v6215_v10  ;;  %v2589_v10 = vadd.f32 %v22002_v54, %v18359_v49 }
 0x66b   : > { %v19466_v56 = vadd.f32 %v14927_v34, %v6231_v27  ;;  %13897 = vmatpush3.bf16.msra.mxu1 %v14373_v21 }
 0x66c   : > { %v14931_v11 = vpop.eup %14930  ;;  %13898 = vmatprep.subr.bf16.mxu1 %v14374_v51 }
 0x66d   : > { %v19470_v45 = vpack.c.bf16 %v19466_v56, %v19463_v35  ;;  %v6216_v25 = vsub.f32 %v21996_v20, %v14931_v11  ;;  %v14933_v3 = vpop.eup %14932  ;;  %v22003_v20 = vld [vmem:[#allocation171_spill] sm:$0xff] }
 0x66f   : > { %21995 = vst [vmem:[#allocation82_spill] sm:$0xff] %v19470_v45  ;;  %6577 = vmatmul.mubr.bf16.gmra.mxu1 %v19470_v45  ;;  %13886 = vmatprep.mubr.bf16.mxu0 %v19470_v45  ;;  %v6232_v29 = vmul.f32 %v14933_v3, %v6216_v25  ;;  %v2585_v25 = vadd.f32 %v22003_v20, %v18366_v58 }
 0x670   : > { %v14935_v4 = vpop.eup %14934  ;;  %6586 = vmatprep.mubr.bf16.mxu1 %v21458_v0  ;;  %13899 = vmatpush3.bf16.msra.mxu1 %v14374_v51 }
 0x671   : > { %v6217_v50 = vsub.f32 %v21997_v8, %v14935_v4  ;;  %v19477_v52 = vadd.f32 %v14931_v11, %v6232_v29  ;;  %v14937_v5 = vpop.eup %14936  ;;  %13900 = vmatprep.subr.bf16.mxu1 %v14375_v1  ;;  %v22004_v29 = vld [vmem:[#allocation174_spill] sm:$0xff] }
 0x673   : > { %v6233_v36 = vmul.f32 %v14937_v5, %v6217_v50  ;;  %v22005_v50 = vld [vmem:[#allocation175_spill] sm:$0xff] }
 0x674   : > { %13901 = vmatpush3.bf16.msra.mxu1 %v14375_v1  ;;  %v2593_v5 = vadd.f32 %v22005_v50, %v18359_v49  ;;  %v22006_v1 = vld [vmem:[#allocation177_spill] sm:$0xff]  ;;  %v22011_v50 = vld [vmem:[#allocation184_spill] sm:$0xff] }
 0x675   : > { %v19479_v26 = vadd.f32 %v14935_v4, %v6233_v36  ;;  %13902 = vmatprep.subr.bf16.mxu1 %v14376_v33  ;;  %v2591_v4 = vadd.f32 %v22004_v29, %v18366_v58 }
 0x677   : > { %v19483_v19 = vpack.c.bf16 %v19479_v26, %v19477_v52 }
 0x678   : > { %13903 = vmatpush3.bf16.msra.mxu1 %v14376_v33  ;;  %v2595_v33 = vadd.f32 %v22006_v1, %v18366_v58 }
 0x679   : > { %21998 = vst [vmem:[#allocation88_spill] sm:$0xff] %v19483_v19  ;;  %6587 = vmatmul.mubr.bf16.gmra.mxu1 %v19483_v19  ;;  %13887 = vmatmul.mubr.bf16.gmra.mxu0 %v19483_v19 }
 0x67a   : > { %7296 = vmatprep.mubr.bf16.mxu0 %v21458_v0  ;;  %13904 = vmatprep.subr.bf16.mxu1 %v14377_v2 }
 0x67c   : > { %13905 = vmatpush3.bf16.msra.mxu1 %v14377_v2 }
 0x6f4   : > { %v6518_v13 = vpop.f32.mrf.mxu1 }
 0x6f5   : > { %v6694_v28 = vadd.f32 %v6518_v13, %v2579_v37  ;;  %v22007_v13 = vld [vmem:[#allocation178_spill] sm:$0xff] }
 0x6f6   : > { %v6520_v59 = vpop.f32.mrf.mxu1 }
 0x6f7   : > { %v12227_v17 = vmul.f32 -1.442695, %v6694_v28  ;;  %v6695_v27 = vadd.f32 %v6520_v59, %v2581_v57  ;;  %v2599_v28 = vadd.f32 %v22007_v13, %v18359_v49  ;;  %v22009_v57 = vld [vmem:[#allocation181_spill] sm:$0xff] }
 0x6f8   : > { %v6522_v23 = vpop.f32.mrf.mxu1 }
 0x6f9   : > { %14938 = vpow2.f32 %v12227_v17  ;;  %v6696_v22 = vadd.f32 %v6522_v23, %v2583_v31  ;;  %v12228_v9 = vmul.f32 -1.442695, %v6695_v27  ;;  %v22008_v23 = vld [vmem:[#allocation180_spill] sm:$0xff] }
 0x6fa   : > { %v6524_v34 = vpop.f32.mrf.mxu1 }
 0x6fb   : > { %v12229_v62 = vmul.f32 -1.442695, %v6696_v22  ;;  %v6697_v36 = vadd.f32 %v6524_v34, %v2585_v25  ;;  %v2601_v22 = vadd.f32 %v22008_v23, %v18366_v58  ;;  %v2603_v34 = vadd.f32 %v22009_v57, %v18359_v49 }
 0x6fc   : > { %v6528_v11 = vpop.f32.mrf.mxu1 }
 0x6fd   : > { %14940 = vpow2.f32 %v12229_v62  ;;  %v6698_v3 = vadd.f32 %v6528_v11, %v2589_v10  ;;  %v12230_v44 = vmul.f32 -1.442695, %v6697_v36 }
 0x6fe   : > { %v6530_v8 = vpop.f32.mrf.mxu1 }
 0x6ff   : > { %v12231_v46 = vmul.f32 -1.442695, %v6698_v3  ;;  %v6699_v18 = vadd.f32 %v6530_v8, %v2591_v4  ;;  %v22010_v3 = vld [vmem:[#allocation183_spill] sm:$0xff]  ;;  %v19536_v4 = vpop.f32.mrf.mxu0 }
 0x700   : > { %v6532_v21 = vpop.f32.mrf.mxu1  ;;  %v2605_v29 = vadd.f32 %v22010_v3, %v18366_v58 }
 0x701   : > { %14942 = vpow2.f32 %v12231_v46  ;;  %v6700_v51 = vadd.f32 %v6532_v21, %v2593_v5  ;;  %v12232_v59 = vmul.f32 -1.442695, %v6699_v18  ;;  %v2609_v5 = vadd.f32 %v22011_v50, %v18359_v49 }
 0x702   : > { %v6534_v2 = vpop.f32.mrf.mxu1  ;;  %14944 = vpow2.f32 %v12228_v9 }
 0x703   : > { %v12233_v37 = vmul.f32 -1.442695, %v6700_v51  ;;  %v6701_v40 = vadd.f32 %v6534_v2, %v2595_v33  ;;  %v22012_v33 = vld [vmem:[#allocation186_spill] sm:$0xff] }
 0x704   : > { %v2611_v2 = vadd.f32 %v22012_v33, %v18366_v58 }
 0x705   : > { %14946 = vpow2.f32 %v12233_v37  ;;  %v6538_v31 = vpop.f32.mrf.mxu1  ;;  %v12234_v62 = vmul.f32 -1.442695, %v6701_v40  ;;  %v22013_v40 = vld [vmem:[#allocation187_spill] sm:$0xff] }
 0x706   : > { %v14939_v17 = vpop.eup %14938  ;;  %v6702_v15 = vadd.f32 %v6538_v31, %v2599_v28  ;;  %14948 = vpow2.f32 %v12230_v44  ;;  %v6631_v44 = vpop.f32.mrf.mxu0  ;;  %v2613_v31 = vadd.f32 %v22013_v40, %v18359_v49  ;;  %v22016_v40 = vld [vmem:[#allocation190_spill] sm:$0xff] }
 0x707   : > { %v6822_v54 = vadd.f32 1.0, %v14939_v17  ;;  %v6540_v10 = vpop.f32.mrf.mxu1  ;;  %14950 = vpow2.f32 %v12232_v59 }
 0x708   : > { %v12235_v27 = vmul.f32 -1.442695, %v6702_v15  ;;  %v6703_v11 = vadd.f32 %v6540_v10, %v2601_v22  ;;  %v19546_v10 = vpop.f32.mrf.mxu0 }
 0x709   : > { %14952 = vrcp.f32 %v6822_v54  ;;  %v6542_v20 = vpop.f32.mrf.mxu1 }
 0x70a   : > { %v14941_v25 = vpop.eup %14940  ;;  %14954 = vpow2.f32 %v12235_v27  ;;  %v6704_v8 = vadd.f32 %v6542_v20, %v2603_v34  ;;  %v12236_v9 = vmul.f32 -1.442695, %v6703_v11  ;;  %v22014_v34 = vld [vmem:[#allocation189_spill] sm:$0xff] }
 0x70b   : > { %v6824_v36 = vadd.f32 1.0, %v14941_v25  ;;  %v6544_v46 = vpop.f32.mrf.mxu1  ;;  %14956 = vpow2.f32 %v12234_v62  ;;  %v2615_v54 = vadd.f32 %v22014_v34, %v18366_v58 }
 0x70c   : > { %v12237_v18 = vmul.f32 -1.442695, %v6704_v8  ;;  %v6705_v21 = vadd.f32 %v6544_v46, %v2605_v29  ;;  %v6634_v46 = vpop.f32.mrf.mxu0 }
 0x70d   : > { %14958 = vrcp.f32 %v6824_v36  ;;  %v6548_v51 = vpop.f32.mrf.mxu1 }
 0x70e   : > { %v14943_v1 = vpop.eup %14942  ;;  %14960 = vpow2.f32 %v12237_v18  ;;  %v6706_v37 = vadd.f32 %v6548_v51, %v2609_v5  ;;  %v12238_v28 = vmul.f32 -1.442695, %v6705_v21  ;;  %v6918_v5 = vadd.f32 %v19306_v6, %v6631_v44  ;;  %v22015_v21 = vld [vmem:[#allocation91_spill] sm:$0xff] }
 0x70f   : > { %v6826_v13 = vadd.f32 1.0, %v14943_v1  ;;  %v6550_v59 = vpop.f32.mrf.mxu1  ;;  %14962 = vpow2.f32 %v12236_v9  ;;  %v14945_v22 = vpop.eup %14944  ;;  %v3204_v51 = vadd.f32 %v22015_v21, %v18576_v60 }
 0x710   : > { %v12239_v17 = vmul.f32 -1.442695, %v6706_v37  ;;  %v6707_v23 = vadd.f32 %v6550_v59, %v2611_v2  ;;  %v6823_v3 = vadd.f32 1.0, %v14945_v22  ;;  %v6919_v59 = vadd.f32 %v19306_v6, %v6634_v46  ;;  %v22019_v46 = vld [vmem:[#allocation193_spill] sm:$0xff] }
 0x711   : > { %14964 = vrcp.f32 %v6826_v13  ;;  %v6552_v15 = vpop.f32.mrf.mxu1 }
 0x712   : > { %v14947_v57 = vpop.eup %14946  ;;  %14966 = vpow2.f32 %v12239_v17  ;;  %v12240_v62 = vmul.f32 -1.442695, %v6707_v23  ;;  %v6708_v27 = vadd.f32 %v6552_v15, %v2613_v31  ;;  %v2619_v31 = vadd.f32 %v22016_v40, %v18359_v49  ;;  %v22017_v23 = vld [vmem:[#allocation95_spill] sm:$0xff]  ;;  %v22020_v40 = vld [vmem:[#allocation93_spill] sm:$0xff] }
 0x713   : > { %v6828_v11 = vadd.f32 1.0, %v14947_v57  ;;  %14968 = vpow2.f32 %v12238_v28  ;;  %v6554_v20 = vpop.f32.mrf.mxu1  ;;  %v14949_v25 = vpop.eup %14948  ;;  %v3207_v22 = vadd.f32 %v22017_v23, %v18576_v60  ;;  %v22021_v23 = vld [vmem:[#allocation192_spill] sm:$0xff] }
 0x714   : > { %14970 = vpow2.f32 %v12240_v62  ;;  %v12241_v29 = vmul.f32 -1.442695, %v6708_v27  ;;  %v6709_v8 = vadd.f32 %v6554_v20, %v2615_v54  ;;  %v14951_v50 = vpop.eup %14950  ;;  %v6825_v33 = vadd.f32 1.0, %v14949_v25  ;;  %v19556_v57 = vpop.f32.mrf.mxu0 }
 0x715   : > { %14972 = vrcp.f32 %v6828_v11  ;;  %v6827_v13 = vadd.f32 1.0, %v14951_v50  ;;  %v6920_v20 = vadd.f32 %v19306_v6, %v19536_v4 }
 0x716   : > { %v14953_v36 = vpop.eup %14952  ;;  %14974 = vpow2.f32 %v12241_v29  ;;  %v12242_v9 = vmul.f32 -1.442695, %v6709_v8  ;;  %v6647_v21 = vpop.f32.mrf.mxu0 }
 0x717   : > { %v14955_v18 = vpop.eup %14954  ;;  %v6934_v1 = vmul.f32 %v14953_v36, %v6918_v5  ;;  %14976 = vrcp.f32 %v6823_v3  ;;  %v22018_v5 = vld [vmem:[#allocation89_spill] sm:$0xff] }
 0x718   : > { %v6830_v2 = vadd.f32 1.0, %v14955_v18  ;;  %v14957_v37 = vpop.eup %14956  ;;  %14978 = vpow2.f32 %v12242_v9  ;;  %v3212_v36 = vadd.f32 %v22018_v5, %v18576_v60  ;;  %v2623_v9 = vadd.f32 %v22019_v46, %v18359_v49 }
 0x719   : > { %v6950_v28 = vadd.f32 %v6934_v1, %v3204_v51  ;;  %v6829_v54 = vadd.f32 1.0, %v14957_v37 }
 0x71a   : > { %v14959_v44 = vpop.eup %14958  ;;  %14980 = vrcp.f32 %v6830_v2 }
 0x71b   : > { %v14961_v17 = vpop.eup %14960  ;;  %14982 = vtanh.f32 %v6950_v28  ;;  %v6935_v15 = vmul.f32 %v14959_v44, %v6919_v59 }
 0x71c   : > { %v6558_v34 = vpop.f32.mrf.mxu1  ;;  %14984 = vrcp.f32 %v6825_v33  ;;  %v6832_v62 = vadd.f32 1.0, %v14961_v17  ;;  %v14963_v11 = vpop.eup %14962 }
 0x71d   : > { %v6710_v27 = vadd.f32 %v6558_v34, %v2619_v31  ;;  %14986 = vrcp.f32 %v6827_v13  ;;  %v6951_v25 = vadd.f32 %v6935_v15, %v3207_v22  ;;  %v6831_v4 = vadd.f32 1.0, %v14963_v11  ;;  %v22022_v15 = vld [vmem:[#allocation196_spill] sm:$0xff] }
 0x71e   : > { %v6560_v3 = vpop.f32.mrf.mxu1  ;;  %v14965_v29 = vpop.eup %14964  ;;  %14988 = vrcp.f32 %v6832_v62  ;;  %v6921_v13 = vadd.f32 %v19306_v6, %v19546_v10  ;;  %v3215_v31 = vadd.f32 %v22020_v40, %v18576_v60  ;;  %v2621_v22 = vadd.f32 %v22021_v23, %v18366_v58  ;;  %v22026_v40 = vld [vmem:[#allocation103_spill] sm:$0xff] }
 0x71f   : > { %v12243_v8 = vmul.f32 -1.442695, %v6710_v27  ;;  %v14967_v50 = vpop.eup %14966  ;;  %v6936_v18 = vmul.f32 %v14965_v29, %v6920_v20  ;;  %14990 = vtanh.f32 %v6951_v25  ;;  %v2629_v34 = vadd.f32 %v22022_v15, %v18359_v49  ;;  %v19574_v62 = vpop.f32.mrf.mxu0 }
 0x720   : > { %v6562_v51 = vpop.f32.mrf.mxu1  ;;  %v14969_v1 = vpop.eup %14968  ;;  %14992 = vrcp.f32 %v6829_v54  ;;  %v6834_v33 = vadd.f32 1.0, %v14967_v50  ;;  %v6711_v29 = vadd.f32 %v6560_v3, %v2621_v22 }
 0x721   : > { %v14971_v2 = vpop.eup %14970  ;;  %v6952_v37 = vadd.f32 %v6936_v18, %v3212_v36  ;;  %14994 = vpow2.f32 %v12243_v8  ;;  %v6712_v28 = vadd.f32 %v6562_v51, %v2623_v9  ;;  %v6833_v10 = vadd.f32 1.0, %v14969_v1  ;;  %v22023_v36 = vld [vmem:[#allocation97_spill] sm:$0xff]  ;;  %v22024_v1 = vld [vmem:[#allocation99_spill] sm:$0xff]  ;;  %v6650_v3 = vpop.f32.mrf.mxu0 }
 0x722   : > { %v19566_v59 = vpop.f32.mrf.mxu1  ;;  %v14973_v44 = vpop.eup %14972  ;;  %14996 = vrcp.f32 %v6834_v33  ;;  %v19578_v46 = vadd.f32 %v22023_v36, %v18576_v60  ;;  %v6835_v9 = vadd.f32 1.0, %v14971_v2  ;;  %v6922_v18 = vadd.f32 %v19306_v6, %v6647_v21  ;;  %v22027_v2 = vld [vmem:[#allocation195_spill] sm:$0xff] }
 0x723   : > { %v14975_v17 = vpop.eup %14974  ;;  %14998 = vtanh.f32 %v6952_v37  ;;  %v6937_v54 = vmul.f32 %v14973_v44, %v6921_v13  ;;  %v12245_v8 = vmul.f32 -1.442695, %v6712_v28  ;;  %v22025_v37 = vld [vmem:[#allocation199_spill] sm:$0xff]  ;;  %v12244_v15 = vmul.f32 -1.442695, %v6711_v29 }
 0x724   : > { %15000 = vrcp.f32 %v6831_v4  ;;  %v6836_v27 = vadd.f32 1.0, %v14975_v17  ;;  %v14977_v20 = vpop.eup %14976  ;;  %v3220_v4 = vadd.f32 %v22024_v1, %v18576_v60  ;;  %v2633_v13 = vadd.f32 %v22025_v37, %v18359_v49  ;;  %v22029_v1 = vld [vmem:[#allocation201_spill] sm:$0xff] }
 0x725   : > { %v6568_v11 = vpop.f32.mrf.mxu1  ;;  %v6953_v25 = vadd.f32 %v6937_v54, %v3215_v31  ;;  %v14979_v5 = vpop.eup %14978  ;;  %v3223_v31 = vadd.f32 %v22026_v40, %v18576_v60  ;;  %v2625_v17 = vadd.f32 %v22027_v2, %v18366_v58  ;;  %v2635_v37 = vadd.f32 %v22029_v1, %v18366_v58 }
 0x726   : > { %v6714_v50 = vadd.f32 %v6568_v11, %v2629_v34  ;;  %15002 = vrcp.f32 %v6836_v27  ;;  %v22028_v27 = vld [vmem:[#allocation198_spill] sm:$0xff] }
 0x727   : > { %v6570_v51 = vpop.f32.mrf.mxu1  ;;  %v14981_v33 = vpop.eup %14980  ;;  %15004 = vtanh.f32 %v6953_v25  ;;  %v2631_v11 = vadd.f32 %v22028_v27, %v18366_v58 }
 0x728   : > { %v12247_v28 = vmul.f32 -1.442695, %v6714_v50  ;;  %v14983_v44 = vpop.eup %14982  ;;  %15006 = vrcp.f32 %v6833_v10  ;;  %v6938_v6 = vmul.f32 %v14981_v33, %v6922_v18  ;;  %v19595_v50 = vld [vmem:[%s21373_s7] ss:$0 sm:$0xff] }
 0x729   : > { %v6572_v21 = vpop.f32.mrf.mxu1  ;;  %v14985_v23 = vpop.eup %14984  ;;  %v6982_v22 = vsub.f32 %v19310_v30, %v14983_v44  ;;  %15008 = vpow2.f32 %v12245_v8  ;;  %v6923_v10 = vadd.f32 %v19595_v50, %v6650_v3  ;;  %v6837_v30 = vadd.f32 1.0, %v14979_v5 }
 0x72a   : > { %v6716_v34 = vadd.f32 %v6572_v21, %v2633_v13  ;;  %v14987_v54 = vpop.eup %14986  ;;  %15010 = vrcp.f32 %v6835_v9  ;;  %v6954_v25 = vadd.f32 %v6938_v6, %v3220_v4  ;;  %v22030_v9 = vld [vmem:[#allocation202_spill] sm:$0xff]  ;;  %v6715_v21 = vadd.f32 %v6570_v51, %v2631_v11 }
 0x72b   : > { %v6574_v36 = vpop.f32.mrf.mxu1  ;;  %v14989_v18 = vpop.eup %14988  ;;  %v6998_v33 = vmul.f32 %v14977_v20, %v6982_v22  ;;  %15012 = vpow2.f32 %v12247_v28  ;;  %v2639_v4 = vadd.f32 %v22030_v9, %v18359_v49  ;;  %v6713_v20 = vadd.f32 %v19566_v59, %v2625_v17 }
 0x72c   : > { %v12249_v29 = vmul.f32 -1.442695, %v6716_v34  ;;  %v14991_v8 = vpop.eup %14990  ;;  %15014 = vtanh.f32 %v6954_v25  ;;  %v6939_v13 = vmul.f32 %v14989_v18, %v6923_v10  ;;  %v6924_v28 = vadd.f32 %v19595_v50, %v19556_v57  ;;  %v22031_v18 = vld [vmem:[#allocation205_spill] sm:$0xff] }
 0x72d   : > { %v14993_v40 = vpop.eup %14992  ;;  %v19602_v2 = vadd.f32 %v14983_v44, %v6998_v33  ;;  %v6983_v3 = vsub.f32 %v19323_v12, %v14991_v8  ;;  %15016 = vpow2.f32 %v12244_v15  ;;  %v2643_v12 = vadd.f32 %v22031_v18, %v18359_v49 }
 0x72e   : > { %v14995_v5 = vpop.eup %14994  ;;  %v6955_v6 = vadd.f32 %v6939_v13, %v3223_v31  ;;  %15018 = vpow2.f32 %v12249_v29  ;;  %v6925_v59 = vadd.f32 %v19595_v50, %v19574_v62  ;;  %v12246_v51 = vmul.f32 -1.442695, %v6713_v20 }
 0x72f   : > { %v6578_v22 = vpop.f32.mrf.mxu1  ;;  %v14997_v34 = vpop.eup %14996  ;;  %15020 = vrcp.f32 %v6837_v30  ;;  %v6838_v27 = vadd.f32 1.0, %v14995_v5  ;;  %v6999_v10 = vmul.f32 %v14985_v23, %v6983_v3  ;;  %v12248_v23 = vmul.f32 -1.442695, %v6715_v21 }
 0x730   : > { %v6718_v25 = vadd.f32 %v6578_v22, %v2639_v4  ;;  %v14999_v44 = vpop.eup %14998  ;;  %v6940_v15 = vmul.f32 %v14997_v34, %v6924_v28  ;;  %15022 = vtanh.f32 %v6955_v6  ;;  %v6717_v30 = vadd.f32 %v6574_v36, %v2635_v37  ;;  %v22032_v4 = vld [vmem:[#allocation101_spill] sm:$0xff]  ;;  %v22034_v36 = vld [vmem:[#allocation204_spill] sm:$0xff]  ;;  %v19627_v34 = vpop.f32.mrf.mxu0 }
 0x731   : > { %v6580_v17 = vpop.f32.mrf.mxu1  ;;  %v19612_v57 = vpop.eup %15000  ;;  %15024 = vrcp.f32 %v6838_v27  ;;  %v19614_v11 = vadd.f32 %v14991_v8, %v6999_v10  ;;  %v6984_v1 = vsub.f32 %v19338_v42, %v14999_v44  ;;  %v3231_v62 = vadd.f32 %v22032_v4, %v18576_v60  ;;  %v22035_v10 = vld [vmem:[#allocation208_spill] sm:$0xff] }
 0x732   : > { %v12251_v31 = vmul.f32 -1.442695, %v6718_v25  ;;  %v6956_v33 = vadd.f32 %v6940_v15, %v19578_v46  ;;  %v2641_v37 = vadd.f32 %v22034_v36, %v18366_v58  ;;  %v12250_v27 = vmul.f32 -1.442695, %v6717_v30  ;;  %v6663_v30 = vpop.f32.mrf.mxu0 }
 0x733   : > { %v6582_v29 = vpop.f32.mrf.mxu1  ;;  %v15003_v9 = vpop.eup %15002  ;;  %v19622_v8 = vpack.c.bf16 %v19614_v11, %v19602_v2  ;;  %v7000_v46 = vmul.f32 %v14987_v54, %v6984_v1  ;;  %v2649_v18 = vadd.f32 %v22035_v10, %v18359_v49 }
 0x734   : > { %15026 = vpow2.f32 %v12251_v31  ;;  %v6720_v13 = vadd.f32 %v6582_v29, %v2643_v12  ;;  %v15005_v3 = vpop.eup %15004  ;;  %v6941_v5 = vmul.f32 %v15003_v9, %v6925_v59 }
 0x735   : > { %15028 = vtanh.f32 %v6956_v33  ;;  %v6584_v20 = vpop.f32.mrf.mxu1  ;;  %22033 = vst [vmem:[#allocation36_spill] sm:$0xff] %v19622_v8  ;;  %v15007_v28 = vpop.eup %15006  ;;  %v6985_v6 = vsub.f32 %v19348_v38, %v15005_v3  ;;  %7297 = vmatmul.mubr.bf16.vlgmr.msra.gmra.mxu0 %v19622_v8  ;;  %13906 = vmatprep.mubr.bf16.mxu1 %v19622_v8  ;;  %v19631_v25 = vadd.f32 %v14999_v44, %v7000_v46 }
 0x736   : > { %15030 = vpow2.f32 %v12246_v51  ;;  %v12253_v42 = vmul.f32 -1.442695, %v6720_v13  ;;  %v15009_v21 = vpop.eup %15008  ;;  %v6957_v22 = vadd.f32 %v6941_v5, %v3231_v62  ;;  %7306 = vmatprep.mubr.bf16.mxu0 %v21458_v0  ;;  %v6719_v33 = vadd.f32 %v6580_v17, %v2641_v37  ;;  %v22037_v5 = vld [vmem:[#allocation207_spill] sm:$0xff] }
 0x737   : > { %15032 = vpow2.f32 %v12248_v23  ;;  %v19633_v54 = vpop.eup %15010  ;;  %v6840_v12 = vadd.f32 1.0, %v15009_v21  ;;  %v7001_v38 = vmul.f32 %v14993_v40, %v6985_v6  ;;  %v22036_v40 = vld [vmem:[#allocation211_spill] sm:$0xff]  ;;  %v2645_v17 = vadd.f32 %v22037_v5, %v18366_v58 }
 0x738   : > { %15034 = vpow2.f32 %v12253_v42  ;;  %v15013_v15 = vpop.eup %15012  ;;  %v2653_v62 = vadd.f32 %v22036_v40, %v18359_v49  ;;  %v12252_v6 = vmul.f32 -1.442695, %v6719_v33 }
 0x739   : > { %15036 = vtanh.f32 %v6957_v22  ;;  %v6588_v59 = vpop.f32.mrf.mxu1  ;;  %v15015_v51 = vpop.eup %15014  ;;  %v6842_v31 = vadd.f32 1.0, %v15013_v15  ;;  %v19640_v1 = vadd.f32 %v15005_v3, %v7001_v38  ;;  %v6721_v10 = vadd.f32 %v6584_v20, %v2645_v17  ;;  %v22039_v38 = vld [vmem:[#allocation107_spill] sm:$0xff] }
 0x73a   : > { %15038 = vrcp.f32 %v6840_v12  ;;  %v6722_v23 = vadd.f32 %v6588_v59, %v2649_v18  ;;  %v15017_v44 = vpop.eup %15016  ;;  %v6986_v9 = vsub.f32 %v19367_v7, %v15015_v51  ;;  %v6926_v7 = vadd.f32 %v19595_v50, %v6663_v30 }
 0x73b   : > { %15040 = vpow2.f32 %v12250_v27  ;;  %v19638_v29 = vpop.f32.mrf.mxu1  ;;  %v15019_v4 = vpop.eup %15018  ;;  %v19651_v42 = vpack.c.bf16 %v19640_v1, %v19631_v25  ;;  %v3236_v15 = vadd.f32 %v22039_v38, %v18576_v60 }
 0x73c   : > { %15042 = vrcp.f32 %v6842_v31  ;;  %v19645_v13 = vpop.eup %15020  ;;  %v6844_v46 = vadd.f32 1.0, %v15019_v4  ;;  %v12255_v36 = vmul.f32 -1.442695, %v6722_v23  ;;  %v13885_v27 = vpop.f32.mrf.mxu0  ;;  %v7002_v12 = vmul.f32 %v19612_v57, %v6986_v9 }
 0x73d   : > { %v6592_v37 = vpop.f32.mrf.mxu1  ;;  %22038 = vst [vmem:[#allocation86_spill] sm:$0xff] %v19651_v42  ;;  %v15023_v3 = vpop.eup %15022  ;;  %7307 = vmatmul.mubr.bf16.gmra.mxu0 %v19651_v42  ;;  %13907 = vmatmul.mubr.bf16.vlgmr.msra.gmra.mxu1 %v19651_v42  ;;  %v6839_v4 = vadd.f32 1.0, %v15017_v44  ;;  %v12254_v57 = vmul.f32 -1.442695, %v6721_v10 }
 0x73e   : > { %v6724_v21 = vadd.f32 %v6592_v37, %v2653_v62  ;;  %v15025_v22 = vpop.eup %15024  ;;  %15044 = vrcp.f32 %v6844_v46  ;;  %v6987_v18 = vsub.f32 %v19377_v61, %v15023_v3  ;;  %7316 = vmatprep.mubr.bf16.mxu0 %v21458_v0  ;;  %v19661_v30 = vadd.f32 %v15015_v51, %v7002_v12  ;;  %v6666_v5 = vpop.f32.mrf.mxu0 }
 0x73f   : > { %v6942_v59 = vmul.f32 %v15025_v22, %v6926_v7  ;;  %15046 = vpow2.f32 %v12255_v36 }
 0x740   : > { %v12257_v31 = vmul.f32 -1.442695, %v6724_v21  ;;  %v7003_v23 = vmul.f32 %v15007_v28, %v6987_v18  ;;  %15048 = vpow2.f32 %v12252_v6  ;;  %v22040_v28 = vld [vmem:[#allocation111_spill] sm:$0xff]  ;;  %v19668_v36 = vpop.f32.mrf.mxu0 }
 0x741   : > { %v15027_v33 = vpop.eup %15026  ;;  %v6958_v40 = vadd.f32 %v6942_v59, %v3236_v15  ;;  %v3239_v51 = vadd.f32 %v22040_v28, %v18576_v60  ;;  %v6928_v15 = vadd.f32 %v19595_v50, %v19627_v34  ;;  %v6929_v34 = vadd.f32 %v19595_v50, %v13885_v27 }
 0x742   : > { %v15029_v20 = vpop.eup %15028  ;;  %v6846_v62 = vadd.f32 1.0, %v15027_v33  ;;  %15050 = vpow2.f32 %v12257_v31  ;;  %v19663_v9 = vadd.f32 %v15023_v3, %v7003_v23  ;;  %v22042_v3 = vld [vmem:[#allocation210_spill] sm:$0xff]  ;;  %v6594_v33 = vpop.f32.mrf.mxu1 }
 0x743   : > { %v15031_v61 = vpop.eup %15030  ;;  %v6988_v17 = vsub.f32 %v19390_v53, %v15029_v20  ;;  %15052 = vtanh.f32 %v6958_v40  ;;  %v2651_v21 = vadd.f32 %v22042_v3, %v18366_v58  ;;  %v6927_v53 = vadd.f32 %v19595_v50, %v6666_v5 }
 0x744   : > { %v15033_v46 = vpop.eup %15032  ;;  %15054 = vrcp.f32 %v6846_v62  ;;  %v19672_v44 = vpack.c.bf16 %v19663_v9, %v19661_v30  ;;  %v6841_v18 = vadd.f32 1.0, %v15031_v61  ;;  %v6679_v61 = vpop.f32.mrf.mxu0 }
 0x745   : > { %v15035_v37 = vpop.eup %15034  ;;  %v7004_v7 = vmul.f32 %v19633_v54, %v6988_v17  ;;  %15056 = vrcp.f32 %v6839_v4  ;;  %v6723_v31 = vadd.f32 %v19638_v29, %v2651_v21  ;;  %v22043_v4 = vld [vmem:[#allocation213_spill] sm:$0xff]  ;;  %v6843_v62 = vadd.f32 1.0, %v15033_v46 }
 0x746   : > { %22041 = vst [vmem:[#allocation92_spill] sm:$0xff] %v19672_v44  ;;  %v15037_v6 = vpop.eup %15036  ;;  %v6848_v22 = vadd.f32 1.0, %v15035_v37  ;;  %15058 = vpow2.f32 %v12254_v57  ;;  %7317 = vmatmul.mubr.bf16.gmra.mxu0 %v19672_v44  ;;  %13910 = vmatprep.mubr.bf16.mxu1 %v19672_v44  ;;  %v2655_v40 = vadd.f32 %v22043_v4, %v18366_v58  ;;  %v22045_v46 = vld [vmem:[#allocation109_spill] sm:$0xff] }
 0x747   : > { %v15039_v10 = vpop.eup %15038  ;;  %v6989_v12 = vsub.f32 %v19403_v16, %v15037_v6  ;;  %v19681_v38 = vadd.f32 %v15029_v20, %v7004_v7  ;;  %7326 = vmatprep.mubr.bf16.mxu0 %v21458_v0  ;;  %v22044_v20 = vld [vmem:[#allocation105_spill] sm:$0xff]  ;;  %v12256_v21 = vmul.f32 -1.442695, %v6723_v31 }
 0x748   : > { %v15041_v54 = vpop.eup %15040  ;;  %v6943_v59 = vmul.f32 %v15039_v10, %v6927_v53  ;;  %15060 = vrcp.f32 %v6848_v22  ;;  %v3244_v5 = vadd.f32 %v22044_v20, %v18576_v60  ;;  %v6725_v37 = vadd.f32 %v6594_v33, %v2655_v40  ;;  %v13889_v22 = vpop.f32.mrf.mxu0 }
 0x749   : > { %v15043_v23 = vpop.eup %15042  ;;  %v7005_v16 = vmul.f32 %v19645_v13, %v6989_v12  ;;  %15062 = vrcp.f32 %v6841_v18  ;;  %v6845_v29 = vadd.f32 1.0, %v15041_v54  ;;  %v3247_v53 = vadd.f32 %v22045_v46, %v18576_v60 }
 0x74a   : > { %v6944_v57 = vmul.f32 %v15043_v23, %v6928_v15  ;;  %v6959_v17 = vadd.f32 %v6943_v59, %v3239_v51  ;;  %v12258_v12 = vmul.f32 -1.442695, %v6725_v37  ;;  %v6930_v59 = vadd.f32 %v19595_v50, %v6679_v61  ;;  %v6682_v33 = vpop.f32.mrf.mxu0  ;;  %v22048_v37 = vld [vmem:[#allocation117_spill] sm:$0xff] }
 0x74b   : > { %v19693_v28 = vadd.f32 %v15037_v6, %v7005_v16  ;;  %v15045_v7 = vpop.eup %15044 }
 0x74c   : > { %v6960_v3 = vadd.f32 %v6944_v57, %v3244_v5  ;;  %15064 = vtanh.f32 %v6959_v17  ;;  %v6945_v13 = vmul.f32 %v15045_v7, %v6929_v34  ;;  %v15047_v27 = vpop.eup %15046  ;;  %v6931_v57 = vadd.f32 %v19595_v50, %v6682_v33 }
 0x74d   : > { %15066 = vrcp.f32 %v6843_v62  ;;  %v19699_v10 = vpack.c.bf16 %v19693_v28, %v19681_v38  ;;  %v15049_v51 = vpop.eup %15048  ;;  %v6850_v6 = vadd.f32 1.0, %v15047_v27  ;;  %v22047_v62 = vld [vmem:[#allocation114_spill] sm:$0xff]  ;;  %v3255_v7 = vadd.f32 %v22048_v37, %v18576_v60 }
 0x74e   : > { %15068 = vtanh.f32 %v6960_v3  ;;  %v6961_v18 = vadd.f32 %v6945_v13, %v3247_v53  ;;  %v3252_v16 = vadd.f32 %v22047_v62, %v18576_v60 }
 0x74f   : > { %22046 = vst [vmem:[#allocation38_spill] sm:$0xff] %v19699_v10  ;;  %15070 = vrcp.f32 %v6845_v29  ;;  %7327 = vmatmul.mubr.bf16.gmra.mxu0 %v19699_v10  ;;  %13911 = vmatmul.mubr.bf16.gmra.mxu1 %v19699_v10  ;;  %v15051_v54 = vpop.eup %15050  ;;  %v6847_v29 = vadd.f32 1.0, %v15049_v51 }
 0x750   : > { %15072 = vpow2.f32 %v12256_v21  ;;  %7336 = vmatprep.mubr.bf16.mxu0 %v21458_v0  ;;  %v15053_v15 = vpop.eup %15052  ;;  %v6852_v31 = vadd.f32 1.0, %v15051_v54 }
 0x751   : > { %15074 = vtanh.f32 %v6961_v18  ;;  %v15055_v23 = vpop.eup %15054  ;;  %v6990_v4 = vsub.f32 %v19422_v14, %v15053_v15 }
 0x752   : > { %15076 = vrcp.f32 %v6850_v6  ;;  %v15057_v40 = vpop.eup %15056  ;;  %v6946_v20 = vmul.f32 %v15055_v23, %v6930_v59 }
 0x753   : > { %15078 = vpow2.f32 %v12258_v12  ;;  %v15059_v5 = vpop.eup %15058  ;;  %v7006_v34 = vmul.f32 %v15057_v40, %v6990_v4  ;;  %v22050_v40 = vld [vmem:[#allocation112_spill] sm:$0xff] }
 0x754   : > { %15080 = vrcp.f32 %v6852_v31  ;;  %v6962_v61 = vadd.f32 %v6946_v20, %v3252_v16  ;;  %v6849_v46 = vadd.f32 1.0, %v15059_v5  ;;  %v3260_v62 = vadd.f32 %v22050_v40, %v18576_v60 }
 0x755   : > { %v15061_v17 = vpop.eup %15060  ;;  %v19711_v21 = vadd.f32 %v15053_v15, %v7006_v34  ;;  %v6932_v15 = vadd.f32 %v19595_v50, %v19668_v36  ;;  %v6933_v5 = vadd.f32 %v19595_v50, %v13889_v22 }
 0x756   : > { %v6947_v3 = vmul.f32 %v15061_v17, %v6931_v57  ;;  %15082 = vtanh.f32 %v6962_v61  ;;  %v15063_v14 = vpop.eup %15062 }
 0x757   : > { %15084 = vrcp.f32 %v6847_v29  ;;  %v22053_v29 = vld [vmem:[#allocation115_spill] sm:$0xff] }
 0x758   : > { %v6963_v53 = vadd.f32 %v6947_v3, %v3255_v7  ;;  %v3263_v61 = vadd.f32 %v22053_v29, %v18576_v60  ;;  %v19796_v29 = vld [vmem:[%s21371_s5 + $0x7c] ss:$12 sps:$4 sm:$0xff]  }
 0x759   : > { %v15065_v13 = vpop.eup %15064 }
 0x75a   : > { %v15067_v27 = vpop.eup %15066  ;;  %15086 = vtanh.f32 %v6963_v53  ;;  %v6991_v18 = vsub.f32 %v19432_v43, %v15065_v13 }
 0x75b   : > { %v15069_v6 = vpop.eup %15068  ;;  %15088 = vrcp.f32 %v6849_v46 }
 0x75c   : > { %v15071_v12 = vpop.eup %15070  ;;  %v7007_v51 = vmul.f32 %v15063_v14, %v6991_v18  ;;  %v6992_v54 = vsub.f32 %v19449_v32, %v15069_v6 }
 0x75d   : > { %v15073_v59 = vpop.eup %15072 }
 0x75e   : > { %v15075_v31 = vpop.eup %15074  ;;  %v19717_v33 = vadd.f32 %v15065_v13, %v7007_v51  ;;  %v7008_v23 = vmul.f32 %v15067_v27, %v6992_v54  ;;  %v6851_v34 = vadd.f32 1.0, %v15073_v59 }
 0x75f   : > { %v15077_v4 = vpop.eup %15076  ;;  %v6993_v43 = vsub.f32 %v19453_v41, %v15075_v31 }
 0x760   : > { %22049 = vst [vmem:[#allocation25_spill] sm:$0xff] %v19717_v33  ;;  %v15079_v16 = vpop.eup %15078  ;;  %v6948_v20 = vmul.f32 %v15077_v4, %v6932_v15  ;;  %v19725_v32 = vpack.c.bf16 %v19717_v33, %v19711_v21  ;;  %v19727_v57 = vadd.f32 %v15069_v6, %v7008_v23 }
 0x761   : > { %v15081_v36 = vpop.eup %15080  ;;  %v7009_v17 = vmul.f32 %v15071_v12, %v6993_v43  ;;  %v6853_v14 = vadd.f32 1.0, %v15079_v16 }
 0x762   : > { %22051 = vst [vmem:[#allocation90_spill] sm:$0xff] %v19725_v32  ;;  %22052 = vst [vmem:[#allocation37_spill] sm:$0xff] %v19727_v57  ;;  %v6964_v37 = vadd.f32 %v6948_v20, %v3260_v62  ;;  %v6949_v7 = vmul.f32 %v15081_v36, %v6933_v5  ;;  %7337 = vmatmul.mubr.bf16.gmra.mxu0 %v19725_v32  ;;  %13914 = vmatprep.mubr.bf16.mxu1 %v19725_v32  ;;  %v19781_v36 = vld [vmem:[%s21371_s5 + $0x94] ss:$12 sps:$4 sm:$0xff]  }
 0x763   : > { %7346 = vmatprep.mubr.bf16.mxu0 %v21458_v0  ;;  %v19734_v41 = vadd.f32 %v15075_v31, %v7009_v17  ;;  %v15083_v22 = vpop.eup %15082  ;;  %v14378_v17 = vld [vmem:[%s21371_s5 + $0xb0] ss:$12 sps:$4 sm:$0xff]  }
 0x764   : > { %15090 = vtanh.f32 %v6964_v37  ;;  %v6965_v3 = vadd.f32 %v6949_v7, %v3263_v61  ;;  %v6994_v53 = vsub.f32 %v19463_v35, %v15083_v22  ;;  %v15085_v13 = vpop.eup %15084  ;;  %v19801_v61 = vld [vmem:[%s21371_s5 + $0x78] ss:$12 sps:$4 sm:$0xff]   ;;  %13922 = vmatprep.subr.bf16.mxu0 %v14378_v17 }
 0x765   : > { %22054 = vst [vmem:[#allocation96_spill] sm:$0xff] %v19734_v41  ;;  %15092 = vrcp.f32 %v6851_v34  ;;  %v19738_v46 = vpack.c.bf16 %v19734_v41, %v19727_v57  ;;  %v19786_v34 = vld [vmem:[%s21371_s5 + $0x90] ss:$12 sps:$4 sm:$0xff]   ;;  %13923 = vmatpush3.bf16.msra.mxu0 %v14378_v17  ;;  %v14385_v37 = vld [vmem:[%s21371_s5 + $0x98] ss:$12 sps:$4 sm:$0xff]  }
 0x766   : > { %15094 = vtanh.f32 %v6965_v3  ;;  %v7010_v18 = vmul.f32 %v15085_v13, %v6994_v53  ;;  %v19811_v7 = vld [vmem:[%s21371_s5 + $0x64] ss:$12 sps:$4 sm:$0xff]   ;;  %13924 = vmatprep.subr.bf16.mxu0 %v14385_v37  ;;  %v14392_v3 = vld [vmem:[%s21371_s5 + $0x80] ss:$12 sps:$4 sm:$0xff]   ;;  %v19831_v53 = vld [vmem:[%s21371_s5 + $0x48] ss:$12 sps:$4 sm:$0xff]  }
 0x767   : > { %22055 = vst [vmem:[#allocation24_spill] sm:$0xff] %v19738_v46  ;;  %v15087_v27 = vpop.eup %15086  ;;  %13915 = vmatmul.mubr.bf16.gmra.mxu1 %v19738_v46  ;;  %15096 = vrcp.f32 %v6853_v14  ;;  %v19826_v14 = vld [vmem:[%s21371_s5 + $0x4c] ss:$12 sps:$4 sm:$0xff]   ;;  %v19838_v13 = vld [vmem:[%s21371_s5 + $0x34] ss:$12 sps:$4 sm:$0xff]  }
 0x768   : > { %v6995_v6 = vsub.f32 %v19466_v56, %v15087_v27  ;;  %v15089_v12 = vpop.eup %15088  ;;  %v19743_v51 = vadd.f32 %v15083_v22, %v7010_v18  ;;  %v19816_v22 = vld [vmem:[%s21371_s5 + $0x60] ss:$12 sps:$4 sm:$0xff]   ;;  %v19846_v18 = vld [vmem:[%s21371_s5 + $0x30] ss:$12 sps:$4 sm:$0xff]  }
 0x769   : > { %13925 = vmatpush3.bf16.msra.mxu0 %v14385_v37 }
 0x76a   : > { %22056 = vst [vmem:[#allocation41_spill] sm:$0xff] %v19743_v51  ;;  %7347 = vmatmul.mubr.bf16.gmra.mxu0 %v19738_v46  ;;  %v7011_v54 = vmul.f32 %v15089_v12, %v6995_v6  ;;  %13926 = vmatprep.subr.bf16.mxu0 %v14392_v3  ;;  %v19853_v6 = vld [vmem:[%s21371_s5 + $0x1c] ss:$12 sps:$4 sm:$0xff]  }
 0x76b   : > { %7356 = vmatprep.mubr.bf16.mxu0 %v21458_v0  ;;  %v14403_v12 = vld [vmem:[%s21371_s5 + $0x50] ss:$12 sps:$4 sm:$0xff]  }
 0x76c   : > { %v19747_v59 = vadd.f32 %v15087_v27, %v7011_v54  ;;  %v14399_v27 = vld [vmem:[%s21371_s5 + $0x68] ss:$12 sps:$4 sm:$0xff]   ;;  %v19861_v54 = vld [vmem:[%s21371_s5 + $0x18] ss:$12 sps:$4 sm:$0xff]  }
 0x76d   : > { %13927 = vmatpush3.bf16.msra.mxu0 %v14392_v3  ;;  %v22065_v3 = vld [vmem:[#allocation217_spill] sm:$0xff] }
 0x76e   : > { %22057 = vst [vmem:[#allocation42_spill] sm:$0xff] %v19747_v59  ;;  %v19751_v35 = vpack.c.bf16 %v19747_v59, %v19743_v51  ;;  %13928 = vmatprep.subr.bf16.mxu0 %v14399_v27 }
 0x770   : > { %22058 = vst [vmem:[#allocation43_spill] sm:$0xff] %v19751_v35  ;;  %13918 = vmatprep.mubr.bf16.mxu1 %v19751_v35 }
 0x771   : > { %v15091_v31 = vpop.eup %15090  ;;  %13929 = vmatpush3.bf16.msra.mxu0 %v14399_v27  ;;  %v2663_v27 = vadd.f32 %v22065_v3, %v18359_v49 }
 0x772   : > { %v15093_v15 = vpop.eup %15092  ;;  %7357 = vmatmul.mubr.bf16.gmra.mxu0 %v19751_v35  ;;  %v6996_v56 = vsub.f32 %v19477_v52, %v15091_v31  ;;  %v14381_v52 = vld [vmem:[%s21371_s5 + $0xac] ss:$12 sps:$4 sm:$0xff]   ;;  %13930 = vmatprep.subr.bf16.mxu0 %v14403_v12 }
 0x773   : > { %v15095_v23 = vpop.eup %15094  ;;  %7366 = vmatprep.mubr.bf16.mxu0 %v21458_v0  ;;  %8044 = vmatprep.subr.bf16.mxu1 %v14381_v52  ;;  %v22066_v35 = vld [vmem:[#allocation220_spill] sm:$0xff] }
 0x774   : > { %v6997_v4 = vsub.f32 %v19479_v26, %v15095_v23  ;;  %v7012_v40 = vmul.f32 %v15093_v15, %v6996_v56  ;;  %v15097_v62 = vpop.eup %15096  ;;  %v19775_v26 = vld [vmem:[%s21371_s5 + $0xa8] ss:$12 sps:$4 sm:$0xff]   ;;  %v14407_v15 = vld [vmem:[%s21371_s5 + $0x38] ss:$12 sps:$4 sm:$0xff]   ;;  %v19876_v56 = vld [vmem:[%s21371_s5] ss:$12 sps:$4 sm:$0xff]   ;;  %v2669_v46 = vadd.f32 %v22066_v35, %v18359_v49 }
 0x775   : > { %8045 = vmatpush1.bf16.msra.mxu1 %v19775_v26  ;;  %13931 = vmatpush3.bf16.msra.mxu0 %v14403_v12  ;;  %22063 = vst [vmem:[#allocation104_spill] sm:$0xff] %v19876_v56 }
 0x776   : > { %v7013_v43 = vmul.f32 %v15097_v62, %v6997_v4  ;;  %v19758_v16 = vadd.f32 %v15091_v31, %v7012_v40  ;;  %8046 = vmatprep.subr.bf16.mxu1 %v19781_v36  ;;  %v19868_v31 = vld [vmem:[%s21371_s5 + $0x4] ss:$12 sps:$4 sm:$0xff]   ;;  %13932 = vmatprep.subr.bf16.mxu0 %v14407_v15  ;;  %v14409_v4 = vld [vmem:[%s21371_s5 + $0x8] ss:$12 sps:$4 sm:$0xff]  }
 0x777   : > { %22062 = vst [vmem:[#allocation98_spill] sm:$0xff] %v19868_v31  ;;  %v22064_v40 = vld [vmem:[#allocation214_spill] sm:$0xff] }
 0x778   : > { %22059 = vst [vmem:[#allocation100_spill] sm:$0xff] %v19758_v16  ;;  %v19760_v20 = vadd.f32 %v15095_v23, %v7013_v43  ;;  %v14408_v23 = vld [vmem:[%s21371_s5 + $0x20] ss:$12 sps:$4 sm:$0xff]   ;;  %v2659_v62 = vadd.f32 %v22064_v40, %v18359_v49  ;;  %v22067_v40 = vld [vmem:[#allocation216_spill] sm:$0xff] }
 0x779   : > { %8047 = vmatpush1.bf16.msra.mxu1 %v19786_v34  ;;  %13933 = vmatpush3.bf16.msra.mxu0 %v14407_v15  ;;  %v2661_v10 = vadd.f32 %v22067_v40, %v18366_v58 }
 0x77a   : > { %22060 = vst [vmem:[#allocation46_spill] sm:$0xff] %v19760_v20  ;;  %v19764_v5 = vpack.c.bf16 %v19760_v20, %v19758_v16  ;;  %8048 = vmatprep.subr.bf16.mxu1 %v19796_v29  ;;  %13934 = vmatprep.subr.bf16.mxu0 %v14408_v23 }
 0x77c   : > { %22061 = vst [vmem:[#allocation94_spill] sm:$0xff] %v19764_v5  ;;  %7367 = vmatmul.mubr.bf16.gmra.mxu0 %v19764_v5  ;;  %13919 = vmatmul.mubr.bf16.gmra.mxu1 %v19764_v5 }
 0x77d   : > { %8076 = vmatprep.mubr.bf16.mxu1 %v21458_v0  ;;  %8049 = vmatpush1.bf16.msra.mxu1 %v19801_v61 }
 0x77e   : > { %8050 = vmatprep.subr.bf16.mxu1 %v19811_v7  ;;  %13935 = vmatpush3.bf16.msra.mxu0 %v14408_v23 }
 0x77f   : > { %13936 = vmatprep.subr.bf16.mxu0 %v14409_v4 }
 0x781   : > { %8051 = vmatpush1.bf16.msra.mxu1 %v19816_v22 }
 0x782   : > { %8052 = vmatprep.subr.bf16.mxu1 %v19826_v14  ;;  %13937 = vmatpush3.bf16.msra.mxu0 %v14409_v4 }
 0x783   : > { %8824 = vmatprep.subr.bf16.mxu0 %v14381_v52 }
 0x785   : > { %8053 = vmatpush1.bf16.msra.mxu1 %v19831_v53 }
 0x786   : > { %8054 = vmatprep.subr.bf16.mxu1 %v19838_v13 }
 0x789   : > { %8055 = vmatpush1.bf16.msra.mxu1 %v19846_v18 }
 0x78a   : > { %8056 = vmatprep.subr.bf16.mxu1 %v19853_v6 }
 0x78d   : > { %8057 = vmatpush1.bf16.msra.mxu1 %v19861_v54 }
 0x78e   : > { %8058 = vmatprep.subr.bf16.mxu1 %v19868_v31 }
 0x791   : > { %8059 = vmatpush1.bf16.msra.mxu1 %v19876_v56 }
 0x7f5   : > { %v7298_v43 = vpop.f32.mrf.mxu0 }
 0x7f6   : > { %v7474_v17 = vadd.f32 %v7298_v43, %v2659_v62  ;;  %v22068_v43 = vld [vmem:[#allocation223_spill] sm:$0xff] }
 0x7f7   : > { %v7300_v37 = vpop.f32.mrf.mxu0  ;;  %v2673_v44 = vadd.f32 %v22068_v43, %v18359_v49 }
 0x7f8   : > { %v12283_v12 = vmul.f32 -1.442695, %v7474_v17  ;;  %v7475_v17 = vadd.f32 %v7300_v37, %v2661_v10 }
 0x7f9   : > { %v7302_v15 = vpop.f32.mrf.mxu0 }
 0x7fa   : > { %15098 = vpow2.f32 %v12283_v12  ;;  %v7476_v23 = vadd.f32 %v7302_v15, %v2663_v27  ;;  %v22069_v12 = vld [vmem:[#allocation219_spill] sm:$0xff] }
 0x7fb   : > { %v7304_v5 = vpop.f32.mrf.mxu0  ;;  %v2665_v15 = vadd.f32 %v22069_v12, %v18366_v58 }
 0x7fc   : > { %v12285_v32 = vmul.f32 -1.442695, %v7476_v23  ;;  %v22070_v23 = vld [vmem:[#allocation226_spill] sm:$0xff] }
 0x7fd   : > { %v7308_v4 = vpop.f32.mrf.mxu0  ;;  %v7477_v8 = vadd.f32 %v7304_v5, %v2665_v15  ;;  %v22073_v15 = vld [vmem:[#allocation225_spill] sm:$0xff] }
 0x7fe   : > { %15100 = vpow2.f32 %v12285_v32  ;;  %v7478_v52 = vadd.f32 %v7308_v4, %v2669_v46  ;;  %v2679_v32 = vadd.f32 %v22070_v23, %v18359_v49  ;;  %v12284_v4 = vmul.f32 -1.442695, %v7475_v17  ;;  %v19904_v17 = vpop.f32.mrf.mxu1 }
 0x7ff   : > { %v7310_v62 = vpop.f32.mrf.mxu0  ;;  %v12286_v12 = vmul.f32 -1.442695, %v7477_v8 }
 0x800   : > { %v12287_v3 = vmul.f32 -1.442695, %v7478_v52  ;;  %v22071_v52 = vld [vmem:[#allocation222_spill] sm:$0xff] }
 0x801   : > { %v7312_v42 = vpop.f32.mrf.mxu0  ;;  %v2671_v10 = vadd.f32 %v22071_v52, %v18366_v58 }
 0x802   : > { %15102 = vpow2.f32 %v12287_v3  ;;  %v7480_v27 = vadd.f32 %v7312_v42, %v2673_v44  ;;  %v22072_v42 = vld [vmem:[#allocation229_spill] sm:$0xff] }
 0x803   : > { %v7314_v35 = vpop.f32.mrf.mxu0  ;;  %v2683_v44 = vadd.f32 %v22072_v42, %v18359_v49  ;;  %v7479_v55 = vadd.f32 %v7310_v62, %v2671_v10 }
 0x804   : > { %v12289_v46 = vmul.f32 -1.442695, %v7480_v27 }
 0x806   : > { %v7318_v40 = vpop.f32.mrf.mxu0  ;;  %15104 = vpow2.f32 %v12289_v46 }
 0x807   : > { %v7482_v19 = vadd.f32 %v7318_v40, %v2679_v32  ;;  %v15099_v45 = vpop.eup %15098  ;;  %15106 = vpow2.f32 %v12284_v4  ;;  %v2675_v32 = vadd.f32 %v22073_v15, %v18366_v58  ;;  %v22074_v40 = vld [vmem:[#allocation232_spill] sm:$0xff]  ;;  %v22076_v15 = vld [vmem:[#allocation231_spill] sm:$0xff] }
 0x808   : > { %v7320_v37 = vpop.f32.mrf.mxu0  ;;  %v7602_v43 = vadd.f32 1.0, %v15099_v45  ;;  %v2689_v52 = vadd.f32 %v22074_v40, %v18359_v49  ;;  %v22075_v4 = vld [vmem:[#allocation228_spill] sm:$0xff] }
 0x809   : > { %v12291_v3 = vmul.f32 -1.442695, %v7482_v19  ;;  %v12288_v19 = vmul.f32 -1.442695, %v7479_v55  ;;  %v7481_v8 = vadd.f32 %v7314_v35, %v2675_v32  ;;  %v2681_v10 = vadd.f32 %v22075_v4, %v18366_v58 }
 0x80a   : > { %v7322_v23 = vpop.f32.mrf.mxu0  ;;  %15108 = vrcp.f32 %v7602_v43 }
 0x80b   : > { %v7484_v5 = vadd.f32 %v7322_v23, %v2683_v44  ;;  %v15101_v27 = vpop.eup %15100  ;;  %15110 = vpow2.f32 %v12291_v3  ;;  %v7411_v44 = vpop.f32.mrf.mxu1  ;;  %v2685_v3 = vadd.f32 %v22076_v15, %v18366_v58  ;;  %v12290_v40 = vmul.f32 -1.442695, %v7481_v8 }
 0x80c   : > { %v7324_v46 = vpop.f32.mrf.mxu0  ;;  %v7604_v42 = vadd.f32 1.0, %v15101_v27  ;;  %15112 = vpow2.f32 %v12286_v12  ;;  %v22078_v12 = vld [vmem:[#allocation235_spill] sm:$0xff] }
 0x80d   : > { %v12293_v45 = vmul.f32 -1.442695, %v7484_v5  ;;  %v2693_v55 = vadd.f32 %v22078_v12, %v18359_v49  ;;  %v7483_v5 = vadd.f32 %v7320_v37, %v2681_v10 }
 0x80e   : > { %15114 = vrcp.f32 %v7604_v42  ;;  %v7485_v42 = vadd.f32 %v7324_v46, %v2685_v3  ;;  %v22080_v3 = vld [vmem:[#allocation237_spill] sm:$0xff] }
 0x80f   : > { %v7328_v62 = vpop.f32.mrf.mxu0  ;;  %v15103_v23 = vpop.eup %15102  ;;  %15116 = vpow2.f32 %v12293_v45  ;;  %v12292_v24 = vmul.f32 -1.442695, %v7483_v5 }
 0x810   : > { %v7486_v43 = vadd.f32 %v7328_v62, %v2689_v52  ;;  %v7606_v35 = vadd.f32 1.0, %v15103_v23  ;;  %15118 = vpow2.f32 %v12288_v19  ;;  %v13909_v52 = vpop.f32.mrf.mxu1  ;;  %v12294_v47 = vmul.f32 -1.442695, %v7485_v42 }
 0x811   : > { %v7330_v27 = vpop.f32.mrf.mxu0  ;;  %v7698_v23 = vadd.f32 %v19595_v50, %v7411_v44 }
 0x812   : > { %v12295_v32 = vmul.f32 -1.442695, %v7486_v43  ;;  %15120 = vrcp.f32 %v7606_v35  ;;  %v7487_v62 = vadd.f32 %v7330_v27, %v2691_v39  ;;  %v7414_v37 = vpop.f32.mrf.mxu1  ;;  %v22079_v39 = vld [vmem:[#allocation121_spill] sm:$0xff]  ;;  %v2695_v27 = vadd.f32 %v22080_v3, %v18366_v58 }
 0x813   : > { %v7332_v4 = vpop.f32.mrf.mxu0  ;;  %v15105_v15 = vpop.eup %15104  ;;  %v3268_v43 = vadd.f32 %v22079_v39, %v18576_v60 }
 0x814   : > { %v7488_v63 = vadd.f32 %v7332_v4, %v2693_v55  ;;  %15122 = vpow2.f32 %v12295_v32  ;;  %v7608_v48 = vadd.f32 1.0, %v15105_v15  ;;  %v15107_v20 = vpop.eup %15106  ;;  %v12296_v19 = vmul.f32 -1.442695, %v7487_v62  ;;  %v22081_v4 = vld [vmem:[#allocation125_spill] sm:$0xff] }
 0x815   : > { %15124 = vpow2.f32 %v12290_v40  ;;  %v7334_v46 = vpop.f32.mrf.mxu0  ;;  %v19924_v40 = vpop.f32.mrf.mxu1  ;;  %v3271_v62 = vadd.f32 %v22081_v4, %v18576_v60 }
 0x816   : > { %v12297_v45 = vmul.f32 -1.442695, %v7488_v63  ;;  %15126 = vrcp.f32 %v7608_v48  ;;  %v7699_v63 = vadd.f32 %v19595_v50, %v7414_v37  ;;  %v7603_v48 = vadd.f32 1.0, %v15107_v20 }
 0x817   : > { %v15109_v8 = vpop.eup %15108  ;;  %v7489_v5 = vadd.f32 %v7334_v46, %v2695_v27 }
 0x818   : > { %15128 = vpow2.f32 %v12297_v45  ;;  %v15111_v10 = vpop.eup %15110  ;;  %v7714_v12 = vmul.f32 %v15109_v8, %v7698_v23  ;;  %v22082_v8 = vld [vmem:[#allocation238_spill] sm:$0xff] }
 0x819   : > { %15130 = vpow2.f32 %v12292_v24  ;;  %v7610_v55 = vadd.f32 1.0, %v15111_v10  ;;  %v15113_v44 = vpop.eup %15112  ;;  %v12298_v37 = vmul.f32 -1.442695, %v7489_v5  ;;  %v2699_v46 = vadd.f32 %v22082_v8, %v18359_v49  ;;  %v7427_v10 = vpop.f32.mrf.mxu1 }
 0x81a   : > { %15132 = vpow2.f32 %v12294_v47  ;;  %v7730_v35 = vadd.f32 %v7714_v12, %v3268_v43  ;;  %v7605_v24 = vadd.f32 1.0, %v15113_v44  ;;  %v7700_v47 = vadd.f32 %v19595_v50, %v19904_v17  ;;  %v22083_v43 = vld [vmem:[#allocation119_spill] sm:$0xff] }
 0x81b   : > { %15134 = vpow2.f32 %v12296_v19  ;;  %v15115_v32 = vpop.eup %15114  ;;  %v3276_v3 = vadd.f32 %v22083_v43, %v18576_v60 }
 0x81c   : > { %15136 = vrcp.f32 %v7610_v55  ;;  %v15117_v42 = vpop.eup %15116  ;;  %v7715_v15 = vmul.f32 %v15115_v32, %v7699_v63 }
 0x81d   : > { %15138 = vtanh.f32 %v7730_v35  ;;  %v7612_v45 = vadd.f32 1.0, %v15117_v42  ;;  %v15119_v23 = vpop.eup %15118  ;;  %v7701_v35 = vadd.f32 %v19595_v50, %v13909_v52  ;;  %v22084_v42 = vld [vmem:[#allocation123_spill] sm:$0xff]  ;;  %v22087_v52 = vld [vmem:[#allocation129_spill] sm:$0xff] }
 0x81e   : > { %15140 = vrcp.f32 %v7603_v48  ;;  %v7731_v20 = vadd.f32 %v7715_v15, %v3271_v62  ;;  %v7607_v63 = vadd.f32 1.0, %v15119_v23  ;;  %v3279_v4 = vadd.f32 %v22084_v42, %v18576_v60  ;;  %v22085_v62 = vld [vmem:[#allocation241_spill] sm:$0xff] }
 0x81f   : > { %v15121_v19 = vpop.eup %15120  ;;  %15142 = vrcp.f32 %v7612_v45  ;;  %v2703_v15 = vadd.f32 %v22085_v62, %v18359_v49  ;;  %v19939_v45 = vpop.f32.mrf.mxu1 }
 0x820   : > { %v7716_v27 = vmul.f32 %v15121_v19, %v7700_v47  ;;  %15144 = vtanh.f32 %v7731_v20  ;;  %v22086_v47 = vld [vmem:[#allocation126_spill] sm:$0xff] }
 0x821   : > { %v15123_v39 = vpop.eup %15122  ;;  %15146 = vrcp.f32 %v7605_v24  ;;  %v19943_v20 = vadd.f32 %v22086_v47, %v18576_v60 }
 0x822   : > { %v7338_v12 = vpop.f32.mrf.mxu0  ;;  %v7614_v55 = vadd.f32 1.0, %v15123_v39  ;;  %v15125_v17 = vpop.eup %15124  ;;  %v7732_v48 = vadd.f32 %v7716_v27, %v3276_v3  ;;  %15148 = vpow2.f32 %v12298_v37  ;;  %v3284_v37 = vadd.f32 %v22087_v52, %v18576_v60  ;;  %v22088_v39 = vld [vmem:[#allocation131_spill] sm:$0xff] }
 0x823   : > { %v7490_v44 = vadd.f32 %v7338_v12, %v2699_v46  ;;  %v15127_v32 = vpop.eup %15126  ;;  %v19949_v43 = vadd.f32 %v22088_v39, %v18576_v60  ;;  %v7609_v62 = vadd.f32 1.0, %v15125_v17  ;;  %v7430_v39 = vpop.f32.mrf.mxu1 }
 0x824   : > { %v7340_v5 = vpop.f32.mrf.mxu0  ;;  %15150 = vrcp.f32 %v7614_v55  ;;  %v7717_v19 = vmul.f32 %v15127_v32, %v7701_v35  ;;  %v22089_v55 = vld [vmem:[#allocation134_spill] sm:$0xff]  ;;  %v7702_v32 = vadd.f32 %v19595_v50, %v7427_v10 }
 0x825   : > { %v12299_v24 = vmul.f32 -1.442695, %v7490_v44  ;;  %v15129_v23 = vpop.eup %15128  ;;  %15152 = vtanh.f32 %v7732_v48  ;;  %v3287_v44 = vadd.f32 %v22089_v55, %v18576_v60  ;;  %v22090_v48 = vld [vmem:[#allocation244_spill] sm:$0xff] }
 0x826   : > { %v7342_v8 = vpop.f32.mrf.mxu0  ;;  %v15131_v46 = vpop.eup %15130  ;;  %15154 = vrcp.f32 %v7607_v63  ;;  %v7616_v3 = vadd.f32 1.0, %v15129_v23  ;;  %v7733_v42 = vadd.f32 %v7717_v19, %v3279_v4  ;;  %v2709_v35 = vadd.f32 %v22090_v48, %v18359_v49  ;;  %v22093_v19 = vld [vmem:[#allocation246_spill] sm:$0xff]  ;;  %v22094_v48 = vld [vmem:[#allocation247_spill] sm:$0xff] }
 0x827   : > { %v7492_v27 = vadd.f32 %v7342_v8, %v2703_v15  ;;  %v15133_v12 = vpop.eup %15132  ;;  %15156 = vpow2.f32 %v12299_v24  ;;  %v22091_v15 = vld [vmem:[#allocation240_spill] sm:$0xff]  ;;  %v22092_v8 = vld [vmem:[#allocation243_spill] sm:$0xff]  ;;  %v7611_v17 = vadd.f32 1.0, %v15131_v46  ;;  %v2711_v59 = vadd.f32 %v22093_v19, %v18366_v58 }
 0x828   : > { %v7344_v47 = vpop.f32.mrf.mxu0  ;;  %v15135_v52 = vpop.eup %15134  ;;  %15158 = vrcp.f32 %v7616_v3  ;;  %v2701_v23 = vadd.f32 %v22091_v15, %v18366_v58  ;;  %v2705_v55 = vadd.f32 %v22092_v8, %v18366_v58  ;;  %v2713_v50 = vadd.f32 %v22094_v48, %v18359_v49  ;;  %v19968_v15 = vld [vmem:[%s21373_s7] ss:$0 sm:$0xff] }
 0x829   : > { %v12301_v16 = vmul.f32 -1.442695, %v7492_v27  ;;  %v15137_v63 = vpop.eup %15136  ;;  %15160 = vtanh.f32 %v7733_v42  ;;  %v7613_v51 = vadd.f32 1.0, %v15133_v12  ;;  %v7703_v46 = vadd.f32 %v19968_v15, %v7430_v39 }
 0x82a   : > { %v7348_v4 = vpop.f32.mrf.mxu0  ;;  %v15139_v24 = vpop.eup %15138  ;;  %v7718_v10 = vmul.f32 %v15137_v63, %v7702_v32  ;;  %15162 = vrcp.f32 %v7609_v62  ;;  %v7491_v19 = vadd.f32 %v7340_v5, %v2701_v23  ;;  %v22095_v63 = vld [vmem:[#allocation250_spill] sm:$0xff] }
 0x82b   : > { %v7494_v3 = vadd.f32 %v7348_v4, %v2709_v35  ;;  %v7762_v27 = vsub.f32 %v19602_v2, %v15139_v24  ;;  %v15141_v8 = vpop.eup %15140  ;;  %15164 = vpow2.f32 %v12301_v16  ;;  %v7615_v35 = vadd.f32 1.0, %v15135_v52 }
 0x82c   : > { %v7350_v42 = vpop.f32.mrf.mxu0  ;;  %v7734_v41 = vadd.f32 %v7718_v10, %v3284_v37  ;;  %v15143_v48 = vpop.eup %15142  ;;  %15166 = vrcp.f32 %v7611_v17  ;;  %v7493_v2 = vadd.f32 %v7344_v47, %v2705_v55  ;;  %v2719_v4 = vadd.f32 %v22095_v63, %v18359_v49 }
 0x82d   : > { %v12303_v57 = vmul.f32 -1.442695, %v7494_v3  ;;  %v7778_v32 = vmul.f32 %v15141_v8, %v7762_v27  ;;  %v15145_v12 = vpop.eup %15144  ;;  %v7719_v56 = vmul.f32 %v15143_v48, %v7703_v46  ;;  %v7704_v16 = vadd.f32 %v19968_v15, %v19924_v40 }
 0x82e   : > { %v7352_v62 = vpop.f32.mrf.mxu0  ;;  %15168 = vtanh.f32 %v7734_v41  ;;  %v15147_v39 = vpop.eup %15146  ;;  %v7763_v5 = vsub.f32 %v19614_v11, %v15145_v12  ;;  %v12300_v23 = vmul.f32 -1.442695, %v7491_v19  ;;  %v22096_v41 = vld [vmem:[#allocation253_spill] sm:$0xff]  ;;  %v7705_v40 = vadd.f32 %v19968_v15, %v19939_v45 }
 0x82f   : > { %v7496_v33 = vadd.f32 %v7352_v62, %v2713_v50  ;;  %v19973_v31 = vadd.f32 %v15139_v24, %v7778_v32  ;;  %15170 = vpow2.f32 %v12303_v57  ;;  %v15149_v52 = vpop.eup %15148  ;;  %v7735_v47 = vadd.f32 %v7719_v56, %v3287_v44 }
 0x830   : > { %v7354_v37 = vpop.f32.mrf.mxu0  ;;  %15172 = vrcp.f32 %v7613_v51  ;;  %v2723_v10 = vadd.f32 %v22096_v41, %v18359_v49  ;;  %v7779_v50 = vmul.f32 %v15147_v39, %v7763_v5  ;;  %v12302_v24 = vmul.f32 -1.442695, %v7493_v2 }
 0x831   : > { %v12305_v55 = vmul.f32 -1.442695, %v7496_v33  ;;  %v15151_v17 = vpop.eup %15150  ;;  %15174 = vrcp.f32 %v7615_v35  ;;  %v7495_v56 = vadd.f32 %v7350_v42, %v2711_v59  ;;  %v7617_v48 = vadd.f32 1.0, %v15149_v52  ;;  %v22097_v42 = vld [vmem:[#allocation249_spill] sm:$0xff] }
 0x832   : > { %v7358_v3 = vpop.f32.mrf.mxu0  ;;  %v15153_v27 = vpop.eup %15152  ;;  %v7720_v11 = vmul.f32 %v15151_v17, %v7704_v16  ;;  %15176 = vtanh.f32 %v7735_v47  ;;  %v19982_v51 = vadd.f32 %v15145_v12, %v7779_v50  ;;  %v2715_v63 = vadd.f32 %v22097_v42, %v18366_v58  ;;  %v22098_v50 = vld [vmem:[#allocation256_spill] sm:$0xff] }
 0x833   : > { %v7498_v57 = vadd.f32 %v7358_v3, %v2719_v4  ;;  %v15155_v46 = vpop.eup %15154  ;;  %15178 = vpow2.f32 %v12305_v55  ;;  %v7764_v44 = vsub.f32 %v19631_v25, %v15153_v27  ;;  %v20001_v17 = vpop.f32.mrf.mxu1 }
 0x834   : > { %v7360_v33 = vpop.f32.mrf.mxu0  ;;  %v15157_v8 = vpop.eup %15156  ;;  %v7736_v19 = vadd.f32 %v7720_v11, %v19943_v20  ;;  %15180 = vpow2.f32 %v12300_v23  ;;  %v19988_v62 = vpack.c.bf16 %v19982_v51, %v19973_v31  ;;  %v12304_v20 = vmul.f32 -1.442695, %v7495_v56 }
 0x835   : > { %v12307_v32 = vmul.f32 -1.442695, %v7498_v57  ;;  %v15159_v35 = vpop.eup %15158  ;;  %v7618_v2 = vadd.f32 1.0, %v15157_v8  ;;  %15182 = vpow2.f32 %v12302_v24  ;;  %v7780_v12 = vmul.f32 %v15155_v46, %v7764_v44  ;;  %v22099_v44 = vld [vmem:[#allocation252_spill] sm:$0xff] }
 0x836   : > { %v7362_v45 = vpop.f32.mrf.mxu0  ;;  %v15161_v59 = vpop.eup %15160  ;;  %15184 = vtanh.f32 %v7736_v19  ;;  %v7721_v25 = vmul.f32 %v15159_v35, %v7705_v40  ;;  %8077 = vmatmul.mubr.bf16.vlgmr.msra.gmra.mxu1 %v19988_v62  ;;  %13938 = vmatprep.mubr.bf16.mxu0 %v19988_v62  ;;  %v7497_v23 = vadd.f32 %v7354_v37, %v2715_v63  ;;  %v2729_v24 = vadd.f32 %v22098_v50, %v18359_v49 }
 0x837   : > { %v7500_v4 = vadd.f32 %v7362_v45, %v2723_v10  ;;  %15186 = vrcp.f32 %v7618_v2  ;;  %v7765_v5 = vsub.f32 %v19640_v1, %v15161_v59  ;;  %v19997_v16 = vadd.f32 %v15153_v27, %v7780_v12  ;;  %v15163_v52 = vpop.eup %15162  ;;  %8086 = vmatprep.mubr.bf16.mxu1 %v21458_v0  ;;  %v22100_v45 = vld [vmem:[#allocation259_spill] sm:$0xff] }
 0x838   : > { %v19992_v39 = vpop.f32.mrf.mxu0  ;;  %v7737_v47 = vadd.f32 %v7721_v25, %v19949_v43  ;;  %15188 = vpow2.f32 %v12307_v32  ;;  %v15165_v55 = vpop.eup %15164  ;;  %v12306_v40 = vmul.f32 -1.442695, %v7497_v23  ;;  %v2721_v8 = vadd.f32 %v22099_v44, %v18366_v58 }
 0x839   : > { %15190 = vrcp.f32 %v7617_v48  ;;  %v7781_v41 = vmul.f32 %v15163_v52, %v7765_v5  ;;  %v15167_v10 = vpop.eup %15166  ;;  %v7620_v1 = vadd.f32 1.0, %v15165_v55  ;;  %v12309_v3 = vmul.f32 -1.442695, %v7500_v4  ;;  %v7443_v48 = vpop.f32.mrf.mxu1 }
 0x83a   : > { %15192 = vtanh.f32 %v7737_v47  ;;  %v2733_v12 = vadd.f32 %v22100_v45, %v18359_v49 }
 0x83b   : > { %v15169_v27 = vpop.eup %15168  ;;  %15194 = vpow2.f32 %v12304_v20  ;;  %v20005_v43 = vadd.f32 %v15161_v59, %v7781_v41  ;;  %v20022_v47 = vpop.f32.mrf.mxu1  ;;  %v22101_v41 = vld [vmem:[#allocation255_spill] sm:$0xff] }
 0x83c   : > { %v7368_v11 = vpop.f32.mrf.mxu0  ;;  %v15171_v37 = vpop.eup %15170  ;;  %15196 = vrcp.f32 %v7620_v1  ;;  %v7766_v46 = vsub.f32 %v19661_v30, %v15169_v27  ;;  %v7499_v30 = vadd.f32 %v7360_v33, %v2721_v8  ;;  %v7706_v1 = vadd.f32 %v19968_v15, %v7443_v48 }
 0x83d   : > { %v7502_v57 = vadd.f32 %v7368_v11, %v2729_v24  ;;  %v15173_v56 = vpop.eup %15172  ;;  %v7622_v19 = vadd.f32 1.0, %v15171_v37  ;;  %v20014_v35 = vpack.c.bf16 %v20005_v43, %v19997_v16  ;;  %15198 = vpow2.f32 %v12309_v3  ;;  %v22102_v37 = vld [vmem:[#allocation140_spill] sm:$0xff]  ;;  %v7446_v44 = vpop.f32.mrf.mxu1 }
 0x83e   : > { %v20010_v32 = vpop.f32.mrf.mxu0  ;;  %v15175_v2 = vpop.eup %15174  ;;  %v7782_v25 = vmul.f32 %v15167_v10, %v7766_v46  ;;  %v2725_v10 = vadd.f32 %v22101_v41, %v18366_v58  ;;  %v7708_v41 = vadd.f32 %v19968_v15, %v20001_v17 }
 0x83f   : > { %v12311_v59 = vmul.f32 -1.442695, %v7502_v57  ;;  %v15177_v42 = vpop.eup %15176  ;;  %15200 = vrcp.f32 %v7622_v19  ;;  %8087 = vmatmul.mubr.bf16.gmra.mxu1 %v20014_v35  ;;  %13939 = vmatmul.mubr.bf16.vlgmr.msra.gmra.mxu0 %v20014_v35 }
 0x840   : > { %v7372_v63 = vpop.f32.mrf.mxu0  ;;  %v15179_v4 = vpop.eup %15178  ;;  %15202 = vpow2.f32 %v12306_v40  ;;  %8096 = vmatprep.mubr.bf16.mxu1 %v21458_v0  ;;  %8825 = vmatpush1.bf16.msra.mxu0 %v19775_v26  ;;  %v7767_v23 = vsub.f32 %v19663_v9, %v15177_v42  ;;  %v20025_v33 = vadd.f32 %v15169_v27, %v7782_v25  ;;  %v12308_v26 = vmul.f32 -1.442695, %v7499_v30  ;;  %v22103_v40 = vld [vmem:[#allocation258_spill] sm:$0xff] }
 0x841   : > { %v7504_v20 = vadd.f32 %v7372_v63, %v2733_v12  ;;  %v15181_v5 = vpop.eup %15180  ;;  %v7624_v52 = vadd.f32 1.0, %v15179_v4  ;;  %8826 = vmatprep.subr.bf16.mxu0 %v19781_v36  ;;  %15204 = vpow2.f32 %v12311_v59  ;;  %v3300_v9 = vadd.f32 %v22102_v37, %v18576_v60 }
 0x842   : > { %v15183_v55 = vpop.eup %15182  ;;  %v7783_v3 = vmul.f32 %v15173_v56, %v7767_v23  ;;  %v2731_v57 = vadd.f32 %v22103_v40, %v18366_v58  ;;  %v7501_v8 = vadd.f32 %v19992_v39, %v2725_v10  ;;  %v7619_v48 = vadd.f32 1.0, %v15181_v5  ;;  %v22105_v23 = vld [vmem:[#allocation261_spill] sm:$0xff]  ;;  %v7374_v10 = vpop.f32.mrf.mxu0 }
 0x843   : > { %v12313_v50 = vmul.f32 -1.442695, %v7504_v20  ;;  %v15185_v24 = vpop.eup %15184  ;;  %15206 = vrcp.f32 %v7624_v52  ;;  %v7621_v59 = vadd.f32 1.0, %v15183_v55  ;;  %v7707_v39 = vadd.f32 %v19968_v15, %v7446_v44 }
 0x844   : > { %v15187_v11 = vpop.eup %15186  ;;  %v7768_v27 = vsub.f32 %v19681_v38, %v15185_v24  ;;  %8827 = vmatpush1.bf16.msra.mxu0 %v19786_v34  ;;  %v20038_v19 = vadd.f32 %v15177_v42, %v7783_v3  ;;  %v12310_v20 = vmul.f32 -1.442695, %v7501_v8  ;;  %v7503_v52 = vadd.f32 %v20010_v32, %v2731_v57  ;;  %v20061_v3 = vpop.f32.mrf.mxu1 }
 0x845   : > { %v15189_v36 = vpop.eup %15188  ;;  %v7722_v46 = vmul.f32 %v15187_v11, %v7706_v1  ;;  %8828 = vmatprep.subr.bf16.mxu0 %v19796_v29  ;;  %15208 = vpow2.f32 %v12313_v50  ;;  %v2735_v55 = vadd.f32 %v22105_v23, %v18366_v58  ;;  %v22106_v11 = vld [vmem:[#allocation137_spill] sm:$0xff] }
 0x846   : > { %v15191_v56 = vpop.eup %15190  ;;  %v7626_v45 = vadd.f32 1.0, %v15189_v36  ;;  %v7784_v12 = vmul.f32 %v15175_v2, %v7768_v27  ;;  %15210 = vpow2.f32 %v12308_v26  ;;  %v20043_v30 = vpack.c.bf16 %v20038_v19, %v20025_v33  ;;  %v22104_v2 = vld [vmem:[#allocation146_spill] sm:$0xff] }
 0x847   : > { %v15193_v38 = vpop.eup %15192  ;;  %v7738_v34 = vadd.f32 %v7722_v46, %v3300_v9  ;;  %v3303_v4 = vadd.f32 %v22104_v2, %v18576_v60  ;;  %v3308_v37 = vadd.f32 %v22106_v11, %v18576_v60  ;;  %v12312_v17 = vmul.f32 -1.442695, %v7503_v52 }
 0x848   : > { %v15195_v63 = vpop.eup %15194  ;;  %15212 = vrcp.f32 %v7626_v45  ;;  %v7769_v42 = vsub.f32 %v19693_v28, %v15193_v38  ;;  %v20047_v29 = vadd.f32 %v15185_v24, %v7784_v12  ;;  %8829 = vmatpush1.bf16.msra.mxu0 %v19801_v61  ;;  %8097 = vmatmul.mubr.bf16.gmra.mxu1 %v20043_v30  ;;  %v7505_v27 = vadd.f32 %v7374_v10, %v2735_v55  ;;  %v22109_v55 = vld [vmem:[#allocation98_spill] sm:$0xff] }
 0x849   : > { %v15197_v25 = vpop.eup %15196  ;;  %15214 = vtanh.f32 %v7738_v34  ;;  %13942 = vmatprep.mubr.bf16.mxu0 %v20043_v30  ;;  %8106 = vmatprep.mubr.bf16.mxu1 %v21458_v0  ;;  %v7623_v24 = vadd.f32 1.0, %v15195_v63 }
 0x84a   : > { %15216 = vrcp.f32 %v7619_v48  ;;  %v7723_v5 = vmul.f32 %v15197_v25, %v7707_v39  ;;  %v7785_v28 = vmul.f32 %v15191_v56, %v7769_v42  ;;  %8830 = vmatprep.subr.bf16.mxu0 %v19811_v7  ;;  %v15199_v61 = vpop.eup %15198  ;;  %v7459_v56 = vpop.f32.mrf.mxu1  ;;  %v12314_v12 = vmul.f32 -1.442695, %v7505_v27  ;;  %v22108_v25 = vld [vmem:[#allocation152_spill] sm:$0xff] }
 0x84b   : > { %15218 = vrcp.f32 %v7621_v59  ;;  %v7628_v26 = vadd.f32 1.0, %v15199_v61  ;;  %v7710_v34 = vadd.f32 %v19968_v15, %v7459_v56  ;;  %v3316_v2 = vadd.f32 %v22108_v25, %v18576_v60 }
 0x84c   : > { %v15201_v50 = vpop.eup %15200  ;;  %v7739_v1 = vadd.f32 %v7723_v5, %v3303_v4  ;;  %v20063_v32 = vadd.f32 %v15193_v38, %v7785_v28  ;;  %8831 = vmatpush1.bf16.msra.mxu0 %v19816_v22  ;;  %15220 = vpow2.f32 %v12310_v20  ;;  %v7709_v22 = vadd.f32 %v19968_v15, %v20022_v47  ;;  %v13921_v39 = vpop.f32.mrf.mxu1 }
 0x84d   : > { %v15203_v7 = vpop.eup %15202  ;;  %v7724_v9 = vmul.f32 %v15201_v50, %v7708_v41  ;;  %8832 = vmatprep.subr.bf16.mxu0 %v19826_v14  ;;  %v22107_v14 = vld [vmem:[#allocation143_spill] sm:$0xff] }
 0x84e   : > { %15222 = vtanh.f32 %v7739_v1  ;;  %v20071_v36 = vpack.c.bf16 %v20063_v32, %v20047_v29  ;;  %v15205_v40 = vpop.eup %15204  ;;  %v7625_v44 = vadd.f32 1.0, %v15203_v7  ;;  %v3311_v48 = vadd.f32 %v22107_v14, %v18576_v60  ;;  %v7462_v61 = vpop.f32.mrf.mxu1  ;;  %v22114_v14 = vld [vmem:[#allocation149_spill] sm:$0xff] }
 0x84f   : > { %v7740_v57 = vadd.f32 %v7724_v9, %v3308_v37  ;;  %15224 = vrcp.f32 %v7628_v26  ;;  %v7630_v8 = vadd.f32 1.0, %v15205_v40  ;;  %v7711_v10 = vadd.f32 %v19968_v15, %v7462_v61  ;;  %v22111_v26 = vld [vmem:[#allocation158_spill] sm:$0xff]  ;;  %v22112_v37 = vld [vmem:[#allocation104_spill] sm:$0xff] }
 0x850   : > { %v15207_v46 = vpop.eup %15206  ;;  %15226 = vrcp.f32 %v7623_v24  ;;  %13943 = vmatmul.mubr.bf16.gmra.mxu0 %v20071_v36  ;;  %8107 = vmatmul.mubr.bf16.gmra.mxu1 %v20071_v36  ;;  %v22110_v24 = vld [vmem:[#allocation25_spill] sm:$0xff]  ;;  %v3319_v7 = vadd.f32 %v22111_v26, %v18576_v60  ;;  %v7712_v40 = vadd.f32 %v19968_v15, %v20061_v3 }
 0x851   : > { %15228 = vtanh.f32 %v7740_v57  ;;  %v7725_v45 = vmul.f32 %v15207_v46, %v7709_v22  ;;  %8833 = vmatpush1.bf16.msra.mxu0 %v19831_v53  ;;  %8116 = vmatprep.mubr.bf16.mxu1 %v21458_v0  ;;  %v22113_v22 = vld [vmem:[#allocation37_spill] sm:$0xff] }
 0x852   : > { %15230 = vpow2.f32 %v12312_v17  ;;  %8834 = vmatprep.subr.bf16.mxu0 %v19838_v13  ;;  %v15209_v47 = vpop.eup %15208 }
 0x853   : > { %v7741_v38 = vadd.f32 %v7725_v45, %v3311_v48  ;;  %15232 = vrcp.f32 %v7630_v8  ;;  %v15211_v59 = vpop.eup %15210  ;;  %v7632_v63 = vadd.f32 1.0, %v15209_v47  ;;  %v3324_v48 = vadd.f32 %v22114_v14, %v18576_v60 }
 0x854   : > { %15234 = vrcp.f32 %v7625_v44  ;;  %v7627_v52 = vadd.f32 1.0, %v15211_v59 }
 0x855   : > { %v15213_v42 = vpop.eup %15212  ;;  %15236 = vtanh.f32 %v7741_v38  ;;  %8835 = vmatpush1.bf16.msra.mxu0 %v19846_v18  ;;  %v7713_v38 = vadd.f32 %v19968_v15, %v13921_v39 }
 0x856   : > { %v15215_v53 = vpop.eup %15214  ;;  %v7726_v4 = vmul.f32 %v15213_v42, %v7710_v34  ;;  %15238 = vpow2.f32 %v12314_v12  ;;  %8836 = vmatprep.subr.bf16.mxu0 %v19853_v6  ;;  %v22115_v42 = vld [vmem:[#allocation96_spill] sm:$0xff] }
 0x857   : > { %v15217_v13 = vpop.eup %15216  ;;  %15240 = vrcp.f32 %v7632_v63  ;;  %v7770_v20 = vsub.f32 %v19711_v21, %v15215_v53 }
 0x858   : > { %v15219_v5 = vpop.eup %15218  ;;  %v7742_v28 = vadd.f32 %v7726_v4, %v3316_v2  ;;  %v22116_v4 = vld [vmem:[#allocation155_spill] sm:$0xff] }
 0x859   : > { %v7786_v23 = vmul.f32 %v15217_v13, %v7770_v20  ;;  %8837 = vmatpush1.bf16.msra.mxu0 %v19861_v54  ;;  %v15221_v18 = vpop.eup %15220  ;;  %v3327_v13 = vadd.f32 %v22116_v4, %v18576_v60 }
 0x85a   : > { %15242 = vtanh.f32 %v7742_v28  ;;  %8838 = vmatprep.subr.bf16.mxu0 %v22109_v55  ;;  %v7629_v9 = vadd.f32 1.0, %v15221_v18 }
 0x85b   : > { %v15223_v41 = vpop.eup %15222  ;;  %v20091_v50 = vadd.f32 %v15215_v53, %v7786_v23  ;;  %15244 = vrcp.f32 %v7627_v52  ;;  %v22117_v23 = vld [vmem:[#allocation41_spill] sm:$0xff] }
 0x85c   : > { %v15225_v6 = vpop.eup %15224  ;;  %v7771_v21 = vsub.f32 %v22110_v24, %v15223_v41 }
 0x85d   : > { %v15227_v1 = vpop.eup %15226  ;;  %v7727_v11 = vmul.f32 %v15225_v6, %v7711_v10  ;;  %8839 = vmatpush1.bf16.msra.mxu0 %v22112_v37 }
 0x85e   : > { %v15229_v54 = vpop.eup %15228  ;;  %v7787_v17 = vmul.f32 %v15219_v5, %v7771_v21 }
 0x85f   : > { %v15231_v27 = vpop.eup %15230  ;;  %v7743_v57 = vadd.f32 %v7727_v11, %v3319_v7  ;;  %v7772_v46 = vsub.f32 %v22113_v22, %v15229_v54  ;;  %v22120_v22 = vld [vmem:[#allocation46_spill] sm:$0xff] }
 0x860   : > { %v15233_v44 = vpop.eup %15232  ;;  %v20100_v8 = vadd.f32 %v15223_v41, %v7787_v17  ;;  %v7631_v63 = vadd.f32 1.0, %v15231_v27 }
 0x861   : > { %v15235_v56 = vpop.eup %15234  ;;  %v7728_v45 = vmul.f32 %v15233_v44, %v7712_v40  ;;  %15246 = vtanh.f32 %v7743_v57  ;;  %v7788_v12 = vmul.f32 %v15227_v1, %v7772_v46  ;;  %v22118_v1 = vld [vmem:[#allocation42_spill] sm:$0xff] }
 0x862   : > { %v15237_v47 = vpop.eup %15236  ;;  %15248 = vrcp.f32 %v7629_v9  ;;  %v20107_v3 = vpack.c.bf16 %v20100_v8, %v20091_v50 }
 0x863   : > { %v15239_v59 = vpop.eup %15238  ;;  %v7744_v34 = vadd.f32 %v7728_v45, %v3324_v48  ;;  %v7773_v53 = vsub.f32 %v22115_v42, %v15237_v47  ;;  %v20110_v25 = vadd.f32 %v15229_v54, %v7788_v12  ;;  %v22119_v54 = vld [vmem:[#allocation100_spill] sm:$0xff]  ;;  %v14416_v42 = vld [vmem:[%s21371_s5 + $0x20] ss:$12 sps:$4 sm:$0xff]  }
 0x864   : > { %v15241_v2 = vpop.eup %15240  ;;  %8117 = vmatmul.mubr.bf16.gmra.mxu1 %v20107_v3  ;;  %13946 = vmatprep.mubr.bf16.mxu0 %v20107_v3  ;;  %v7633_v28 = vadd.f32 1.0, %v15239_v59  ;;  %v14410_v12 = vld [vmem:[%s21371_s5 + $0xb0] ss:$12 sps:$4 sm:$0xff]   ;;  %v14413_v59 = vld [vmem:[%s21371_s5 + $0x68] ss:$12 sps:$4 sm:$0xff]  }
 0x865   : > { %15250 = vtanh.f32 %v7744_v34  ;;  %v7729_v39 = vmul.f32 %v15241_v2, %v7713_v38  ;;  %8126 = vmatprep.mubr.bf16.mxu1 %v21458_v0  ;;  %v7789_v20 = vmul.f32 %v15235_v56, %v7773_v53  ;;  %13954 = vmatprep.subr.bf16.mxu1 %v14410_v12  ;;  %v14412_v38 = vld [vmem:[%s21371_s5 + $0x80] ss:$12 sps:$4 sm:$0xff]   ;;  %v14414_v34 = vld [vmem:[%s21371_s5 + $0x50] ss:$12 sps:$4 sm:$0xff]   ;;  %v14417_v53 = vld [vmem:[%s21371_s5 + $0x8] ss:$12 sps:$4 sm:$0xff]  }
 0x866   : > { %15252 = vrcp.f32 %v7631_v63  ;;  %13955 = vmatpush3.bf16.msra.mxu1 %v14410_v12  ;;  %v14415_v63 = vld [vmem:[%s21371_s5 + $0x38] ss:$12 sps:$4 sm:$0xff]   ;;  %v22121_v2 = vld [vmem:[#allocation262_spill] sm:$0xff] }
 0x867   : > { %v15243_v5 = vpop.eup %15242  ;;  %v7745_v52 = vadd.f32 %v7729_v39, %v3327_v13  ;;  %v20117_v61 = vadd.f32 %v15237_v47, %v7789_v20  ;;  %v14411_v47 = vld [vmem:[%s21371_s5 + $0x98] ss:$12 sps:$4 sm:$0xff]   ;;  %v2739_v4 = vadd.f32 %v22121_v2, %v18359_v49 }
 0x868   : > { %v7774_v18 = vsub.f32 %v22117_v23, %v15243_v5  ;;  %v15245_v55 = vpop.eup %15244  ;;  %13956 = vmatprep.subr.bf16.mxu1 %v14411_v47 }
 0x869   : > { %15254 = vtanh.f32 %v7745_v52  ;;  %v20122_v41 = vpack.c.bf16 %v20117_v61, %v20110_v25 }
 0x86a   : > { %v7790_v10 = vmul.f32 %v15245_v55, %v7774_v18  ;;  %15256 = vrcp.f32 %v7633_v28  ;;  %13957 = vmatpush3.bf16.msra.mxu1 %v14411_v47  ;;  %v22123_v55 = vld [vmem:[#allocation264_spill] sm:$0xff] }
 0x86b   : > { %13947 = vmatmul.mubr.bf16.gmra.mxu0 %v20122_v41  ;;  %13958 = vmatprep.subr.bf16.mxu1 %v14412_v38 }
 0x86c   : > { %8127 = vmatmul.mubr.bf16.gmra.mxu1 %v20122_v41  ;;  %v20126_v6 = vadd.f32 %v15243_v5, %v7790_v10  ;;  %v22122_v5 = vld [vmem:[#allocation265_spill] sm:$0xff]  ;;  %v2741_v10 = vadd.f32 %v22123_v55, %v18366_v58 }
 0x86d   : > { %8136 = vmatprep.mubr.bf16.mxu1 %v21458_v0  ;;  %v2743_v52 = vadd.f32 %v22122_v5, %v18359_v49 }
 0x86e   : > { %v15247_v24 = vpop.eup %15246  ;;  %13959 = vmatpush3.bf16.msra.mxu1 %v14412_v38 }
 0x86f   : > { %v15249_v21 = vpop.eup %15248  ;;  %v7775_v26 = vsub.f32 %v22118_v1, %v15247_v24  ;;  %13960 = vmatprep.subr.bf16.mxu1 %v14413_v59 }
 0x871   : > { %v7791_v7 = vmul.f32 %v15249_v21, %v7775_v26  ;;  %v22124_v21 = vld [vmem:[#allocation268_spill] sm:$0xff] }
 0x872   : > { %v15251_v11 = vpop.eup %15250  ;;  %13961 = vmatpush3.bf16.msra.mxu1 %v14413_v59  ;;  %v2749_v1 = vadd.f32 %v22124_v21, %v18359_v49 }
 0x873   : > { %v20130_v37 = vadd.f32 %v15247_v24, %v7791_v7  ;;  %v7776_v9 = vsub.f32 %v22119_v54, %v15251_v11  ;;  %v15253_v17 = vpop.eup %15252  ;;  %13962 = vmatprep.subr.bf16.mxu1 %v14414_v34 }
 0x875   : > { %v20135_v27 = vpack.c.bf16 %v20130_v37, %v20126_v6  ;;  %v7792_v40 = vmul.f32 %v15253_v17, %v7776_v9  ;;  %v22125_v17 = vld [vmem:[#allocation271_spill] sm:$0xff] }
 0x876   : > { %v15255_v57 = vpop.eup %15254  ;;  %13963 = vmatpush3.bf16.msra.mxu1 %v14414_v34  ;;  %v22127_v34 = vld [vmem:[#allocation270_spill] sm:$0xff] }
 0x877   : > { %8137 = vmatmul.mubr.bf16.gmra.mxu1 %v20135_v27  ;;  %13950 = vmatprep.mubr.bf16.mxu0 %v20135_v27  ;;  %v7777_v46 = vsub.f32 %v22120_v22, %v15255_v57  ;;  %v20140_v44 = vadd.f32 %v15251_v11, %v7792_v40  ;;  %v15257_v56 = vpop.eup %15256  ;;  %v2753_v40 = vadd.f32 %v22125_v17, %v18359_v49  ;;  %v22131_v17 = vld [vmem:[#allocation276_spill] sm:$0xff] }
 0x878   : > { %8146 = vmatprep.mubr.bf16.mxu1 %v21458_v0  ;;  %13964 = vmatprep.subr.bf16.mxu1 %v14415_v63 }
 0x879   : > { %v7793_v14 = vmul.f32 %v15257_v56, %v7777_v46  ;;  %v22126_v56 = vld [vmem:[#allocation267_spill] sm:$0xff] }
 0x87a   : > { %13965 = vmatpush3.bf16.msra.mxu1 %v14415_v63  ;;  %v2751_v63 = vadd.f32 %v22127_v34, %v18366_v58 }
 0x87b   : > { %v20143_v48 = vadd.f32 %v15255_v57, %v7793_v14  ;;  %13966 = vmatprep.subr.bf16.mxu1 %v14416_v42  ;;  %v2745_v14 = vadd.f32 %v22126_v56, %v18366_v58 }
 0x87d   : > { %v20147_v45 = vpack.c.bf16 %v20143_v48, %v20140_v44 }
 0x87e   : > { %13967 = vmatpush3.bf16.msra.mxu1 %v14416_v42  ;;  %v22128_v42 = vld [vmem:[#allocation274_spill] sm:$0xff] }
 0x87f   : > { %8147 = vmatmul.mubr.bf16.gmra.mxu1 %v20147_v45  ;;  %13951 = vmatmul.mubr.bf16.gmra.mxu0 %v20147_v45 }
 0x880   : > { %8856 = vmatprep.mubr.bf16.mxu0 %v21458_v0  ;;  %13968 = vmatprep.subr.bf16.mxu1 %v14417_v53 }
 0x882   : > { %13969 = vmatpush3.bf16.msra.mxu1 %v14417_v53  ;;  %v2759_v53 = vadd.f32 %v22128_v42, %v18359_v49 }
 0x8f6   : > { %v8078_v13 = vpop.f32.mrf.mxu1 }
 0x8f7   : > { %v8254_v39 = vadd.f32 %v8078_v13, %v2739_v4 }
 0x8f8   : > { %v8080_v20 = vpop.f32.mrf.mxu1 }
 0x8f9   : > { %v12339_v28 = vmul.f32 -1.442695, %v8254_v39  ;;  %v8255_v7 = vadd.f32 %v8080_v20, %v2741_v10 }
 0x8fa   : > { %v8082_v23 = vpop.f32.mrf.mxu1 }
 0x8fb   : > { %15258 = vpow2.f32 %v12339_v28  ;;  %v8256_v18 = vadd.f32 %v8082_v23, %v2743_v52  ;;  %v12340_v22 = vmul.f32 -1.442695, %v8255_v7  ;;  %v22129_v28 = vld [vmem:[#allocation273_spill] sm:$0xff] }
 0x8fc   : > { %v8084_v24 = vpop.f32.mrf.mxu1  ;;  %v2755_v23 = vadd.f32 %v22129_v28, %v18366_v58 }
 0x8fd   : > { %v12341_v26 = vmul.f32 -1.442695, %v8256_v18  ;;  %v8257_v38 = vadd.f32 %v8084_v24, %v2745_v14  ;;  %v22130_v18 = vld [vmem:[#allocation277_spill] sm:$0xff] }
 0x8fe   : > { %v2763_v55 = vadd.f32 %v22130_v18, %v18359_v49 }
 0x8ff   : > { %v8088_v11 = vpop.f32.mrf.mxu1  ;;  %15260 = vpow2.f32 %v12341_v26  ;;  %v12342_v20 = vmul.f32 -1.442695, %v8257_v38  ;;  %v20196_v21 = vpop.f32.mrf.mxu0 }
 0x900   : > { %v8258_v54 = vadd.f32 %v8088_v11, %v2749_v1 }
 0x901   : > { %v8090_v9 = vpop.f32.mrf.mxu1  ;;  %v8191_v14 = vpop.f32.mrf.mxu0 }
 0x902   : > { %v12343_v57 = vmul.f32 -1.442695, %v8258_v54  ;;  %v8259_v4 = vadd.f32 %v8090_v9, %v2751_v63 }
 0x903   : > { %v8092_v46 = vpop.f32.mrf.mxu1 }
 0x904   : > { %15262 = vpow2.f32 %v12343_v57  ;;  %v8260_v12 = vadd.f32 %v8092_v46, %v2753_v40  ;;  %v12344_v1 = vmul.f32 -1.442695, %v8259_v4  ;;  %v2761_v40 = vadd.f32 %v22131_v17, %v18366_v58  ;;  %v22132_v57 = vld [vmem:[#allocation280_spill] sm:$0xff]  ;;  %v22134_v4 = vld [vmem:[#allocation283_spill] sm:$0xff] }
 0x905   : > { %v8094_v47 = vpop.f32.mrf.mxu1  ;;  %15264 = vpow2.f32 %v12340_v22  ;;  %v2769_v22 = vadd.f32 %v22132_v57, %v18359_v49 }
 0x906   : > { %v12345_v59 = vmul.f32 -1.442695, %v8260_v12  ;;  %v8261_v11 = vadd.f32 %v8094_v47, %v2755_v23  ;;  %v22133_v47 = vld [vmem:[#allocation279_spill] sm:$0xff]  ;;  %v13941_v23 = vpop.f32.mrf.mxu0 }
 0x907   : > { %v2765_v42 = vadd.f32 %v22133_v47, %v18366_v58 }
 0x908   : > { %15266 = vpow2.f32 %v12345_v59  ;;  %v15259_v2 = vpop.eup %15258  ;;  %v8098_v13 = vpop.f32.mrf.mxu1  ;;  %v12346_v59 = vmul.f32 -1.442695, %v8261_v11 }
 0x909   : > { %v8382_v39 = vadd.f32 1.0, %v15259_v2  ;;  %v8262_v5 = vadd.f32 %v8098_v13, %v2759_v53  ;;  %v2773_v13 = vadd.f32 %v22134_v4, %v18359_v49 }
 0x90a   : > { %v8100_v52 = vpop.f32.mrf.mxu1 }
 0x90b   : > { %15268 = vrcp.f32 %v8382_v39  ;;  %v12347_v10 = vmul.f32 -1.442695, %v8262_v5  ;;  %v8263_v34 = vadd.f32 %v8100_v52, %v2761_v40  ;;  %v22135_v5 = vld [vmem:[#allocation282_spill] sm:$0xff] }
 0x90c   : > { %v15261_v24 = vpop.eup %15260  ;;  %v8102_v26 = vpop.f32.mrf.mxu1  ;;  %15270 = vpow2.f32 %v12342_v20  ;;  %v2771_v28 = vadd.f32 %v22135_v5, %v18366_v58 }
 0x90d   : > { %v8384_v7 = vadd.f32 1.0, %v15261_v24  ;;  %v8264_v54 = vadd.f32 %v8102_v26, %v2763_v55  ;;  %15272 = vpow2.f32 %v12347_v10  ;;  %v12348_v10 = vmul.f32 -1.442695, %v8263_v34 }
 0x90e   : > { %v8104_v9 = vpop.f32.mrf.mxu1 }
 0x90f   : > { %15274 = vrcp.f32 %v8384_v7  ;;  %v12349_v46 = vmul.f32 -1.442695, %v8264_v54  ;;  %v8265_v18 = vadd.f32 %v8104_v9, %v2765_v42  ;;  %v8478_v7 = vadd.f32 %v19968_v15, %v8191_v14 }
 0x910   : > { %15276 = vpow2.f32 %v12344_v1  ;;  %v8108_v12 = vpop.f32.mrf.mxu1  ;;  %v22136_v1 = vld [vmem:[#allocation285_spill] sm:$0xff] }
 0x911   : > { %v15263_v56 = vpop.eup %15262  ;;  %v8266_v63 = vadd.f32 %v8108_v12, %v2769_v22  ;;  %15278 = vpow2.f32 %v12349_v46  ;;  %v2775_v26 = vadd.f32 %v22136_v1, %v18366_v58  ;;  %v8194_v22 = vpop.f32.mrf.mxu0  ;;  %v12350_v46 = vmul.f32 -1.442695, %v8265_v18  ;;  %v22139_v1 = vld [vmem:[#allocation161_spill] sm:$0xff] }
 0x912   : > { %v8386_v38 = vadd.f32 1.0, %v15263_v56  ;;  %v8110_v53 = vpop.f32.mrf.mxu1  ;;  %v15265_v2 = vpop.eup %15264  ;;  %v22137_v56 = vld [vmem:[#allocation164_spill] sm:$0xff] }
 0x913   : > { %v12351_v39 = vmul.f32 -1.442695, %v8266_v63  ;;  %v8383_v54 = vadd.f32 1.0, %v15265_v2  ;;  %v8267_v17 = vadd.f32 %v8110_v53, %v2771_v28  ;;  %v3332_v12 = vadd.f32 %v22137_v56, %v18576_v60  ;;  %v20216_v5 = vpop.f32.mrf.mxu0 }
 0x914   : > { %15280 = vrcp.f32 %v8386_v38  ;;  %v8112_v55 = vpop.f32.mrf.mxu1  ;;  %v8479_v63 = vadd.f32 %v19968_v15, %v8194_v22 }
 0x915   : > { %v15267_v20 = vpop.eup %15266  ;;  %15282 = vpow2.f32 %v12346_v59  ;;  %v8268_v24 = vadd.f32 %v8112_v55, %v2773_v13  ;;  %v12352_v47 = vmul.f32 -1.442695, %v8267_v17  ;;  %v22138_v13 = vld [vmem:[#allocation170_spill] sm:$0xff]  ;;  %v8480_v55 = vadd.f32 %v19968_v15, %v20196_v21 }
 0x916   : > { %v8388_v52 = vadd.f32 1.0, %v15267_v20  ;;  %15284 = vpow2.f32 %v12351_v39  ;;  %v8114_v11 = vpop.f32.mrf.mxu1  ;;  %v3335_v39 = vadd.f32 %v22138_v13, %v18576_v60 }
 0x917   : > { %v12353_v40 = vmul.f32 -1.442695, %v8268_v24  ;;  %v8269_v9 = vadd.f32 %v8114_v11, %v2775_v26  ;;  %v3340_v26 = vadd.f32 %v22139_v1, %v18576_v60 }
 0x918   : > { %15286 = vrcp.f32 %v8388_v52  ;;  %v15269_v57 = vpop.eup %15268 }
 0x919   : > { %v8494_v38 = vmul.f32 %v15269_v57, %v8478_v7  ;;  %15288 = vpow2.f32 %v12348_v10  ;;  %v15271_v59 = vpop.eup %15270  ;;  %v12354_v2 = vmul.f32 -1.442695, %v8269_v9 }
 0x91a   : > { %15290 = vpow2.f32 %v12353_v40  ;;  %v15273_v34 = vpop.eup %15272  ;;  %v8385_v18 = vadd.f32 1.0, %v15271_v59  ;;  %v8207_v40 = vpop.f32.mrf.mxu0  ;;  %v22141_v59 = vld [vmem:[#allocation167_spill] sm:$0xff] }
 0x91b   : > { %15292 = vrcp.f32 %v8383_v54  ;;  %v8510_v14 = vadd.f32 %v8494_v38, %v3332_v12  ;;  %v8390_v53 = vadd.f32 1.0, %v15273_v34  ;;  %v22140_v54 = vld [vmem:[#allocation286_spill] sm:$0xff]  ;;  %v3343_v34 = vadd.f32 %v22141_v59, %v18576_v60 }
 0x91c   : > { %v15275_v42 = vpop.eup %15274  ;;  %15294 = vpow2.f32 %v12350_v46  ;;  %v2779_v17 = vadd.f32 %v22140_v54, %v18359_v49  ;;  %v8481_v46 = vadd.f32 %v19968_v15, %v13941_v23  ;;  %v22144_v54 = vld [vmem:[#allocation292_spill] sm:$0xff] }
 0x91d   : > { %v15277_v4 = vpop.eup %15276  ;;  %15296 = vtanh.f32 %v8510_v14  ;;  %v8495_v20 = vmul.f32 %v15275_v42, %v8479_v63  ;;  %v22142_v42 = vld [vmem:[#allocation289_spill] sm:$0xff] }
 0x91e   : > { %15298 = vrcp.f32 %v8390_v53  ;;  %v15279_v28 = vpop.eup %15278  ;;  %v8387_v21 = vadd.f32 1.0, %v15277_v4  ;;  %v2783_v53 = vadd.f32 %v22142_v42, %v18359_v49 }
 0x91f   : > { %v8511_v52 = vadd.f32 %v8495_v20, %v3335_v39  ;;  %15300 = vpow2.f32 %v12352_v47  ;;  %v8392_v24 = vadd.f32 1.0, %v15279_v28 }
 0x920   : > { %15302 = vpow2.f32 %v12354_v2  ;;  %v20229_v2 = vpop.f32.mrf.mxu0 }
 0x921   : > { %v15281_v10 = vpop.eup %15280  ;;  %15304 = vtanh.f32 %v8511_v52 }
 0x922   : > { %v8496_v7 = vmul.f32 %v15281_v10, %v8480_v55  ;;  %v15283_v11 = vpop.eup %15282  ;;  %15306 = vrcp.f32 %v8392_v24  ;;  %v22143_v10 = vld [vmem:[#allocation173_spill] sm:$0xff] }
 0x923   : > { %v15285_v57 = vpop.eup %15284  ;;  %15308 = vrcp.f32 %v8385_v18  ;;  %v8389_v13 = vadd.f32 1.0, %v15283_v11  ;;  %v20233_v24 = vadd.f32 %v22143_v10, %v18576_v60  ;;  %v8210_v11 = vpop.f32.mrf.mxu0 }
 0x924   : > { %v8512_v22 = vadd.f32 %v8496_v7, %v3340_v26  ;;  %v8118_v9 = vpop.f32.mrf.mxu1  ;;  %v8394_v12 = vadd.f32 1.0, %v15285_v57  ;;  %v8482_v57 = vadd.f32 %v19968_v15, %v8207_v40 }
 0x925   : > { %v15287_v56 = vpop.eup %15286  ;;  %v8270_v38 = vadd.f32 %v8118_v9, %v2779_v17  ;;  %v2789_v17 = vadd.f32 %v22144_v54, %v18359_v49 }
 0x926   : > { %15310 = vtanh.f32 %v8512_v22  ;;  %v8497_v14 = vmul.f32 %v15287_v56, %v8481_v46  ;;  %v8120_v63 = vpop.f32.mrf.mxu1  ;;  %v15289_v47 = vpop.eup %15288  ;;  %v22145_v46 = vld [vmem:[#allocation176_spill] sm:$0xff] }
 0x927   : > { %15312 = vrcp.f32 %v8394_v12  ;;  %v15291_v4 = vpop.eup %15290  ;;  %v12355_v18 = vmul.f32 -1.442695, %v8270_v38  ;;  %v8391_v1 = vadd.f32 1.0, %v15289_v47  ;;  %v3348_v9 = vadd.f32 %v22145_v46, %v18576_v60  ;;  %v22146_v56 = vld [vmem:[#allocation288_spill] sm:$0xff] }
 0x928   : > { %15314 = vrcp.f32 %v8387_v21  ;;  %v8513_v23 = vadd.f32 %v8497_v14, %v3343_v34  ;;  %v8122_v39 = vpop.f32.mrf.mxu1  ;;  %v15293_v20 = vpop.eup %15292  ;;  %v8396_v28 = vadd.f32 1.0, %v15291_v4  ;;  %v2781_v12 = vadd.f32 %v22146_v56, %v18366_v58  ;;  %v22147_v14 = vld [vmem:[#allocation291_spill] sm:$0xff]  ;;  %v22149_v56 = vld [vmem:[#allocation182_spill] sm:$0xff] }
 0x929   : > { %v8272_v55 = vadd.f32 %v8122_v39, %v2783_v53  ;;  %v15295_v52 = vpop.eup %15294  ;;  %v2785_v47 = vadd.f32 %v22147_v14, %v18366_v58  ;;  %v22148_v53 = vld [vmem:[#allocation295_spill] sm:$0xff]  ;;  %v20250_v39 = vld [vmem:[%s21373_s7] ss:$0 sm:$0xff] }
 0x92a   : > { %15316 = vtanh.f32 %v8513_v23  ;;  %v8124_v26 = vpop.f32.mrf.mxu1  ;;  %v15297_v7 = vpop.eup %15296  ;;  %v2793_v4 = vadd.f32 %v22148_v53, %v18359_v49 }
 0x92b   : > { %15318 = vrcp.f32 %v8396_v28  ;;  %v12357_v22 = vmul.f32 -1.442695, %v8272_v55  ;;  %v15299_v21 = vpop.eup %15298  ;;  %v8542_v38 = vsub.f32 %v19973_v31, %v15297_v7  ;;  %v8483_v31 = vadd.f32 %v20250_v39, %v8210_v11 }
 0x92c   : > { %15320 = vrcp.f32 %v8389_v13  ;;  %v8128_v59 = vpop.f32.mrf.mxu1  ;;  %v15301_v34 = vpop.eup %15300  ;;  %v8498_v42 = vmul.f32 %v15299_v21, %v8482_v57  ;;  %v8393_v55 = vadd.f32 1.0, %v15295_v52  ;;  %v8484_v52 = vadd.f32 %v20250_v39, %v20216_v5 }
 0x92d   : > { %15322 = vpow2.f32 %v12355_v18  ;;  %v8274_v15 = vadd.f32 %v8128_v59, %v2789_v17  ;;  %v15303_v40 = vpop.eup %15302  ;;  %v8558_v23 = vmul.f32 %v15293_v20, %v8542_v38  ;;  %v8395_v20 = vadd.f32 1.0, %v15301_v34 }
 0x92e   : > { %15324 = vrcp.f32 %v8391_v1  ;;  %v8130_v13 = vpop.f32.mrf.mxu1  ;;  %v15305_v28 = vpop.eup %15304  ;;  %v8514_v10 = vadd.f32 %v8498_v42, %v3348_v9  ;;  %v8271_v1 = vadd.f32 %v8120_v63, %v2781_v12  ;;  %v3351_v38 = vadd.f32 %v22149_v56, %v18576_v60 }
 0x92f   : > { %15326 = vpow2.f32 %v12357_v22  ;;  %v12359_v18 = vmul.f32 -1.442695, %v8274_v15  ;;  %v15307_v54 = vpop.eup %15306  ;;  %v20253_v17 = vadd.f32 %v15297_v7, %v8558_v23  ;;  %v8543_v57 = vsub.f32 %v19982_v51, %v15305_v28  ;;  %v22150_v23 = vld [vmem:[#allocation294_spill] sm:$0xff] }
 0x930   : > { %v8132_v21 = vpop.f32.mrf.mxu1  ;;  %v15309_v46 = vpop.eup %15308  ;;  %15328 = vtanh.f32 %v8514_v10  ;;  %v8499_v11 = vmul.f32 %v15307_v54, %v8483_v31  ;;  %v8273_v22 = vadd.f32 %v8124_v26, %v2785_v47  ;;  %v8397_v14 = vadd.f32 1.0, %v15303_v40  ;;  %v22151_v26 = vld [vmem:[#allocation298_spill] sm:$0xff] }
 0x931   : > { %v8276_v59 = vadd.f32 %v8132_v21, %v2793_v4  ;;  %15330 = vpow2.f32 %v12359_v18  ;;  %v8559_v9 = vmul.f32 %v15309_v46, %v8543_v57  ;;  %v12356_v42 = vmul.f32 -1.442695, %v8271_v1 }
 0x932   : > { %15332 = vrcp.f32 %v8393_v55  ;;  %v8515_v51 = vadd.f32 %v8499_v11, %v3351_v38  ;;  %v8134_v63 = vpop.f32.mrf.mxu1  ;;  %v2791_v5 = vadd.f32 %v22150_v23, %v18366_v58  ;;  %v2799_v47 = vadd.f32 %v22151_v26, %v18359_v49 }
 0x933   : > { %v15311_v7 = vpop.eup %15310  ;;  %v12361_v34 = vmul.f32 -1.442695, %v8276_v59  ;;  %15334 = vrcp.f32 %v8395_v20  ;;  %v20260_v15 = vadd.f32 %v15305_v28, %v8559_v9  ;;  %v12358_v40 = vmul.f32 -1.442695, %v8273_v22  ;;  %v22154_v22 = vld [vmem:[#allocation301_spill] sm:$0xff] }
 0x934   : > { %v15313_v12 = vpop.eup %15312  ;;  %v8544_v53 = vsub.f32 %v19997_v16, %v15311_v7  ;;  %15336 = vtanh.f32 %v8515_v51  ;;  %v8485_v16 = vadd.f32 %v20250_v39, %v20229_v2  ;;  %v8275_v54 = vadd.f32 %v8130_v13, %v2791_v5  ;;  %v22153_v2 = vld [vmem:[#allocation297_spill] sm:$0xff]  ;;  %v20286_v5 = vpop.f32.mrf.mxu0 }
 0x935   : > { %v15315_v4 = vpop.eup %15314  ;;  %v8500_v31 = vmul.f32 %v15313_v12, %v8484_v52  ;;  %15338 = vpow2.f32 %v12361_v34  ;;  %v20269_v55 = vpack.c.bf16 %v20260_v15, %v20253_v17  ;;  %v2795_v11 = vadd.f32 %v22153_v2, %v18366_v58 }
 0x936   : > { %v8560_v10 = vmul.f32 %v15315_v4, %v8544_v53  ;;  %15340 = vrcp.f32 %v8397_v14  ;;  %v2803_v9 = vadd.f32 %v22154_v22, %v18359_v49  ;;  %v12360_v12 = vmul.f32 -1.442695, %v8275_v54 }
 0x937   : > { %v15317_v28 = vpop.eup %15316  ;;  %v8516_v18 = vadd.f32 %v8500_v31, %v20233_v24  ;;  %v8138_v57 = vpop.f32.mrf.mxu1  ;;  %15342 = vpow2.f32 %v12356_v42  ;;  %8857 = vmatmul.mubr.bf16.vlgmr.msra.gmra.mxu0 %v20269_v55  ;;  %13970 = vmatprep.mubr.bf16.mxu1 %v20269_v55  ;;  %v22152_v24 = vld [vmem:[#allocation179_spill] sm:$0xff]  ;;  %v8277_v42 = vadd.f32 %v8134_v63, %v2795_v11 }
 0x938   : > { %v15319_v20 = vpop.eup %15318  ;;  %v8278_v1 = vadd.f32 %v8138_v57, %v2799_v47  ;;  %v8545_v21 = vsub.f32 %v20005_v43, %v15317_v28  ;;  %v20277_v46 = vadd.f32 %v15311_v7, %v8560_v10  ;;  %v3359_v38 = vadd.f32 %v22152_v24, %v18576_v60  ;;  %8866 = vmatprep.mubr.bf16.mxu0 %v21458_v0  ;;  %v22155_v10 = vld [vmem:[#allocation304_spill] sm:$0xff] }
 0x939   : > { %v15321_v56 = vpop.eup %15320  ;;  %15344 = vtanh.f32 %v8516_v18  ;;  %v8501_v13 = vmul.f32 %v15319_v20, %v8485_v16  ;;  %v8140_v59 = vpop.f32.mrf.mxu1  ;;  %v2809_v18 = vadd.f32 %v22155_v10, %v18359_v49  ;;  %v12362_v63 = vmul.f32 -1.442695, %v8277_v42 }
 0x93a   : > { %v15323_v52 = vpop.eup %15322  ;;  %15346 = vpow2.f32 %v12358_v40  ;;  %v12363_v43 = vmul.f32 -1.442695, %v8278_v1  ;;  %v8561_v7 = vmul.f32 %v15321_v56, %v8545_v21  ;;  %v22157_v21 = vld [vmem:[#allocation300_spill] sm:$0xff] }
 0x93b   : > { %v15325_v14 = vpop.eup %15324  ;;  %v8517_v51 = vadd.f32 %v8501_v13, %v3359_v38  ;;  %v8398_v34 = vadd.f32 1.0, %v15323_v52  ;;  %v8142_v53 = vpop.f32.mrf.mxu1 }
 0x93c   : > { %v15327_v4 = vpop.eup %15326  ;;  %15348 = vpow2.f32 %v12363_v43  ;;  %v8280_v26 = vadd.f32 %v8142_v53, %v2803_v9  ;;  %v20290_v31 = vadd.f32 %v15317_v28, %v8561_v7  ;;  %v2801_v28 = vadd.f32 %v22157_v21, %v18366_v58  ;;  %v8223_v38 = vpop.f32.mrf.mxu0 }
 0x93d   : > { %15350 = vtanh.f32 %v8517_v51  ;;  %v8400_v23 = vadd.f32 1.0, %v15327_v4  ;;  %v20288_v47 = vpop.f32.mrf.mxu1  ;;  %v15329_v40 = vpop.eup %15328 }
 0x93e   : > { %15352 = vrcp.f32 %v8398_v34  ;;  %v15331_v16 = vpop.eup %15330  ;;  %v20296_v57 = vpack.c.bf16 %v20290_v31, %v20277_v46  ;;  %v8546_v20 = vsub.f32 %v20025_v33, %v15329_v40  ;;  %v12365_v2 = vmul.f32 -1.442695, %v8280_v26  ;;  %v22158_v33 = vld [vmem:[#allocation306_spill] sm:$0xff] }
 0x93f   : > { %15354 = vpow2.f32 %v12360_v12  ;;  %v8148_v54 = vpop.f32.mrf.mxu1  ;;  %v15333_v1 = vpop.eup %15332  ;;  %v8402_v56 = vadd.f32 1.0, %v15331_v16  ;;  %v2813_v9 = vadd.f32 %v22158_v33, %v18359_v49  ;;  %v8279_v43 = vadd.f32 %v8140_v59, %v2801_v28 }
 0x940   : > { %22156 = vst [vmem:[#allocation102_spill] sm:$0xff] %v20296_v57  ;;  %15356 = vrcp.f32 %v8400_v23  ;;  %v15335_v24 = vpop.eup %15334  ;;  %v8282_v11 = vadd.f32 %v8148_v54, %v2809_v18  ;;  %8867 = vmatmul.mubr.bf16.gmra.mxu0 %v20296_v57  ;;  %13971 = vmatmul.mubr.bf16.vlgmr.msra.gmra.mxu1 %v20296_v57  ;;  %v8562_v52 = vmul.f32 %v15325_v14, %v8546_v20  ;;  %v13949_v14 = vpop.f32.mrf.mxu0 }
 0x941   : > { %v20301_v13 = vpop.f32.mrf.mxu1  ;;  %v15337_v22 = vpop.eup %15336  ;;  %15358 = vrcp.f32 %v8402_v56  ;;  %8876 = vmatprep.mubr.bf16.mxu0 %v21458_v0  ;;  %v12364_v59 = vmul.f32 -1.442695, %v8279_v43  ;;  %v22161_v43 = vld [vmem:[#allocation188_spill] sm:$0xff] }
 0x942   : > { %v15339_v7 = vpop.eup %15338  ;;  %15360 = vpow2.f32 %v12362_v63  ;;  %v8547_v34 = vsub.f32 %v20038_v19, %v15337_v22  ;;  %v20309_v12 = vadd.f32 %v15329_v40, %v8562_v52  ;;  %v12367_v26 = vmul.f32 -1.442695, %v8282_v11  ;;  %v8226_v40 = vpop.f32.mrf.mxu0 }
 0x943   : > { %v8152_v51 = vpop.f32.mrf.mxu1  ;;  %v15341_v42 = vpop.eup %15340  ;;  %v8404_v53 = vadd.f32 1.0, %v15339_v7  ;;  %15362 = vpow2.f32 %v12365_v2  ;;  %v8486_v11 = vadd.f32 %v20250_v39, %v8223_v38  ;;  %v3364_v7 = vadd.f32 %v22161_v43, %v18576_v60 }
 0x944   : > { %v8284_v4 = vadd.f32 %v8152_v51, %v2813_v9  ;;  %v15343_v23 = vpop.eup %15342  ;;  %v8563_v10 = vmul.f32 %v15333_v1, %v8547_v34  ;;  %v22160_v1 = vld [vmem:[#allocation303_spill] sm:$0xff]  ;;  %v8487_v38 = vadd.f32 %v20250_v39, %v8226_v40  ;;  %v22164_v40 = vld [vmem:[#allocation305_spill] sm:$0xff] }
 0x945   : > { %15364 = vrcp.f32 %v8404_v53  ;;  %v2805_v2 = vadd.f32 %v22160_v1, %v18366_v58  ;;  %v8399_v33 = vadd.f32 1.0, %v15343_v23  ;;  %v22162_v53 = vld [vmem:[#allocation185_spill] sm:$0xff] }
 0x946   : > { %v15345_v18 = vpop.eup %15344  ;;  %v12369_v54 = vmul.f32 -1.442695, %v8284_v4  ;;  %v20311_v20 = vadd.f32 %v15337_v22, %v8563_v10  ;;  %15366 = vpow2.f32 %v12367_v26  ;;  %v3372_v4 = vadd.f32 %v22162_v53, %v18576_v60  ;;  %v22163_v10 = vld [vmem:[#allocation194_spill] sm:$0xff] }
 0x947   : > { %v15347_v16 = vpop.eup %15346  ;;  %v8548_v63 = vsub.f32 %v20047_v29, %v15345_v18  ;;  %15368 = vpow2.f32 %v12364_v59  ;;  %v8281_v26 = vadd.f32 %v20288_v47, %v2805_v2  ;;  %v8488_v59 = vadd.f32 %v20250_v39, %v20286_v5  ;;  %v22165_v47 = vld [vmem:[#allocation307_spill] sm:$0xff] }
 0x948   : > { %v20316_v21 = vpack.c.bf16 %v20311_v20, %v20309_v12  ;;  %15370 = vpow2.f32 %v12369_v54  ;;  %v8401_v23 = vadd.f32 1.0, %v15347_v16 }
 0x949   : > { %v15349_v19 = vpop.eup %15348  ;;  %v8564_v28 = vmul.f32 %v15335_v24, %v8548_v63  ;;  %v12366_v5 = vmul.f32 -1.442695, %v8281_v26 }
 0x94a   : > { %22159 = vst [vmem:[#allocation108_spill] sm:$0xff] %v20316_v21  ;;  %v15351_v56 = vpop.eup %15350  ;;  %v8406_v52 = vadd.f32 1.0, %v15349_v19  ;;  %8877 = vmatmul.mubr.bf16.gmra.mxu0 %v20316_v21  ;;  %13974 = vmatprep.mubr.bf16.mxu1 %v20316_v21 }
 0x94b   : > { %v15353_v22 = vpop.eup %15352  ;;  %v8549_v29 = vsub.f32 %v20063_v32, %v15351_v56  ;;  %v20324_v9 = vadd.f32 %v15345_v18, %v8564_v28  ;;  %8886 = vmatprep.mubr.bf16.mxu0 %v21458_v0  ;;  %v3367_v18 = vadd.f32 %v22163_v10, %v18576_v60  ;;  %v2811_v28 = vadd.f32 %v22164_v40, %v18366_v58 }
 0x94c   : > { %v15355_v24 = vpop.eup %15354  ;;  %v8502_v51 = vmul.f32 %v15353_v22, %v8486_v11  ;;  %15372 = vrcp.f32 %v8406_v52  ;;  %v8154_v22 = vpop.f32.mrf.mxu1 }
 0x94d   : > { %v15357_v34 = vpop.eup %15356  ;;  %v8565_v32 = vmul.f32 %v15341_v42, %v8549_v29  ;;  %15374 = vrcp.f32 %v8399_v33  ;;  %v8403_v1 = vadd.f32 1.0, %v15355_v24  ;;  %v2815_v42 = vadd.f32 %v22165_v47, %v18366_v58  ;;  %v20343_v29 = vpop.f32.mrf.mxu0 }
 0x94e   : > { %v8518_v54 = vadd.f32 %v8502_v51, %v3364_v7  ;;  %v8503_v63 = vmul.f32 %v15357_v34, %v8487_v38  ;;  %v15359_v19 = vpop.eup %15358  ;;  %v8283_v43 = vadd.f32 %v20301_v13, %v2811_v28  ;;  %v8489_v7 = vadd.f32 %v20250_v39, %v13949_v14  ;;  %v22167_v13 = vld [vmem:[#allocation191_spill] sm:$0xff] }
 0x94f   : > { %v20339_v11 = vadd.f32 %v15351_v56, %v8565_v32  ;;  %v15361_v16 = vpop.eup %15360  ;;  %v8504_v2 = vmul.f32 %v15359_v19, %v8488_v59  ;;  %v8285_v53 = vadd.f32 %v8154_v22, %v2815_v42  ;;  %v8239_v14 = vpop.f32.mrf.mxu0 }
 0x950   : > { %15376 = vtanh.f32 %v8518_v54  ;;  %v8519_v52 = vadd.f32 %v8503_v63, %v3367_v18  ;;  %v15363_v56 = vpop.eup %15362  ;;  %v8405_v38 = vadd.f32 1.0, %v15361_v16  ;;  %v8490_v19 = vadd.f32 %v20250_v39, %v8239_v14 }
 0x951   : > { %15378 = vrcp.f32 %v8401_v23  ;;  %v20348_v33 = vpack.c.bf16 %v20339_v11, %v20324_v9  ;;  %v8520_v24 = vadd.f32 %v8504_v2, %v3372_v4  ;;  %v8408_v34 = vadd.f32 1.0, %v15363_v56  ;;  %v13953_v42 = vpop.f32.mrf.mxu0 }
 0x952   : > { %15380 = vtanh.f32 %v8519_v52  ;;  %v15365_v51 = vpop.eup %15364  ;;  %v3375_v23 = vadd.f32 %v22167_v13, %v18576_v60  ;;  %v12368_v4 = vmul.f32 -1.442695, %v8283_v43  ;;  %v12370_v54 = vmul.f32 -1.442695, %v8285_v53 }
 0x953   : > { %22166 = vst [vmem:[#allocation106_spill] sm:$0xff] %v20348_v33  ;;  %15382 = vrcp.f32 %v8403_v1  ;;  %8887 = vmatmul.mubr.bf16.gmra.mxu0 %v20348_v33  ;;  %13975 = vmatmul.mubr.bf16.gmra.mxu1 %v20348_v33  ;;  %v8505_v26 = vmul.f32 %v15365_v51, %v8489_v7  ;;  %v15367_v32 = vpop.eup %15366  ;;  %v22168_v1 = vld [vmem:[#allocation200_spill] sm:$0xff]  ;;  %v8242_v7 = vpop.f32.mrf.mxu0 }
 0x954   : > { %15384 = vtanh.f32 %v8520_v24  ;;  %8896 = vmatprep.mubr.bf16.mxu0 %v21458_v0  ;;  %v15369_v18 = vpop.eup %15368  ;;  %v8410_v59 = vadd.f32 1.0, %v15367_v32  ;;  %v3380_v16 = vadd.f32 %v22168_v1, %v18576_v60 }
 0x955   : > { %15386 = vpow2.f32 %v12366_v5  ;;  %v8521_v10 = vadd.f32 %v8505_v26, %v3375_v23  ;;  %v15371_v63 = vpop.eup %15370  ;;  %v8407_v52 = vadd.f32 1.0, %v15369_v18  ;;  %v8491_v23 = vadd.f32 %v20250_v39, %v8242_v7  ;;  %v22172_v7 = vld [vmem:[#allocation203_spill] sm:$0xff] }
 0x956   : > { %15388 = vrcp.f32 %v8408_v34  ;;  %v8412_v28 = vadd.f32 1.0, %v15371_v63 }
 0x957   : > { %15390 = vrcp.f32 %v8405_v38 }
 0x958   : > { %15392 = vtanh.f32 %v8521_v10 }
 0x959   : > { %v15373_v40 = vpop.eup %15372  ;;  %15394 = vpow2.f32 %v12368_v4 }
 0x95a   : > { %15396 = vrcp.f32 %v8410_v59  ;;  %v8506_v47 = vmul.f32 %v15373_v40, %v8490_v19  ;;  %v15375_v2 = vpop.eup %15374  ;;  %v8492_v40 = vadd.f32 %v20250_v39, %v20343_v29 }
 0x95b   : > { %15398 = vpow2.f32 %v12370_v54 }
 0x95c   : > { %v8522_v22 = vadd.f32 %v8506_v47, %v3380_v16  ;;  %15400 = vrcp.f32 %v8412_v28 }
 0x95d   : > { %v15377_v5 = vpop.eup %15376 }
 0x95e   : > { %v15379_v43 = vpop.eup %15378  ;;  %15402 = vtanh.f32 %v8522_v22  ;;  %v8550_v56 = vsub.f32 %v20091_v50, %v15377_v5  ;;  %v22169_v50 = vld [vmem:[#allocation206_spill] sm:$0xff] }
 0x95f   : > { %v15381_v24 = vpop.eup %15380  ;;  %15404 = vrcp.f32 %v8407_v52  ;;  %v3383_v18 = vadd.f32 %v22169_v50, %v18576_v60  ;;  %v22171_v52 = vld [vmem:[#allocation197_spill] sm:$0xff] }
 0x960   : > { %v15383_v51 = vpop.eup %15382  ;;  %v8551_v38 = vsub.f32 %v20100_v8, %v15381_v24  ;;  %v8566_v34 = vmul.f32 %v15375_v2, %v8550_v56  ;;  %v3388_v22 = vadd.f32 %v22171_v52, %v18576_v60  ;;  %v8493_v56 = vadd.f32 %v20250_v39, %v13953_v42 }
 0x961   : > { %v15385_v53 = vpop.eup %15384 }
 0x962   : > { %v15387_v13 = vpop.eup %15386  ;;  %v8567_v26 = vmul.f32 %v15379_v43, %v8551_v38  ;;  %v20362_v4 = vadd.f32 %v15377_v5, %v8566_v34  ;;  %v8552_v14 = vsub.f32 %v20110_v25, %v15385_v53 }
 0x963   : > { %v15389_v32 = vpop.eup %15388  ;;  %v8409_v19 = vadd.f32 1.0, %v15387_v13 }
 0x964   : > { %v15391_v10 = vpop.eup %15390  ;;  %v8507_v59 = vmul.f32 %v15389_v32, %v8491_v23  ;;  %v20367_v54 = vadd.f32 %v15381_v24, %v8567_v26  ;;  %v8568_v63 = vmul.f32 %v15383_v51, %v8552_v14 }
 0x965   : > { %v15393_v8 = vpop.eup %15392 }
 0x966   : > { %v15395_v28 = vpop.eup %15394  ;;  %v8523_v1 = vadd.f32 %v8507_v59, %v3383_v18  ;;  %v20373_v16 = vpack.c.bf16 %v20367_v54, %v20362_v4  ;;  %v8553_v25 = vsub.f32 %v20117_v61, %v15393_v8  ;;  %v20376_v47 = vadd.f32 %v15385_v53, %v8568_v63 }
 0x967   : > { %v15397_v2 = vpop.eup %15396  ;;  %v3391_v61 = vadd.f32 %v22172_v7, %v18576_v60  ;;  %v8411_v51 = vadd.f32 1.0, %v15395_v28  ;;  %v14421_v7 = vld [vmem:[%s21371_s5 + $0xb0] ss:$12 sps:$4 sm:$0xff]  }
 0x968   : > { %22170 = vst [vmem:[#allocation110_spill] sm:$0xff] %v20373_v16  ;;  %v15399_v5 = vpop.eup %15398  ;;  %v8508_v43 = vmul.f32 %v15397_v2, %v8492_v40  ;;  %15406 = vtanh.f32 %v8523_v1  ;;  %8897 = vmatmul.mubr.bf16.gmra.mxu0 %v20373_v16  ;;  %13978 = vmatprep.mubr.bf16.mxu1 %v20373_v16  ;;  %v8569_v29 = vmul.f32 %v15391_v10, %v8553_v25  ;;  %v22205_v16 = vld [vmem:[#allocation330_spill] sm:$0xff] }
 0x969   : > { %v15401_v24 = vpop.eup %15400  ;;  %8906 = vmatprep.mubr.bf16.mxu0 %v21458_v0  ;;  %15408 = vrcp.f32 %v8409_v19  ;;  %v8413_v42 = vadd.f32 1.0, %v15399_v5  ;;  %13986 = vmatprep.subr.bf16.mxu0 %v14421_v7 }
 0x96a   : > { %v8524_v38 = vadd.f32 %v8508_v43, %v3388_v22  ;;  %v8509_v34 = vmul.f32 %v15401_v24, %v8493_v56  ;;  %v20386_v53 = vadd.f32 %v15393_v8, %v8569_v29  ;;  %v14418_v56 = vld [vmem:[%s21371_s5 + $0xa8] ss:$12 sps:$4 sm:$0xff]   ;;  %v14422_v24 = vld [vmem:[%s21371_s5 + $0x90] ss:$12 sps:$4 sm:$0xff]   ;;  %13987 = vmatpush3.bf16.msra.mxu0 %v14421_v7 }
 0x96b   : > { %v15403_v13 = vpop.eup %15402  ;;  %v14424_v29 = vld [vmem:[%s21371_s5 + $0x94] ss:$12 sps:$4 sm:$0xff]  }
 0x96c   : > { %15410 = vtanh.f32 %v8524_v38  ;;  %v8525_v23 = vadd.f32 %v8509_v34, %v3391_v61  ;;  %v20390_v26 = vpack.c.bf16 %v20386_v53, %v20376_v47  ;;  %v8554_v14 = vsub.f32 %v20126_v6, %v15403_v13  ;;  %v15405_v32 = vpop.eup %15404  ;;  %v14427_v61 = vld [vmem:[%s21371_s5 + $0x7c] ss:$12 sps:$4 sm:$0xff]   ;;  %v14428_v38 = vld [vmem:[%s21371_s5 + $0x98] ss:$12 sps:$4 sm:$0xff]  }
 0x96d   : > { %15412 = vrcp.f32 %v8411_v51  ;;  %v14425_v51 = vld [vmem:[%s21371_s5 + $0x78] ss:$12 sps:$4 sm:$0xff]   ;;  %13988 = vmatprep.subr.bf16.mxu0 %v14428_v38 }
 0x96e   : > { %22173 = vst [vmem:[#allocation113_spill] sm:$0xff] %v20390_v26  ;;  %15414 = vtanh.f32 %v8525_v23  ;;  %13979 = vmatmul.mubr.bf16.gmra.mxu1 %v20390_v26  ;;  %v8570_v10 = vmul.f32 %v15405_v32, %v8554_v14  ;;  %v14431_v34 = vld [vmem:[%s21371_s5 + $0x64] ss:$12 sps:$4 sm:$0xff]   ;;  %13989 = vmatpush3.bf16.msra.mxu0 %v14428_v38  ;;  %v14435_v23 = vld [vmem:[%s21371_s5 + $0x80] ss:$12 sps:$4 sm:$0xff]  }
 0x96f   : > { %15416 = vrcp.f32 %v8413_v42  ;;  %v14434_v42 = vld [vmem:[%s21371_s5 + $0x4c] ss:$12 sps:$4 sm:$0xff]   ;;  %v14432_v14 = vld [vmem:[%s21371_s5 + $0x48] ss:$12 sps:$4 sm:$0xff]   ;;  %13990 = vmatprep.subr.bf16.mxu0 %v14435_v23 }
 0x970   : > { %8907 = vmatmul.mubr.bf16.gmra.mxu0 %v20390_v26  ;;  %v20395_v50 = vadd.f32 %v15403_v13, %v8570_v10  ;;  %v14429_v13 = vld [vmem:[%s21371_s5 + $0x60] ss:$12 sps:$4 sm:$0xff]   ;;  %v14439_v10 = vld [vmem:[%s21371_s5 + $0x68] ss:$12 sps:$4 sm:$0xff]  }
 0x971   : > { %8916 = vmatprep.mubr.bf16.mxu0 %v21458_v0  ;;  %v14438_v32 = vld [vmem:[%s21371_s5 + $0x34] ss:$12 sps:$4 sm:$0xff]  }
 0x972   : > { %13991 = vmatpush3.bf16.msra.mxu0 %v14435_v23 }
 0x973   : > { %13992 = vmatprep.subr.bf16.mxu0 %v14439_v10 }
 0x975   : > { %v15407_v18 = vpop.eup %15406 }
 0x976   : > { %v8555_v59 = vsub.f32 %v20130_v37, %v15407_v18  ;;  %v15409_v63 = vpop.eup %15408  ;;  %13993 = vmatpush3.bf16.msra.mxu0 %v14439_v10 }
 0x978   : > { %v8571_v8 = vmul.f32 %v15409_v63, %v8555_v59  ;;  %v14442_v59 = vld [vmem:[%s21371_s5 + $0x1c] ss:$12 sps:$4 sm:$0xff]  }
 0x979   : > { %v15411_v19 = vpop.eup %15410  ;;  %v14443_v63 = vld [vmem:[%s21371_s5 + $0x50] ss:$12 sps:$4 sm:$0xff]  }
 0x97a   : > { %v15413_v6 = vpop.eup %15412  ;;  %v20399_v40 = vadd.f32 %v15407_v18, %v8571_v8  ;;  %v8556_v28 = vsub.f32 %v20140_v44, %v15411_v19  ;;  %v14436_v18 = vld [vmem:[%s21371_s5 + $0x30] ss:$12 sps:$4 sm:$0xff]   ;;  %v14440_v8 = vld [vmem:[%s21371_s5 + $0x18] ss:$12 sps:$4 sm:$0xff]   ;;  %13994 = vmatprep.subr.bf16.mxu0 %v14443_v63 }
 0x97b   : > { %v15415_v1 = vpop.eup %15414  ;;  %13995 = vmatpush3.bf16.msra.mxu0 %v14443_v63  ;;  %v22180_v63 = vld [vmem:[#allocation314_spill] sm:$0xff] }
 0x97c   : > { %v20404_v25 = vpack.c.bf16 %v20399_v40, %v20395_v50  ;;  %v8557_v2 = vsub.f32 %v20143_v48, %v15415_v1  ;;  %v8572_v52 = vmul.f32 %v15413_v6, %v8556_v28  ;;  %v15417_v22 = vpop.eup %15416  ;;  %v14420_v48 = vld [vmem:[%s21371_s5 + $0xac] ss:$12 sps:$4 sm:$0xff]  }
 0x97d   : > { %9604 = vmatprep.subr.bf16.mxu1 %v14420_v48  ;;  %v14447_v6 = vld [vmem:[%s21371_s5 + $0x38] ss:$12 sps:$4 sm:$0xff]   ;;  %v14444_v28 = vld [vmem:[%s21371_s5] ss:$12 sps:$4 sm:$0xff]  }
 0x97e   : > { %22174 = vst [vmem:[#allocation50_spill] sm:$0xff] %v20404_v25  ;;  %8917 = vmatmul.mubr.bf16.gmra.mxu0 %v20404_v25  ;;  %13982 = vmatprep.mubr.bf16.mxu1 %v20404_v25  ;;  %v8573_v37 = vmul.f32 %v15417_v22, %v8557_v2  ;;  %v20409_v5 = vadd.f32 %v15411_v19, %v8572_v52  ;;  %v14446_v19 = vld [vmem:[%s21371_s5 + $0x4] ss:$12 sps:$4 sm:$0xff]   ;;  %v14449_v2 = vld [vmem:[%s21371_s5 + $0x8] ss:$12 sps:$4 sm:$0xff]   ;;  %v20496_v52 = vld [vmem:[%s21374_s8 + $0x38] sm:$0xff]  }
 0x97f   : > { %8926 = vmatprep.mubr.bf16.mxu0 %v21458_v0  ;;  %9605 = vmatpush1.bf16.msra.mxu1 %v14418_v56  ;;  %v22176_v22 = vld [vmem:[#allocation308_spill] sm:$0xff] }
 0x980   : > { %v20412_v43 = vadd.f32 %v15415_v1, %v8573_v37  ;;  %9606 = vmatprep.subr.bf16.mxu1 %v14424_v29  ;;  %13996 = vmatprep.subr.bf16.mxu0 %v14447_v6  ;;  %v14448_v1 = vld [vmem:[%s21371_s5 + $0x20] ss:$12 sps:$4 sm:$0xff]   ;;  %v2819_v37 = vadd.f32 %v22176_v22, %v18359_v49 }
 0x981   : > { %13997 = vmatpush3.bf16.msra.mxu0 %v14447_v6 }
 0x982   : > { %v20416_v44 = vpack.c.bf16 %v20412_v43, %v20409_v5  ;;  %13998 = vmatprep.subr.bf16.mxu0 %v14448_v1 }
 0x983   : > { %9607 = vmatpush1.bf16.msra.mxu1 %v14422_v24  ;;  %v22177_v24 = vld [vmem:[#allocation310_spill] sm:$0xff] }
 0x984   : > { %22175 = vst [vmem:[#allocation116_spill] sm:$0xff] %v20416_v44  ;;  %13983 = vmatmul.mubr.bf16.gmra.mxu1 %v20416_v44  ;;  %9608 = vmatprep.subr.bf16.mxu1 %v14427_v61  ;;  %v2823_v7 = vadd.f32 %v22177_v24, %v18359_v49 }
 0x985   : > { %9636 = vmatprep.mubr.bf16.mxu1 %v21458_v0  ;;  %13999 = vmatpush3.bf16.msra.mxu0 %v14448_v1 }
 0x986   : > { %8927 = vmatmul.mubr.bf16.gmra.mxu0 %v20416_v44  ;;  %14000 = vmatprep.subr.bf16.mxu0 %v14449_v2 }
 0x987   : > { %9609 = vmatpush1.bf16.msra.mxu1 %v14425_v51 }
 0x988   : > { %9610 = vmatprep.subr.bf16.mxu1 %v14431_v34 }
 0x989   : > { %14001 = vmatpush3.bf16.msra.mxu0 %v14449_v2 }
 0x98a   : > { %14018 = vmatprep.subr.bf16.mxu0 %v20496_v52 }
 0x98b   : > { %9611 = vmatpush1.bf16.msra.mxu1 %v14429_v13 }
 0x98c   : > { %9612 = vmatprep.subr.bf16.mxu1 %v14434_v42  ;;  %v22178_v42 = vld [vmem:[#allocation312_spill] sm:$0xff] }
 0x98d   : > { %v2829_v23 = vadd.f32 %v22178_v42, %v18359_v49 }
 0x98f   : > { %9613 = vmatpush1.bf16.msra.mxu1 %v14432_v14 }
 0x990   : > { %9614 = vmatprep.subr.bf16.mxu1 %v14438_v32  ;;  %v22179_v32 = vld [vmem:[#allocation309_spill] sm:$0xff] }
 0x991   : > { %v2821_v10 = vadd.f32 %v22179_v32, %v18366_v58 }
 0x993   : > { %9615 = vmatpush1.bf16.msra.mxu1 %v14436_v18 }
 0x994   : > { %9616 = vmatprep.subr.bf16.mxu1 %v14442_v59 }
 0x997   : > { %9617 = vmatpush1.bf16.msra.mxu1 %v14440_v8  ;;  %v2833_v8 = vadd.f32 %v22180_v63, %v18359_v49 }
 0x998   : > { %9618 = vmatprep.subr.bf16.mxu1 %v14446_v19 }
 0x99b   : > { %9619 = vmatpush1.bf16.msra.mxu1 %v14444_v28  ;;  %v22181_v28 = vld [vmem:[#allocation311_spill] sm:$0xff] }
 0x99c   : > { %v2825_v1 = vadd.f32 %v22181_v28, %v18366_v58 }
 0x9f7   : > { %v8858_v48 = vpop.f32.mrf.mxu0 }
 0x9f8   : > { %v9034_v56 = vadd.f32 %v8858_v48, %v2819_v37 }
 0x9f9   : > { %v8860_v29 = vpop.f32.mrf.mxu0 }
 0x9fa   : > { %v12395_v61 = vmul.f32 -1.442695, %v9034_v56  ;;  %v9035_v19 = vadd.f32 %v8860_v29, %v2821_v10 }
 0x9fb   : > { %v8862_v51 = vpop.f32.mrf.mxu0 }
 0x9fc   : > { %15418 = vpow2.f32 %v12395_v61  ;;  %v9036_v38 = vadd.f32 %v8862_v51, %v2823_v7  ;;  %v12396_v56 = vmul.f32 -1.442695, %v9035_v19  ;;  %v22182_v7 = vld [vmem:[#allocation313_spill] sm:$0xff] }
 0x9fd   : > { %v8864_v34 = vpop.f32.mrf.mxu0  ;;  %v2831_v61 = vadd.f32 %v22182_v7, %v18366_v58 }
 0x9fe   : > { %v12397_v13 = vmul.f32 -1.442695, %v9036_v38  ;;  %v9037_v37 = vadd.f32 %v8864_v34, %v2825_v1  ;;  %v22183_v38 = vld [vmem:[#allocation316_spill] sm:$0xff] }
 0xa00   : > { %15420 = vpow2.f32 %v12397_v13  ;;  %v8868_v14 = vpop.f32.mrf.mxu0  ;;  %v2839_v13 = vadd.f32 %v22183_v38, %v18359_v49  ;;  %v12398_v42 = vmul.f32 -1.442695, %v9037_v37 }
 0xa01   : > { %v9038_v18 = vadd.f32 %v8868_v14, %v2829_v23 }
 0xa02   : > { %v8870_v59 = vpop.f32.mrf.mxu0 }
 0xa03   : > { %v12399_v6 = vmul.f32 -1.442695, %v9038_v18  ;;  %v9039_v23 = vadd.f32 %v8870_v59, %v2831_v61  ;;  %v22184_v18 = vld [vmem:[#allocation315_spill] sm:$0xff] }
 0xa04   : > { %v8872_v2 = vpop.f32.mrf.mxu0  ;;  %v2835_v63 = vadd.f32 %v22184_v18, %v18366_v58 }
 0xa05   : > { %15422 = vpow2.f32 %v12399_v6  ;;  %v9040_v22 = vadd.f32 %v8872_v2, %v2833_v8  ;;  %v22185_v8 = vld [vmem:[#allocation318_spill] sm:$0xff]  ;;  %v20519_v6 = vpop.f32.mrf.mxu1  ;;  %v12400_v2 = vmul.f32 -1.442695, %v9039_v23 }
 0xa06   : > { %v8874_v48 = vpop.f32.mrf.mxu0  ;;  %v2843_v19 = vadd.f32 %v22185_v8, %v18359_v49 }
 0xa07   : > { %v12401_v24 = vmul.f32 -1.442695, %v9040_v22  ;;  %v9041_v59 = vadd.f32 %v8874_v48, %v2835_v63  ;;  %v8971_v61 = vpop.f32.mrf.mxu1 }
 0xa09   : > { %v15419_v51 = vpop.eup %15418  ;;  %15424 = vpow2.f32 %v12401_v24  ;;  %v22186_v24 = vld [vmem:[#allocation320_spill] sm:$0xff]  ;;  %v13973_v63 = vpop.f32.mrf.mxu1 }
 0xa0a   : > { %v9162_v29 = vadd.f32 1.0, %v15419_v51  ;;  %v8878_v14 = vpop.f32.mrf.mxu0  ;;  %15426 = vpow2.f32 %v12396_v56  ;;  %v2849_v7 = vadd.f32 %v22186_v24, %v18359_v49 }
 0xa0b   : > { %v9042_v32 = vadd.f32 %v8878_v14, %v2839_v13  ;;  %v22187_v13 = vld [vmem:[#allocation317_spill] sm:$0xff] }
 0xa0c   : > { %15428 = vrcp.f32 %v9162_v29  ;;  %v8880_v10 = vpop.f32.mrf.mxu0  ;;  %v2841_v29 = vadd.f32 %v22187_v13, %v18366_v58 }
 0xa0d   : > { %v15421_v34 = vpop.eup %15420  ;;  %v12403_v28 = vmul.f32 -1.442695, %v9042_v32  ;;  %15430 = vpow2.f32 %v12398_v42  ;;  %v12402_v42 = vmul.f32 -1.442695, %v9041_v59  ;;  %v9258_v59 = vadd.f32 %v20250_v39, %v8971_v61 }
 0xa0e   : > { %v9164_v1 = vadd.f32 1.0, %v15421_v34  ;;  %v8882_v22 = vpop.f32.mrf.mxu0  ;;  %v22188_v34 = vld [vmem:[#allocation322_spill] sm:$0xff]  ;;  %v9043_v8 = vadd.f32 %v8880_v10, %v2841_v29  ;;  %v22190_v10 = vld [vmem:[#allocation212_spill] sm:$0xff] }
 0xa0f   : > { %15432 = vpow2.f32 %v12403_v28  ;;  %v9044_v37 = vadd.f32 %v8882_v22, %v2843_v19  ;;  %v2853_v18 = vadd.f32 %v22188_v34, %v18359_v49  ;;  %v22189_v22 = vld [vmem:[#allocation319_spill] sm:$0xff]  ;;  %v3396_v29 = vadd.f32 %v22190_v10, %v18576_v60 }
 0xa10   : > { %15434 = vrcp.f32 %v9164_v1  ;;  %v8884_v56 = vpop.f32.mrf.mxu0  ;;  %v12404_v13 = vmul.f32 -1.442695, %v9043_v8 }
 0xa11   : > { %v12405_v51 = vmul.f32 -1.442695, %v9044_v37  ;;  %15436 = vpow2.f32 %v12400_v2  ;;  %v2845_v37 = vadd.f32 %v22189_v22, %v18366_v58  ;;  %v22191_v22 = vld [vmem:[#allocation321_spill] sm:$0xff] }
 0xa12   : > { %v15423_v38 = vpop.eup %15422 }
 0xa13   : > { %v8888_v14 = vpop.f32.mrf.mxu0  ;;  %v9166_v32 = vadd.f32 1.0, %v15423_v38  ;;  %15438 = vpow2.f32 %v12405_v51  ;;  %v8974_v51 = vpop.f32.mrf.mxu1 }
 0xa14   : > { %v9046_v23 = vadd.f32 %v8888_v14, %v2849_v7  ;;  %v9045_v14 = vadd.f32 %v8884_v56, %v2845_v37  ;;  %v9259_v61 = vadd.f32 %v20250_v39, %v8974_v51  ;;  %v22192_v37 = vld [vmem:[#allocation218_spill] sm:$0xff] }
 0xa15   : > { %v8890_v48 = vpop.f32.mrf.mxu0  ;;  %15440 = vrcp.f32 %v9166_v32 }
 0xa16   : > { %v12407_v19 = vmul.f32 -1.442695, %v9046_v23  ;;  %v15425_v28 = vpop.eup %15424  ;;  %15442 = vpow2.f32 %v12402_v42  ;;  %v12406_v8 = vmul.f32 -1.442695, %v9045_v14  ;;  %v20541_v14 = vpop.f32.mrf.mxu1 }
 0xa17   : > { %v8892_v1 = vpop.f32.mrf.mxu0  ;;  %v9168_v24 = vadd.f32 1.0, %v15425_v28  ;;  %v15427_v38 = vpop.eup %15426  ;;  %v2851_v28 = vadd.f32 %v22191_v22, %v18366_v58  ;;  %v22193_v22 = vld [vmem:[#allocation323_spill] sm:$0xff] }
 0xa18   : > { %v9048_v2 = vadd.f32 %v8892_v1, %v2853_v18  ;;  %15444 = vpow2.f32 %v12407_v19  ;;  %v9163_v18 = vadd.f32 1.0, %v15427_v38  ;;  %v2855_v44 = vadd.f32 %v22193_v22, %v18366_v58 }
 0xa19   : > { %v15429_v7 = vpop.eup %15428  ;;  %15446 = vrcp.f32 %v9168_v24  ;;  %v9047_v56 = vadd.f32 %v8890_v48, %v2851_v28 }
 0xa1a   : > { %v12409_v32 = vmul.f32 -1.442695, %v9048_v2  ;;  %v9274_v23 = vmul.f32 %v15429_v7, %v9258_v59  ;;  %v15431_v34 = vpop.eup %15430  ;;  %v3399_v2 = vadd.f32 %v22192_v37, %v18576_v60  ;;  %v8894_v7 = vpop.f32.mrf.mxu0  ;;  %v9261_v37 = vadd.f32 %v20250_v39, %v13973_v63 }
 0xa1b   : > { %v9165_v51 = vadd.f32 1.0, %v15431_v34  ;;  %v8987_v34 = vpop.f32.mrf.mxu1 }
 0xa1c   : > { %v15433_v42 = vpop.eup %15432  ;;  %v9290_v1 = vadd.f32 %v9274_v23, %v3396_v29  ;;  %15448 = vpow2.f32 %v12409_v32  ;;  %v9260_v32 = vadd.f32 %v20250_v39, %v20519_v6  ;;  %v12408_v29 = vmul.f32 -1.442695, %v9047_v56 }
 0xa1d   : > { %v15435_v19 = vpop.eup %15434  ;;  %v9170_v24 = vadd.f32 1.0, %v15433_v42  ;;  %15450 = vpow2.f32 %v12404_v13  ;;  %v9049_v23 = vadd.f32 %v8894_v7, %v2855_v44  ;;  %v22195_v44 = vld [vmem:[#allocation324_spill] sm:$0xff]  ;;  %v22196_v7 = vld [vmem:[#allocation215_spill] sm:$0xff] }
 0xa1e   : > { %15452 = vtanh.f32 %v9290_v1  ;;  %v9275_v59 = vmul.f32 %v15435_v19, %v9259_v61  ;;  %v15437_v10 = vpop.eup %15436  ;;  %v22194_v1 = vld [vmem:[#allocation209_spill] sm:$0xff]  ;;  %v2859_v56 = vadd.f32 %v22195_v44, %v18359_v49 }
 0xa1f   : > { %15454 = vrcp.f32 %v9170_v24  ;;  %v9167_v42 = vadd.f32 1.0, %v15437_v10  ;;  %v3404_v61 = vadd.f32 %v22194_v1, %v18576_v60  ;;  %v3407_v10 = vadd.f32 %v22196_v7, %v18576_v60  ;;  %v22199_v7 = vld [vmem:[#allocation224_spill] sm:$0xff] }
 0xa20   : > { %v15439_v38 = vpop.eup %15438  ;;  %15456 = vrcp.f32 %v9163_v18  ;;  %v9291_v13 = vadd.f32 %v9275_v59, %v3399_v2  ;;  %v12410_v2 = vmul.f32 -1.442695, %v9049_v23 }
 0xa21   : > { %v9172_v48 = vadd.f32 1.0, %v15439_v38  ;;  %15458 = vpow2.f32 %v12406_v8 }
 0xa22   : > { %v15441_v28 = vpop.eup %15440  ;;  %15460 = vtanh.f32 %v9291_v13 }
 0xa23   : > { %v9276_v19 = vmul.f32 %v15441_v28, %v9260_v32  ;;  %15462 = vrcp.f32 %v9172_v48  ;;  %v15443_v18 = vpop.eup %15442  ;;  %v22197_v28 = vld [vmem:[#allocation326_spill] sm:$0xff] }
 0xa24   : > { %15464 = vrcp.f32 %v9165_v51  ;;  %v20550_v51 = vpop.f32.mrf.mxu1  ;;  %v9169_v48 = vadd.f32 1.0, %v15443_v18 }
 0xa25   : > { %v15445_v24 = vpop.eup %15444  ;;  %v9292_v6 = vadd.f32 %v9276_v19, %v3404_v61  ;;  %15466 = vpow2.f32 %v12408_v29 }
 0xa26   : > { %v15447_v8 = vpop.eup %15446  ;;  %15468 = vrcp.f32 %v9167_v42  ;;  %v9174_v59 = vadd.f32 1.0, %v15445_v24  ;;  %v2863_v42 = vadd.f32 %v22197_v28, %v18359_v49  ;;  %v9262_v24 = vadd.f32 %v20250_v39, %v8987_v34  ;;  %v8990_v44 = vpop.f32.mrf.mxu1 }
 0xa27   : > { %15470 = vtanh.f32 %v9292_v6  ;;  %v9277_v22 = vmul.f32 %v15447_v8, %v9261_v37 }
 0xa28   : > { %v8898_v38 = vpop.f32.mrf.mxu0  ;;  %15472 = vrcp.f32 %v9174_v59 }
 0xa29   : > { %v9050_v32 = vadd.f32 %v8898_v38, %v2859_v56  ;;  %v15449_v13 = vpop.eup %15448  ;;  %v9293_v63 = vadd.f32 %v9277_v22, %v3407_v10  ;;  %15474 = vpow2.f32 %v12410_v2  ;;  %v22198_v2 = vld [vmem:[#allocation221_spill] sm:$0xff]  ;;  %v3412_v10 = vadd.f32 %v22199_v7, %v18576_v60  ;;  %v22203_v7 = vld [vmem:[#allocation327_spill] sm:$0xff] }
 0xa2a   : > { %v8900_v29 = vpop.f32.mrf.mxu0  ;;  %v15451_v23 = vpop.eup %15450  ;;  %v9176_v1 = vadd.f32 1.0, %v15449_v13  ;;  %v3420_v59 = vadd.f32 %v22198_v2, %v18576_v60  ;;  %v20567_v2 = vld [vmem:[%s21373_s7] ss:$0 sm:$0xff] }
 0xa2b   : > { %v12411_v61 = vmul.f32 -1.442695, %v9050_v32  ;;  %v15453_v19 = vpop.eup %15452  ;;  %15476 = vtanh.f32 %v9293_v63  ;;  %v9171_v39 = vadd.f32 1.0, %v15451_v23  ;;  %v22202_v23 = vld [vmem:[#allocation325_spill] sm:$0xff] }
 0xa2c   : > { %v8902_v6 = vpop.f32.mrf.mxu0  ;;  %v15455_v37 = vpop.eup %15454  ;;  %v9322_v8 = vsub.f32 %v20253_v17, %v15453_v19  ;;  %15478 = vrcp.f32 %v9176_v1  ;;  %v22200_v17 = vld [vmem:[#allocation230_spill] sm:$0xff] }
 0xa2d   : > { %v9052_v56 = vadd.f32 %v8902_v6, %v2863_v42  ;;  %v15457_v18 = vpop.eup %15456  ;;  %15480 = vrcp.f32 %v9169_v48  ;;  %v9278_v22 = vmul.f32 %v15455_v37, %v9262_v24  ;;  %v3415_v28 = vadd.f32 %v22200_v17, %v18576_v60  ;;  %v22201_v42 = vld [vmem:[#allocation328_spill] sm:$0xff] }
 0xa2e   : > { %v8904_v38 = vpop.f32.mrf.mxu0  ;;  %v15459_v32 = vpop.eup %15458  ;;  %v9338_v13 = vmul.f32 %v15457_v18, %v9322_v8  ;;  %15482 = vpow2.f32 %v12411_v61  ;;  %v2869_v1 = vadd.f32 %v22201_v42, %v18359_v49  ;;  %v9263_v48 = vadd.f32 %v20567_v2, %v8990_v44  ;;  %v22204_v44 = vld [vmem:[#allocation329_spill] sm:$0xff] }
 0xa2f   : > { %v12413_v34 = vmul.f32 -1.442695, %v9052_v56  ;;  %v15461_v63 = vpop.eup %15460  ;;  %v9294_v6 = vadd.f32 %v9278_v22, %v3412_v10  ;;  %v2861_v61 = vadd.f32 %v22202_v23, %v18366_v58  ;;  %v2865_v10 = vadd.f32 %v22203_v7, %v18366_v58 }
 0xa30   : > { %v8908_v24 = vpop.f32.mrf.mxu0  ;;  %v15463_v37 = vpop.eup %15462  ;;  %v20572_v8 = vadd.f32 %v15453_v19, %v9338_v13  ;;  %v9323_v56 = vsub.f32 %v20260_v15, %v15461_v63  ;;  %v2871_v26 = vadd.f32 %v22204_v44, %v18366_v58  ;;  %v2873_v23 = vadd.f32 %v22205_v16, %v18359_v49  ;;  %v22206_v44 = vld [vmem:[#allocation331_spill] sm:$0xff] }
 0xa31   : > { %15484 = vpow2.f32 %v12413_v34  ;;  %v15465_v18 = vpop.eup %15464  ;;  %v9279_v22 = vmul.f32 %v15463_v37, %v9263_v48  ;;  %v9054_v17 = vadd.f32 %v8908_v24, %v2869_v1  ;;  %v9173_v15 = vadd.f32 1.0, %v15459_v32 }
 0xa32   : > { %15486 = vtanh.f32 %v9294_v6  ;;  %v8910_v42 = vpop.f32.mrf.mxu0  ;;  %v15467_v25 = vpop.eup %15466  ;;  %v9339_v19 = vmul.f32 %v15465_v18, %v9323_v56  ;;  %v9051_v33 = vadd.f32 %v8900_v29, %v2861_v61  ;;  %v9264_v1 = vadd.f32 %v20567_v2, %v20541_v14 }
 0xa33   : > { %15488 = vrcp.f32 %v9171_v39  ;;  %v15469_v13 = vpop.eup %15468  ;;  %v9295_v34 = vadd.f32 %v9279_v22, %v3415_v28  ;;  %v12415_v21 = vmul.f32 -1.442695, %v9054_v17  ;;  %v9053_v48 = vadd.f32 %v8904_v38, %v2865_v10 }
 0xa34   : > { %v8912_v57 = vpop.f32.mrf.mxu0  ;;  %v15471_v7 = vpop.eup %15470  ;;  %v20581_v6 = vadd.f32 %v15461_v63, %v9339_v19  ;;  %v2875_v16 = vadd.f32 %v22206_v44, %v18366_v58  ;;  %v9175_v56 = vadd.f32 1.0, %v15467_v25  ;;  %v9265_v28 = vadd.f32 %v20567_v2, %v20550_v51 }
 0xa35   : > { %v9056_v24 = vadd.f32 %v8912_v57, %v2873_v23  ;;  %v15473_v37 = vpop.eup %15472  ;;  %15490 = vtanh.f32 %v9295_v34  ;;  %v9324_v32 = vsub.f32 %v20277_v46, %v15471_v7  ;;  %v12412_v61 = vmul.f32 -1.442695, %v9051_v33  ;;  %v22207_v23 = vld [vmem:[#allocation227_spill] sm:$0xff] }
 0xa36   : > { %v15475_v39 = vpop.eup %15474  ;;  %v9280_v29 = vmul.f32 %v15473_v37, %v9264_v1  ;;  %15492 = vpow2.f32 %v12415_v21  ;;  %v8914_v14 = vpop.f32.mrf.mxu0  ;;  %v20592_v57 = vpack.c.bf16 %v20581_v6, %v20572_v8  ;;  %v12414_v10 = vmul.f32 -1.442695, %v9053_v48 }
 0xa37   : > { %v12417_v63 = vmul.f32 -1.442695, %v9056_v24  ;;  %15494 = vrcp.f32 %v9173_v15  ;;  %v9340_v38 = vmul.f32 %v15469_v13, %v9324_v32  ;;  %v9055_v22 = vadd.f32 %v8910_v42, %v2871_v26  ;;  %v22208_v42 = vld [vmem:[#allocation332_spill] sm:$0xff] }
 0xa38   : > { %v15477_v18 = vpop.eup %15476  ;;  %v9296_v25 = vadd.f32 %v9280_v29, %v3420_v59  ;;  %v9177_v17 = vadd.f32 1.0, %v15475_v39  ;;  %9637 = vmatmul.mubr.bf16.vlgmr.msra.gmra.mxu1 %v20592_v57  ;;  %14002 = vmatprep.mubr.bf16.mxu0 %v20592_v57  ;;  %v3423_v19 = vadd.f32 %v22207_v23, %v18576_v60  ;;  %v9057_v13 = vadd.f32 %v8914_v14, %v2875_v16  ;;  %v14451_v14 = vld [vmem:[%s21374_s8 + $0x30] sm:$0xff]  }
 0xa39   : > { %15496 = vpow2.f32 %v12417_v63  ;;  %v15479_v46 = vpop.eup %15478  ;;  %v9325_v21 = vsub.f32 %v20290_v31, %v15477_v18  ;;  %v20597_v33 = vadd.f32 %v15471_v7, %v9340_v38  ;;  %9646 = vmatprep.mubr.bf16.mxu1 %v21458_v0  ;;  %v2879_v15 = vadd.f32 %v22208_v42, %v18359_v49  ;;  %v22209_v38 = vld [vmem:[#allocation334_spill] sm:$0xff] }
 0xa3a   : > { %15498 = vrcp.f32 %v9175_v56  ;;  %v15481_v51 = vpop.eup %15480  ;;  %v9281_v59 = vmul.f32 %v15479_v46, %v9265_v28  ;;  %v12416_v31 = vmul.f32 -1.442695, %v9055_v22  ;;  %v20606_v56 = vpop.f32.mrf.mxu1  ;;  %v12418_v32 = vmul.f32 -1.442695, %v9057_v13 }
 0xa3b   : > { %15500 = vtanh.f32 %v9296_v25  ;;  %v15483_v26 = vpop.eup %15482  ;;  %v9341_v34 = vmul.f32 %v15481_v51, %v9325_v21 }
 0xa3c   : > { %15502 = vpow2.f32 %v12412_v61  ;;  %v9297_v1 = vadd.f32 %v9281_v59, %v3423_v19  ;;  %v9178_v48 = vadd.f32 1.0, %v15483_v26  ;;  %v14452_v59 = vld [vmem:[%s21374_s8 + $0x28] sm:$0xff]   ;;  %v22210_v26 = vld [vmem:[#allocation336_spill] sm:$0xff] }
 0xa3d   : > { %15504 = vpow2.f32 %v12414_v10  ;;  %v20604_v37 = vadd.f32 %v15477_v18, %v9341_v34  ;;  %v2883_v18 = vadd.f32 %v22209_v38, %v18359_v49  ;;  %v2889_v42 = vadd.f32 %v22210_v26, %v18359_v49  ;;  %v22212_v38 = vld [vmem:[#allocation338_spill] sm:$0xff] }
 0xa3e   : > { %v15485_v7 = vpop.eup %15484  ;;  %15506 = vrcp.f32 %v9177_v17  ;;  %v8918_v24 = vpop.f32.mrf.mxu0 }
 0xa3f   : > { %v15487_v44 = vpop.eup %15486  ;;  %15508 = vtanh.f32 %v9297_v1  ;;  %v9180_v16 = vadd.f32 1.0, %v15485_v7  ;;  %v9058_v39 = vadd.f32 %v8918_v24, %v2879_v15  ;;  %v20610_v63 = vpack.c.bf16 %v20604_v37, %v20597_v33  ;;  %v9003_v17 = vpop.f32.mrf.mxu1 }
 0xa40   : > { %v15489_v29 = vpop.eup %15488  ;;  %15510 = vrcp.f32 %v9178_v48  ;;  %v8920_v28 = vpop.f32.mrf.mxu0  ;;  %v9326_v61 = vsub.f32 %v20309_v12, %v15487_v44 }
 0xa41   : > { %15512 = vpow2.f32 %v12416_v31  ;;  %v12419_v25 = vmul.f32 -1.442695, %v9058_v39  ;;  %9647 = vmatmul.mubr.bf16.gmra.mxu1 %v20610_v63  ;;  %14003 = vmatmul.mubr.bf16.vlgmr.msra.gmra.mxu0 %v20610_v63 }
 0xa42   : > { %15514 = vrcp.f32 %v9180_v16  ;;  %v8922_v10 = vpop.f32.mrf.mxu0  ;;  %v9342_v22 = vmul.f32 %v15489_v29, %v9326_v61  ;;  %v15491_v46 = vpop.eup %15490  ;;  %9656 = vmatprep.mubr.bf16.mxu1 %v21458_v0  ;;  %14019 = vmatpush3.bf16.msra.mxu0 %v20496_v52  ;;  %v22211_v29 = vld [vmem:[#allocation333_spill] sm:$0xff] }
 0xa43   : > { %15516 = vpow2.f32 %v12418_v32  ;;  %v9060_v12 = vadd.f32 %v8922_v10, %v2883_v18  ;;  %v15493_v21 = vpop.eup %15492  ;;  %v9327_v23 = vsub.f32 %v20311_v20, %v15491_v46  ;;  %14020 = vmatprep.subr.bf16.mxu0 %v14451_v14  ;;  %v20630_v20 = vpop.f32.mrf.mxu1  ;;  %v2881_v61 = vadd.f32 %v22211_v29, %v18366_v58  ;;  %v14453_v10 = vld [vmem:[%s21374_s8 + $0x20] sm:$0xff]  }
 0xa44   : > { %15518 = vpow2.f32 %v12419_v25  ;;  %v8924_v51 = vpop.f32.mrf.mxu0  ;;  %v20623_v19 = vadd.f32 %v15487_v44, %v9342_v22  ;;  %v15495_v13 = vpop.eup %15494  ;;  %v9182_v15 = vadd.f32 1.0, %v15493_v21  ;;  %v2893_v18 = vadd.f32 %v22212_v38, %v18359_v49 }
 0xa45   : > { %v12421_v1 = vmul.f32 -1.442695, %v9060_v12  ;;  %v9343_v48 = vmul.f32 %v15495_v13, %v9327_v23  ;;  %v9006_v23 = vpop.f32.mrf.mxu1  ;;  %v9059_v13 = vadd.f32 %v8920_v28, %v2881_v61 }
 0xa46   : > { %v15497_v34 = vpop.eup %15496  ;;  %v8928_v52 = vpop.f32.mrf.mxu0  ;;  %15520 = vrcp.f32 %v9182_v15  ;;  %14021 = vmatpush3.bf16.msra.mxu0 %v14451_v14  ;;  %v22214_v15 = vld [vmem:[#allocation335_spill] sm:$0xff] }
 0xa47   : > { %v15499_v31 = vpop.eup %15498  ;;  %v9184_v7 = vadd.f32 1.0, %v15497_v34  ;;  %v9062_v24 = vadd.f32 %v8928_v52, %v2889_v42  ;;  %v20634_v32 = vadd.f32 %v15491_v46, %v9343_v48  ;;  %14022 = vmatprep.subr.bf16.mxu0 %v14452_v59  ;;  %v2885_v34 = vadd.f32 %v22214_v15, %v18366_v58 }
 0xa48   : > { %v15501_v44 = vpop.eup %15500  ;;  %v20632_v16 = vpop.f32.mrf.mxu0  ;;  %v9266_v48 = vadd.f32 %v20567_v2, %v9003_v17  ;;  %v22215_v17 = vld [vmem:[#allocation236_spill] sm:$0xff] }
 0xa49   : > { %v15503_v39 = vpop.eup %15502  ;;  %15522 = vrcp.f32 %v9184_v7  ;;  %v12423_v25 = vmul.f32 -1.442695, %v9062_v24  ;;  %v20645_v46 = vpack.c.bf16 %v20634_v32, %v20623_v19  ;;  %v9328_v12 = vsub.f32 %v20324_v9, %v15501_v44  ;;  %v14454_v9 = vld [vmem:[%s21374_s8 + $0x18] sm:$0xff]  }
 0xa4a   : > { %v15505_v14 = vpop.eup %15504  ;;  %15524 = vpow2.f32 %v12421_v1  ;;  %v8932_v22 = vpop.f32.mrf.mxu0  ;;  %14023 = vmatpush3.bf16.msra.mxu0 %v14452_v59  ;;  %v9179_v52 = vadd.f32 1.0, %v15503_v39  ;;  %v3428_v29 = vadd.f32 %v22215_v17, %v18576_v60 }
 0xa4b   : > { %22213 = vst [vmem:[#allocation44_spill] sm:$0xff] %v20645_v46  ;;  %v15507_v21 = vpop.eup %15506  ;;  %v9064_v26 = vadd.f32 %v8932_v22, %v2893_v18  ;;  %9657 = vmatmul.mubr.bf16.gmra.mxu1 %v20645_v46  ;;  %14006 = vmatprep.mubr.bf16.mxu0 %v20645_v46  ;;  %v9344_v1 = vmul.f32 %v15499_v31, %v9328_v12  ;;  %v9181_v28 = vadd.f32 1.0, %v15505_v14  ;;  %15526 = vpow2.f32 %v12423_v25 }
 0xa4c   : > { %v15509_v42 = vpop.eup %15508  ;;  %9666 = vmatprep.mubr.bf16.mxu1 %v21458_v0  ;;  %14024 = vmatprep.subr.bf16.mxu0 %v14453_v10  ;;  %v9267_v31 = vadd.f32 %v20567_v2, %v9006_v23  ;;  %v12420_v22 = vmul.f32 -1.442695, %v9059_v13  ;;  %v9061_v12 = vadd.f32 %v8924_v51, %v2885_v34  ;;  %v14455_v23 = vld [vmem:[%s21374_s8 + $0x10] sm:$0xff]  }
 0xa4d   : > { %v15511_v7 = vpop.eup %15510  ;;  %v12425_v59 = vmul.f32 -1.442695, %v9064_v26  ;;  %v9329_v24 = vsub.f32 %v20339_v11, %v15509_v42  ;;  %v20661_v38 = vadd.f32 %v15501_v44, %v9344_v1  ;;  %v22216_v26 = vld [vmem:[#allocation242_spill] sm:$0xff] }
 0xa4e   : > { %v15513_v39 = vpop.eup %15512  ;;  %v9282_v61 = vmul.f32 %v15511_v7, %v9266_v48  ;;  %14025 = vmatpush3.bf16.msra.mxu0 %v14453_v10  ;;  %v3431_v11 = vadd.f32 %v22216_v26, %v18576_v60  ;;  %v22217_v48 = vld [vmem:[#allocation337_spill] sm:$0xff]  ;;  %v12422_v1 = vmul.f32 -1.442695, %v9061_v12  ;;  %v8934_v7 = vpop.f32.mrf.mxu0 }
 0xa4f   : > { %v15515_v18 = vpop.eup %15514  ;;  %15528 = vpow2.f32 %v12425_v59  ;;  %v9345_v25 = vmul.f32 %v15507_v21, %v9329_v24  ;;  %14026 = vmatprep.subr.bf16.mxu0 %v14454_v9  ;;  %v2891_v13 = vadd.f32 %v22217_v48, %v18366_v58  ;;  %v9183_v10 = vadd.f32 1.0, %v15513_v39  ;;  %v22219_v39 = vld [vmem:[#allocation233_spill] sm:$0xff]  ;;  %v13984_v26 = vpop.f32.mrf.mxu1 }
 0xa50   : > { %v15517_v14 = vpop.eup %15516  ;;  %15530 = vrcp.f32 %v9179_v52  ;;  %v9298_v15 = vadd.f32 %v9282_v61, %v3428_v29  ;;  %v9283_v46 = vmul.f32 %v15515_v18, %v9267_v31  ;;  %v9268_v52 = vadd.f32 %v20567_v2, %v20606_v56  ;;  %v14456_v56 = vld [vmem:[%s21374_s8 + $0x8] sm:$0xff]  }
 0xa51   : > { %v15519_v44 = vpop.eup %15518  ;;  %15532 = vrcp.f32 %v9181_v28  ;;  %v20670_v51 = vadd.f32 %v15509_v42, %v9345_v25  ;;  %v22218_v28 = vld [vmem:[#allocation339_spill] sm:$0xff]  ;;  %v9185_v17 = vadd.f32 1.0, %v15517_v14  ;;  %v3436_v29 = vadd.f32 %v22219_v39, %v18576_v60 }
 0xa52   : > { %15534 = vtanh.f32 %v9298_v15  ;;  %v9299_v21 = vadd.f32 %v9283_v46, %v3431_v11  ;;  %v9186_v34 = vadd.f32 1.0, %v15519_v44  ;;  %14027 = vmatpush3.bf16.msra.mxu0 %v14454_v9  ;;  %v2895_v42 = vadd.f32 %v22218_v28, %v18366_v58  ;;  %v14457_v15 = vld [vmem:[%s21374_s8] sm:$0xff]  }
 0xa53   : > { %15536 = vpow2.f32 %v12420_v22  ;;  %v20676_v59 = vpack.c.bf16 %v20670_v51, %v20661_v38  ;;  %v15521_v24 = vpop.eup %15520  ;;  %v9063_v46 = vadd.f32 %v20632_v16, %v2891_v13  ;;  %14028 = vmatprep.subr.bf16.mxu0 %v14455_v23  ;;  %v9269_v9 = vadd.f32 %v20567_v2, %v20630_v20  ;;  %v22220_v22 = vld [vmem:[#allocation239_spill] sm:$0xff] }
 0xa54   : > { %15538 = vtanh.f32 %v9299_v21  ;;  %v9284_v61 = vmul.f32 %v15521_v24, %v9268_v52  ;;  %v9065_v16 = vadd.f32 %v8934_v7, %v2895_v42  ;;  %v3439_v12 = vadd.f32 %v22220_v22, %v18576_v60  ;;  %v9019_v21 = vpop.f32.mrf.mxu1 }
 0xa55   : > { %15540 = vrcp.f32 %v9186_v34  ;;  %9667 = vmatmul.mubr.bf16.gmra.mxu1 %v20676_v59  ;;  %14007 = vmatmul.mubr.bf16.gmra.mxu0 %v20676_v59  ;;  %v12424_v11 = vmul.f32 -1.442695, %v9063_v46  ;;  %v9270_v46 = vadd.f32 %v20567_v2, %v9019_v21 }
 0xa56   : > { %v15523_v31 = vpop.eup %15522  ;;  %15542 = vrcp.f32 %v9183_v10  ;;  %9676 = vmatprep.mubr.bf16.mxu1 %v21458_v0  ;;  %v9300_v25 = vadd.f32 %v9284_v61, %v3436_v29  ;;  %14029 = vmatpush3.bf16.msra.mxu0 %v14455_v23  ;;  %v12426_v13 = vmul.f32 -1.442695, %v9065_v16  ;;  %v13985_v24 = vpop.f32.mrf.mxu1 }
 0xa57   : > { %v15525_v18 = vpop.eup %15524  ;;  %v9285_v14 = vmul.f32 %v15523_v31, %v9269_v9  ;;  %15544 = vpow2.f32 %v12422_v1  ;;  %14030 = vmatprep.subr.bf16.mxu0 %v14456_v56  ;;  %v22221_v9 = vld [vmem:[#allocation248_spill] sm:$0xff] }
 0xa58   : > { %15546 = vrcp.f32 %v9185_v17  ;;  %v9188_v20 = vadd.f32 1.0, %v15525_v18  ;;  %v15527_v48 = vpop.eup %15526  ;;  %v3444_v31 = vadd.f32 %v22221_v9, %v18576_v60  ;;  %v9022_v18 = vpop.f32.mrf.mxu1  ;;  %v9273_v9 = vadd.f32 %v20567_v2, %v13985_v24 }
 0xa59   : > { %15548 = vtanh.f32 %v9300_v25  ;;  %v9301_v44 = vadd.f32 %v9285_v14, %v3439_v12  ;;  %v9190_v10 = vadd.f32 1.0, %v15527_v48 }
 0xa5a   : > { %15550 = vrcp.f32 %v9188_v20  ;;  %14031 = vmatpush3.bf16.msra.mxu0 %v14456_v56 }
 0xa5b   : > { %15552 = vtanh.f32 %v9301_v44  ;;  %14032 = vmatprep.subr.bf16.mxu0 %v14457_v15 }
 0xa5c   : > { %v15529_v34 = vpop.eup %15528  ;;  %15554 = vpow2.f32 %v12424_v11 }
 0xa5d   : > { %v15531_v23 = vpop.eup %15530  ;;  %15556 = vrcp.f32 %v9190_v10  ;;  %v9192_v52 = vadd.f32 1.0, %v15529_v34  ;;  %v22222_v10 = vld [vmem:[#allocation254_spill] sm:$0xff] }
 0xa5e   : > { %v15533_v1 = vpop.eup %15532  ;;  %15558 = vpow2.f32 %v12426_v13  ;;  %14033 = vmatpush3.bf16.msra.mxu0 %v14457_v15  ;;  %v9271_v15 = vadd.f32 %v20567_v2, %v9022_v18  ;;  %v3447_v21 = vadd.f32 %v22222_v10, %v18576_v60 }
 0xa5f   : > { %v15535_v7 = vpop.eup %15534  ;;  %15560 = vrcp.f32 %v9192_v52 }
 0xa60   : > { %v15537_v28 = vpop.eup %15536  ;;  %v9330_v42 = vsub.f32 %v20362_v4, %v15535_v7 }
 0xa61   : > { %v15539_v17 = vpop.eup %15538  ;;  %v9187_v20 = vadd.f32 1.0, %v15537_v28 }
 0xa62   : > { %v15541_v39 = vpop.eup %15540  ;;  %v9331_v56 = vsub.f32 %v20367_v54, %v15539_v17  ;;  %v9346_v29 = vmul.f32 %v15531_v23, %v9330_v42 }
 0xa63   : > { %v15543_v61 = vpop.eup %15542  ;;  %v9286_v16 = vmul.f32 %v15541_v39, %v9270_v46 }
 0xa64   : > { %v15545_v22 = vpop.eup %15544  ;;  %v9347_v12 = vmul.f32 %v15533_v1, %v9331_v56  ;;  %v20701_v25 = vadd.f32 %v15535_v7, %v9346_v29  ;;  %v9272_v1 = vadd.f32 %v20567_v2, %v13984_v26 }
 0xa65   : > { %v15547_v14 = vpop.eup %15546  ;;  %v9302_v4 = vadd.f32 %v9286_v16, %v3444_v31  ;;  %v9189_v46 = vadd.f32 1.0, %v15545_v22  ;;  %v22224_v16 = vld [vmem:[#allocation251_spill] sm:$0xff] }
 0xa66   : > { %v15549_v11 = vpop.eup %15548  ;;  %v20704_v44 = vadd.f32 %v15539_v17, %v9347_v12  ;;  %v22223_v17 = vld [vmem:[#allocation245_spill] sm:$0xff]  ;;  %v3455_v18 = vadd.f32 %v22224_v16, %v18576_v60  ;;  %v22231_v16 = vld [vmem:[#allocation19_spill] sm:$0xff] }
 0xa67   : > { %v15551_v54 = vpop.eup %15550  ;;  %15562 = vtanh.f32 %v9302_v4  ;;  %v9332_v48 = vsub.f32 %v20376_v47, %v15549_v11  ;;  %v3452_v47 = vadd.f32 %v22223_v17, %v18576_v60 }
 0xa68   : > { %v15553_v13 = vpop.eup %15552  ;;  %v9287_v34 = vmul.f32 %v15551_v54, %v9271_v15  ;;  %v20711_v23 = vpack.c.bf16 %v20704_v44, %v20701_v25  ;;  %15564 = vrcp.f32 %v9187_v20 }
 0xa69   : > { %v15555_v52 = vpop.eup %15554  ;;  %v9333_v7 = vsub.f32 %v20386_v53, %v15553_v13  ;;  %v9348_v28 = vmul.f32 %v15543_v61, %v9332_v48 }
 0xa6a   : > { %v15557_v42 = vpop.eup %15556  ;;  %v9303_v39 = vadd.f32 %v9287_v34, %v3447_v21  ;;  %9677 = vmatmul.mubr.bf16.gmra.mxu1 %v20711_v23  ;;  %14010 = vmatprep.mubr.bf16.mxu0 %v20711_v23  ;;  %v9191_v61 = vadd.f32 1.0, %v15555_v52 }
 0xa6b   : > { %v15559_v56 = vpop.eup %15558  ;;  %v9288_v29 = vmul.f32 %v15557_v42, %v9272_v1  ;;  %9686 = vmatprep.mubr.bf16.mxu1 %v21458_v0  ;;  %v9349_v26 = vmul.f32 %v15547_v14, %v9333_v7  ;;  %v20721_v31 = vadd.f32 %v15549_v11, %v9348_v28 }
 0xa6c   : > { %v15561_v53 = vpop.eup %15560  ;;  %15566 = vtanh.f32 %v9303_v39  ;;  %v9193_v15 = vadd.f32 1.0, %v15559_v56 }
 0xa6d   : > { %v9304_v22 = vadd.f32 %v9288_v29, %v3452_v47  ;;  %v9289_v12 = vmul.f32 %v15561_v53, %v9273_v9  ;;  %v20725_v20 = vadd.f32 %v15553_v13, %v9349_v26  ;;  %15568 = vrcp.f32 %v9189_v46  ;;  %v22226_v9 = vld [vmem:[#allocation13_spill] sm:$0xff]  ;;  %v22227_v26 = vld [vmem:[#allocation14_spill] sm:$0xff] }
 0xa6e   : > { %v22228_v53 = vld [vmem:[#allocation17_spill] sm:$0xff] }
 0xa6f   : > { %15570 = vtanh.f32 %v9304_v22  ;;  %v9305_v4 = vadd.f32 %v9289_v12, %v3455_v18  ;;  %v20729_v24 = vpack.c.bf16 %v20725_v20, %v20721_v31  ;;  %v22232_v18 = vld [vmem:[#allocation20_spill] sm:$0xff]  ;;  %v22233_v22 = vld [vmem:[#allocation23_spill] sm:$0xff]  ;;  %v22234_v12 = vld [vmem:[#allocation22_spill] sm:$0xff] }
 0xa70   : > { %15572 = vrcp.f32 %v9191_v61  ;;  %v22229_v61 = vld [vmem:[#allocation16_spill] sm:$0xff] }
 0xa71   : > { %15574 = vtanh.f32 %v9305_v4  ;;  %14011 = vmatmul.mubr.bf16.gmra.mxu0 %v20729_v24  ;;  %v22235_v4 = vld [vmem:[#allocation27_spill] sm:$0xff] }
 0xa72   : > { %9687 = vmatmul.mubr.bf16.gmra.mxu1 %v20729_v24  ;;  %15576 = vrcp.f32 %v9193_v15  ;;  %v22236_v15 = vld [vmem:[#allocation28_spill] sm:$0xff] }
 0xa73   : > { %9696 = vmatprep.mubr.bf16.mxu1 %v21458_v0 }
 0xa74   : > { %v15563_v14 = vpop.eup %15562 }
 0xa75   : > { %v9334_v11 = vsub.f32 %v20395_v50, %v15563_v14  ;;  %v15565_v54 = vpop.eup %15564 }
 0xa77   : > { %v9350_v48 = vmul.f32 %v15565_v54, %v9334_v11  ;;  %v22238_v11 = vld [vmem:[#allocation33_spill] sm:$0xff]  ;;  %v22239_v54 = vld [vmem:[#allocation59_spill] sm:$0xff] }
 0xa79   : > { %v15567_v13 = vpop.eup %15566  ;;  %v20735_v10 = vadd.f32 %v15563_v14, %v9350_v48  ;;  %v22237_v14 = vld [vmem:[#allocation29_spill] sm:$0xff]  ;;  %v22240_v48 = vld [vmem:[#allocation68_spill] sm:$0xff] }
 0xa7a   : > { %v9335_v21 = vsub.f32 %v20399_v40, %v15567_v13  ;;  %v15569_v34 = vpop.eup %15568 }
 0xa7c   : > { %v15571_v52 = vpop.eup %15570  ;;  %v9351_v1 = vmul.f32 %v15569_v34, %v9335_v21  ;;  %v22242_v21 = vld [vmem:[#allocation76_spill] sm:$0xff] }
 0xa7d   : > { %v15573_v7 = vpop.eup %15572  ;;  %v9336_v28 = vsub.f32 %v20409_v5, %v15571_v52  ;;  %v22243_v34 = vld [vmem:[#allocation80_spill] sm:$0xff] }
 0xa7e   : > { %v15575_v42 = vpop.eup %15574  ;;  %v20739_v17 = vadd.f32 %v15567_v13, %v9351_v1  ;;  %v22241_v13 = vld [vmem:[#allocation70_spill] sm:$0xff] }
 0xa7f   : > { %v9337_v47 = vsub.f32 %v20412_v43, %v15575_v42  ;;  %v9352_v46 = vmul.f32 %v15573_v7, %v9336_v28  ;;  %v15577_v50 = vpop.eup %15576  ;;  %v22225_v43 = vld [vmem:[#allocation55_spill] sm:$0xff]  ;;  %v22245_v1 = vld [vmem:[#allocation78_spill] sm:$0xff]  ;;  %v22246_v7 = vld [vmem:[#allocation84_spill] sm:$0xff] }
 0xa80   : > { %v20744_v39 = vpack.c.bf16 %v20739_v17, %v20735_v10  ;;  %v22247_v28 = vld [vmem:[#allocation82_spill] sm:$0xff] }
 0xa81   : > { %v9353_v56 = vmul.f32 %v15577_v50, %v9337_v47  ;;  %v20746_v29 = vadd.f32 %v15571_v52, %v9352_v46  ;;  %v22244_v52 = vld [vmem:[#allocation74_spill] sm:$0xff]  ;;  %v22249_v47 = vld [vmem:[#allocation36_spill] sm:$0xff] }
 0xa82   : > { %9697 = vmatmul.mubr.bf16.gmra.mxu1 %v20744_v39  ;;  %14014 = vmatprep.mubr.bf16.mxu0 %v20744_v39  ;;  %v22250_v46 = vld [vmem:[#allocation86_spill] sm:$0xff]  ;;  %v22251_v50 = vld [vmem:[#allocation92_spill] sm:$0xff] }
 0xa83   : > { %9706 = vmatprep.mubr.bf16.mxu1 %v21458_v0  ;;  %v20751_v40 = vadd.f32 %v15575_v42, %v9353_v56  ;;  %v22230_v0 = vld [vmem:[#allocation15_spill] sm:$0xff]  ;;  %v22248_v42 = vld [vmem:[#allocation88_spill] sm:$0xff]  ;;  %v22252_v56 = vld [vmem:[#allocation38_spill] sm:$0xff] }
 0xa85   : > { %v20755_v5 = vpack.c.bf16 %v20751_v40, %v20746_v29 }
 0xa87   : > { %14015 = vmatmul.mubr.bf16.gmra.mxu0 %v20755_v5 }
 0xa88   : > { %14034 = vmatprep.mubr.bf16.mxu0 %v22225_v43  ;;  %v22253_v43 = vld [vmem:[#allocation90_spill] sm:$0xff] }
 0xa8a   : > { %9707 = vmatmul.mubr.bf16.gmra.mxu1 %v20755_v5 }
 0xa8f   : > { %14035 = vmatmul.mubr.bf16.vlgmr.msra.gmra.mxu0 %v22226_v9  ;;  %v22254_v9 = vld [vmem:[#allocation340_spill] sm:$0xff] }
 0xa90   : > { %14038 = vmatprep.mubr.bf16.mxu0 %v22227_v26  ;;  %v2899_v26 = vadd.f32 %v22254_v9, %v18359_v49  ;;  %v22262_v9 = vld [vmem:[#allocation345_spill] sm:$0xff] }
 0xa97   : > { %14039 = vmatmul.mubr.bf16.gmra.mxu0 %v22228_v53 }
 0xa98   : > { %14042 = vmatprep.mubr.bf16.mxu0 %v22229_v61 }
 0xa9f   : > { %14043 = vmatmul.mubr.bf16.gmra.mxu0 %v22230_v0 }
 0xaa0   : > { %14046 = vmatprep.mubr.bf16.mxu0 %v22231_v16  ;;  %v22255_v16 = vld [vmem:[#allocation342_spill] sm:$0xff] }
 0xaa7   : > { %14047 = vmatmul.mubr.bf16.gmra.mxu0 %v22232_v18  ;;  %v2903_v18 = vadd.f32 %v22255_v16, %v18359_v49 }
 0xaa8   : > { %14050 = vmatprep.mubr.bf16.mxu0 %v22233_v22 }
 0xaaf   : > { %14051 = vmatmul.mubr.bf16.gmra.mxu0 %v22234_v12 }
 0xab0   : > { %14054 = vmatprep.mubr.bf16.mxu0 %v22235_v4  ;;  %v22256_v4 = vld [vmem:[#allocation24_spill] sm:$0xff] }
 0xab7   : > { %14055 = vmatmul.mubr.bf16.gmra.mxu0 %v22236_v15 }
 0xab8   : > { %14058 = vmatprep.mubr.bf16.mxu0 %v22237_v14  ;;  %v22257_v14 = vld [vmem:[#allocation43_spill] sm:$0xff] }
 0xabf   : > { %14059 = vmatmul.mubr.bf16.gmra.mxu0 %v22238_v11 }
 0xac0   : > { %14062 = vmatprep.mubr.bf16.mxu0 %v22239_v54  ;;  %v22258_v54 = vld [vmem:[#allocation344_spill] sm:$0xff] }
 0xac7   : > { %14063 = vmatmul.mubr.bf16.gmra.mxu0 %v22240_v48  ;;  %v2909_v48 = vadd.f32 %v22258_v54, %v18359_v49 }
 0xac8   : > { %14066 = vmatprep.mubr.bf16.mxu0 %v22241_v13 }
 0xacf   : > { %14067 = vmatmul.mubr.bf16.gmra.mxu0 %v22242_v21 }
 0xad0   : > { %14070 = vmatprep.mubr.bf16.mxu0 %v22243_v34 }
 0xad7   : > { %14071 = vmatmul.mubr.bf16.gmra.mxu0 %v22244_v52  ;;  %v22259_v52 = vld [vmem:[#allocation341_spill] sm:$0xff] }
 0xad8   : > { %14074 = vmatprep.mubr.bf16.mxu0 %v22245_v1  ;;  %v2901_v1 = vadd.f32 %v22259_v52, %v18366_v58 }
 0xadf   : > { %14075 = vmatmul.mubr.bf16.gmra.mxu0 %v22246_v7 }
 0xae0   : > { %14078 = vmatprep.mubr.bf16.mxu0 %v22247_v28  ;;  %v22260_v28 = vld [vmem:[#allocation346_spill] sm:$0xff] }
 0xae7   : > { %14079 = vmatmul.mubr.bf16.gmra.mxu0 %v22248_v42  ;;  %v2913_v42 = vadd.f32 %v22260_v28, %v18359_v49 }
 0xae8   : > { %14082 = vmatprep.mubr.bf16.mxu0 %v22249_v47 }
 0xaef   : > { %14083 = vmatmul.mubr.bf16.gmra.mxu0 %v22250_v46  ;;  %v22261_v46 = vld [vmem:[#allocation343_spill] sm:$0xff] }
 0xaf0   : > { %14086 = vmatprep.mubr.bf16.mxu0 %v22251_v50  ;;  %v2905_v50 = vadd.f32 %v22261_v46, %v18366_v58 }
 0xaf7   : > { %14087 = vmatmul.mubr.bf16.gmra.mxu0 %v22252_v56 }
 0xaf8   : > { %14090 = vmatprep.mubr.bf16.mxu0 %v22253_v43  ;;  %v9638_v53 = vpop.f32.mrf.mxu1 }
 0xaf9   : > { %v9814_v61 = vadd.f32 %v9638_v53, %v2899_v26  ;;  %v2911_v26 = vadd.f32 %v22262_v9, %v18366_v58  ;;  %v22263_v53 = vld [vmem:[#allocation94_spill] sm:$0xff] }
 0xafa   : > { %v9640_v0 = vpop.f32.mrf.mxu1 }
 0xafb   : > { %v12451_v22 = vmul.f32 -1.442695, %v9814_v61  ;;  %v9815_v56 = vadd.f32 %v9640_v0, %v2901_v1  ;;  %v22265_v0 = vld [vmem:[#allocation18_spill] sm:$0xff] }
 0xafc   : > { %v9642_v12 = vpop.f32.mrf.mxu1  ;;  %v2919_v54 = vadd.f32 %v22265_v0, %v18359_v49 }
 0xafd   : > { %15578 = vpow2.f32 %v12451_v22  ;;  %v9816_v15 = vadd.f32 %v9642_v12, %v2903_v18 }
 0xafe   : > { %v9644_v11 = vpop.f32.mrf.mxu1 }
 0xaff   : > { %14091 = vmatmul.mubr.bf16.gmra.mxu0 %v22256_v4  ;;  %v12453_v13 = vmul.f32 -1.442695, %v9816_v15  ;;  %v9817_v16 = vadd.f32 %v9644_v11, %v2905_v50  ;;  %v12452_v4 = vmul.f32 -1.442695, %v9815_v56  ;;  %v22264_v15 = vld [vmem:[#allocation347_spill] sm:$0xff]  ;;  %v22266_v11 = vld [vmem:[#allocation348_spill] sm:$0xff] }
 0xb00   : > { %14094 = vmatprep.mubr.bf16.mxu0 %v22257_v14  ;;  %v2915_v14 = vadd.f32 %v22264_v15, %v18366_v58 }
 0xb01   : > { %v9648_v21 = vpop.f32.mrf.mxu1  ;;  %15580 = vpow2.f32 %v12453_v13  ;;  %v12454_v13 = vmul.f32 -1.442695, %v9817_v16  ;;  %v20814_v46 = vpop.f32.mrf.mxu0 }
 0xb02   : > { %v9818_v34 = vadd.f32 %v9648_v21, %v2909_v48 }
 0xb03   : > { %v9650_v7 = vpop.f32.mrf.mxu1 }
 0xb04   : > { %v12455_v47 = vmul.f32 -1.442695, %v9818_v34  ;;  %v9819_v22 = vadd.f32 %v9650_v7, %v2911_v26  ;;  %v2923_v7 = vadd.f32 %v22266_v11, %v18359_v49 }
 0xb05   : > { %v9652_v43 = vpop.f32.mrf.mxu1 }
 0xb06   : > { %15582 = vpow2.f32 %v12455_v47  ;;  %v9820_v61 = vadd.f32 %v9652_v43, %v2913_v42  ;;  %v12456_v52 = vmul.f32 -1.442695, %v9819_v22 }
 0xb07   : > { %14095 = vmatmul.mubr.bf16.gmra.mxu0 %v22263_v53  ;;  %v9654_v18 = vpop.f32.mrf.mxu1  ;;  %v22267_v53 = vld [vmem:[#allocation26_spill] sm:$0xff] }
 0xb08   : > { %14098 = vmatprep.mubr.bf16.mxu0 %v19988_v62  ;;  %v12457_v12 = vmul.f32 -1.442695, %v9820_v61  ;;  %v9821_v1 = vadd.f32 %v9654_v18, %v2915_v14  ;;  %v2921_v61 = vadd.f32 %v22267_v53, %v18366_v58  ;;  %v22268_v18 = vld [vmem:[#allocation30_spill] sm:$0xff]  ;;  %v22269_v14 = vld [vmem:[#allocation349_spill] sm:$0xff] }
 0xb09   : > { %v2929_v22 = vadd.f32 %v22268_v18, %v18359_v49  ;;  %v2925_v0 = vadd.f32 %v22269_v14, %v18366_v58 }
 0xb0a   : > { %15584 = vpow2.f32 %v12457_v12  ;;  %v15579_v48 = vpop.eup %15578  ;;  %v12458_v43 = vmul.f32 -1.442695, %v9821_v1 }
 0xb0b   : > { %v9658_v21 = vpop.f32.mrf.mxu1  ;;  %v9942_v34 = vadd.f32 1.0, %v15579_v48  ;;  %15586 = vpow2.f32 %v12452_v4 }
 0xb0c   : > { %v9822_v28 = vadd.f32 %v9658_v21, %v2919_v54  ;;  %v22270_v21 = vld [vmem:[#allocation350_spill] sm:$0xff] }
 0xb0d   : > { %v9660_v62 = vpop.f32.mrf.mxu1  ;;  %15588 = vrcp.f32 %v9942_v34  ;;  %v2933_v34 = vadd.f32 %v22270_v21, %v18359_v49 }
 0xb0e   : > { %v12459_v42 = vmul.f32 -1.442695, %v9822_v28  ;;  %v15581_v47 = vpop.eup %15580  ;;  %15590 = vpow2.f32 %v12454_v13  ;;  %v9823_v4 = vadd.f32 %v9660_v62, %v2921_v61  ;;  %v22271_v61 = vld [vmem:[#allocation260_spill] sm:$0xff] }
 0xb0f   : > { %14099 = vmatmul.mubr.bf16.gmra.mxu0 %v20014_v35  ;;  %v9662_v50 = vpop.f32.mrf.mxu1  ;;  %v9944_v56 = vadd.f32 1.0, %v15581_v47  ;;  %15592 = vpow2.f32 %v12456_v52 }
 0xb10   : > { %14102 = vmatprep.mubr.bf16.mxu0 %v20043_v30  ;;  %v9824_v9 = vadd.f32 %v9662_v50, %v2923_v7  ;;  %15594 = vpow2.f32 %v12459_v42  ;;  %v9751_v30 = vpop.f32.mrf.mxu0  ;;  %v12460_v11 = vmul.f32 -1.442695, %v9823_v4 }
 0xb11   : > { %v9664_v26 = vpop.f32.mrf.mxu1  ;;  %15596 = vrcp.f32 %v9944_v56  ;;  %v10038_v50 = vadd.f32 %v20567_v2, %v9751_v30 }
 0xb12   : > { %v12461_v16 = vmul.f32 -1.442695, %v9824_v9  ;;  %15598 = vpow2.f32 %v12458_v43  ;;  %v14005_v52 = vpop.f32.mrf.mxu0  ;;  %v9825_v1 = vadd.f32 %v9664_v26, %v2925_v0 }
 0xb13   : > { %v15583_v35 = vpop.eup %15582 }
 0xb14   : > { %v9946_v12 = vadd.f32 1.0, %v15583_v35  ;;  %15600 = vpow2.f32 %v12461_v16  ;;  %v9754_v56 = vpop.f32.mrf.mxu0  ;;  %v12462_v43 = vmul.f32 -1.442695, %v9825_v1  ;;  %v22272_v35 = vld [vmem:[#allocation31_spill] sm:$0xff] }
 0xb15   : > { %v9668_v15 = vpop.f32.mrf.mxu1  ;;  %v2931_v18 = vadd.f32 %v22272_v35, %v18366_v58  ;;  %v10039_v30 = vadd.f32 %v20567_v2, %v9754_v56 }
 0xb16   : > { %v9826_v54 = vadd.f32 %v9668_v15, %v2929_v22  ;;  %15602 = vrcp.f32 %v9946_v12 }
 0xb17   : > { %14103 = vmatmul.mubr.bf16.gmra.mxu0 %v20071_v36  ;;  %v9670_v48 = vpop.f32.mrf.mxu1  ;;  %v15585_v13 = vpop.eup %15584 }
 0xb18   : > { %14106 = vmatprep.mubr.bf16.mxu0 %v20107_v3  ;;  %v12463_v28 = vmul.f32 -1.442695, %v9826_v54  ;;  %v9948_v62 = vadd.f32 1.0, %v15585_v13  ;;  %v15587_v47 = vpop.eup %15586  ;;  %v3460_v3 = vadd.f32 %v22271_v61, %v18576_v60  ;;  %v9827_v54 = vadd.f32 %v9670_v48, %v2931_v18  ;;  %v22273_v13 = vld [vmem:[#allocation266_spill] sm:$0xff] }
 0xb19   : > { %v9672_v7 = vpop.f32.mrf.mxu1  ;;  %v9943_v12 = vadd.f32 1.0, %v15587_v47  ;;  %v3463_v21 = vadd.f32 %v22273_v13, %v18576_v60  ;;  %v20840_v47 = vpop.f32.mrf.mxu0 }
 0xb1a   : > { %15604 = vpow2.f32 %v12463_v28  ;;  %v9828_v42 = vadd.f32 %v9672_v7, %v2933_v34  ;;  %v15589_v36 = vpop.eup %15588 }
 0xb1b   : > { %15606 = vrcp.f32 %v9948_v62  ;;  %v15591_v53 = vpop.eup %15590  ;;  %v10054_v16 = vmul.f32 %v15589_v36, %v10038_v50  ;;  %v9674_v1 = vpop.f32.mrf.mxu1  ;;  %v22274_v62 = vld [vmem:[#allocation351_spill] sm:$0xff]  ;;  %v12464_v36 = vmul.f32 -1.442695, %v9827_v54 }
 0xb1c   : > { %v12465_v9 = vmul.f32 -1.442695, %v9828_v42  ;;  %15608 = vpow2.f32 %v12460_v11  ;;  %v15593_v26 = vpop.eup %15592  ;;  %v9945_v14 = vadd.f32 1.0, %v15591_v53  ;;  %v2935_v11 = vadd.f32 %v22274_v62, %v18366_v58 }
 0xb1d   : > { %v15595_v22 = vpop.eup %15594  ;;  %v10070_v4 = vadd.f32 %v10054_v16, %v3460_v3  ;;  %v9947_v42 = vadd.f32 1.0, %v15593_v26  ;;  %v9767_v26 = vpop.f32.mrf.mxu0 }
 0xb1e   : > { %15610 = vpow2.f32 %v12465_v9  ;;  %v15597_v15 = vpop.eup %15596  ;;  %v9950_v0 = vadd.f32 1.0, %v15595_v22  ;;  %v9829_v56 = vadd.f32 %v9674_v1, %v2935_v11 }
 0xb1f   : > { %14107 = vmatmul.mubr.bf16.gmra.mxu0 %v20122_v41  ;;  %15612 = vpow2.f32 %v12462_v43  ;;  %v10055_v34 = vmul.f32 %v15597_v15, %v10039_v30  ;;  %v15599_v28 = vpop.eup %15598  ;;  %v10040_v41 = vadd.f32 %v20567_v2, %v20814_v46  ;;  %v22275_v43 = vld [vmem:[#allocation257_spill] sm:$0xff]  ;;  %v10041_v46 = vadd.f32 %v20567_v2, %v14005_v52  ;;  %v22277_v30 = vld [vmem:[#allocation352_spill] sm:$0xff] }
 0xb20   : > { %14110 = vmatprep.mubr.bf16.mxu0 %v20135_v27  ;;  %15614 = vtanh.f32 %v10070_v4  ;;  %v3468_v9 = vadd.f32 %v22275_v43, %v18576_v60  ;;  %v9949_v16 = vadd.f32 1.0, %v15599_v28  ;;  %v12466_v22 = vmul.f32 -1.442695, %v9829_v56  ;;  %v20866_v43 = vld [vmem:[%s21373_s7] ss:$0 sm:$0xff] }
 0xb21   : > { %15616 = vrcp.f32 %v9950_v0  ;;  %v15601_v7 = vpop.eup %15600  ;;  %v10071_v27 = vadd.f32 %v10055_v34, %v3463_v21  ;;  %v2939_v15 = vadd.f32 %v22277_v30, %v18359_v49  ;;  %v22279_v34 = vld [vmem:[#allocation353_spill] sm:$0xff]  ;;  %v22284_v30 = vld [vmem:[#allocation278_spill] sm:$0xff] }
 0xb22   : > { %15618 = vrcp.f32 %v9943_v12  ;;  %v9952_v50 = vadd.f32 1.0, %v15601_v7  ;;  %v22276_v12 = vld [vmem:[#allocation263_spill] sm:$0xff]  ;;  %v2943_v1 = vadd.f32 %v22279_v34, %v18359_v49 }
 0xb23   : > { %v15603_v48 = vpop.eup %15602  ;;  %15620 = vrcp.f32 %v9945_v14  ;;  %v3471_v4 = vadd.f32 %v22276_v12, %v18576_v60  ;;  %v22283_v12 = vld [vmem:[#allocation272_spill] sm:$0xff] }
 0xb24   : > { %v10056_v53 = vmul.f32 %v15603_v48, %v10040_v41  ;;  %15622 = vtanh.f32 %v10071_v27  ;;  %v22280_v48 = vld [vmem:[#allocation269_spill] sm:$0xff] }
 0xb25   : > { %15624 = vrcp.f32 %v9952_v50  ;;  %v20859_v50 = vadd.f32 %v22280_v48, %v18576_v60 }
 0xb26   : > { %v10072_v3 = vadd.f32 %v10056_v53, %v3468_v9  ;;  %15626 = vrcp.f32 %v9947_v42  ;;  %v10042_v9 = vadd.f32 %v20866_v43, %v9767_v26  ;;  %v22285_v26 = vld [vmem:[#allocation39_spill] sm:$0xff] }
 0xb27   : > { %v15605_v61 = vpop.eup %15604  ;;  %14111 = vmatmul.mubr.bf16.gmra.mxu0 %v20147_v45  ;;  %15628 = vpow2.f32 %v12464_v36  ;;  %v22278_v45 = vld [vmem:[#allocation35_spill] sm:$0xff]  ;;  %v22281_v36 = vld [vmem:[#allocation354_spill] sm:$0xff] }
 0xb28   : > { %v15607_v35 = vpop.eup %15606  ;;  %v9954_v18 = vadd.f32 1.0, %v15605_v61  ;;  %14114 = vmatprep.mubr.bf16.mxu0 %v20269_v55  ;;  %15630 = vtanh.f32 %v10072_v3  ;;  %v2941_v54 = vadd.f32 %v22278_v45, %v18366_v58  ;;  %v20853_v55 = vpop.f32.mrf.mxu0  ;;  %v2945_v56 = vadd.f32 %v22281_v36, %v18366_v58 }
 0xb29   : > { %v10057_v14 = vmul.f32 %v15607_v35, %v10041_v46  ;;  %v15609_v0 = vpop.eup %15608  ;;  %v22282_v46 = vld [vmem:[#allocation102_spill] sm:$0xff] }
 0xb2a   : > { %15632 = vrcp.f32 %v9954_v18  ;;  %v9678_v2 = vpop.f32.mrf.mxu1  ;;  %v9951_v7 = vadd.f32 1.0, %v15609_v0  ;;  %v9770_v3 = vpop.f32.mrf.mxu0 }
 0xb2b   : > { %v15611_v52 = vpop.eup %15610  ;;  %v10073_v13 = vadd.f32 %v10057_v14, %v3471_v4  ;;  %15634 = vrcp.f32 %v9949_v16  ;;  %v9830_v21 = vadd.f32 %v9678_v2, %v2939_v15  ;;  %v3476_v4 = vadd.f32 %v22283_v12, %v18576_v60  ;;  %v22286_v2 = vld [vmem:[#allocation108_spill] sm:$0xff] }
 0xb2c   : > { %v9956_v28 = vadd.f32 1.0, %v15611_v52  ;;  %15636 = vpow2.f32 %v12466_v22  ;;  %v9680_v62 = vpop.f32.mrf.mxu1  ;;  %v15613_v11 = vpop.eup %15612  ;;  %v3479_v15 = vadd.f32 %v22284_v30, %v18576_v60  ;;  %v2949_v14 = vadd.f32 %v22285_v26, %v18359_v49 }
 0xb2d   : > { %15638 = vtanh.f32 %v10073_v13  ;;  %v12467_v41 = vmul.f32 -1.442695, %v9830_v21  ;;  %v9831_v42 = vadd.f32 %v9680_v62, %v2941_v54  ;;  %v15615_v27 = vpop.eup %15614  ;;  %v9953_v34 = vadd.f32 1.0, %v15613_v11 }
 0xb2e   : > { %15640 = vrcp.f32 %v9956_v28  ;;  %v9682_v53 = vpop.f32.mrf.mxu1  ;;  %v15617_v61 = vpop.eup %15616  ;;  %v10102_v18 = vsub.f32 %v20572_v8, %v15615_v27  ;;  %v10043_v28 = vadd.f32 %v20866_v43, %v9770_v3 }
 0xb2f   : > { %15642 = vpow2.f32 %v12467_v41  ;;  %14115 = vmatmul.mubr.bf16.gmra.mxu0 %v22282_v46  ;;  %v12468_v16 = vmul.f32 -1.442695, %v9831_v42  ;;  %v9832_v35 = vadd.f32 %v9682_v53, %v2943_v1  ;;  %v15619_v22 = vpop.eup %15618  ;;  %v10058_v0 = vmul.f32 %v15617_v61, %v10042_v9  ;;  %v22287_v42 = vld [vmem:[#allocation355_spill] sm:$0xff] }
 0xb30   : > { %14118 = vmatprep.mubr.bf16.mxu0 %v22286_v2  ;;  %v9684_v52 = vpop.f32.mrf.mxu1  ;;  %v15621_v45 = vpop.eup %15620  ;;  %15644 = vrcp.f32 %v9951_v7  ;;  %v10118_v8 = vmul.f32 %v15619_v22, %v10102_v18  ;;  %v2951_v48 = vadd.f32 %v22287_v42, %v18366_v58  ;;  %v22288_v7 = vld [vmem:[#allocation40_spill] sm:$0xff] }
 0xb31   : > { %v12469_v54 = vmul.f32 -1.442695, %v9832_v35  ;;  %v9833_v13 = vadd.f32 %v9684_v52, %v2945_v56  ;;  %v15623_v21 = vpop.eup %15622  ;;  %v10074_v1 = vadd.f32 %v10058_v0, %v3476_v4  ;;  %15646 = vpow2.f32 %v12468_v16  ;;  %v22289_v4 = vld [vmem:[#allocation356_spill] sm:$0xff]  ;;  %v22290_v0 = vld [vmem:[#allocation106_spill] sm:$0xff] }
 0xb32   : > { %v9688_v62 = vpop.f32.mrf.mxu1  ;;  %v15625_v41 = vpop.eup %15624  ;;  %v10103_v9 = vsub.f32 %v20581_v6, %v15623_v21  ;;  %v2953_v56 = vadd.f32 %v22288_v7, %v18359_v49  ;;  %v20885_v46 = vadd.f32 %v15615_v27, %v10118_v8  ;;  %v2955_v30 = vadd.f32 %v22289_v4, %v18366_v58 }
 0xb33   : > { %15648 = vpow2.f32 %v12469_v54  ;;  %v9834_v36 = vadd.f32 %v9688_v62, %v2949_v14  ;;  %v15627_v53 = vpop.eup %15626  ;;  %v10059_v11 = vmul.f32 %v15625_v41, %v10043_v28  ;;  %v12470_v16 = vmul.f32 -1.442695, %v9833_v13  ;;  %v20902_v28 = vpop.f32.mrf.mxu0 }
 0xb34   : > { %15650 = vtanh.f32 %v10074_v1  ;;  %v9690_v61 = vpop.f32.mrf.mxu1  ;;  %v15629_v3 = vpop.eup %15628  ;;  %v10119_v22 = vmul.f32 %v15621_v45, %v10103_v9  ;;  %v10044_v6 = vadd.f32 %v20866_v43, %v20840_v47  ;;  %10167 = vst [vmem:[%s20893_s12] sm:$0xff] %v20885_v46 }
 0xb35   : > { %v12471_v35 = vmul.f32 -1.442695, %v9834_v36  ;;  %v9835_v18 = vadd.f32 %v9690_v61, %v2951_v48  ;;  %v15631_v12 = vpop.eup %15630  ;;  %15652 = vrcp.f32 %v9953_v34  ;;  %v10075_v26 = vadd.f32 %v10059_v11, %v3479_v15  ;;  %v22291_v15 = vld [vmem:[#allocation110_spill] sm:$0xff]  ;;  %v22292_v61 = vld [vmem:[#allocation275_spill] sm:$0xff] }
 0xb36   : > { %v9692_v14 = vpop.f32.mrf.mxu1  ;;  %v20898_v45 = vadd.f32 %v15623_v21, %v10119_v22  ;;  %v9955_v47 = vadd.f32 1.0, %v15629_v3  ;;  %v10104_v34 = vsub.f32 %v20597_v33, %v15631_v12  ;;  %v10045_v36 = vadd.f32 %v20866_v43, %v20853_v55 }
 0xb37   : > { %v15633_v27 = vpop.eup %15632  ;;  %15654 = vpow2.f32 %v12471_v35  ;;  %14119 = vmatmul.mubr.bf16.gmra.mxu0 %v22290_v0  ;;  %v12472_v2 = vmul.f32 -1.442695, %v9835_v18  ;;  %v9836_v52 = vadd.f32 %v9692_v14, %v2953_v56  ;;  %v3487_v3 = vadd.f32 %v22292_v61, %v18576_v60  ;;  %v20916_v18 = vpop.f32.mrf.mxu0 }
 0xb38   : > { %v15635_v54 = vpop.eup %15634  ;;  %v10060_v13 = vmul.f32 %v15633_v27, %v10044_v6  ;;  %15656 = vtanh.f32 %v10075_v26  ;;  %14122 = vmatprep.mubr.bf16.mxu0 %v22291_v15  ;;  %v9694_v8 = vpop.f32.mrf.mxu1  ;;  %10168 = vst [vmem:[%s20893_s12 + $0x8] sm:$0xff] %v20898_v45  ;;  %v10367_v21 = vpack.c.bf16 %v20898_v45, %v20885_v46  ;;  %v10120_v9 = vmul.f32 %v15627_v53, %v10104_v34  ;;  %v22294_v26 = vld [vmem:[#allocation50_spill] sm:$0xff]  ;;  %v22295_v27 = vld [vmem:[#allocation357_spill] sm:$0xff] }
 0xb39   : > { %v15637_v1 = vpop.eup %15636  ;;  %15658 = vpow2.f32 %v12470_v16  ;;  %v12473_v62 = vmul.f32 -1.442695, %v9836_v52  ;;  %v9837_v41 = vadd.f32 %v9694_v8, %v2955_v30  ;;  %v22293_v30 = vld [vmem:[#allocation113_spill] sm:$0xff]  ;;  %v2959_v0 = vadd.f32 %v22295_v27, %v18359_v49  ;;  %v20926_v52 = vpop.f32.mrf.mxu0  ;;  %v22296_v34 = vld [vmem:[#allocation358_spill] sm:$0xff] }
 0xb3a   : > { %v15639_v42 = vpop.eup %15638  ;;  %v10076_v48 = vadd.f32 %v10060_v13, %v20859_v50  ;;  %15660 = vpow2.f32 %v12472_v2  ;;  %v20914_v35 = vadd.f32 %v15631_v12, %v10120_v9  ;;  %v9957_v4 = vadd.f32 1.0, %v15637_v1 }
 0xb3b   : > { %v15641_v33 = vpop.eup %15640  ;;  %15662 = vpow2.f32 %v12473_v62  ;;  %v12474_v7 = vmul.f32 -1.442695, %v9837_v41  ;;  %v10105_v56 = vsub.f32 %v20604_v37, %v15639_v42  ;;  %v2961_v1 = vadd.f32 %v22296_v34, %v18366_v58  ;;  %v9786_v61 = vpop.f32.mrf.mxu0 }
 0xb3c   : > { %v15643_v11 = vpop.eup %15642  ;;  %15664 = vtanh.f32 %v10076_v48  ;;  %v10061_v16 = vmul.f32 %v15641_v33, %v10045_v36  ;;  %10169 = vst [vmem:[%s20893_s12 + $0x10] sm:$0xff] %v20914_v35 }
 0xb3d   : > { %15666 = vrcp.f32 %v9955_v47  ;;  %v9958_v50 = vadd.f32 1.0, %v15643_v11  ;;  %v10121_v55 = vmul.f32 %v15635_v54, %v10105_v56  ;;  %v15645_v53 = vpop.eup %15644 }
 0xb3e   : > { %v10077_v22 = vadd.f32 %v10061_v16, %v3487_v3  ;;  %15668 = vpow2.f32 %v12474_v7  ;;  %v15647_v37 = vpop.eup %15646  ;;  %v22298_v7 = vld [vmem:[#allocation47_spill] sm:$0xff] }
 0xb3f   : > { %15670 = vrcp.f32 %v9958_v50  ;;  %14123 = vmatmul.mubr.bf16.gmra.mxu0 %v22293_v30  ;;  %v20921_v6 = vadd.f32 %v15639_v42, %v10121_v55  ;;  %v9959_v13 = vadd.f32 1.0, %v15647_v37  ;;  %v22297_v42 = vld [vmem:[#allocation284_spill] sm:$0xff]  ;;  %v2963_v56 = vadd.f32 %v22298_v7, %v18359_v49  ;;  %v22299_v50 = vld [vmem:[#allocation359_spill] sm:$0xff]  ;;  %v22300_v30 = vld [vmem:[#allocation45_spill] sm:$0xff] }
 0xb40   : > { %v15649_v12 = vpop.eup %15648  ;;  %15672 = vtanh.f32 %v10077_v22  ;;  %14126 = vmatprep.mubr.bf16.mxu0 %v22294_v26  ;;  %v20937_v48 = vadd.f32 %v22297_v42, %v18576_v60  ;;  %v2965_v55 = vadd.f32 %v22299_v50, %v18366_v58 }
 0xb41   : > { %v15651_v14 = vpop.eup %15650  ;;  %v9960_v2 = vadd.f32 1.0, %v15649_v12  ;;  %10170 = vst [vmem:[%s20893_s12 + $0x18] sm:$0xff] %v20921_v6  ;;  %v10368_v54 = vpack.c.bf16 %v20921_v6, %v20914_v35  ;;  %15674 = vrcp.f32 %v9957_v4  ;;  %v2969_v12 = vadd.f32 %v22300_v30, %v18359_v49 }
 0xb42   : > { %v9698_v47 = vpop.f32.mrf.mxu1  ;;  %v10106_v15 = vsub.f32 %v20623_v19, %v15651_v14  ;;  %v15653_v8 = vpop.eup %15652 }
 0xb43   : > { %15676 = vrcp.f32 %v9960_v2  ;;  %v9838_v62 = vadd.f32 %v9698_v47, %v2959_v0  ;;  %v22301_v2 = vld [vmem:[#allocation116_spill] sm:$0xff] }
 0xb44   : > { %v15655_v41 = vpop.eup %15654  ;;  %v9700_v36 = vpop.f32.mrf.mxu1  ;;  %v10122_v9 = vmul.f32 %v15645_v53, %v10106_v15  ;;  %15678 = vrcp.f32 %v9959_v13  ;;  %v22302_v13 = vld [vmem:[#allocation49_spill] sm:$0xff] }
 0xb45   : > { %v15657_v33 = vpop.eup %15656  ;;  %v9962_v11 = vadd.f32 1.0, %v15655_v41  ;;  %v12475_v19 = vmul.f32 -1.442695, %v9838_v62  ;;  %v9839_v3 = vadd.f32 %v9700_v36, %v2961_v1  ;;  %v2971_v15 = vadd.f32 %v22302_v13, %v18366_v58 }
 0xb46   : > { %v15659_v16 = vpop.eup %15658  ;;  %v9702_v22 = vpop.f32.mrf.mxu1  ;;  %v10107_v4 = vsub.f32 %v20634_v32, %v15657_v33  ;;  %v20944_v37 = vadd.f32 %v15651_v14, %v10122_v9  ;;  %v22303_v32 = vld [vmem:[#allocation52_spill] sm:$0xff] }
 0xb47   : > { %v15661_v53 = vpop.eup %15660  ;;  %15680 = vrcp.f32 %v9962_v11  ;;  %v12476_v26 = vmul.f32 -1.442695, %v9839_v3  ;;  %v9840_v27 = vadd.f32 %v9702_v22, %v2963_v56  ;;  %v20948_v0 = vpop.f32.mrf.mxu0  ;;  %14127 = vmatmul.mubr.bf16.gmra.mxu0 %v22301_v2  ;;  %v2973_v34 = vadd.f32 %v22303_v32, %v18359_v49  ;;  %v22304_v11 = vld [vmem:[#allocation360_spill] sm:$0xff] }
 0xb48   : > { %v15663_v47 = vpop.eup %15662  ;;  %15682 = vpow2.f32 %v12475_v19  ;;  %v9704_v14 = vpop.f32.mrf.mxu1  ;;  %14130 = vmatprep.mubr.bf16.mxu0 %v20592_v57  ;;  %v10123_v1 = vmul.f32 %v15653_v8, %v10107_v4  ;;  %10171 = vst [vmem:[%s20893_s12 + $0x20] sm:$0xff] %v20944_v37  ;;  %v9961_v41 = vadd.f32 1.0, %v15659_v16  ;;  %v2975_v3 = vadd.f32 %v22304_v11, %v18366_v58  ;;  %v22306_v11 = vld [vmem:[#allocation44_spill] sm:$0xff] }
 0xb49   : > { %v15665_v62 = vpop.eup %15664  ;;  %v9964_v42 = vadd.f32 1.0, %v15663_v47  ;;  %v12477_v36 = vmul.f32 -1.442695, %v9840_v27  ;;  %v9841_v9 = vadd.f32 %v9704_v14, %v2965_v55  ;;  %v20958_v7 = vpop.f32.mrf.mxu0  ;;  %15684 = vpow2.f32 %v12476_v26 }
 0xb4a   : > { %v15667_v56 = vpop.eup %15666  ;;  %v9708_v49 = vpop.f32.mrf.mxu1  ;;  %v20962_v19 = vadd.f32 %v15657_v33, %v10123_v1  ;;  %v10108_v57 = vsub.f32 %v20661_v38, %v15665_v62  ;;  %v10046_v16 = vadd.f32 %v20866_v43, %v20916_v18  ;;  %v9963_v30 = vadd.f32 1.0, %v15661_v53 }
 0xb4b   : > { %v15669_v8 = vpop.eup %15668  ;;  %15686 = vrcp.f32 %v9964_v42  ;;  %v12478_v50 = vmul.f32 -1.442695, %v9841_v9  ;;  %v9842_v55 = vadd.f32 %v9708_v49, %v2969_v12  ;;  %v20967_v22 = vpop.f32.mrf.mxu0  ;;  %v10047_v12 = vadd.f32 %v20866_v43, %v9786_v61 }
 0xb4c   : > { %v15671_v4 = vpop.eup %15670  ;;  %15688 = vpow2.f32 %v12477_v36  ;;  %v9710_v27 = vpop.f32.mrf.mxu1  ;;  %10172 = vst [vmem:[%s20893_s12 + $0x28] sm:$0xff] %v20962_v19  ;;  %v10369_v58 = vpack.c.bf16 %v20962_v19, %v20944_v37  ;;  %v10124_v33 = vmul.f32 %v15667_v56, %v10108_v57  ;;  %v9965_v9 = vadd.f32 1.0, %v15669_v8 }
 0xb4d   : > { %v15673_v38 = vpop.eup %15672  ;;  %15690 = vrcp.f32 %v9961_v41  ;;  %v10062_v26 = vmul.f32 %v15671_v4, %v10046_v16  ;;  %v12479_v2 = vmul.f32 -1.442695, %v9842_v55  ;;  %v9843_v18 = vadd.f32 %v9710_v27, %v2971_v15  ;;  %v20973_v47 = vpop.f32.mrf.mxu0  ;;  %v20983_v15 = vld [vmem:[%s21375_s9] ss:$0 sm:$0xff] }
 0xb4e   : > { %15692 = vpow2.f32 %v12478_v50  ;;  %v9712_v13 = vpop.f32.mrf.mxu1  ;;  %v10109_v53 = vsub.f32 %v20670_v51, %v15673_v38  ;;  %v20977_v32 = vadd.f32 %v15665_v62, %v10124_v33  ;;  %v15675_v14 = vpop.eup %15674  ;;  %v22305_v51 = vld [vmem:[#allocation290_spill] sm:$0xff]  ;;  %v10048_v8 = vadd.f32 %v20866_v43, %v20902_v28 }
 0xb4f   : > { %v10078_v1 = vadd.f32 %v10062_v26, %v20937_v48  ;;  %15694 = vpow2.f32 %v12479_v2  ;;  %v12480_v42 = vmul.f32 -1.442695, %v9843_v18  ;;  %v9844_v41 = vadd.f32 %v9712_v13, %v2973_v34  ;;  %v14036_v36 = vpop.f32.mrf.mxu0  ;;  %14131 = vmatmul.mubr.bf16.gmra.mxu0 %v20610_v63 }
 0xb50   : > { %v15677_v61 = vpop.eup %15676  ;;  %v3495_v62 = vadd.f32 %v22305_v51, %v18576_v60  ;;  %15696 = vrcp.f32 %v9963_v30  ;;  %v9714_v56 = vpop.f32.mrf.mxu1  ;;  %14134 = vmatprep.mubr.bf16.mxu0 %v22306_v11  ;;  %v10125_v48 = vmul.f32 %v15675_v14, %v10109_v53  ;;  %10173 = vst [vmem:[%s20893_s12 + $0x30] sm:$0xff] %v20977_v32  ;;  %v10489_v63 = vadd.f32 %v14036_v36, %v20983_v15  ;;  %v22308_v51 = vld [vmem:[#allocation287_spill] sm:$0xff] }
 0xb51   : > { %15698 = vtanh.f32 %v10078_v1  ;;  %v10063_v34 = vmul.f32 %v15677_v61, %v10047_v12  ;;  %v12481_v49 = vmul.f32 -1.442695, %v9844_v41  ;;  %v9845_v57 = vadd.f32 %v9714_v56, %v2975_v3  ;;  %v10480_v16 = vpop.f32.mrf.mxu0  ;;  %v20994_v55 = vpop.eup %15678 }
 0xb52   : > { %15700 = vpow2.f32 %v12480_v42  ;;  %v20992_v50 = vadd.f32 %v15673_v38, %v10125_v48  ;;  %v22307_v38 = vld [vmem:[#allocation281_spill] sm:$0xff]  ;;  %v10481_v28 = vadd.f32 %v20983_v15, %v10480_v16  ;;  %v10049_v1 = vadd.f32 %v20866_v43, %v20926_v52 }
 0xb53   : > { %v10079_v4 = vadd.f32 %v10063_v34, %v3495_v62  ;;  %15702 = vpow2.f32 %v12481_v49  ;;  %v12482_v30 = vmul.f32 -1.442695, %v9845_v57  ;;  %v14037_v27 = vpop.f32.mrf.mxu0  ;;  %v3500_v2 = vadd.f32 %v22307_v38, %v18576_v60 }
 0xb54   : > { %v15681_v33 = vpop.eup %15680  ;;  %15704 = vrcp.f32 %v9965_v9  ;;  %10174 = vst [vmem:[%s20893_s12 + $0x38] sm:$0xff] %v20992_v50  ;;  %v10370_v3 = vpack.c.bf16 %v20992_v50, %v20977_v32  ;;  %v10492_v42 = vadd.f32 %v14037_v27, %v20983_v15  ;;  %v3503_v62 = vadd.f32 %v22308_v51, %v18576_v60 }
 0xb55   : > { %v15683_v26 = vpop.eup %15682  ;;  %v10064_v18 = vmul.f32 %v15681_v33, %v10048_v8  ;;  %15706 = vtanh.f32 %v10079_v4  ;;  %v10483_v12 = vpop.f32.mrf.mxu0 }
 0xb56   : > { %v9966_v13 = vadd.f32 1.0, %v15683_v26  ;;  %15708 = vtanh.f32 %v10489_v63  ;;  %v15685_v53 = vpop.eup %15684  ;;  %v10484_v16 = vadd.f32 %v20983_v15, %v10483_v12 }
 0xb57   : > { %v10080_v14 = vadd.f32 %v10064_v18, %v3500_v2  ;;  %15710 = vpow2.f32 %v12482_v30  ;;  %v14040_v41 = vpop.f32.mrf.mxu0  ;;  %14135 = vmatmul.mubr.bf16.gmra.mxu0 %v20676_v59  ;;  %v9967_v48 = vadd.f32 1.0, %v15685_v53 }
 0xb58   : > { %v15687_v36 = vpop.eup %15686  ;;  %15712 = vrcp.f32 %v9966_v13  ;;  %14138 = vmatprep.mubr.bf16.mxu0 %v20711_v23  ;;  %v10505_v27 = vadd.f32 %v14040_v41, %v20983_v15 }
 0xb59   : > { %v15689_v61 = vpop.eup %15688  ;;  %15714 = vtanh.f32 %v10080_v14  ;;  %v10065_v9 = vmul.f32 %v15687_v36, %v10049_v1  ;;  %v10496_v56 = vpop.f32.mrf.mxu0 }
 0xb5a   : > { %v15691_v11 = vpop.eup %15690  ;;  %v9968_v52 = vadd.f32 1.0, %v15689_v61  ;;  %15716 = vtanh.f32 %v10481_v28 }
 0xb5b   : > { %v15693_v34 = vpop.eup %15692  ;;  %v10081_v49 = vadd.f32 %v10065_v9, %v3503_v62  ;;  %15718 = vtanh.f32 %v10492_v42  ;;  %v14041_v57 = vpop.f32.mrf.mxu0 }
 0xb5c   : > { %v15695_v59 = vpop.eup %15694  ;;  %15720 = vrcp.f32 %v9968_v52  ;;  %v9969_v63 = vadd.f32 1.0, %v15693_v34  ;;  %v10508_v28 = vadd.f32 %v14041_v57, %v20983_v15  ;;  %v22309_v52 = vld [vmem:[#allocation296_spill] sm:$0xff]  ;;  %v10051_v57 = vadd.f32 %v20866_v43, %v20973_v47 }
 0xb5d   : > { %v21013_v23 = vpop.eup %15696  ;;  %15722 = vtanh.f32 %v10081_v49  ;;  %v9970_v8 = vadd.f32 1.0, %v15695_v59  ;;  %v10499_v4 = vpop.f32.mrf.mxu0  ;;  %v3508_v34 = vadd.f32 %v22309_v52, %v18576_v60 }
 0xb5e   : > { %v15699_v30 = vpop.eup %15698  ;;  %15724 = vrcp.f32 %v9967_v48  ;;  %v10500_v42 = vadd.f32 %v20983_v15, %v10499_v4 }
 0xb5f   : > { %v15701_v33 = vpop.eup %15700  ;;  %15726 = vrcp.f32 %v9970_v8  ;;  %v14044_v26 = vpop.f32.mrf.mxu0  ;;  %14139 = vmatmul.mubr.bf16.gmra.mxu0 %v20729_v24  ;;  %v10110_v38 = vsub.f32 %v20701_v25, %v15699_v30  ;;  %v10497_v24 = vadd.f32 %v20983_v15, %v10496_v56 }
 0xb60   : > { %v15703_v2 = vpop.eup %15702  ;;  %v9971_v18 = vadd.f32 1.0, %v15701_v33  ;;  %15728 = vtanh.f32 %v10484_v16  ;;  %14142 = vmatprep.mubr.bf16.mxu0 %v20744_v39  ;;  %v10521_v51 = vadd.f32 %v14044_v26, %v20983_v15 }
 0xb61   : > { %v21019_v12 = vpop.eup %15704  ;;  %15730 = vrcp.f32 %v9969_v63  ;;  %v9972_v13 = vadd.f32 1.0, %v15703_v2  ;;  %v10512_v53 = vpop.f32.mrf.mxu0  ;;  %v10126_v14 = vmul.f32 %v20994_v55, %v10110_v38  ;;  %v10050_v55 = vadd.f32 %v20866_v43, %v20958_v7  ;;  %v22310_v2 = vld [vmem:[#allocation302_spill] sm:$0xff] }
 0xb62   : > { %v15707_v1 = vpop.eup %15706  ;;  %15732 = vtanh.f32 %v10505_v27  ;;  %v10513_v9 = vadd.f32 %v20983_v15, %v10512_v53 }
 0xb63   : > { %v15709_v25 = vpop.eup %15708  ;;  %15734 = vrcp.f32 %v9972_v13  ;;  %v14045_v39 = vpop.f32.mrf.mxu0  ;;  %v10111_v41 = vsub.f32 %v20704_v44, %v15707_v1  ;;  %v21026_v36 = vadd.f32 %v15699_v30, %v10126_v14  ;;  %v10052_v13 = vadd.f32 %v20866_v43, %v20948_v0 }
 0xb64   : > { %v21028_v61 = vpop.eup %15710  ;;  %15736 = vrcp.f32 %v9971_v18  ;;  %v10524_v59 = vadd.f32 %v14045_v39, %v20983_v15  ;;  %v3511_v18 = vadd.f32 %v22310_v2, %v18576_v60 }
 0xb65   : > { %v15713_v62 = vpop.eup %15712  ;;  %15738 = vtanh.f32 %v10508_v28  ;;  %v10515_v56 = vpop.f32.mrf.mxu0  ;;  %v10127_v48 = vmul.f32 %v15691_v11, %v10111_v41  ;;  %10175 = vst [vmem:[%s20893_s12 + $0x40] sm:$0xff] %v21026_v36 }
 0xb66   : > { %v15715_v44 = vpop.eup %15714  ;;  %v10066_v49 = vmul.f32 %v15713_v62, %v10050_v55  ;;  %15740 = vtanh.f32 %v10497_v24  ;;  %v10516_v30 = vadd.f32 %v20983_v15, %v10515_v56 }
 0xb67   : > { %v15717_v7 = vpop.eup %15716  ;;  %15742 = vtanh.f32 %v10500_v42  ;;  %v14048_v16 = vpop.f32.mrf.mxu0  ;;  %14143 = vmatmul.mubr.bf16.gmra.mxu0 %v20755_v5  ;;  %v21043_v11 = vadd.f32 %v15707_v1, %v10127_v48  ;;  %v10112_v63 = vsub.f32 %v20721_v31, %v15715_v44 }
 0xb68   : > { %v15719_v8 = vpop.eup %15718  ;;  %v10082_v4 = vadd.f32 %v10066_v49, %v3508_v34  ;;  %15744 = vtanh.f32 %v10521_v51  ;;  %v10537_v47 = vadd.f32 %v14048_v16, %v20983_v15  ;;  %14146 = vmatprep.mubr.bf16.mxu0 %v10367_v21  ;;  %v10053_v51 = vadd.f32 %v20866_v43, %v20967_v22 }
 0xb69   : > { %v15721_v27 = vpop.eup %15720  ;;  %v12767_v33 = vpack.c.bf16 %v15719_v8, %v15709_v25  ;;  %15746 = vtanh.f32 %v10513_v9  ;;  %v10528_v5 = vpop.f32.mrf.mxu0  ;;  %10176 = vst [vmem:[%s20893_s12 + $0x48] sm:$0xff] %v21043_v11  ;;  %v10371_v31 = vpack.c.bf16 %v21043_v11, %v21026_v36  ;;  %v10128_v26 = vmul.f32 %v21013_v23, %v10112_v63  ;;  %v22311_v25 = vld [vmem:[#allocation293_spill] sm:$0xff] }
 0xb6a   : > { %v15723_v38 = vpop.eup %15722  ;;  %15748 = vtanh.f32 %v10082_v4  ;;  %v10067_v46 = vmul.f32 %v15721_v27, %v10051_v57  ;;  %v10529_v21 = vadd.f32 %v20983_v15, %v10528_v5  ;;  %v3516_v42 = vadd.f32 %v22311_v25, %v18576_v60 }
 0xb6b   : > { %v21060_v45 = vpop.eup %15724  ;;  %13079 = vst [vmem:[%s21064_s22 + $0x8] sm:$0xff] %v12767_v33   ;;  %15750 = vtanh.f32 %v10524_v59  ;;  %v14049_v23 = vpop.f32.mrf.mxu0  ;;  %v10113_v28 = vsub.f32 %v20725_v20, %v15723_v38  ;;  %v21069_v53 = vadd.f32 %v15715_v44, %v10128_v26  ;;  %v9973_v44 = vadd.f32 1.0, %v21028_v61  ;;  %v22312_v61 = vld [vmem:[#allocation299_spill] sm:$0xff] }
 0xb6c   : > { %v15727_v14 = vpop.eup %15726  ;;  %v10083_v0 = vadd.f32 %v10067_v46, %v3511_v18  ;;  %15752 = vtanh.f32 %v10516_v30  ;;  %v10540_v1 = vadd.f32 %v14049_v23, %v20983_v15  ;;  %v3519_v49 = vadd.f32 %v22312_v61, %v18576_v60 }
 0xb6d   : > { %v15729_v24 = vpop.eup %15728  ;;  %v10068_v39 = vmul.f32 %v15727_v14, %v10052_v13  ;;  %15754 = vtanh.f32 %v10537_v47  ;;  %v10531_v41 = vpop.f32.mrf.mxu0  ;;  %v10129_v55 = vmul.f32 %v21019_v12, %v10113_v28  ;;  %10177 = vst [vmem:[%s20893_s12 + $0x50] sm:$0xff] %v21069_v53 }
 0xb6e   : > { %v21077_v20 = vpop.eup %15730  ;;  %15756 = vtanh.f32 %v10083_v0  ;;  %v12762_v62 = vpack.c.bf16 %v15729_v24, %v15717_v7  ;;  %v10532_v9 = vadd.f32 %v20983_v15, %v10531_v41 }
 0xb6f   : > { %v15733_v56 = vpop.eup %15732  ;;  %v10084_v48 = vadd.f32 %v10068_v39, %v3516_v42  ;;  %15758 = vtanh.f32 %v10529_v21  ;;  %v14052_v52 = vpop.f32.mrf.mxu0  ;;  %14147 = vmatmul.mubr.bf16.gmra.mxu0 %v10368_v54  ;;  %v21086_v12 = vadd.f32 %v15723_v38, %v10129_v55 }
 0xb70   : > { %v15735_v34 = vpop.eup %15734  ;;  %12763 = vst [vmem:[%s21064_s22] sm:$0xff] %v12762_v62   ;;  %15760 = vtanh.f32 %v10540_v1  ;;  %v10553_v43 = vadd.f32 %v14052_v52, %v20983_v15  ;;  %14150 = vmatprep.mubr.bf16.mxu0 %v10369_v58 }
 0xb71   : > { %v21093_v22 = vpop.eup %15736  ;;  %15762 = vtanh.f32 %v10084_v48  ;;  %v10069_v57 = vmul.f32 %v15735_v34, %v10053_v51  ;;  %v10544_v35 = vpop.f32.mrf.mxu0  ;;  %10178 = vst [vmem:[%s20893_s12 + $0x58] sm:$0xff] %v21086_v12  ;;  %v10372_v6 = vpack.c.bf16 %v21086_v12, %v21069_v53 }
 0xb72   : > { %v15739_v54 = vpop.eup %15738  ;;  %15764 = vtanh.f32 %v10532_v9  ;;  %v10545_v19 = vadd.f32 %v20983_v15, %v10544_v35 }
 0xb73   : > { %v15741_v7 = vpop.eup %15740  ;;  %v10085_v59 = vadd.f32 %v10069_v57, %v3519_v49  ;;  %15766 = vrcp.f32 %v9973_v44  ;;  %v12777_v37 = vpack.c.bf16 %v15739_v54, %v15733_v56  ;;  %v14053_v58 = vpop.f32.mrf.mxu0 }
 0xb74   : > { %v15743_v60 = vpop.eup %15742  ;;  %15768 = vtanh.f32 %v10553_v43  ;;  %v10556_v16 = vadd.f32 %v14053_v58, %v20983_v15 }
 0xb75   : > { %v15745_v63 = vpop.eup %15744  ;;  %15770 = vtanh.f32 %v10085_v59  ;;  %13081 = vst [vmem:[%s21064_s22 + $0x18] sm:$0xff] %v12777_v37   ;;  %v12772_v8 = vpack.c.bf16 %v15743_v60, %v15741_v7  ;;  %v10547_v4 = vpop.f32.mrf.mxu0 }
 0xb76   : > { %v15747_v30 = vpop.eup %15746  ;;  %15772 = vtanh.f32 %v10556_v16  ;;  %v10548_v47 = vadd.f32 %v20983_v15, %v10547_v4 }
 0xb77   : > { %v15749_v27 = vpop.eup %15748  ;;  %13080 = vst [vmem:[%s21064_s22 + $0x10] sm:$0xff] %v12772_v8   ;;  %15774 = vtanh.f32 %v10545_v19  ;;  %v14056_v33 = vpop.f32.mrf.mxu0  ;;  %14151 = vmatmul.mubr.bf16.gmra.mxu0 %v10370_v3 }
 0xb78   : > { %v15751_v5 = vpop.eup %15750  ;;  %15776 = vtanh.f32 %v10548_v47  ;;  %14154 = vmatprep.mubr.bf16.mxu0 %v10371_v31  ;;  %v10114_v26 = vsub.f32 %v20735_v10, %v15749_v27  ;;  %v10569_v18 = vadd.f32 %v14056_v33, %v20983_v15 }
 0xb79   : > { %v15753_v38 = vpop.eup %15752  ;;  %v12787_v2 = vpack.c.bf16 %v15751_v5, %v15745_v63  ;;  %v10560_v13 = vpop.f32.mrf.mxu0 }
 0xb7a   : > { %v15755_v46 = vpop.eup %15754  ;;  %v12782_v21 = vpack.c.bf16 %v15753_v38, %v15747_v30  ;;  %v10130_v23 = vmul.f32 %v21060_v45, %v10114_v26  ;;  %v10561_v50 = vadd.f32 %v20983_v15, %v10560_v13  ;;  %15778 = vtanh.f32 %v10569_v18 }
 0xb7b   : > { %v15757_v32 = vpop.eup %15756  ;;  %13083 = vst [vmem:[%s21064_s22 + $0x28] sm:$0xff] %v12787_v2   ;;  %v14057_v3 = vpop.f32.mrf.mxu0 }
 0xb7c   : > { %v15759_v28 = vpop.eup %15758  ;;  %13082 = vst [vmem:[%s21064_s22 + $0x20] sm:$0xff] %v12782_v21   ;;  %v10572_v36 = vadd.f32 %v14057_v3, %v20983_v15  ;;  %v10115_v10 = vsub.f32 %v20739_v17, %v15757_v32  ;;  %v10146_v11 = vadd.f32 %v15749_v27, %v10130_v23 }
 0xb7d   : > { %v15761_v31 = vpop.eup %15760  ;;  %v10563_v53 = vpop.f32.mrf.mxu0 }
 0xb7e   : > { %v15763_v14 = vpop.eup %15762  ;;  %v12797_v0 = vpack.c.bf16 %v15761_v31, %v15755_v46  ;;  %15780 = vtanh.f32 %v10572_v36  ;;  %v10564_v45 = vadd.f32 %v20983_v15, %v10563_v53  ;;  %v10131_v1 = vmul.f32 %v21077_v20, %v10115_v10  ;;  %10179 = vst [vmem:[%s20893_s12 + $0x60] sm:$0xff] %v10146_v11 }
 0xb7f   : > { %v15765_v24 = vpop.eup %15764  ;;  %15782 = vtanh.f32 %v10561_v50  ;;  %v14060_v25 = vpop.f32.mrf.mxu0  ;;  %14155 = vmatmul.mubr.bf16.gmra.mxu0 %v10372_v6  ;;  %v10116_v17 = vsub.f32 %v20746_v29, %v15763_v14 }
 0xb80   : > { %v15767_v42 = vpop.eup %15766  ;;  %13085 = vst [vmem:[%s21064_s22 + $0x38] sm:$0xff] %v12797_v0   ;;  %v12792_v39 = vpack.c.bf16 %v15765_v24, %v15759_v28  ;;  %15784 = vtanh.f32 %v10564_v45  ;;  %v10147_v41 = vadd.f32 %v15757_v32, %v10131_v1  ;;  %v10585_v51 = vadd.f32 %v14060_v25, %v20983_v15 }
 0xb81   : > { %v15769_v55 = vpop.eup %15768  ;;  %v10576_v62 = vpop.f32.mrf.mxu0  ;;  %v10132_v20 = vmul.f32 %v21093_v22, %v10116_v17 }
 0xb82   : > { %v15771_v9 = vpop.eup %15770  ;;  %13084 = vst [vmem:[%s21064_s22 + $0x30] sm:$0xff] %v12792_v39   ;;  %10180 = vst [vmem:[%s20893_s12 + $0x68] sm:$0xff] %v10147_v41  ;;  %v10373_v56 = vpack.c.bf16 %v10147_v41, %v10146_v11  ;;  %v10577_v29 = vadd.f32 %v20983_v15, %v10576_v62  ;;  %15786 = vtanh.f32 %v10585_v51 }
 0xb83   : > { %v15773_v48 = vpop.eup %15772  ;;  %v14061_v44 = vpop.f32.mrf.mxu0  ;;  %v10117_v52 = vsub.f32 %v20751_v40, %v15771_v9  ;;  %v10148_v12 = vadd.f32 %v15763_v14, %v10132_v20 }
 0xb84   : > { %v15775_v34 = vpop.eup %15774  ;;  %v12807_v43 = vpack.c.bf16 %v15773_v48, %v15769_v55  ;;  %14158 = vmatprep.mubr.bf16.mxu0 %v10373_v56  ;;  %v10588_v61 = vadd.f32 %v14061_v44, %v20983_v15 }
 0xb85   : > { %v15777_v22 = vpop.eup %15776  ;;  %v10579_v49 = vpop.f32.mrf.mxu0  ;;  %v10133_v57 = vmul.f32 %v15767_v42, %v10117_v52  ;;  %10181 = vst [vmem:[%s20893_s12 + $0x70] sm:$0xff] %v10148_v12 }
 0xb86   : > { %13087 = vst [vmem:[%s21064_s22 + $0x48] sm:$0xff] %v12807_v43   ;;  %v12802_v35 = vpack.c.bf16 %v15777_v22, %v15775_v34  ;;  %15788 = vtanh.f32 %v10588_v61  ;;  %v10580_v6 = vadd.f32 %v20983_v15, %v10579_v49 }
 0xb87   : > { %15790 = vtanh.f32 %v10577_v29  ;;  %v14064_v40 = vpop.f32.mrf.mxu0  ;;  %v10149_v54 = vadd.f32 %v15771_v9, %v10133_v57  ;;  %v15779_v19 = vpop.eup %15778 }
 0xb88   : > { %13086 = vst [vmem:[%s21064_s22 + $0x40] sm:$0xff] %v12802_v35   ;;  %15792 = vtanh.f32 %v10580_v6  ;;  %v10601_v7 = vadd.f32 %v14064_v40, %v20983_v15 }
 0xb89   : > { %10182 = vst [vmem:[%s20893_s12 + $0x78] sm:$0xff] %v10149_v54  ;;  %v10374_v59 = vpack.c.bf16 %v10149_v54, %v10148_v12  ;;  %v10592_v37 = vpop.f32.mrf.mxu0 }
 0xb8a   : > { %v10593_v60 = vadd.f32 %v20983_v15, %v10592_v37  ;;  %15794 = vtanh.f32 %v10601_v7 }
 0xb8b   : > { %v15781_v58 = vpop.eup %15780  ;;  %14159 = vmatmul.mubr.bf16.gmra.mxu0 %v10374_v59  ;;  %v14065_v16 = vpop.f32.mrf.mxu0 }
 0xb8c   : > { %v15783_v63 = vpop.eup %15782  ;;  %v12817_v8 = vpack.c.bf16 %v15781_v58, %v15779_v19  ;;  %v10604_v4 = vadd.f32 %v14065_v16, %v20983_v15 }
 0xb8d   : > { %v15785_v30 = vpop.eup %15784  ;;  %v10595_v47 = vpop.f32.mrf.mxu0 }
 0xb8e   : > { %13089 = vst [vmem:[%s21064_s22 + $0x58] sm:$0xff] %v12817_v8   ;;  %v12812_v27 = vpack.c.bf16 %v15785_v30, %v15783_v63  ;;  %15796 = vtanh.f32 %v10604_v4  ;;  %v10596_v33 = vadd.f32 %v20983_v15, %v10595_v47 }
 0xb8f   : > { %15798 = vtanh.f32 %v10593_v60  ;;  %v14068_v5 = vpop.f32.mrf.mxu0  ;;  %v15787_v2 = vpop.eup %15786 }
 0xb90   : > { %13088 = vst [vmem:[%s21064_s22 + $0x50] sm:$0xff] %v12812_v27   ;;  %15800 = vtanh.f32 %v10596_v33  ;;  %v10617_v26 = vadd.f32 %v14068_v5, %v20983_v15 }
 0xb91   : > { %v10608_v38 = vpop.f32.mrf.mxu0 }
 0xb92   : > { %v10609_v13 = vadd.f32 %v20983_v15, %v10608_v38  ;;  %15802 = vtanh.f32 %v10617_v26 }
 0xb93   : > { %v15789_v18 = vpop.eup %15788  ;;  %v14069_v46 = vpop.f32.mrf.mxu0 }
 0xb94   : > { %v15791_v21 = vpop.eup %15790  ;;  %v12827_v23 = vpack.c.bf16 %v15789_v18, %v15787_v2  ;;  %v10620_v32 = vadd.f32 %v14069_v46, %v20983_v15 }
 0xb95   : > { %v15793_v50 = vpop.eup %15792  ;;  %v10611_v3 = vpop.f32.mrf.mxu0 }
 0xb96   : > { %13091 = vst [vmem:[%s21064_s22 + $0x68] sm:$0xff] %v12827_v23   ;;  %v12822_v28 = vpack.c.bf16 %v15793_v50, %v15791_v21  ;;  %15804 = vtanh.f32 %v10620_v32  ;;  %v10612_v36 = vadd.f32 %v20983_v15, %v10611_v3 }
 0xb97   : > { %15806 = vtanh.f32 %v10609_v13  ;;  %v14072_v10 = vpop.f32.mrf.mxu0  ;;  %v15795_v53 = vpop.eup %15794 }
 0xb98   : > { %13090 = vst [vmem:[%s21064_s22 + $0x60] sm:$0xff] %v12822_v28   ;;  %15808 = vtanh.f32 %v10612_v36  ;;  %v10633_v11 = vadd.f32 %v14072_v10, %v20983_v15 }
 0xb99   : > { %v10624_v31 = vpop.f32.mrf.mxu0 }
 0xb9a   : > { %v10625_v0 = vadd.f32 %v20983_v15, %v10624_v31  ;;  %15810 = vtanh.f32 %v10633_v11 }
 0xb9b   : > { %v15797_v14 = vpop.eup %15796  ;;  %v14073_v45 = vpop.f32.mrf.mxu0 }
 0xb9c   : > { %v15799_v1 = vpop.eup %15798  ;;  %v12837_v24 = vpack.c.bf16 %v15797_v14, %v15795_v53  ;;  %v10636_v25 = vadd.f32 %v14073_v45, %v20983_v15 }
 0xb9d   : > { %v15801_v17 = vpop.eup %15800  ;;  %v10627_v42 = vpop.f32.mrf.mxu0 }
 0xb9e   : > { %13093 = vst [vmem:[%s21064_s22 + $0x78] sm:$0xff] %v12837_v24   ;;  %v12832_v39 = vpack.c.bf16 %v15801_v17, %v15799_v1  ;;  %15812 = vtanh.f32 %v10636_v25  ;;  %v10628_v41 = vadd.f32 %v20983_v15, %v10627_v42 }
 0xb9f   : > { %15814 = vtanh.f32 %v10625_v0  ;;  %v14076_v55 = vpop.f32.mrf.mxu0  ;;  %v15803_v20 = vpop.eup %15802 }
 0xba0   : > { %13092 = vst [vmem:[%s21064_s22 + $0x70] sm:$0xff] %v12832_v39   ;;  %15816 = vtanh.f32 %v10628_v41  ;;  %v10649_v51 = vadd.f32 %v14076_v55, %v20983_v15 }
 0xba1   : > { %v10640_v62 = vpop.f32.mrf.mxu0 }
 0xba2   : > { %v10641_v56 = vadd.f32 %v20983_v15, %v10640_v62  ;;  %15818 = vtanh.f32 %v10649_v51 }
 0xba3   : > { %v15805_v9 = vpop.eup %15804  ;;  %v14077_v48 = vpop.f32.mrf.mxu0 }
 0xba4   : > { %v15807_v29 = vpop.eup %15806  ;;  %v12847_v44 = vpack.c.bf16 %v15805_v9, %v15803_v20  ;;  %v10652_v52 = vadd.f32 %v14077_v48, %v20983_v15 }
 0xba5   : > { %v15809_v12 = vpop.eup %15808  ;;  %v10643_v34 = vpop.f32.mrf.mxu0 }
 0xba6   : > { %13095 = vst [vmem:[%s21064_s22 + $0x88] sm:$0xff] %v12847_v44   ;;  %v12842_v43 = vpack.c.bf16 %v15809_v12, %v15807_v29  ;;  %15820 = vtanh.f32 %v10652_v52  ;;  %v10644_v61 = vadd.f32 %v20983_v15, %v10643_v34 }
 0xba7   : > { %15822 = vtanh.f32 %v10641_v56  ;;  %v14080_v22 = vpop.f32.mrf.mxu0  ;;  %v15811_v35 = vpop.eup %15810 }
 0xba8   : > { %13094 = vst [vmem:[%s21064_s22 + $0x80] sm:$0xff] %v12842_v43   ;;  %15824 = vtanh.f32 %v10644_v61  ;;  %v10665_v49 = vadd.f32 %v14080_v22, %v20983_v15 }
 0xba9   : > { %v10656_v57 = vpop.f32.mrf.mxu0 }
 0xbaa   : > { %v10657_v40 = vadd.f32 %v20983_v15, %v10656_v57  ;;  %15826 = vtanh.f32 %v10665_v49 }
 0xbab   : > { %v15813_v6 = vpop.eup %15812  ;;  %v14081_v54 = vpop.f32.mrf.mxu0 }
 0xbac   : > { %v15815_v7 = vpop.eup %15814  ;;  %v12857_v59 = vpack.c.bf16 %v15813_v6, %v15811_v35  ;;  %v10668_v37 = vadd.f32 %v14081_v54, %v20983_v15 }
 0xbad   : > { %v15817_v19 = vpop.eup %15816  ;;  %v10659_v58 = vpop.f32.mrf.mxu0 }
 0xbae   : > { %13097 = vst [vmem:[%s21064_s22 + $0x98] sm:$0xff] %v12857_v59   ;;  %v12852_v60 = vpack.c.bf16 %v15817_v19, %v15815_v7  ;;  %15828 = vtanh.f32 %v10668_v37  ;;  %v10660_v16 = vadd.f32 %v20983_v15, %v10659_v58 }
 0xbaf   : > { %15830 = vtanh.f32 %v10657_v40  ;;  %v14084_v63 = vpop.f32.mrf.mxu0  ;;  %v15819_v30 = vpop.eup %15818 }
 0xbb0   : > { %13096 = vst [vmem:[%s21064_s22 + $0x90] sm:$0xff] %v12852_v60   ;;  %15832 = vtanh.f32 %v10660_v16  ;;  %v10681_v8 = vadd.f32 %v14084_v63, %v20983_v15 }
 0xbb1   : > { %v10672_v4 = vpop.f32.mrf.mxu0 }
 0xbb2   : > { %v10673_v27 = vadd.f32 %v20983_v15, %v10672_v4  ;;  %15834 = vtanh.f32 %v10681_v8 }
 0xbb3   : > { %v15821_v47 = vpop.eup %15820  ;;  %v14085_v33 = vpop.f32.mrf.mxu0 }
 0xbb4   : > { %v15823_v5 = vpop.eup %15822  ;;  %v12867_v26 = vpack.c.bf16 %v15821_v47, %v15819_v30  ;;  %v10684_v38 = vadd.f32 %v14085_v33, %v20983_v15 }
 0xbb5   : > { %v15825_v2 = vpop.eup %15824  ;;  %v10675_v18 = vpop.f32.mrf.mxu0 }
 0xbb6   : > { %13099 = vst [vmem:[%s21064_s22 + $0xa8] sm:$0xff] %v12867_v26   ;;  %v12862_v13 = vpack.c.bf16 %v15825_v2, %v15823_v5  ;;  %15836 = vtanh.f32 %v10684_v38  ;;  %v10676_v46 = vadd.f32 %v20983_v15, %v10675_v18 }
 0xbb7   : > { %15838 = vtanh.f32 %v10673_v27  ;;  %v14088_v21 = vpop.f32.mrf.mxu0  ;;  %v15827_v50 = vpop.eup %15826 }
 0xbb8   : > { %13098 = vst [vmem:[%s21064_s22 + $0xa0] sm:$0xff] %v12862_v13   ;;  %15840 = vtanh.f32 %v10676_v46  ;;  %v10697_v23 = vadd.f32 %v14088_v21, %v20983_v15 }
 0xbb9   : > { %v10688_v32 = vpop.f32.mrf.mxu0 }
 0xbba   : > { %v10689_v28 = vadd.f32 %v20983_v15, %v10688_v32  ;;  %15842 = vtanh.f32 %v10697_v23 }
 0xbbb   : > { %v15829_v3 = vpop.eup %15828  ;;  %v14089_v36 = vpop.f32.mrf.mxu0 }
 0xbbc   : > { %v15831_v10 = vpop.eup %15830  ;;  %v12877_v11 = vpack.c.bf16 %v15829_v3, %v15827_v50  ;;  %v10700_v31 = vadd.f32 %v14089_v36, %v20983_v15 }
 0xbbd   : > { %v15833_v53 = vpop.eup %15832  ;;  %v10691_v14 = vpop.f32.mrf.mxu0 }
 0xbbe   : > { %13101 = vst [vmem:[%s21064_s22 + $0xb8] sm:$0xff] %v12877_v11   ;;  %v12872_v0 = vpack.c.bf16 %v15833_v53, %v15831_v10  ;;  %15844 = vtanh.f32 %v10700_v31  ;;  %v10692_v45 = vadd.f32 %v20983_v15, %v10691_v14 }
 0xbbf   : > { %15846 = vtanh.f32 %v10689_v28  ;;  %v14092_v1 = vpop.f32.mrf.mxu0  ;;  %v15835_v17 = vpop.eup %15834 }
 0xbc0   : > { %13100 = vst [vmem:[%s21064_s22 + $0xb0] sm:$0xff] %v12872_v0   ;;  %15848 = vtanh.f32 %v10692_v45  ;;  %v10713_v24 = vadd.f32 %v14092_v1, %v20983_v15 }
 0xbc1   : > { %v10704_v25 = vpop.f32.mrf.mxu0 }
 0xbc2   : > { %v10705_v39 = vadd.f32 %v20983_v15, %v10704_v25  ;;  %15850 = vtanh.f32 %v10713_v24 }
 0xbc3   : > { %v15837_v42 = vpop.eup %15836  ;;  %v14093_v41 = vpop.f32.mrf.mxu0 }
 0xbc4   : > { %v15839_v55 = vpop.eup %15838  ;;  %v12887_v51 = vpack.c.bf16 %v15837_v42, %v15835_v17  ;;  %v10716_v62 = vadd.f32 %v14093_v41, %v20983_v15 }
 0xbc5   : > { %v15841_v20 = vpop.eup %15840  ;;  %v10707_v9 = vpop.f32.mrf.mxu0 }
 0xbc6   : > { %13103 = vst [vmem:[%s21064_s22 + $0xc8] sm:$0xff] %v12887_v51   ;;  %v12882_v56 = vpack.c.bf16 %v15841_v20, %v15839_v55  ;;  %15852 = vtanh.f32 %v10716_v62  ;;  %v10708_v48 = vadd.f32 %v20983_v15, %v10707_v9  ;;  %v21212_v51 = vld [vmem:[%s21375_s9] ss:$0 sm:$0xff] }
 0xbc7   : > { %15854 = vtanh.f32 %v10705_v39  ;;  %v14096_v29 = vpop.f32.mrf.mxu0  ;;  %v15843_v12 = vpop.eup %15842 }
 0xbc8   : > { %13102 = vst [vmem:[%s21064_s22 + $0xc0] sm:$0xff] %v12882_v56   ;;  %15856 = vtanh.f32 %v10708_v48  ;;  %v10729_v44 = vadd.f32 %v14096_v29, %v20983_v15 }
 0xbc9   : > { %v10720_v52 = vpop.f32.mrf.mxu0 }
 0xbca   : > { %v10721_v43 = vadd.f32 %v20983_v15, %v10720_v52  ;;  %15858 = vtanh.f32 %v10729_v44 }
 0xbcb   : > { %v15845_v34 = vpop.eup %15844  ;;  %v14097_v61 = vpop.f32.mrf.mxu0 }
 0xbcc   : > { %v15847_v22 = vpop.eup %15846  ;;  %v12897_v49 = vpack.c.bf16 %v15845_v34, %v15843_v12  ;;  %v10732_v57 = vadd.f32 %v14097_v61, %v20983_v15 }
 0xbcd   : > { %v15849_v35 = vpop.eup %15848  ;;  %v10723_v6 = vpop.f32.mrf.mxu0 }
 0xbce   : > { %13105 = vst [vmem:[%s21064_s22 + $0xd8] sm:$0xff] %v12897_v49   ;;  %v12892_v40 = vpack.c.bf16 %v15849_v35, %v15847_v22  ;;  %15860 = vtanh.f32 %v10732_v57  ;;  %v10724_v54 = vadd.f32 %v20983_v15, %v10723_v6 }
 0xbcf   : > { %15862 = vtanh.f32 %v10721_v43  ;;  %v14100_v7 = vpop.f32.mrf.mxu0  ;;  %v15851_v19 = vpop.eup %15850 }
 0xbd0   : > { %13104 = vst [vmem:[%s21064_s22 + $0xd0] sm:$0xff] %v12892_v40   ;;  %15864 = vtanh.f32 %v10724_v54  ;;  %v10745_v59 = vadd.f32 %v14100_v7, %v20983_v15 }
 0xbd1   : > { %v10736_v37 = vpop.f32.mrf.mxu0 }
 0xbd2   : > { %v10737_v60 = vadd.f32 %v20983_v15, %v10736_v37  ;;  %15866 = vtanh.f32 %v10745_v59 }
 0xbd3   : > { %v15853_v58 = vpop.eup %15852  ;;  %v14101_v16 = vpop.f32.mrf.mxu0 }
 0xbd4   : > { %v15855_v63 = vpop.eup %15854  ;;  %v12907_v8 = vpack.c.bf16 %v15853_v58, %v15851_v19  ;;  %v10748_v4 = vadd.f32 %v14101_v16, %v20983_v15 }
 0xbd5   : > { %v15857_v30 = vpop.eup %15856  ;;  %v10739_v47 = vpop.f32.mrf.mxu0 }
 0xbd6   : > { %13107 = vst [vmem:[%s21064_s22 + $0xe8] sm:$0xff] %v12907_v8   ;;  %v12902_v27 = vpack.c.bf16 %v15857_v30, %v15855_v63  ;;  %15868 = vtanh.f32 %v10748_v4  ;;  %v10740_v33 = vadd.f32 %v20983_v15, %v10739_v47 }
 0xbd7   : > { %15870 = vtanh.f32 %v10737_v60  ;;  %v14104_v5 = vpop.f32.mrf.mxu0  ;;  %v15859_v2 = vpop.eup %15858 }
 0xbd8   : > { %13106 = vst [vmem:[%s21064_s22 + $0xe0] sm:$0xff] %v12902_v27   ;;  %15872 = vtanh.f32 %v10740_v33  ;;  %v10761_v26 = vadd.f32 %v14104_v5, %v20983_v15 }
 0xbd9   : > { %v10752_v38 = vpop.f32.mrf.mxu0 }
 0xbda   : > { %v10753_v13 = vadd.f32 %v20983_v15, %v10752_v38  ;;  %15874 = vtanh.f32 %v10761_v26 }
 0xbdb   : > { %v15861_v18 = vpop.eup %15860  ;;  %v14105_v46 = vpop.f32.mrf.mxu0 }
 0xbdc   : > { %v15863_v21 = vpop.eup %15862  ;;  %v12917_v23 = vpack.c.bf16 %v15861_v18, %v15859_v2  ;;  %v10764_v32 = vadd.f32 %v14105_v46, %v20983_v15 }
 0xbdd   : > { %v15865_v50 = vpop.eup %15864  ;;  %v10755_v3 = vpop.f32.mrf.mxu0 }
 0xbde   : > { %13109 = vst [vmem:[%s21064_s22 + $0xf8] sm:$0xff] %v12917_v23   ;;  %v12912_v28 = vpack.c.bf16 %v15865_v50, %v15863_v21  ;;  %15876 = vtanh.f32 %v10764_v32  ;;  %v10756_v36 = vadd.f32 %v20983_v15, %v10755_v3 }
 0xbdf   : > { %15878 = vtanh.f32 %v10753_v13  ;;  %v14108_v10 = vpop.f32.mrf.mxu0  ;;  %v15867_v53 = vpop.eup %15866 }
 0xbe0   : > { %13108 = vst [vmem:[%s21064_s22 + $0xf0] sm:$0xff] %v12912_v28   ;;  %15880 = vtanh.f32 %v10756_v36  ;;  %v10777_v11 = vadd.f32 %v14108_v10, %v20983_v15 }
 0xbe1   : > { %v10768_v31 = vpop.f32.mrf.mxu0 }
 0xbe2   : > { %v10769_v0 = vadd.f32 %v20983_v15, %v10768_v31  ;;  %15882 = vtanh.f32 %v10777_v11 }
 0xbe3   : > { %v15869_v14 = vpop.eup %15868  ;;  %v14109_v45 = vpop.f32.mrf.mxu0 }
 0xbe4   : > { %v15871_v1 = vpop.eup %15870  ;;  %v12927_v24 = vpack.c.bf16 %v15869_v14, %v15867_v53  ;;  %v10780_v25 = vadd.f32 %v14109_v45, %v20983_v15 }
 0xbe5   : > { %v15873_v17 = vpop.eup %15872  ;;  %v10771_v42 = vpop.f32.mrf.mxu0 }
 0xbe6   : > { %13111 = vst [vmem:[%s21064_s22 + $0x108] sm:$0xff] %v12927_v24   ;;  %v12922_v39 = vpack.c.bf16 %v15873_v17, %v15871_v1  ;;  %15884 = vtanh.f32 %v10780_v25  ;;  %v10772_v41 = vadd.f32 %v20983_v15, %v10771_v42 }
 0xbe7   : > { %15886 = vtanh.f32 %v10769_v0  ;;  %v14112_v55 = vpop.f32.mrf.mxu0  ;;  %v15875_v9 = vpop.eup %15874 }
 0xbe8   : > { %13110 = vst [vmem:[%s21064_s22 + $0x100] sm:$0xff] %v12922_v39   ;;  %15888 = vtanh.f32 %v10772_v41  ;;  %v10793_v62 = vadd.f32 %v21212_v51, %v14112_v55 }
 0xbe9   : > { %v10784_v20 = vpop.f32.mrf.mxu0 }
 0xbea   : > { %v10785_v48 = vadd.f32 %v21212_v51, %v10784_v20  ;;  %15890 = vtanh.f32 %v10793_v62 }
 0xbeb   : > { %v15877_v56 = vpop.eup %15876  ;;  %v14113_v29 = vpop.f32.mrf.mxu0 }
 0xbec   : > { %v15879_v15 = vpop.eup %15878  ;;  %v12937_v44 = vpack.c.bf16 %v15877_v56, %v15875_v9  ;;  %v10796_v52 = vadd.f32 %v21212_v51, %v14113_v29 }
 0xbed   : > { %v15881_v12 = vpop.eup %15880  ;;  %v10787_v34 = vpop.f32.mrf.mxu0 }
 0xbee   : > { %13113 = vst [vmem:[%s21064_s22 + $0x118] sm:$0xff] %v12937_v44   ;;  %v12932_v43 = vpack.c.bf16 %v15881_v12, %v15879_v15  ;;  %15892 = vtanh.f32 %v10796_v52  ;;  %v10788_v61 = vadd.f32 %v21212_v51, %v10787_v34 }
 0xbef   : > { %15894 = vtanh.f32 %v10785_v48  ;;  %v14116_v22 = vpop.f32.mrf.mxu0  ;;  %v15883_v35 = vpop.eup %15882 }
 0xbf0   : > { %13112 = vst [vmem:[%s21064_s22 + $0x110] sm:$0xff] %v12932_v43   ;;  %15896 = vtanh.f32 %v10788_v61  ;;  %v10809_v49 = vadd.f32 %v21212_v51, %v14116_v22 }
 0xbf1   : > { %v10800_v57 = vpop.f32.mrf.mxu0 }
 0xbf2   : > { %v10801_v40 = vadd.f32 %v21212_v51, %v10800_v57  ;;  %15898 = vtanh.f32 %v10809_v49 }
 0xbf3   : > { %v15885_v6 = vpop.eup %15884  ;;  %v14117_v54 = vpop.f32.mrf.mxu0 }
 0xbf4   : > { %v15887_v7 = vpop.eup %15886  ;;  %v12947_v59 = vpack.c.bf16 %v15885_v6, %v15883_v35  ;;  %v10812_v37 = vadd.f32 %v21212_v51, %v14117_v54 }
 0xbf5   : > { %v15889_v19 = vpop.eup %15888  ;;  %v10803_v58 = vpop.f32.mrf.mxu0 }
 0xbf6   : > { %13115 = vst [vmem:[%s21064_s22 + $0x128] sm:$0xff] %v12947_v59   ;;  %v12942_v60 = vpack.c.bf16 %v15889_v19, %v15887_v7  ;;  %15900 = vtanh.f32 %v10812_v37  ;;  %v10804_v16 = vadd.f32 %v21212_v51, %v10803_v58 }
 0xbf7   : > { %15902 = vtanh.f32 %v10801_v40  ;;  %v14120_v63 = vpop.f32.mrf.mxu0  ;;  %v15891_v30 = vpop.eup %15890 }
 0xbf8   : > { %13114 = vst [vmem:[%s21064_s22 + $0x120] sm:$0xff] %v12942_v60   ;;  %15904 = vtanh.f32 %v10804_v16  ;;  %v10825_v8 = vadd.f32 %v21212_v51, %v14120_v63 }
 0xbf9   : > { %v10816_v4 = vpop.f32.mrf.mxu0 }
 0xbfa   : > { %v10817_v27 = vadd.f32 %v21212_v51, %v10816_v4  ;;  %15906 = vtanh.f32 %v10825_v8 }
 0xbfb   : > { %v15893_v47 = vpop.eup %15892  ;;  %v14121_v33 = vpop.f32.mrf.mxu0 }
 0xbfc   : > { %v15895_v5 = vpop.eup %15894  ;;  %v12957_v26 = vpack.c.bf16 %v15893_v47, %v15891_v30  ;;  %v10828_v38 = vadd.f32 %v21212_v51, %v14121_v33 }
 0xbfd   : > { %v15897_v2 = vpop.eup %15896  ;;  %v10819_v18 = vpop.f32.mrf.mxu0 }
 0xbfe   : > { %13117 = vst [vmem:[%s21064_s22 + $0x138] sm:$0xff] %v12957_v26   ;;  %v12952_v13 = vpack.c.bf16 %v15897_v2, %v15895_v5  ;;  %15908 = vtanh.f32 %v10828_v38  ;;  %v10820_v46 = vadd.f32 %v21212_v51, %v10819_v18 }
 0xbff   : > { %15910 = vtanh.f32 %v10817_v27  ;;  %v14124_v21 = vpop.f32.mrf.mxu0  ;;  %v15899_v50 = vpop.eup %15898 }
 0xc00   : > { %13116 = vst [vmem:[%s21064_s22 + $0x130] sm:$0xff] %v12952_v13   ;;  %15912 = vtanh.f32 %v10820_v46  ;;  %v10841_v23 = vadd.f32 %v21212_v51, %v14124_v21 }
 0xc01   : > { %v10832_v32 = vpop.f32.mrf.mxu0 }
 0xc02   : > { %v10833_v28 = vadd.f32 %v21212_v51, %v10832_v32  ;;  %15914 = vtanh.f32 %v10841_v23 }
 0xc03   : > { %v15901_v3 = vpop.eup %15900  ;;  %v14125_v36 = vpop.f32.mrf.mxu0 }
 0xc04   : > { %v15903_v10 = vpop.eup %15902  ;;  %v12967_v11 = vpack.c.bf16 %v15901_v3, %v15899_v50  ;;  %v10844_v31 = vadd.f32 %v21212_v51, %v14125_v36 }
 0xc05   : > { %v15905_v53 = vpop.eup %15904  ;;  %v10835_v14 = vpop.f32.mrf.mxu0 }
 0xc06   : > { %13119 = vst [vmem:[%s21064_s22 + $0x148] sm:$0xff] %v12967_v11   ;;  %v12962_v0 = vpack.c.bf16 %v15905_v53, %v15903_v10  ;;  %15916 = vtanh.f32 %v10844_v31  ;;  %v10836_v45 = vadd.f32 %v21212_v51, %v10835_v14 }
 0xc07   : > { %15918 = vtanh.f32 %v10833_v28  ;;  %v14128_v1 = vpop.f32.mrf.mxu0  ;;  %v15907_v17 = vpop.eup %15906 }
 0xc08   : > { %13118 = vst [vmem:[%s21064_s22 + $0x140] sm:$0xff] %v12962_v0   ;;  %15920 = vtanh.f32 %v10836_v45  ;;  %v10857_v24 = vadd.f32 %v21212_v51, %v14128_v1 }
 0xc09   : > { %v10848_v25 = vpop.f32.mrf.mxu0 }
 0xc0a   : > { %v10849_v39 = vadd.f32 %v21212_v51, %v10848_v25  ;;  %15922 = vtanh.f32 %v10857_v24 }
 0xc0b   : > { %v15909_v42 = vpop.eup %15908  ;;  %v14129_v41 = vpop.f32.mrf.mxu0 }
 0xc0c   : > { %v15911_v55 = vpop.eup %15910  ;;  %v12977_v62 = vpack.c.bf16 %v15909_v42, %v15907_v17  ;;  %v10860_v20 = vadd.f32 %v21212_v51, %v14129_v41 }
 0xc0d   : > { %v15913_v9 = vpop.eup %15912  ;;  %v10851_v56 = vpop.f32.mrf.mxu0 }
 0xc0e   : > { %13121 = vst [vmem:[%s21064_s22 + $0x158] sm:$0xff] %v12977_v62   ;;  %v12972_v48 = vpack.c.bf16 %v15913_v9, %v15911_v55  ;;  %15924 = vtanh.f32 %v10860_v20  ;;  %v10852_v29 = vadd.f32 %v21212_v51, %v10851_v56 }
 0xc0f   : > { %15926 = vtanh.f32 %v10849_v39  ;;  %v14132_v15 = vpop.f32.mrf.mxu0  ;;  %v15915_v12 = vpop.eup %15914 }
 0xc10   : > { %13120 = vst [vmem:[%s21064_s22 + $0x150] sm:$0xff] %v12972_v48   ;;  %15928 = vtanh.f32 %v10852_v29  ;;  %v10873_v44 = vadd.f32 %v21212_v51, %v14132_v15 }
 0xc11   : > { %v10864_v52 = vpop.f32.mrf.mxu0 }
 0xc12   : > { %v10865_v43 = vadd.f32 %v21212_v51, %v10864_v52  ;;  %15930 = vtanh.f32 %v10873_v44 }
 0xc13   : > { %v15917_v34 = vpop.eup %15916  ;;  %v14133_v61 = vpop.f32.mrf.mxu0 }
 0xc14   : > { %v15919_v22 = vpop.eup %15918  ;;  %v12987_v49 = vpack.c.bf16 %v15917_v34, %v15915_v12  ;;  %v10876_v57 = vadd.f32 %v21212_v51, %v14133_v61 }
 0xc15   : > { %v15921_v35 = vpop.eup %15920  ;;  %v10867_v6 = vpop.f32.mrf.mxu0 }
 0xc16   : > { %13123 = vst [vmem:[%s21064_s22 + $0x168] sm:$0xff] %v12987_v49   ;;  %v12982_v40 = vpack.c.bf16 %v15921_v35, %v15919_v22  ;;  %15932 = vtanh.f32 %v10876_v57  ;;  %v10868_v54 = vadd.f32 %v21212_v51, %v10867_v6 }
 0xc17   : > { %15934 = vtanh.f32 %v10865_v43  ;;  %v14136_v7 = vpop.f32.mrf.mxu0  ;;  %v15923_v19 = vpop.eup %15922 }
 0xc18   : > { %13122 = vst [vmem:[%s21064_s22 + $0x160] sm:$0xff] %v12982_v40   ;;  %15936 = vtanh.f32 %v10868_v54  ;;  %v10889_v59 = vadd.f32 %v21212_v51, %v14136_v7 }
 0xc19   : > { %v10880_v37 = vpop.f32.mrf.mxu0 }
 0xc1a   : > { %v10881_v60 = vadd.f32 %v21212_v51, %v10880_v37  ;;  %15938 = vtanh.f32 %v10889_v59 }
 0xc1b   : > { %v15925_v58 = vpop.eup %15924  ;;  %v14137_v16 = vpop.f32.mrf.mxu0 }
 0xc1c   : > { %v15927_v63 = vpop.eup %15926  ;;  %v12997_v8 = vpack.c.bf16 %v15925_v58, %v15923_v19  ;;  %v10892_v4 = vadd.f32 %v21212_v51, %v14137_v16 }
 0xc1d   : > { %v15929_v30 = vpop.eup %15928  ;;  %v10883_v47 = vpop.f32.mrf.mxu0 }
 0xc1e   : > { %13125 = vst [vmem:[%s21064_s22 + $0x178] sm:$0xff] %v12997_v8   ;;  %v12992_v27 = vpack.c.bf16 %v15929_v30, %v15927_v63  ;;  %15940 = vtanh.f32 %v10892_v4  ;;  %v10884_v33 = vadd.f32 %v21212_v51, %v10883_v47 }
 0xc1f   : > { %15942 = vtanh.f32 %v10881_v60  ;;  %v14140_v5 = vpop.f32.mrf.mxu0  ;;  %v15931_v2 = vpop.eup %15930 }
 0xc20   : > { %13124 = vst [vmem:[%s21064_s22 + $0x170] sm:$0xff] %v12992_v27   ;;  %15944 = vtanh.f32 %v10884_v33  ;;  %v10905_v26 = vadd.f32 %v21212_v51, %v14140_v5 }
 0xc21   : > { %v10896_v38 = vpop.f32.mrf.mxu0 }
 0xc22   : > { %v10897_v13 = vadd.f32 %v21212_v51, %v10896_v38  ;;  %15946 = vtanh.f32 %v10905_v26 }
 0xc23   : > { %v15933_v18 = vpop.eup %15932  ;;  %v14141_v46 = vpop.f32.mrf.mxu0 }
 0xc24   : > { %v15935_v21 = vpop.eup %15934  ;;  %v13007_v23 = vpack.c.bf16 %v15933_v18, %v15931_v2  ;;  %v10908_v32 = vadd.f32 %v21212_v51, %v14141_v46 }
 0xc25   : > { %v15937_v50 = vpop.eup %15936  ;;  %v10899_v3 = vpop.f32.mrf.mxu0 }
 0xc26   : > { %13127 = vst [vmem:[%s21064_s22 + $0x188] sm:$0xff] %v13007_v23   ;;  %v13002_v28 = vpack.c.bf16 %v15937_v50, %v15935_v21  ;;  %15948 = vtanh.f32 %v10908_v32  ;;  %v10900_v36 = vadd.f32 %v21212_v51, %v10899_v3 }
 0xc27   : > { %15950 = vtanh.f32 %v10897_v13  ;;  %v14144_v10 = vpop.f32.mrf.mxu0  ;;  %v15939_v53 = vpop.eup %15938 }
 0xc28   : > { %13126 = vst [vmem:[%s21064_s22 + $0x180] sm:$0xff] %v13002_v28   ;;  %15952 = vtanh.f32 %v10900_v36  ;;  %v10921_v11 = vadd.f32 %v21212_v51, %v14144_v10 }
 0xc29   : > { %v10912_v31 = vpop.f32.mrf.mxu0 }
 0xc2a   : > { %v10913_v0 = vadd.f32 %v21212_v51, %v10912_v31  ;;  %15954 = vtanh.f32 %v10921_v11 }
 0xc2b   : > { %v15941_v14 = vpop.eup %15940  ;;  %v14145_v45 = vpop.f32.mrf.mxu0 }
 0xc2c   : > { %v15943_v1 = vpop.eup %15942  ;;  %v13017_v24 = vpack.c.bf16 %v15941_v14, %v15939_v53  ;;  %v10924_v25 = vadd.f32 %v21212_v51, %v14145_v45 }
 0xc2d   : > { %v15945_v17 = vpop.eup %15944  ;;  %v10915_v42 = vpop.f32.mrf.mxu0 }
 0xc2e   : > { %13129 = vst [vmem:[%s21064_s22 + $0x198] sm:$0xff] %v13017_v24   ;;  %v13012_v39 = vpack.c.bf16 %v15945_v17, %v15943_v1  ;;  %15956 = vtanh.f32 %v10924_v25  ;;  %v10916_v41 = vadd.f32 %v21212_v51, %v10915_v42 }
 0xc2f   : > { %15958 = vtanh.f32 %v10913_v0  ;;  %v14148_v55 = vpop.f32.mrf.mxu0  ;;  %v15947_v9 = vpop.eup %15946 }
 0xc30   : > { %13128 = vst [vmem:[%s21064_s22 + $0x190] sm:$0xff] %v13012_v39   ;;  %15960 = vtanh.f32 %v10916_v41  ;;  %v10937_v62 = vadd.f32 %v21212_v51, %v14148_v55 }
 0xc31   : > { %v10928_v20 = vpop.f32.mrf.mxu0 }
 0xc32   : > { %v10929_v48 = vadd.f32 %v21212_v51, %v10928_v20  ;;  %15962 = vtanh.f32 %v10937_v62 }
 0xc33   : > { %v15949_v56 = vpop.eup %15948  ;;  %v14149_v29 = vpop.f32.mrf.mxu0 }
 0xc34   : > { %v15951_v15 = vpop.eup %15950  ;;  %v13027_v44 = vpack.c.bf16 %v15949_v56, %v15947_v9  ;;  %v10940_v52 = vadd.f32 %v21212_v51, %v14149_v29 }
 0xc35   : > { %v15953_v12 = vpop.eup %15952  ;;  %v10931_v34 = vpop.f32.mrf.mxu0 }
 0xc36   : > { %13131 = vst [vmem:[%s21064_s22 + $0x1a8] sm:$0xff] %v13027_v44   ;;  %v13022_v43 = vpack.c.bf16 %v15953_v12, %v15951_v15  ;;  %15964 = vtanh.f32 %v10940_v52  ;;  %v10932_v61 = vadd.f32 %v21212_v51, %v10931_v34 }
 0xc37   : > { %15966 = vtanh.f32 %v10929_v48  ;;  %v14152_v22 = vpop.f32.mrf.mxu0  ;;  %v15955_v35 = vpop.eup %15954 }
 0xc38   : > { %13130 = vst [vmem:[%s21064_s22 + $0x1a0] sm:$0xff] %v13022_v43   ;;  %15968 = vtanh.f32 %v10932_v61  ;;  %v10953_v49 = vadd.f32 %v21212_v51, %v14152_v22 }
 0xc39   : > { %v10944_v57 = vpop.f32.mrf.mxu0 }
 0xc3a   : > { %v10945_v40 = vadd.f32 %v21212_v51, %v10944_v57  ;;  %15970 = vtanh.f32 %v10953_v49 }
 0xc3b   : > { %v15957_v6 = vpop.eup %15956  ;;  %v14153_v54 = vpop.f32.mrf.mxu0 }
 0xc3c   : > { %v15959_v7 = vpop.eup %15958  ;;  %v13037_v59 = vpack.c.bf16 %v15957_v6, %v15955_v35  ;;  %v10956_v37 = vadd.f32 %v21212_v51, %v14153_v54 }
 0xc3d   : > { %v15961_v19 = vpop.eup %15960  ;;  %v10947_v58 = vpop.f32.mrf.mxu0 }
 0xc3e   : > { %13133 = vst [vmem:[%s21064_s22 + $0x1b8] sm:$0xff] %v13037_v59   ;;  %v13032_v60 = vpack.c.bf16 %v15961_v19, %v15959_v7  ;;  %15972 = vtanh.f32 %v10956_v37  ;;  %v10948_v16 = vadd.f32 %v21212_v51, %v10947_v58 }
 0xc3f   : > { %15974 = vtanh.f32 %v10945_v40  ;;  %v14156_v63 = vpop.f32.mrf.mxu0  ;;  %v15963_v30 = vpop.eup %15962 }
 0xc40   : > { %13132 = vst [vmem:[%s21064_s22 + $0x1b0] sm:$0xff] %v13032_v60   ;;  %15976 = vtanh.f32 %v10948_v16  ;;  %v10969_v8 = vadd.f32 %v21212_v51, %v14156_v63 }
 0xc41   : > { %v10960_v4 = vpop.f32.mrf.mxu0 }
 0xc42   : > { %v10961_v27 = vadd.f32 %v21212_v51, %v10960_v4  ;;  %15978 = vtanh.f32 %v10969_v8 }
 0xc43   : > { %v15965_v47 = vpop.eup %15964  ;;  %v14157_v33 = vpop.f32.mrf.mxu0 }
 0xc44   : > { %v15967_v5 = vpop.eup %15966  ;;  %v13047_v26 = vpack.c.bf16 %v15965_v47, %v15963_v30  ;;  %v10972_v38 = vadd.f32 %v21212_v51, %v14157_v33 }
 0xc45   : > { %v15969_v2 = vpop.eup %15968  ;;  %v10963_v18 = vpop.f32.mrf.mxu0 }
 0xc46   : > { %13135 = vst [vmem:[%s21064_s22 + $0x1c8] sm:$0xff] %v13047_v26   ;;  %v13042_v13 = vpack.c.bf16 %v15969_v2, %v15967_v5  ;;  %15980 = vtanh.f32 %v10972_v38  ;;  %v10964_v46 = vadd.f32 %v21212_v51, %v10963_v18 }
 0xc47   : > { %15982 = vtanh.f32 %v10961_v27  ;;  %v15971_v21 = vpop.eup %15970 }
 0xc48   : > { %13134 = vst [vmem:[%s21064_s22 + $0x1c0] sm:$0xff] %v13042_v13   ;;  %15984 = vtanh.f32 %v10964_v46 }
 0xc4b   : > { %v15973_v23 = vpop.eup %15972  ;;  %v14160_v32 = vpop.f32.mrf.mxu0 }
 0xc4c   : > { %v15975_v50 = vpop.eup %15974  ;;  %v13057_v3 = vpack.c.bf16 %v15973_v23, %v15971_v21  ;;  %v10985_v36 = vadd.f32 %v21212_v51, %v14160_v32 }
 0xc4d   : > { %v15977_v28 = vpop.eup %15976  ;;  %v10976_v10 = vpop.f32.mrf.mxu0 }
 0xc4e   : > { %13137 = vst [vmem:[%s21064_s22 + $0x1d8] sm:$0xff] %v13057_v3   ;;  %v13052_v11 = vpack.c.bf16 %v15977_v28, %v15975_v50  ;;  %v10977_v31 = vadd.f32 %v21212_v51, %v10976_v10  ;;  %15986 = vtanh.f32 %v10985_v36 }
 0xc4f   : > { %v14161_v53 = vpop.f32.mrf.mxu0  ;;  %v15979_v45 = vpop.eup %15978 }
 0xc50   : > { %13136 = vst [vmem:[%s21064_s22 + $0x1d0] sm:$0xff] %v13052_v11   ;;  %v10988_v14 = vadd.f32 %v21212_v51, %v14161_v53 }
 0xc51   : > { %v10979_v0 = vpop.f32.mrf.mxu0 }
 0xc52   : > { %15988 = vtanh.f32 %v10988_v14  ;;  %v10980_v1 = vadd.f32 %v21212_v51, %v10979_v0 }
 0xc53   : > { %v15981_v24 = vpop.eup %15980  ;;  %15990 = vtanh.f32 %v10977_v31 }
 0xc54   : > { %v15983_v25 = vpop.eup %15982  ;;  %v13067_v17 = vpack.c.bf16 %v15981_v24, %v15979_v45  ;;  %15992 = vtanh.f32 %v10980_v1 }
 0xc55   : > { %v15985_v42 = vpop.eup %15984 }
 0xc56   : > { %13139 = vst [vmem:[%s21064_s22 + $0x1e8] sm:$0xff] %v13067_v17   ;;  %v13062_v39 = vpack.c.bf16 %v15985_v42, %v15983_v25 }
 0xc58   : > { %13138 = vst [vmem:[%s21064_s22 + $0x1e0] sm:$0xff] %v13062_v39  }
 0xc5b   : > { %v15987_v41 = vpop.eup %15986 }
 0xc5f   : > { %v15989_v55 = vpop.eup %15988 }
 0xc60   : > { %v15991_v62 = vpop.eup %15990  ;;  %v13077_v20 = vpack.c.bf16 %v15989_v55, %v15987_v41 }
 0xc61   : > { %v15993_v9 = vpop.eup %15992 }
 0xc62   : > { %13141 = vst [vmem:[%s21064_s22 + $0x1f8] sm:$0xff] %v13077_v20   ;;  %v13072_v56 = vpack.c.bf16 %v15993_v9, %v15991_v62 }
 0xc64   : > { %13140 = vst [vmem:[%s21064_s22 + $0x1f0] sm:$0xff] %v13072_v56  }
 0xc65   : > { %s12757_s0 = sshll.u32 %s16192_s21, 10  ;;  %s11788_s15 = sshll.u32 %s21064_s22, 4  ;;  %s11789_s15 = int_to_ptr.vmem [resolvable:$true] %s11788_s15 }
 0xc66   : > { %s11777_s24 = scalar_lea.hbm %s21376_s10, %s12757_s0  ;;  %s16101_s16 = smov 1024  }
 0xc67   : > { %14170 = sst [smem:[#allocation10]] (%p16210_p6), %s16101_s16  ;;  %s16102_s30 = smov 2048  }
 0xc68   : > { %14171 = sst [smem:[#allocation10 + $0x1]] (%p16210_p6), %s16102_s30  ;;  %s16103_s1 = smov 16  }
 0xc69   : > { %14172 = sst [smem:[#allocation10 + $0x2]] (%p16210_p6), %s16103_s1  ;;  %s16104_s2 = smov 64  }
 0xc6a   : > { %14173 = sst [smem:[#allocation10 + $0x3]] (%p16210_p6), %s16104_s2  ;;  %s16105_s22 = smov 4  }
 0xc6b   : > { %14174 = sst [smem:[#allocation10 + $0x4]] (%p16210_p6), %s16104_s2  ;;  %s16106_s13 = smov 131072  }
 0xc6c   : > { %14175 = sst [smem:[#allocation10 + $0x5]] (%p16210_p6), %s16105_s22  ;;  %s16107_s0 = smov 0  }
 0xc6d   : > { %14176 = dma.general (%p16210_p6), %s11789_s15, 8192, %s11777_s24, %s11760_s29, %s16106_s13, [#allocation10], %s16107_s0, 0  }
 0xc6e   : > { %s12758_s14 = sshll.u32 %s16192_s21, 11  ;;  %s11817_s30 = sshll.u32 %s20893_s12, 4  ;;  %s21324_s30 = int_to_ptr.vmem [resolvable:$true] %s11817_s30 }
 0xc6f   : > { %s21322_s1 = scalar_lea.hbm %s21377_s11, %s12758_s14  ;;  %s16034_s2 = scalar_lea.vmem %s21324_s30, 2048 }
 0xc70   : > { %p16035_p0 = scmp.ne.s32.totalorder %s21324_s30, %s16034_s2  ;;  %s16108_s29 = smov [#allocation7]  }
 0xc71   : > { %s16038_s15 = sshll.u32 %s16108_s29, 4  ;;  %s16039_s15 = int_to_ptr.vmem [resolvable:$false] %s16038_s15 }
 0xc72   : > { %p16036_p1 = pnand %p16035_p0, %p16210_p6  ;;  %s16040_s21 = scalar_lea.vmem %s16039_s15, 4096 }
 0xc73   : > { %p16041_p3 = scmp.lt.s32.totalorder %s21324_s30, %s16039_s15  ;;  %p16042_p4 = scmp.lt.s32.totalorder %s16040_s21, %s16034_s2 }
 0xc74   : > { %p16037_p2 = pneg %p16036_p1 }
 0xc75   : > { %p16043_p5 = por %p16042_p4, %p16041_p3 }
 0xc77   : > { %p16044_p7 = pnand %p16043_p5, %p16037_p2 }
 0xc79   : > { %16047 = shalt.err (!%p16044_p7)
}
 0xc7a   : > { %s16048_s3 = scalar_lea.hbm %s21322_s1, 2048  ;;  %s16052_s22 = scalar_lea.hbm %s21377_s11, 4096 }
 0xc7b   : > { %p16049_p10 = scmp.ne.s32.totalorder %s21322_s1, %s16048_s3  ;;  %p16053_p13 = scmp.lt.s32.totalorder %s21322_s1, %s21377_s11 }
 0xc7c   : > { %p16054_p0 = scmp.lt.s32.totalorder %s16052_s22, %s16048_s3 }
 0xc7d   : > { %p16050_p11 = pnand %p16049_p10, %p16210_p6 }
 0xc7e   : > { %p16055_p1 = por %p16054_p0, %p16053_p13 }
 0xc7f   : > { %p16051_p12 = pneg %p16050_p11 }
 0xc81   : > { %p16056_p2 = pnand %p16055_p1, %p16051_p12 }
 0xc83   : > { %16059 = shalt.err (!%p16056_p2)
}
 0xc84   : > { %s16109_s14 = smov 128   ;;  %s16110_s16 = smov 8  }
 0xc85   : > { %s22313_s2 = scalar_lea.sflag [#allocation8], %s16492_s25 }
 0xc86   : > { %14177 = dma.vmem_to_hbm [thread:$0]  (%p16210_p6), %s21324_s30, 2048, %s21322_s1, %s22313_s2, %s16109_s14, %s16109_s14, %s16110_s16  }
 0xc87 PF: > { %s11832_s29 = sand.u32 1, %s16086_s17   ;;  %p14181_p3 = pnand %p11931_p9, %p16214_p8 }
 0xc88   : > { %s11833_s15 = scalar_lea.sflag [#allocation6], %s11832_s29 }
 0xc89   : > { %p14182_p4 = pneg %p14181_p3 }
 0xc8b   : > { %16077 = dma.done.wait (%p14182_p4), %s11833_s15, 8192  }
 0xc8c   : > { %16079 = vsyncadd (%p14182_p4), %s11833_s15, 4294959104  ;;  %s11842_s21 = scalar_lea.sflag [#allocation8], %s11832_s29 }
 0xc8d   : > { %16081 = dma.done.wait (%p14182_p4), %s11842_s21, 2048  }
 0xc8e   : > { %16083 = vsyncadd (%p14182_p4), %s11842_s21, 4294965248  ;;  %p25_p6 = scmp.ge.s32.totalorder %s16196_s23, 4   ;;  %s22314_s17 = smov %s16090_s18 }
 0xc8f   : > { %s22315_s18 = smov %s16094_s19  ;;  %s22316_s19 = smov %s16208_s26 }
 0xc90   : > { %s22317_s20 = smov %s16196_s23  ;;  %27 = sbr.rel (!%p25_p6) target bundleno = 10 (0xa), region = 177 }
 0xc95   :  { %11847 = vsyncpa [#allocation6], 1 }
 0xc96   :  { %11849 = vsyncpa [#allocation6 + $0x1], 1 }
 0xc97   :  { %11850 = vsyncpa [#allocation8], 1 }
 0xc98   :  { %11852 = vsyncpa [#allocation8 + $0x1], 1 }

</bundles_post_ra>
